<compile_context>
chip_gen: v6e
topology: v6e:2x2x1
jax: 0.10.0
libtpu: 0.0.40
codegen_flags: <defaults>
</compile_context>

<pallas_src>
import jax
import jax.numpy as jnp
from jax import lax
from jax.experimental import pallas as pl
from jax.experimental.pallas import tpu as pltpu


# ------------------------------ fused kernel --------------------------------

def _lenet_kernel(p1_ref, w1_ref, w2_ref, wf1_ref, wf23_ref, b_ref,
                  out_ref, xu_ref, p2_ref):
    f32 = jnp.float32

    def mm(a, b):
        return jnp.dot(a, b, preferred_element_type=f32)

    # --- conv1: ONE matmul over all 16 (dy,dx,r,s) slabs, then the 2x2 pool
    #     as an elementwise max over the four contiguous 256-row (dy,dx) slabs,
    #     then bias + ReLU once.
    y = mm(p1_ref[0], w1_ref[...])                               # (1024, 128)
    m = jnp.maximum(jnp.maximum(y[0:256, :], y[256:512, :]),
                    jnp.maximum(y[512:768, :], y[768:1024, :]))  # (256, 128)
    pooled1 = jnp.maximum(m + b_ref[0:1, :], 0.0)
    # pooled1 rows = (r, s, hy, hx): parity class cls = 2*r + s of the pooled
    # 14x14 map, 64 rows per class; lanes = conv1 channels (6 valid, rest 0).

    # --- conv2 im2col, step 1: fold kw (x offset) into lanes.
    # Pre-roll the pooled map by 0/1/2 hx steps ONCE (sublane rolls) ...
    psh = (pooled1,
           pltpu.roll(pooled1, shift=256 - 1, axis=0),   # rows shifted by +1
           pltpu.roll(pooled1, shift=256 - 2, axis=0))   # rows shifted by +2
    # ... then assemble each width-unrolled class in registers with lane rolls
    # (channel c -> lane kw*8+c; wrapped lanes are zero) and issue ONE
    # unmasked 128-lane store per class.  Lanes >= 40 stay zero.
    for rp in range(2):            # py-parity of the pooled1 rows being read
        for v in range(2):         # qx parity of the conv2 / pool2 output
            acc = None
            for kw in range(5):
                f = v + kw
                cls = rp * 2 + (f & 1)
                piece = psh[f >> 1][cls * 64:cls * 64 + 64, :]
                if kw:
                    piece = pltpu.roll(piece, shift=kw * 8, axis=1)
                acc = piece if acc is None else acc + piece
            xu_ref[rp * 2 + v, 0:64, :] = acc
            # zero ONLY the 16-row padding tail read by the kh row shifts
            xu_ref[rp * 2 + v, 64:80, :] = jnp.zeros((16, 128), f32)

    # --- conv2 (kh taps = 8-aligned row shifts, kw/ci in K) + bias + ReLU
    #     + 2x2 max-pool over the four (u,v) output parities.
    b2 = b_ref[1:2, :]
    pooled2 = None
    for u in range(2):             # qy parity
        for v in range(2):         # qx parity
            acc = None
            for kh in range(5):
                g = u + kh
                lhs = xu_ref[(g & 1) * 2 + v,
                             (g >> 1) * 8:(g >> 1) * 8 + 64, :]
                t = mm(lhs, w2_ref[kh])
                acc = t if acc is None else acc + t
            yv = jnp.maximum(acc + b2, 0.0)
            pooled2 = yv if pooled2 is None else jnp.maximum(pooled2, yv)
    p2_ref[...] = pooled2          # single full-width (64, 128) store
    # p2_ref rows = (i, j) of the pooled conv2 map on an 8x8 raster
    # (valid i, j <= 4); lanes = conv2 channels (16 valid).

    # --- fc1 as 25 accumulated per-tap matmuls (the flatten is folded into
    #     the repacked weights; no row gathers / masked stores).
    acc = None
    for i in range(5):
        for j in range(5):
            row = i * 8 + j
            t = mm(p2_ref[row:row + 1, :], wf1_ref[i * 5 + j])
            acc = t if acc is None else acc + t
    z = jnp.maximum(acc + b_ref[2:3, :], 0.0)                    # fc1 + ReLU
    z = jnp.maximum(mm(z, wf23_ref[0]) + b_ref[3:4, :], 0.0)     # fc2 + ReLU
    z = mm(z, wf23_ref[1]) + b_ref[4:5, :]                       # fc3
    out_ref[0] = jnp.broadcast_to(z, (8, 128))                   # lane-dense


# ------------------------------ wrapper glue ---------------------------------

def _conv1_patches(x):
    """Per-sample conv1 im2col with rows ordered (dy, dx, r, s, hy, hx).

    Output pixel (4*hy + 2*r + dy, 4*hx + 2*s + dx): the 2x2 max-pool becomes
    an elementwise max over the four contiguous 256-row (dy, dx) slabs, and the
    pooled map lands pre-split into (r, s) parity classes whose rows are a
    plain (hy, hx) raster.
    """
    bsz = x.shape[0]
    xp = jnp.pad(x[:, 0], ((0, 0), (0, 4), (0, 4)))            # (B, 36, 36)
    cols = [xp[:, kh:kh + 32, kw:kw + 32]
            for kh in range(5) for kw in range(5)]
    p = jnp.stack(cols, axis=-1)                               # (B, 32, 32, 25)
    p = p.reshape(bsz, 8, 2, 2, 8, 2, 2, 25)                   # oy=(hy,r,dy), ox=(hx,s,dx)
    p = p.transpose(0, 3, 6, 2, 5, 1, 4, 7)                    # (b,dy,dx,r,s,hy,hx,k)
    p = p.reshape(bsz, 1024, 25)
    return jnp.pad(p, ((0, 0), (0, 0), (0, 7)))                # (B, 1024, 32)


def prepare_params(params):
    """One-time repack of PyTorch-layout weights into lane-dense kernel form."""
    f32 = jnp.float32

    def pad2(a, rows, cols):
        a = a.astype(f32)
        return jnp.pad(a, ((0, rows - a.shape[0]), (0, cols - a.shape[1])))

    def bias_row(b):
        return jnp.pad(b.astype(f32), (0, 128 - b.shape[0]))

    # conv1: rows = kh*5+kw, cols = out channel.
    w1 = pad2(params["conv1_w"].reshape(6, 25).T, 32, 128)          # (32, 128)
    # conv2: (kh, kw*8+ci, co) with K padded to 128.
    w2 = jnp.transpose(params["conv2_w"], (2, 3, 1, 0)).astype(f32)  # (5,5,6,16)
    w2 = jnp.pad(w2, ((0, 0), (0, 0), (0, 2), (0, 112)))             # (5,5,8,128)
    w2 = w2.reshape(5, 40, 128)
    w2 = jnp.pad(w2, ((0, 0), (0, 88), (0, 0)))                      # (5,128,128)
    # fc1 as 25 per-spatial-tap (ci, n) weight slabs (torch flatten = c*25+s).
    wf1 = params["fc1_w"].astype(f32).reshape(120, 16, 25)           # (n, c, s)
    wf1 = wf1.transpose(2, 1, 0)                                     # (s, c, n)
    wf1 = jnp.pad(wf1, ((0, 0), (0, 112), (0, 8)))                   # (25,128,128)
    # fc2 / fc3 stacked into one input.
    wf23 = jnp.stack([pad2(params["fc2_w"].T, 128, 128),
                      pad2(params["fc3_w"].T, 128, 128)], axis=0)    # (2,128,128)
    # all five biases in one (8, 128) buffer (single tiny DMA).
    zero = jnp.zeros((128,), f32)
    biases = jnp.stack([bias_row(params["conv1_b"]),
                        bias_row(params["conv2_b"]),
                        bias_row(params["fc1_b"]),
                        bias_row(params["fc2_b"]),
                        bias_row(params["fc3_b"]),
                        zero, zero, zero], axis=0)                   # (8, 128)
    return {"w1": w1, "w2": w2, "wf1": wf1, "wf23": wf23, "biases": biases}


def net_forward(prepped, x):
    assert x.shape[1:] == (1, 32, 32), x.shape
    bsz = x.shape[0]
    p1 = _conv1_patches(x.astype(jnp.float32))                 # (B, 1024, 32)
    out = pl.pallas_call(
        _lenet_kernel,
        out_shape=jax.ShapeDtypeStruct((bsz, 8, 128), jnp.float32),
        grid=(bsz,),
        in_specs=[
            pl.BlockSpec((1, 1024, 32), lambda b: (b, 0, 0)),   # per-sample patches
            pl.BlockSpec((32, 128), lambda b: (0, 0)),          # conv1 weights
            pl.BlockSpec((5, 128, 128), lambda b: (0, 0, 0)),   # conv2 weights
            pl.BlockSpec((25, 128, 128), lambda b: (0, 0, 0)),  # fc1 tap weights
            pl.BlockSpec((2, 128, 128), lambda b: (0, 0, 0)),   # fc2/fc3 weights
            pl.BlockSpec((8, 128), lambda b: (0, 0)),           # packed biases
        ],
        out_specs=pl.BlockSpec((1, 8, 128), lambda b: (b, 0, 0)),
        scratch_shapes=[
            pltpu.VMEM((4, 80, 128), jnp.float32),   # width-unrolled pooled1
            pltpu.VMEM((64, 128), jnp.float32),      # pooled conv2 map
        ],
        compiler_params=pltpu.CompilerParams(
            dimension_semantics=("parallel",),
            vmem_limit_bytes=32 * 1024 * 1024,
        ),
    )(p1, prepped["w1"], prepped["w2"], prepped["wf1"], prepped["wf23"],
      prepped["biases"])
    return out[:, 0, :10]


# --------------------------- params / reference -----------------------------

def init_params(key):
    ks = jax.random.split(key, 10)

    def u(k, shape, fan_in):
        bound = float(fan_in) ** -0.5
        return jax.random.uniform(k, shape, jnp.float32, -bound, bound)

    return {
        "conv1_w": u(ks[0], (6, 1, 5, 5), 1 * 5 * 5),
        "conv1_b": u(ks[1], (6,), 1 * 5 * 5),
        "conv2_w": u(ks[2], (16, 6, 5, 5), 6 * 5 * 5),
        "conv2_b": u(ks[3], (16,), 6 * 5 * 5),
        "fc1_w": u(ks[4], (120, 400), 400),
        "fc1_b": u(ks[5], (120,), 400),
        "fc2_w": u(ks[6], (84, 120), 120),
        "fc2_b": u(ks[7], (84,), 120),
        "fc3_w": u(ks[8], (10, 84), 84),
        "fc3_b": u(ks[9], (10,), 84),
    }


def reference_forward(params, x):
    def conv_block(x, w, b):
        y = lax.conv_general_dilated(
            x, w, window_strides=(1, 1), padding="VALID",
            dimension_numbers=("NCHW", "OIHW", "NCHW"))
        y = jnp.maximum(y + b[None, :, None, None], 0.0)
        return lax.reduce_window(y, -jnp.inf, lax.max,
                                 (1, 1, 2, 2), (1, 1, 2, 2), "VALID")

    x = conv_block(x, params["conv1_w"], params["conv1_b"])
    x = conv_block(x, params["conv2_w"], params["conv2_b"])
    x = x.reshape(x.shape[0], -1)
    x = jnp.maximum(x @ params["fc1_w"].T + params["fc1_b"], 0.0)
    x = jnp.maximum(x @ params["fc2_w"].T + params["fc2_b"], 0.0)
    return x @ params["fc3_w"].T + params["fc3_b"]


# ---------------------------------- main -------------------------------------

if __name__ == "__main__":
    key = jax.random.PRNGKey(0)
    pkey, xkey = jax.random.split(key)
    params = init_params(pkey)
    # LeNet geometry: 1x32x32 input -> 16*5*5 = 400 features before fc1.
    x = jax.random.normal(xkey, (2, 1, 32, 32), dtype=jnp.float32)

    prepped = prepare_params(params)           # one-time weight repack
    fwd = jax.jit(net_forward)
    out = jax.block_until_ready(fwd(prepped, x))

    ref = reference_forward(params, x)
    assert out.shape == (2, 10), out.shape
    assert bool(jnp.all(jnp.isfinite(out)))
    # Both paths use the MXU's default (bf16-operand) contraction, so the
    # tolerance reflects shared operand rounding rather than layout slack.
    assert jnp.allclose(out, ref, atol=1e-2, rtol=1e-2), (out, ref)

    print("KERNEL_OK")
</pallas_src>

<mosaic_0001>
module attributes {stable_mosaic.version = 11 : i64} {
  func.func @_lenet_kernel(%arg0: i32, %arg1: memref<1x1024x32xf32, #tpu.memory_space<vmem>>, %arg2: memref<32x128xf32, #tpu.memory_space<vmem>>, %arg3: memref<5x128x128xf32, #tpu.memory_space<vmem>>, %arg4: memref<25x128x128xf32, #tpu.memory_space<vmem>>, %arg5: memref<2x128x128xf32, #tpu.memory_space<vmem>>, %arg6: memref<8x128xf32, #tpu.memory_space<vmem>>, %arg7: memref<1x8x128xf32, #tpu.memory_space<vmem>>, %arg8: memref<4x80x128xf32, #tpu.memory_space<vmem>>, %arg9: memref<64x128xf32, #tpu.memory_space<vmem>>) attributes {dimension_semantics = [#tpu.dimension_semantics<parallel>], iteration_bounds = array<i64: 2>, scalar_prefetch = 0 : i64, scratch_operands = 2 : i64, tpu.core_type = #tpu.core_type<tc>, window_params = [{transform_indices = @transform_0, window_bounds = array<i64: 1, 1024, 32>}, {pipeline_mode = #tpu.pipeline_mode<synchronous>, transform_indices = @transform_1, window_bounds = array<i64: 32, 128>}, {pipeline_mode = #tpu.pipeline_mode<synchronous>, transform_indices = @transform_2, window_bounds = array<i64: 5, 128, 128>}, {pipeline_mode = #tpu.pipeline_mode<synchronous>, transform_indices = @transform_3, window_bounds = array<i64: 25, 128, 128>}, {pipeline_mode = #tpu.pipeline_mode<synchronous>, transform_indices = @transform_4, window_bounds = array<i64: 2, 128, 128>}, {pipeline_mode = #tpu.pipeline_mode<synchronous>, transform_indices = @transform_5, window_bounds = array<i64: 8, 128>}, {transform_indices = @transform_6, window_bounds = array<i64: 1, 8, 128>}]} {
    %c0 = arith.constant 0 : index
    %c0_0 = arith.constant 0 : index
    %c0_1 = arith.constant 0 : index
    %0 = vector.load %arg1[%c0, %c0_0, %c0_1] : memref<1x1024x32xf32, #tpu.memory_space<vmem>>, vector<1x1024x32xf32>
    %1 = vector.shape_cast %0 : vector<1x1024x32xf32> to vector<1024x32xf32>
    %c0_2 = arith.constant 0 : index
    %c0_3 = arith.constant 0 : index
    %2 = vector.load %arg2[%c0_2, %c0_3] : memref<32x128xf32, #tpu.memory_space<vmem>>, vector<32x128xf32>
    %cst = arith.constant dense<0.000000e+00> : vector<1024x128xf32>
    %3 = tpu.matmul %1, %2, %cst {dimension_numbers = #tpu.dot_dimension_numbers<[1], [0], [0], [1], [0, 0, 1, 1], [], []>} : vector<1024x32xf32>, vector<32x128xf32>, vector<1024x128xf32> -> vector<1024x128xf32>
    %4 = vector.extract_strided_slice %3 {offsets = [0, 0], sizes = [256, 128], strides = [1, 1]} : vector<1024x128xf32> to vector<256x128xf32>
    %5 = vector.extract_strided_slice %3 {offsets = [256, 0], sizes = [256, 128], strides = [1, 1]} : vector<1024x128xf32> to vector<256x128xf32>
    %6 = arith.maximumf %4, %5 : vector<256x128xf32>
    %7 = vector.extract_strided_slice %3 {offsets = [512, 0], sizes = [256, 128], strides = [1, 1]} : vector<1024x128xf32> to vector<256x128xf32>
    %8 = vector.extract_strided_slice %3 {offsets = [768, 0], sizes = [256, 128], strides = [1, 1]} : vector<1024x128xf32> to vector<256x128xf32>
    %9 = arith.maximumf %7, %8 : vector<256x128xf32>
    %10 = arith.maximumf %6, %9 : vector<256x128xf32>
    %c0_4 = arith.constant 0 : index
    %c0_5 = arith.constant 0 : index
    %11 = vector.load %arg6[%c0_4, %c0_5] : memref<8x128xf32, #tpu.memory_space<vmem>>, vector<1x128xf32>
    %12 = vector.broadcast %11 : vector<1x128xf32> to vector<256x128xf32>
    %13 = arith.addf %10, %12 : vector<256x128xf32>
    %cst_6 = arith.constant 0.000000e+00 : f32
    %14 = vector.broadcast %cst_6 : f32 to vector<256x128xf32>
    %15 = arith.maximumf %13, %14 : vector<256x128xf32>
    %c255_i32 = arith.constant 255 : i32
    %16 = tpu.dynamic_rotate %15 by %c255_i32 dim 0 : vector<256x128xf32>, i32 -> vector<256x128xf32>
    %c254_i32 = arith.constant 254 : i32
    %17 = tpu.dynamic_rotate %15 by %c254_i32 dim 0 : vector<256x128xf32>, i32 -> vector<256x128xf32>
    %18 = vector.extract_strided_slice %15 {offsets = [0, 0], sizes = [64, 128], strides = [1, 1]} : vector<256x128xf32> to vector<64x128xf32>
    %19 = vector.extract_strided_slice %15 {offsets = [64, 0], sizes = [64, 128], strides = [1, 1]} : vector<256x128xf32> to vector<64x128xf32>
    %c8_i32 = arith.constant 8 : i32
    %20 = tpu.dynamic_rotate %19 by %c8_i32 dim 1 : vector<64x128xf32>, i32 -> vector<64x128xf32>
    %21 = arith.addf %18, %20 : vector<64x128xf32>
    %22 = vector.extract_strided_slice %16 {offsets = [0, 0], sizes = [64, 128], strides = [1, 1]} : vector<256x128xf32> to vector<64x128xf32>
    %c16_i32 = arith.constant 16 : i32
    %23 = tpu.dynamic_rotate %22 by %c16_i32 dim 1 : vector<64x128xf32>, i32 -> vector<64x128xf32>
    %24 = arith.addf %21, %23 : vector<64x128xf32>
    %25 = vector.extract_strided_slice %16 {offsets = [64, 0], sizes = [64, 128], strides = [1, 1]} : vector<256x128xf32> to vector<64x128xf32>
    %c24_i32 = arith.constant 24 : i32
    %26 = tpu.dynamic_rotate %25 by %c24_i32 dim 1 : vector<64x128xf32>, i32 -> vector<64x128xf32>
    %27 = arith.addf %24, %26 : vector<64x128xf32>
    %28 = vector.extract_strided_slice %17 {offsets = [0, 0], sizes = [64, 128], strides = [1, 1]} : vector<256x128xf32> to vector<64x128xf32>
    %c32_i32 = arith.constant 32 : i32
    %29 = tpu.dynamic_rotate %28 by %c32_i32 dim 1 : vector<64x128xf32>, i32 -> vector<64x128xf32>
    %30 = arith.addf %27, %29 : vector<64x128xf32>
    %c0_7 = arith.constant 0 : index
    %c0_8 = arith.constant 0 : index
    %c0_9 = arith.constant 0 : index
    %31 = vector.load %arg8[%c0_7, %c0_8, %c0_9] : memref<4x80x128xf32, #tpu.memory_space<vmem>>, vector<1x64x128xf32>
    %32 = vector.shape_cast %31 : vector<1x64x128xf32> to vector<64x128xf32>
    %33 = vector.shape_cast %30 : vector<64x128xf32> to vector<1x64x128xf32>
    tpu.vector_store %arg8[%c0_7, %c0_8, %c0_9], %33 {strides = array<i32>} : memref<4x80x128xf32, #tpu.memory_space<vmem>>, vector<1x64x128xf32>,
    %cst_10 = arith.constant 0.000000e+00 : f32
    %34 = vector.broadcast %cst_10 : f32 to vector<16x128xf32>
    %c0_11 = arith.constant 0 : index
    %c64 = arith.constant 64 : index
    %c0_12 = arith.constant 0 : index
    %35 = vector.load %arg8[%c0_11, %c64, %c0_12] : memref<4x80x128xf32, #tpu.memory_space<vmem>>, vector<1x16x128xf32>
    %36 = vector.shape_cast %35 : vector<1x16x128xf32> to vector<16x128xf32>
    %37 = vector.shape_cast %34 : vector<16x128xf32> to vector<1x16x128xf32>
    tpu.vector_store %arg8[%c0_11, %c64, %c0_12], %37 {strides = array<i32>} : memref<4x80x128xf32, #tpu.memory_space<vmem>>, vector<1x16x128xf32>,
    %38 = vector.extract_strided_slice %15 {offsets = [64, 0], sizes = [64, 128], strides = [1, 1]} : vector<256x128xf32> to vector<64x128xf32>
    %39 = vector.extract_strided_slice %16 {offsets = [0, 0], sizes = [64, 128], strides = [1, 1]} : vector<256x128xf32> to vector<64x128xf32>
    %c8_i32_13 = arith.constant 8 : i32
    %40 = tpu.dynamic_rotate %39 by %c8_i32_13 dim 1 : vector<64x128xf32>, i32 -> vector<64x128xf32>
    %41 = arith.addf %38, %40 : vector<64x128xf32>
    %42 = vector.extract_strided_slice %16 {offsets = [64, 0], sizes = [64, 128], strides = [1, 1]} : vector<256x128xf32> to vector<64x128xf32>
    %c16_i32_14 = arith.constant 16 : i32
    %43 = tpu.dynamic_rotate %42 by %c16_i32_14 dim 1 : vector<64x128xf32>, i32 -> vector<64x128xf32>
    %44 = arith.addf %41, %43 : vector<64x128xf32>
    %45 = vector.extract_strided_slice %17 {offsets = [0, 0], sizes = [64, 128], strides = [1, 1]} : vector<256x128xf32> to vector<64x128xf32>
    %c24_i32_15 = arith.constant 24 : i32
    %46 = tpu.dynamic_rotate %45 by %c24_i32_15 dim 1 : vector<64x128xf32>, i32 -> vector<64x128xf32>
    %47 = arith.addf %44, %46 : vector<64x128xf32>
    %48 = vector.extract_strided_slice %17 {offsets = [64, 0], sizes = [64, 128], strides = [1, 1]} : vector<256x128xf32> to vector<64x128xf32>
    %c32_i32_16 = arith.constant 32 : i32
    %49 = tpu.dynamic_rotate %48 by %c32_i32_16 dim 1 : vector<64x128xf32>, i32 -> vector<64x128xf32>
    %50 = arith.addf %47, %49 : vector<64x128xf32>
    %c1 = arith.constant 1 : index
    %c0_17 = arith.constant 0 : index
    %c0_18 = arith.constant 0 : index
    %51 = vector.load %arg8[%c1, %c0_17, %c0_18] : memref<4x80x128xf32, #tpu.memory_space<vmem>>, vector<1x64x128xf32>
    %52 = vector.shape_cast %51 : vector<1x64x128xf32> to vector<64x128xf32>
    %53 = vector.shape_cast %50 : vector<64x128xf32> to vector<1x64x128xf32>
    tpu.vector_store %arg8[%c1, %c0_17, %c0_18], %53 {strides = array<i32>} : memref<4x80x128xf32, #tpu.memory_space<vmem>>, vector<1x64x128xf32>,
    %cst_19 = arith.constant 0.000000e+00 : f32
    %54 = vector.broadcast %cst_19 : f32 to vector<16x128xf32>
    %c1_20 = arith.constant 1 : index
    %c64_21 = arith.constant 64 : index
    %c0_22 = arith.constant 0 : index
    %55 = vector.load %arg8[%c1_20, %c64_21, %c0_22] : memref<4x80x128xf32, #tpu.memory_space<vmem>>, vector<1x16x128xf32>
    %56 = vector.shape_cast %55 : vector<1x16x128xf32> to vector<16x128xf32>
    %57 = vector.shape_cast %54 : vector<16x128xf32> to vector<1x16x128xf32>
    tpu.vector_store %arg8[%c1_20, %c64_21, %c0_22], %57 {strides = array<i32>} : memref<4x80x128xf32, #tpu.memory_space<vmem>>, vector<1x16x128xf32>,
    %58 = vector.extract_strided_slice %15 {offsets = [128, 0], sizes = [64, 128], strides = [1, 1]} : vector<256x128xf32> to vector<64x128xf32>
    %59 = vector.extract_strided_slice %15 {offsets = [192, 0], sizes = [64, 128], strides = [1, 1]} : vector<256x128xf32> to vector<64x128xf32>
    %c8_i32_23 = arith.constant 8 : i32
    %60 = tpu.dynamic_rotate %59 by %c8_i32_23 dim 1 : vector<64x128xf32>, i32 -> vector<64x128xf32>
    %61 = arith.addf %58, %60 : vector<64x128xf32>
    %62 = vector.extract_strided_slice %16 {offsets = [128, 0], sizes = [64, 128], strides = [1, 1]} : vector<256x128xf32> to vector<64x128xf32>
    %c16_i32_24 = arith.constant 16 : i32
    %63 = tpu.dynamic_rotate %62 by %c16_i32_24 dim 1 : vector<64x128xf32>, i32 -> vector<64x128xf32>
    %64 = arith.addf %61, %63 : vector<64x128xf32>
    %65 = vector.extract_strided_slice %16 {offsets = [192, 0], sizes = [64, 128], strides = [1, 1]} : vector<256x128xf32> to vector<64x128xf32>
    %c24_i32_25 = arith.constant 24 : i32
    %66 = tpu.dynamic_rotate %65 by %c24_i32_25 dim 1 : vector<64x128xf32>, i32 -> vector<64x128xf32>
    %67 = arith.addf %64, %66 : vector<64x128xf32>
    %68 = vector.extract_strided_slice %17 {offsets = [128, 0], sizes = [64, 128], strides = [1, 1]} : vector<256x128xf32> to vector<64x128xf32>
    %c32_i32_26 = arith.constant 32 : i32
    %69 = tpu.dynamic_rotate %68 by %c32_i32_26 dim 1 : vector<64x128xf32>, i32 -> vector<64x128xf32>
    %70 = arith.addf %67, %69 : vector<64x128xf32>
    %c2 = arith.constant 2 : index
    %c0_27 = arith.constant 0 : index
    %c0_28 = arith.constant 0 : index
    %71 = vector.load %arg8[%c2, %c0_27, %c0_28] : memref<4x80x128xf32, #tpu.memory_space<vmem>>, vector<1x64x128xf32>
    %72 = vector.shape_cast %71 : vector<1x64x128xf32> to vector<64x128xf32>
    %73 = vector.shape_cast %70 : vector<64x128xf32> to vector<1x64x128xf32>
    tpu.vector_store %arg8[%c2, %c0_27, %c0_28], %73 {strides = array<i32>} : memref<4x80x128xf32, #tpu.memory_space<vmem>>, vector<1x64x128xf32>,
    %cst_29 = arith.constant 0.000000e+00 : f32
    %74 = vector.broadcast %cst_29 : f32 to vector<16x128xf32>
    %c2_30 = arith.constant 2 : index
    %c64_31 = arith.constant 64 : index
    %c0_32 = arith.constant 0 : index
    %75 = vector.load %arg8[%c2_30, %c64_31, %c0_32] : memref<4x80x128xf32, #tpu.memory_space<vmem>>, vector<1x16x128xf32>
    %76 = vector.shape_cast %75 : vector<1x16x128xf32> to vector<16x128xf32>
    %77 = vector.shape_cast %74 : vector<16x128xf32> to vector<1x16x128xf32>
    tpu.vector_store %arg8[%c2_30, %c64_31, %c0_32], %77 {strides = array<i32>} : memref<4x80x128xf32, #tpu.memory_space<vmem>>, vector<1x16x128xf32>,
    %78 = vector.extract_strided_slice %15 {offsets = [192, 0], sizes = [64, 128], strides = [1, 1]} : vector<256x128xf32> to vector<64x128xf32>
    %79 = vector.extract_strided_slice %16 {offsets = [128, 0], sizes = [64, 128], strides = [1, 1]} : vector<256x128xf32> to vector<64x128xf32>
    %c8_i32_33 = arith.constant 8 : i32
    %80 = tpu.dynamic_rotate %79 by %c8_i32_33 dim 1 : vector<64x128xf32>, i32 -> vector<64x128xf32>
    %81 = arith.addf %78, %80 : vector<64x128xf32>
    %82 = vector.extract_strided_slice %16 {offsets = [192, 0], sizes = [64, 128], strides = [1, 1]} : vector<256x128xf32> to vector<64x128xf32>
    %c16_i32_34 = arith.constant 16 : i32
    %83 = tpu.dynamic_rotate %82 by %c16_i32_34 dim 1 : vector<64x128xf32>, i32 -> vector<64x128xf32>
    %84 = arith.addf %81, %83 : vector<64x128xf32>
    %85 = vector.extract_strided_slice %17 {offsets = [128, 0], sizes = [64, 128], strides = [1, 1]} : vector<256x128xf32> to vector<64x128xf32>
    %c24_i32_35 = arith.constant 24 : i32
    %86 = tpu.dynamic_rotate %85 by %c24_i32_35 dim 1 : vector<64x128xf32>, i32 -> vector<64x128xf32>
    %87 = arith.addf %84, %86 : vector<64x128xf32>
    %88 = vector.extract_strided_slice %17 {offsets = [192, 0], sizes = [64, 128], strides = [1, 1]} : vector<256x128xf32> to vector<64x128xf32>
    %c32_i32_36 = arith.constant 32 : i32
    %89 = tpu.dynamic_rotate %88 by %c32_i32_36 dim 1 : vector<64x128xf32>, i32 -> vector<64x128xf32>
    %90 = arith.addf %87, %89 : vector<64x128xf32>
    %c3 = arith.constant 3 : index
    %c0_37 = arith.constant 0 : index
    %c0_38 = arith.constant 0 : index
    %91 = vector.load %arg8[%c3, %c0_37, %c0_38] : memref<4x80x128xf32, #tpu.memory_space<vmem>>, vector<1x64x128xf32>
    %92 = vector.shape_cast %91 : vector<1x64x128xf32> to vector<64x128xf32>
    %93 = vector.shape_cast %90 : vector<64x128xf32> to vector<1x64x128xf32>
    tpu.vector_store %arg8[%c3, %c0_37, %c0_38], %93 {strides = array<i32>} : memref<4x80x128xf32, #tpu.memory_space<vmem>>, vector<1x64x128xf32>,
    %cst_39 = arith.constant 0.000000e+00 : f32
    %94 = vector.broadcast %cst_39 : f32 to vector<16x128xf32>
    %c3_40 = arith.constant 3 : index
    %c64_41 = arith.constant 64 : index
    %c0_42 = arith.constant 0 : index
    %95 = vector.load %arg8[%c3_40, %c64_41, %c0_42] : memref<4x80x128xf32, #tpu.memory_space<vmem>>, vector<1x16x128xf32>
    %96 = vector.shape_cast %95 : vector<1x16x128xf32> to vector<16x128xf32>
    %97 = vector.shape_cast %94 : vector<16x128xf32> to vector<1x16x128xf32>
    tpu.vector_store %arg8[%c3_40, %c64_41, %c0_42], %97 {strides = array<i32>} : memref<4x80x128xf32, #tpu.memory_space<vmem>>, vector<1x16x128xf32>,
    %c1_43 = arith.constant 1 : index
    %c0_44 = arith.constant 0 : index
    %98 = vector.load %arg6[%c1_43, %c0_44] : memref<8x128xf32, #tpu.memory_space<vmem>>, vector<1x128xf32>
    %c0_45 = arith.constant 0 : index
    %c0_46 = arith.constant 0 : index
    %c0_47 = arith.constant 0 : index
    %99 = vector.load %arg8[%c0_45, %c0_46, %c0_47] : memref<4x80x128xf32, #tpu.memory_space<vmem>>, vector<1x64x128xf32>
    %100 = vector.shape_cast %99 : vector<1x64x128xf32> to vector<64x128xf32>
    %c0_48 = arith.constant 0 : index
    %c0_49 = arith.constant 0 : index
    %c0_50 = arith.constant 0 : index
    %101 = vector.load %arg3[%c0_48, %c0_49, %c0_50] : memref<5x128x128xf32, #tpu.memory_space<vmem>>, vector<1x128x128xf32>
    %102 = vector.shape_cast %101 : vector<1x128x128xf32> to vector<128x128xf32>
    %cst_51 = arith.constant dense<0.000000e+00> : vector<64x128xf32>
    %103 = tpu.matmul %100, %102, %cst_51 {dimension_numbers = #tpu.dot_dimension_numbers<[1], [0], [0], [1], [0, 0, 1, 1], [], []>} : vector<64x128xf32>, vector<128x128xf32>, vector<64x128xf32> -> vector<64x128xf32>
    %c2_52 = arith.constant 2 : index
    %c0_53 = arith.constant 0 : index
    %c0_54 = arith.constant 0 : index
    %104 = vector.load %arg8[%c2_52, %c0_53, %c0_54] : memref<4x80x128xf32, #tpu.memory_space<vmem>>, vector<1x64x128xf32>
    %105 = vector.shape_cast %104 : vector<1x64x128xf32> to vector<64x128xf32>
    %c1_55 = arith.constant 1 : index
    %c0_56 = arith.constant 0 : index
    %c0_57 = arith.constant 0 : index
    %106 = vector.load %arg3[%c1_55, %c0_56, %c0_57] : memref<5x128x128xf32, #tpu.memory_space<vmem>>, vector<1x128x128xf32>
    %107 = vector.shape_cast %106 : vector<1x128x128xf32> to vector<128x128xf32>
    %cst_58 = arith.constant dense<0.000000e+00> : vector<64x128xf32>
    %108 = tpu.matmul %105, %107, %cst_58 {dimension_numbers = #tpu.dot_dimension_numbers<[1], [0], [0], [1], [0, 0, 1, 1], [], []>} : vector<64x128xf32>, vector<128x128xf32>, vector<64x128xf32> -> vector<64x128xf32>
    %109 = arith.addf %103, %108 : vector<64x128xf32>
    %c0_59 = arith.constant 0 : index
    %c8 = arith.constant 8 : index
    %c0_60 = arith.constant 0 : index
    %110 = vector.load %arg8[%c0_59, %c8, %c0_60] : memref<4x80x128xf32, #tpu.memory_space<vmem>>, vector<1x64x128xf32>
    %111 = vector.shape_cast %110 : vector<1x64x128xf32> to vector<64x128xf32>
    %c2_61 = arith.constant 2 : index
    %c0_62 = arith.constant 0 : index
    %c0_63 = arith.constant 0 : index
    %112 = vector.load %arg3[%c2_61, %c0_62, %c0_63] : memref<5x128x128xf32, #tpu.memory_space<vmem>>, vector<1x128x128xf32>
    %113 = vector.shape_cast %112 : vector<1x128x128xf32> to vector<128x128xf32>
    %cst_64 = arith.constant dense<0.000000e+00> : vector<64x128xf32>
    %114 = tpu.matmul %111, %113, %cst_64 {dimension_numbers = #tpu.dot_dimension_numbers<[1], [0], [0], [1], [0, 0, 1, 1], [], []>} : vector<64x128xf32>, vector<128x128xf32>, vector<64x128xf32> -> vector<64x128xf32>
    %115 = arith.addf %109, %114 : vector<64x128xf32>
    %c2_65 = arith.constant 2 : index
    %c8_66 = arith.constant 8 : index
    %c0_67 = arith.constant 0 : index
    %116 = vector.load %arg8[%c2_65, %c8_66, %c0_67] : memref<4x80x128xf32, #tpu.memory_space<vmem>>, vector<1x64x128xf32>
    %117 = vector.shape_cast %116 : vector<1x64x128xf32> to vector<64x128xf32>
    %c3_68 = arith.constant 3 : index
    %c0_69 = arith.constant 0 : index
    %c0_70 = arith.constant 0 : index
    %118 = vector.load %arg3[%c3_68, %c0_69, %c0_70] : memref<5x128x128xf32, #tpu.memory_space<vmem>>, vector<1x128x128xf32>
    %119 = vector.shape_cast %118 : vector<1x128x128xf32> to vector<128x128xf32>
    %cst_71 = arith.constant dense<0.000000e+00> : vector<64x128xf32>
    %120 = tpu.matmul %117, %119, %cst_71 {dimension_numbers = #tpu.dot_dimension_numbers<[1], [0], [0], [1], [0, 0, 1, 1], [], []>} : vector<64x128xf32>, vector<128x128xf32>, vector<64x128xf32> -> vector<64x128xf32>
    %121 = arith.addf %115, %120 : vector<64x128xf32>
    %c0_72 = arith.constant 0 : index
    %c16 = arith.constant 16 : index
    %c0_73 = arith.constant 0 : index
    %122 = vector.load %arg8[%c0_72, %c16, %c0_73] : memref<4x80x128xf32, #tpu.memory_space<vmem>>, vector<1x64x128xf32>
    %123 = vector.shape_cast %122 : vector<1x64x128xf32> to vector<64x128xf32>
    %c4 = arith.constant 4 : index
    %c0_74 = arith.constant 0 : index
    %c0_75 = arith.constant 0 : index
    %124 = vector.load %arg3[%c4, %c0_74, %c0_75] : memref<5x128x128xf32, #tpu.memory_space<vmem>>, vector<1x128x128xf32>
    %125 = vector.shape_cast %124 : vector<1x128x128xf32> to vector<128x128xf32>
    %cst_76 = arith.constant dense<0.000000e+00> : vector<64x128xf32>
    %126 = tpu.matmul %123, %125, %cst_76 {dimension_numbers = #tpu.dot_dimension_numbers<[1], [0], [0], [1], [0, 0, 1, 1], [], []>} : vector<64x128xf32>, vector<128x128xf32>, vector<64x128xf32> -> vector<64x128xf32>
    %127 = arith.addf %121, %126 : vector<64x128xf32>
    %128 = vector.broadcast %98 : vector<1x128xf32> to vector<64x128xf32>
    %129 = arith.addf %127, %128 : vector<64x128xf32>
    %cst_77 = arith.constant 0.000000e+00 : f32
    %130 = vector.broadcast %cst_77 : f32 to vector<64x128xf32>
    %131 = arith.maximumf %129, %130 : vector<64x128xf32>
    %c1_78 = arith.constant 1 : index
    %c0_79 = arith.constant 0 : index
    %c0_80 = arith.constant 0 : index
    %132 = vector.load %arg8[%c1_78, %c0_79, %c0_80] : memref<4x80x128xf32, #tpu.memory_space<vmem>>, vector<1x64x128xf32>
    %133 = vector.shape_cast %132 : vector<1x64x128xf32> to vector<64x128xf32>
    %c0_81 = arith.constant 0 : index
    %c0_82 = arith.constant 0 : index
    %c0_83 = arith.constant 0 : index
    %134 = vector.load %arg3[%c0_81, %c0_82, %c0_83] : memref<5x128x128xf32, #tpu.memory_space<vmem>>, vector<1x128x128xf32>
    %135 = vector.shape_cast %134 : vector<1x128x128xf32> to vector<128x128xf32>
    %cst_84 = arith.constant dense<0.000000e+00> : vector<64x128xf32>
    %136 = tpu.matmul %133, %135, %cst_84 {dimension_numbers = #tpu.dot_dimension_numbers<[1], [0], [0], [1], [0, 0, 1, 1], [], []>} : vector<64x128xf32>, vector<128x128xf32>, vector<64x128xf32> -> vector<64x128xf32>
    %c3_85 = arith.constant 3 : index
    %c0_86 = arith.constant 0 : index
    %c0_87 = arith.constant 0 : index
    %137 = vector.load %arg8[%c3_85, %c0_86, %c0_87] : memref<4x80x128xf32, #tpu.memory_space<vmem>>, vector<1x64x128xf32>
    %138 = vector.shape_cast %137 : vector<1x64x128xf32> to vector<64x128xf32>
    %c1_88 = arith.constant 1 : index
    %c0_89 = arith.constant 0 : index
    %c0_90 = arith.constant 0 : index
    %139 = vector.load %arg3[%c1_88, %c0_89, %c0_90] : memref<5x128x128xf32, #tpu.memory_space<vmem>>, vector<1x128x128xf32>
    %140 = vector.shape_cast %139 : vector<1x128x128xf32> to vector<128x128xf32>
    %cst_91 = arith.constant dense<0.000000e+00> : vector<64x128xf32>
    %141 = tpu.matmul %138, %140, %cst_91 {dimension_numbers = #tpu.dot_dimension_numbers<[1], [0], [0], [1], [0, 0, 1, 1], [], []>} : vector<64x128xf32>, vector<128x128xf32>, vector<64x128xf32> -> vector<64x128xf32>
    %142 = arith.addf %136, %141 : vector<64x128xf32>
    %c1_92 = arith.constant 1 : index
    %c8_93 = arith.constant 8 : index
    %c0_94 = arith.constant 0 : index
    %143 = vector.load %arg8[%c1_92, %c8_93, %c0_94] : memref<4x80x128xf32, #tpu.memory_space<vmem>>, vector<1x64x128xf32>
    %144 = vector.shape_cast %143 : vector<1x64x128xf32> to vector<64x128xf32>
    %c2_95 = arith.constant 2 : index
    %c0_96 = arith.constant 0 : index
    %c0_97 = arith.constant 0 : index
    %145 = vector.load %arg3[%c2_95, %c0_96, %c0_97] : memref<5x128x128xf32, #tpu.memory_space<vmem>>, vector<1x128x128xf32>
    %146 = vector.shape_cast %145 : vector<1x128x128xf32> to vector<128x128xf32>
    %cst_98 = arith.constant dense<0.000000e+00> : vector<64x128xf32>
    %147 = tpu.matmul %144, %146, %cst_98 {dimension_numbers = #tpu.dot_dimension_numbers<[1], [0], [0], [1], [0, 0, 1, 1], [], []>} : vector<64x128xf32>, vector<128x128xf32>, vector<64x128xf32> -> vector<64x128xf32>
    %148 = arith.addf %142, %147 : vector<64x128xf32>
    %c3_99 = arith.constant 3 : index
    %c8_100 = arith.constant 8 : index
    %c0_101 = arith.constant 0 : index
    %149 = vector.load %arg8[%c3_99, %c8_100, %c0_101] : memref<4x80x128xf32, #tpu.memory_space<vmem>>, vector<1x64x128xf32>
    %150 = vector.shape_cast %149 : vector<1x64x128xf32> to vector<64x128xf32>
    %c3_102 = arith.constant 3 : index
    %c0_103 = arith.constant 0 : index
    %c0_104 = arith.constant 0 : index
    %151 = vector.load %arg3[%c3_102, %c0_103, %c0_104] : memref<5x128x128xf32, #tpu.memory_space<vmem>>, vector<1x128x128xf32>
    %152 = vector.shape_cast %151 : vector<1x128x128xf32> to vector<128x128xf32>
    %cst_105 = arith.constant dense<0.000000e+00> : vector<64x128xf32>
    %153 = tpu.matmul %150, %152, %cst_105 {dimension_numbers = #tpu.dot_dimension_numbers<[1], [0], [0], [1], [0, 0, 1, 1], [], []>} : vector<64x128xf32>, vector<128x128xf32>, vector<64x128xf32> -> vector<64x128xf32>
    %154 = arith.addf %148, %153 : vector<64x128xf32>
    %c1_106 = arith.constant 1 : index
    %c16_107 = arith.constant 16 : index
    %c0_108 = arith.constant 0 : index
    %155 = vector.load %arg8[%c1_106, %c16_107, %c0_108] : memref<4x80x128xf32, #tpu.memory_space<vmem>>, vector<1x64x128xf32>
    %156 = vector.shape_cast %155 : vector<1x64x128xf32> to vector<64x128xf32>
    %c4_109 = arith.constant 4 : index
    %c0_110 = arith.constant 0 : index
    %c0_111 = arith.constant 0 : index
    %157 = vector.load %arg3[%c4_109, %c0_110, %c0_111] : memref<5x128x128xf32, #tpu.memory_space<vmem>>, vector<1x128x128xf32>
    %158 = vector.shape_cast %157 : vector<1x128x128xf32> to vector<128x128xf32>
    %cst_112 = arith.constant dense<0.000000e+00> : vector<64x128xf32>
    %159 = tpu.matmul %156, %158, %cst_112 {dimension_numbers = #tpu.dot_dimension_numbers<[1], [0], [0], [1], [0, 0, 1, 1], [], []>} : vector<64x128xf32>, vector<128x128xf32>, vector<64x128xf32> -> vector<64x128xf32>
    %160 = arith.addf %154, %159 : vector<64x128xf32>
    %161 = vector.broadcast %98 : vector<1x128xf32> to vector<64x128xf32>
    %162 = arith.addf %160, %161 : vector<64x128xf32>
    %cst_113 = arith.constant 0.000000e+00 : f32
    %163 = vector.broadcast %cst_113 : f32 to vector<64x128xf32>
    %164 = arith.maximumf %162, %163 : vector<64x128xf32>
    %165 = arith.maximumf %131, %164 : vector<64x128xf32>
    %c2_114 = arith.constant 2 : index
    %c0_115 = arith.constant 0 : index
    %c0_116 = arith.constant 0 : index
    %166 = vector.load %arg8[%c2_114, %c0_115, %c0_116] : memref<4x80x128xf32, #tpu.memory_space<vmem>>, vector<1x64x128xf32>
    %167 = vector.shape_cast %166 : vector<1x64x128xf32> to vector<64x128xf32>
    %c0_117 = arith.constant 0 : index
    %c0_118 = arith.constant 0 : index
    %c0_119 = arith.constant 0 : index
    %168 = vector.load %arg3[%c0_117, %c0_118, %c0_119] : memref<5x128x128xf32, #tpu.memory_space<vmem>>, vector<1x128x128xf32>
    %169 = vector.shape_cast %168 : vector<1x128x128xf32> to vector<128x128xf32>
    %cst_120 = arith.constant dense<0.000000e+00> : vector<64x128xf32>
    %170 = tpu.matmul %167, %169, %cst_120 {dimension_numbers = #tpu.dot_dimension_numbers<[1], [0], [0], [1], [0, 0, 1, 1], [], []>} : vector<64x128xf32>, vector<128x128xf32>, vector<64x128xf32> -> vector<64x128xf32>
    %c0_121 = arith.constant 0 : index
    %c8_122 = arith.constant 8 : index
    %c0_123 = arith.constant 0 : index
    %171 = vector.load %arg8[%c0_121, %c8_122, %c0_123] : memref<4x80x128xf32, #tpu.memory_space<vmem>>, vector<1x64x128xf32>
    %172 = vector.shape_cast %171 : vector<1x64x128xf32> to vector<64x128xf32>
    %c1_124 = arith.constant 1 : index
    %c0_125 = arith.constant 0 : index
    %c0_126 = arith.constant 0 : index
    %173 = vector.load %arg3[%c1_124, %c0_125, %c0_126] : memref<5x128x128xf32, #tpu.memory_space<vmem>>, vector<1x128x128xf32>
    %174 = vector.shape_cast %173 : vector<1x128x128xf32> to vector<128x128xf32>
    %cst_127 = arith.constant dense<0.000000e+00> : vector<64x128xf32>
    %175 = tpu.matmul %172, %174, %cst_127 {dimension_numbers = #tpu.dot_dimension_numbers<[1], [0], [0], [1], [0, 0, 1, 1], [], []>} : vector<64x128xf32>, vector<128x128xf32>, vector<64x128xf32> -> vector<64x128xf32>
    %176 = arith.addf %170, %175 : vector<64x128xf32>
    %c2_128 = arith.constant 2 : index
    %c8_129 = arith.constant 8 : index
    %c0_130 = arith.constant 0 : index
    %177 = vector.load %arg8[%c2_128, %c8_129, %c0_130] : memref<4x80x128xf32, #tpu.memory_space<vmem>>, vector<1x64x128xf32>
    %178 = vector.shape_cast %177 : vector<1x64x128xf32> to vector<64x128xf32>
    %c2_131 = arith.constant 2 : index
    %c0_132 = arith.constant 0 : index
    %c0_133 = arith.constant 0 : index
    %179 = vector.load %arg3[%c2_131, %c0_132, %c0_133] : memref<5x128x128xf32, #tpu.memory_space<vmem>>, vector<1x128x128xf32>
    %180 = vector.shape_cast %179 : vector<1x128x128xf32> to vector<128x128xf32>
    %cst_134 = arith.constant dense<0.000000e+00> : vector<64x128xf32>
    %181 = tpu.matmul %178, %180, %cst_134 {dimension_numbers = #tpu.dot_dimension_numbers<[1], [0], [0], [1], [0, 0, 1, 1], [], []>} : vector<64x128xf32>, vector<128x128xf32>, vector<64x128xf32> -> vector<64x128xf32>
    %182 = arith.addf %176, %181 : vector<64x128xf32>
    %c0_135 = arith.constant 0 : index
    %c16_136 = arith.constant 16 : index
    %c0_137 = arith.constant 0 : index
    %183 = vector.load %arg8[%c0_135, %c16_136, %c0_137] : memref<4x80x128xf32, #tpu.memory_space<vmem>>, vector<1x64x128xf32>
    %184 = vector.shape_cast %183 : vector<1x64x128xf32> to vector<64x128xf32>
    %c3_138 = arith.constant 3 : index
    %c0_139 = arith.constant 0 : index
    %c0_140 = arith.constant 0 : index
    %185 = vector.load %arg3[%c3_138, %c0_139, %c0_140] : memref<5x128x128xf32, #tpu.memory_space<vmem>>, vector<1x128x128xf32>
    %186 = vector.shape_cast %185 : vector<1x128x128xf32> to vector<128x128xf32>
    %cst_141 = arith.constant dense<0.000000e+00> : vector<64x128xf32>
    %187 = tpu.matmul %184, %186, %cst_141 {dimension_numbers = #tpu.dot_dimension_numbers<[1], [0], [0], [1], [0, 0, 1, 1], [], []>} : vector<64x128xf32>, vector<128x128xf32>, vector<64x128xf32> -> vector<64x128xf32>
    %188 = arith.addf %182, %187 : vector<64x128xf32>
    %c2_142 = arith.constant 2 : index
    %c16_143 = arith.constant 16 : index
    %c0_144 = arith.constant 0 : index
    %189 = vector.load %arg8[%c2_142, %c16_143, %c0_144] : memref<4x80x128xf32, #tpu.memory_space<vmem>>, vector<1x64x128xf32>
    %190 = vector.shape_cast %189 : vector<1x64x128xf32> to vector<64x128xf32>
    %c4_145 = arith.constant 4 : index
    %c0_146 = arith.constant 0 : index
    %c0_147 = arith.constant 0 : index
    %191 = vector.load %arg3[%c4_145, %c0_146, %c0_147] : memref<5x128x128xf32, #tpu.memory_space<vmem>>, vector<1x128x128xf32>
    %192 = vector.shape_cast %191 : vector<1x128x128xf32> to vector<128x128xf32>
    %cst_148 = arith.constant dense<0.000000e+00> : vector<64x128xf32>
    %193 = tpu.matmul %190, %192, %cst_148 {dimension_numbers = #tpu.dot_dimension_numbers<[1], [0], [0], [1], [0, 0, 1, 1], [], []>} : vector<64x128xf32>, vector<128x128xf32>, vector<64x128xf32> -> vector<64x128xf32>
    %194 = arith.addf %188, %193 : vector<64x128xf32>
    %195 = vector.broadcast %98 : vector<1x128xf32> to vector<64x128xf32>
    %196 = arith.addf %194, %195 : vector<64x128xf32>
    %cst_149 = arith.constant 0.000000e+00 : f32
    %197 = vector.broadcast %cst_149 : f32 to vector<64x128xf32>
    %198 = arith.maximumf %196, %197 : vector<64x128xf32>
    %199 = arith.maximumf %165, %198 : vector<64x128xf32>
    %c3_150 = arith.constant 3 : index
    %c0_151 = arith.constant 0 : index
    %c0_152 = arith.constant 0 : index
    %200 = vector.load %arg8[%c3_150, %c0_151, %c0_152] : memref<4x80x128xf32, #tpu.memory_space<vmem>>, vector<1x64x128xf32>
    %201 = vector.shape_cast %200 : vector<1x64x128xf32> to vector<64x128xf32>
    %c0_153 = arith.constant 0 : index
    %c0_154 = arith.constant 0 : index
    %c0_155 = arith.constant 0 : index
    %202 = vector.load %arg3[%c0_153, %c0_154, %c0_155] : memref<5x128x128xf32, #tpu.memory_space<vmem>>, vector<1x128x128xf32>
    %203 = vector.shape_cast %202 : vector<1x128x128xf32> to vector<128x128xf32>
    %cst_156 = arith.constant dense<0.000000e+00> : vector<64x128xf32>
    %204 = tpu.matmul %201, %203, %cst_156 {dimension_numbers = #tpu.dot_dimension_numbers<[1], [0], [0], [1], [0, 0, 1, 1], [], []>} : vector<64x128xf32>, vector<128x128xf32>, vector<64x128xf32> -> vector<64x128xf32>
    %c1_157 = arith.constant 1 : index
    %c8_158 = arith.constant 8 : index
    %c0_159 = arith.constant 0 : index
    %205 = vector.load %arg8[%c1_157, %c8_158, %c0_159] : memref<4x80x128xf32, #tpu.memory_space<vmem>>, vector<1x64x128xf32>
    %206 = vector.shape_cast %205 : vector<1x64x128xf32> to vector<64x128xf32>
    %c1_160 = arith.constant 1 : index
    %c0_161 = arith.constant 0 : index
    %c0_162 = arith.constant 0 : index
    %207 = vector.load %arg3[%c1_160, %c0_161, %c0_162] : memref<5x128x128xf32, #tpu.memory_space<vmem>>, vector<1x128x128xf32>
    %208 = vector.shape_cast %207 : vector<1x128x128xf32> to vector<128x128xf32>
    %cst_163 = arith.constant dense<0.000000e+00> : vector<64x128xf32>
    %209 = tpu.matmul %206, %208, %cst_163 {dimension_numbers = #tpu.dot_dimension_numbers<[1], [0], [0], [1], [0, 0, 1, 1], [], []>} : vector<64x128xf32>, vector<128x128xf32>, vector<64x128xf32> -> vector<64x128xf32>
    %210 = arith.addf %204, %209 : vector<64x128xf32>
    %c3_164 = arith.constant 3 : index
    %c8_165 = arith.constant 8 : index
    %c0_166 = arith.constant 0 : index
    %211 = vector.load %arg8[%c3_164, %c8_165, %c0_166] : memref<4x80x128xf32, #tpu.memory_space<vmem>>, vector<1x64x128xf32>
    %212 = vector.shape_cast %211 : vector<1x64x128xf32> to vector<64x128xf32>
    %c2_167 = arith.constant 2 : index
    %c0_168 = arith.constant 0 : index
    %c0_169 = arith.constant 0 : index
    %213 = vector.load %arg3[%c2_167, %c0_168, %c0_169] : memref<5x128x128xf32, #tpu.memory_space<vmem>>, vector<1x128x128xf32>
    %214 = vector.shape_cast %213 : vector<1x128x128xf32> to vector<128x128xf32>
    %cst_170 = arith.constant dense<0.000000e+00> : vector<64x128xf32>
    %215 = tpu.matmul %212, %214, %cst_170 {dimension_numbers = #tpu.dot_dimension_numbers<[1], [0], [0], [1], [0, 0, 1, 1], [], []>} : vector<64x128xf32>, vector<128x128xf32>, vector<64x128xf32> -> vector<64x128xf32>
    %216 = arith.addf %210, %215 : vector<64x128xf32>
    %c1_171 = arith.constant 1 : index
    %c16_172 = arith.constant 16 : index
    %c0_173 = arith.constant 0 : index
    %217 = vector.load %arg8[%c1_171, %c16_172, %c0_173] : memref<4x80x128xf32, #tpu.memory_space<vmem>>, vector<1x64x128xf32>
    %218 = vector.shape_cast %217 : vector<1x64x128xf32> to vector<64x128xf32>
    %c3_174 = arith.constant 3 : index
    %c0_175 = arith.constant 0 : index
    %c0_176 = arith.constant 0 : index
    %219 = vector.load %arg3[%c3_174, %c0_175, %c0_176] : memref<5x128x128xf32, #tpu.memory_space<vmem>>, vector<1x128x128xf32>
    %220 = vector.shape_cast %219 : vector<1x128x128xf32> to vector<128x128xf32>
    %cst_177 = arith.constant dense<0.000000e+00> : vector<64x128xf32>
    %221 = tpu.matmul %218, %220, %cst_177 {dimension_numbers = #tpu.dot_dimension_numbers<[1], [0], [0], [1], [0, 0, 1, 1], [], []>} : vector<64x128xf32>, vector<128x128xf32>, vector<64x128xf32> -> vector<64x128xf32>
    %222 = arith.addf %216, %221 : vector<64x128xf32>
    %c3_178 = arith.constant 3 : index
    %c16_179 = arith.constant 16 : index
    %c0_180 = arith.constant 0 : index
    %223 = vector.load %arg8[%c3_178, %c16_179, %c0_180] : memref<4x80x128xf32, #tpu.memory_space<vmem>>, vector<1x64x128xf32>
    %224 = vector.shape_cast %223 : vector<1x64x128xf32> to vector<64x128xf32>
    %c4_181 = arith.constant 4 : index
    %c0_182 = arith.constant 0 : index
    %c0_183 = arith.constant 0 : index
    %225 = vector.load %arg3[%c4_181, %c0_182, %c0_183] : memref<5x128x128xf32, #tpu.memory_space<vmem>>, vector<1x128x128xf32>
    %226 = vector.shape_cast %225 : vector<1x128x128xf32> to vector<128x128xf32>
    %cst_184 = arith.constant dense<0.000000e+00> : vector<64x128xf32>
    %227 = tpu.matmul %224, %226, %cst_184 {dimension_numbers = #tpu.dot_dimension_numbers<[1], [0], [0], [1], [0, 0, 1, 1], [], []>} : vector<64x128xf32>, vector<128x128xf32>, vector<64x128xf32> -> vector<64x128xf32>
    %228 = arith.addf %222, %227 : vector<64x128xf32>
    %229 = vector.broadcast %98 : vector<1x128xf32> to vector<64x128xf32>
    %230 = arith.addf %228, %229 : vector<64x128xf32>
    %cst_185 = arith.constant 0.000000e+00 : f32
    %231 = vector.broadcast %cst_185 : f32 to vector<64x128xf32>
    %232 = arith.maximumf %230, %231 : vector<64x128xf32>
    %233 = arith.maximumf %199, %232 : vector<64x128xf32>
    %c0_186 = arith.constant 0 : index
    %c0_187 = arith.constant 0 : index
    %234 = vector.load %arg9[%c0_186, %c0_187] : memref<64x128xf32, #tpu.memory_space<vmem>>, vector<64x128xf32>
    tpu.vector_store %arg9[%c0_186, %c0_187], %233 {strides = array<i32>} : memref<64x128xf32, #tpu.memory_space<vmem>>, vector<64x128xf32>,
    %c0_188 = arith.constant 0 : index
    %c0_189 = arith.constant 0 : index
    %235 = vector.load %arg9[%c0_188, %c0_189] : memref<64x128xf32, #tpu.memory_space<vmem>>, vector<1x128xf32>
    %c0_190 = arith.constant 0 : index
    %c0_191 = arith.constant 0 : index
    %c0_192 = arith.constant 0 : index
    %236 = vector.load %arg4[%c0_190, %c0_191, %c0_192] : memref<25x128x128xf32, #tpu.memory_space<vmem>>, vector<1x128x128xf32>
    %237 = vector.shape_cast %236 : vector<1x128x128xf32> to vector<128x128xf32>
    %cst_193 = arith.constant dense<0.000000e+00> : vector<1x128xf32>
    %238 = tpu.matmul %235, %237, %cst_193 {dimension_numbers = #tpu.dot_dimension_numbers<[1], [0], [0], [1], [0, 0, 1, 1], [], []>} : vector<1x128xf32>, vector<128x128xf32>, vector<1x128xf32> -> vector<1x128xf32>
    %c1_194 = arith.constant 1 : index
    %c0_195 = arith.constant 0 : index
    %239 = vector.load %arg9[%c1_194, %c0_195] : memref<64x128xf32, #tpu.memory_space<vmem>>, vector<1x128xf32>
    %c1_196 = arith.constant 1 : index
    %c0_197 = arith.constant 0 : index
    %c0_198 = arith.constant 0 : index
    %240 = vector.load %arg4[%c1_196, %c0_197, %c0_198] : memref<25x128x128xf32, #tpu.memory_space<vmem>>, vector<1x128x128xf32>
    %241 = vector.shape_cast %240 : vector<1x128x128xf32> to vector<128x128xf32>
    %cst_199 = arith.constant dense<0.000000e+00> : vector<1x128xf32>
    %242 = tpu.matmul %239, %241, %cst_199 {dimension_numbers = #tpu.dot_dimension_numbers<[1], [0], [0], [1], [0, 0, 1, 1], [], []>} : vector<1x128xf32>, vector<128x128xf32>, vector<1x128xf32> -> vector<1x128xf32>
    %243 = arith.addf %238, %242 : vector<1x128xf32>
    %c2_200 = arith.constant 2 : index
    %c0_201 = arith.constant 0 : index
    %244 = vector.load %arg9[%c2_200, %c0_201] : memref<64x128xf32, #tpu.memory_space<vmem>>, vector<1x128xf32>
    %c2_202 = arith.constant 2 : index
    %c0_203 = arith.constant 0 : index
    %c0_204 = arith.constant 0 : index
    %245 = vector.load %arg4[%c2_202, %c0_203, %c0_204] : memref<25x128x128xf32, #tpu.memory_space<vmem>>, vector<1x128x128xf32>
    %246 = vector.shape_cast %245 : vector<1x128x128xf32> to vector<128x128xf32>
    %cst_205 = arith.constant dense<0.000000e+00> : vector<1x128xf32>
    %247 = tpu.matmul %244, %246, %cst_205 {dimension_numbers = #tpu.dot_dimension_numbers<[1], [0], [0], [1], [0, 0, 1, 1], [], []>} : vector<1x128xf32>, vector<128x128xf32>, vector<1x128xf32> -> vector<1x128xf32>
    %248 = arith.addf %243, %247 : vector<1x128xf32>
    %c3_206 = arith.constant 3 : index
    %c0_207 = arith.constant 0 : index
    %249 = vector.load %arg9[%c3_206, %c0_207] : memref<64x128xf32, #tpu.memory_space<vmem>>, vector<1x128xf32>
    %c3_208 = arith.constant 3 : index
    %c0_209 = arith.constant 0 : index
    %c0_210 = arith.constant 0 : index
    %250 = vector.load %arg4[%c3_208, %c0_209, %c0_210] : memref<25x128x128xf32, #tpu.memory_space<vmem>>, vector<1x128x128xf32>
    %251 = vector.shape_cast %250 : vector<1x128x128xf32> to vector<128x128xf32>
    %cst_211 = arith.constant dense<0.000000e+00> : vector<1x128xf32>
    %252 = tpu.matmul %249, %251, %cst_211 {dimension_numbers = #tpu.dot_dimension_numbers<[1], [0], [0], [1], [0, 0, 1, 1], [], []>} : vector<1x128xf32>, vector<128x128xf32>, vector<1x128xf32> -> vector<1x128xf32>
    %253 = arith.addf %248, %252 : vector<1x128xf32>
    %c4_212 = arith.constant 4 : index
    %c0_213 = arith.constant 0 : index
    %254 = vector.load %arg9[%c4_212, %c0_213] : memref<64x128xf32, #tpu.memory_space<vmem>>, vector<1x128xf32>
    %c4_214 = arith.constant 4 : index
    %c0_215 = arith.constant 0 : index
    %c0_216 = arith.constant 0 : index
    %255 = vector.load %arg4[%c4_214, %c0_215, %c0_216] : memref<25x128x128xf32, #tpu.memory_space<vmem>>, vector<1x128x128xf32>
    %256 = vector.shape_cast %255 : vector<1x128x128xf32> to vector<128x128xf32>
    %cst_217 = arith.constant dense<0.000000e+00> : vector<1x128xf32>
    %257 = tpu.matmul %254, %256, %cst_217 {dimension_numbers = #tpu.dot_dimension_numbers<[1], [0], [0], [1], [0, 0, 1, 1], [], []>} : vector<1x128xf32>, vector<128x128xf32>, vector<1x128xf32> -> vector<1x128xf32>
    %258 = arith.addf %253, %257 : vector<1x128xf32>
    %c8_218 = arith.constant 8 : index
    %c0_219 = arith.constant 0 : index
    %259 = vector.load %arg9[%c8_218, %c0_219] : memref<64x128xf32, #tpu.memory_space<vmem>>, vector<1x128xf32>
    %c5 = arith.constant 5 : index
    %c0_220 = arith.constant 0 : index
    %c0_221 = arith.constant 0 : index
    %260 = vector.load %arg4[%c5, %c0_220, %c0_221] : memref<25x128x128xf32, #tpu.memory_space<vmem>>, vector<1x128x128xf32>
    %261 = vector.shape_cast %260 : vector<1x128x128xf32> to vector<128x128xf32>
    %cst_222 = arith.constant dense<0.000000e+00> : vector<1x128xf32>
    %262 = tpu.matmul %259, %261, %cst_222 {dimension_numbers = #tpu.dot_dimension_numbers<[1], [0], [0], [1], [0, 0, 1, 1], [], []>} : vector<1x128xf32>, vector<128x128xf32>, vector<1x128xf32> -> vector<1x128xf32>
    %263 = arith.addf %258, %262 : vector<1x128xf32>
    %c9 = arith.constant 9 : index
    %c0_223 = arith.constant 0 : index
    %264 = vector.load %arg9[%c9, %c0_223] : memref<64x128xf32, #tpu.memory_space<vmem>>, vector<1x128xf32>
    %c6 = arith.constant 6 : index
    %c0_224 = arith.constant 0 : index
    %c0_225 = arith.constant 0 : index
    %265 = vector.load %arg4[%c6, %c0_224, %c0_225] : memref<25x128x128xf32, #tpu.memory_space<vmem>>, vector<1x128x128xf32>
    %266 = vector.shape_cast %265 : vector<1x128x128xf32> to vector<128x128xf32>
    %cst_226 = arith.constant dense<0.000000e+00> : vector<1x128xf32>
    %267 = tpu.matmul %264, %266, %cst_226 {dimension_numbers = #tpu.dot_dimension_numbers<[1], [0], [0], [1], [0, 0, 1, 1], [], []>} : vector<1x128xf32>, vector<128x128xf32>, vector<1x128xf32> -> vector<1x128xf32>
    %268 = arith.addf %263, %267 : vector<1x128xf32>
    %c10 = arith.constant 10 : index
    %c0_227 = arith.constant 0 : index
    %269 = vector.load %arg9[%c10, %c0_227] : memref<64x128xf32, #tpu.memory_space<vmem>>, vector<1x128xf32>
    %c7 = arith.constant 7 : index
    %c0_228 = arith.constant 0 : index
    %c0_229 = arith.constant 0 : index
    %270 = vector.load %arg4[%c7, %c0_228, %c0_229] : memref<25x128x128xf32, #tpu.memory_space<vmem>>, vector<1x128x128xf32>
    %271 = vector.shape_cast %270 : vector<1x128x128xf32> to vector<128x128xf32>
    %cst_230 = arith.constant dense<0.000000e+00> : vector<1x128xf32>
    %272 = tpu.matmul %269, %271, %cst_230 {dimension_numbers = #tpu.dot_dimension_numbers<[1], [0], [0], [1], [0, 0, 1, 1], [], []>} : vector<1x128xf32>, vector<128x128xf32>, vector<1x128xf32> -> vector<1x128xf32>
    %273 = arith.addf %268, %272 : vector<1x128xf32>
    %c11 = arith.constant 11 : index
    %c0_231 = arith.constant 0 : index
    %274 = vector.load %arg9[%c11, %c0_231] : memref<64x128xf32, #tpu.memory_space<vmem>>, vector<1x128xf32>
    %c8_232 = arith.constant 8 : index
    %c0_233 = arith.constant 0 : index
    %c0_234 = arith.constant 0 : index
    %275 = vector.load %arg4[%c8_232, %c0_233, %c0_234] : memref<25x128x128xf32, #tpu.memory_space<vmem>>, vector<1x128x128xf32>
    %276 = vector.shape_cast %275 : vector<1x128x128xf32> to vector<128x128xf32>
    %cst_235 = arith.constant dense<0.000000e+00> : vector<1x128xf32>
    %277 = tpu.matmul %274, %276, %cst_235 {dimension_numbers = #tpu.dot_dimension_numbers<[1], [0], [0], [1], [0, 0, 1, 1], [], []>} : vector<1x128xf32>, vector<128x128xf32>, vector<1x128xf32> -> vector<1x128xf32>
    %278 = arith.addf %273, %277 : vector<1x128xf32>
    %c12 = arith.constant 12 : index
    %c0_236 = arith.constant 0 : index
    %279 = vector.load %arg9[%c12, %c0_236] : memref<64x128xf32, #tpu.memory_space<vmem>>, vector<1x128xf32>
    %c9_237 = arith.constant 9 : index
    %c0_238 = arith.constant 0 : index
    %c0_239 = arith.constant 0 : index
    %280 = vector.load %arg4[%c9_237, %c0_238, %c0_239] : memref<25x128x128xf32, #tpu.memory_space<vmem>>, vector<1x128x128xf32>
    %281 = vector.shape_cast %280 : vector<1x128x128xf32> to vector<128x128xf32>
    %cst_240 = arith.constant dense<0.000000e+00> : vector<1x128xf32>
    %282 = tpu.matmul %279, %281, %cst_240 {dimension_numbers = #tpu.dot_dimension_numbers<[1], [0], [0], [1], [0, 0, 1, 1], [], []>} : vector<1x128xf32>, vector<128x128xf32>, vector<1x128xf32> -> vector<1x128xf32>
    %283 = arith.addf %278, %282 : vector<1x128xf32>
    %c16_241 = arith.constant 16 : index
    %c0_242 = arith.constant 0 : index
    %284 = vector.load %arg9[%c16_241, %c0_242] : memref<64x128xf32, #tpu.memory_space<vmem>>, vector<1x128xf32>
    %c10_243 = arith.constant 10 : index
    %c0_244 = arith.constant 0 : index
    %c0_245 = arith.constant 0 : index
    %285 = vector.load %arg4[%c10_243, %c0_244, %c0_245] : memref<25x128x128xf32, #tpu.memory_space<vmem>>, vector<1x128x128xf32>
    %286 = vector.shape_cast %285 : vector<1x128x128xf32> to vector<128x128xf32>
    %cst_246 = arith.constant dense<0.000000e+00> : vector<1x128xf32>
    %287 = tpu.matmul %284, %286, %cst_246 {dimension_numbers = #tpu.dot_dimension_numbers<[1], [0], [0], [1], [0, 0, 1, 1], [], []>} : vector<1x128xf32>, vector<128x128xf32>, vector<1x128xf32> -> vector<1x128xf32>
    %288 = arith.addf %283, %287 : vector<1x128xf32>
    %c17 = arith.constant 17 : index
    %c0_247 = arith.constant 0 : index
    %289 = vector.load %arg9[%c17, %c0_247] : memref<64x128xf32, #tpu.memory_space<vmem>>, vector<1x128xf32>
    %c11_248 = arith.constant 11 : index
    %c0_249 = arith.constant 0 : index
    %c0_250 = arith.constant 0 : index
    %290 = vector.load %arg4[%c11_248, %c0_249, %c0_250] : memref<25x128x128xf32, #tpu.memory_space<vmem>>, vector<1x128x128xf32>
    %291 = vector.shape_cast %290 : vector<1x128x128xf32> to vector<128x128xf32>
    %cst_251 = arith.constant dense<0.000000e+00> : vector<1x128xf32>
    %292 = tpu.matmul %289, %291, %cst_251 {dimension_numbers = #tpu.dot_dimension_numbers<[1], [0], [0], [1], [0, 0, 1, 1], [], []>} : vector<1x128xf32>, vector<128x128xf32>, vector<1x128xf32> -> vector<1x128xf32>
    %293 = arith.addf %288, %292 : vector<1x128xf32>
    %c18 = arith.constant 18 : index
    %c0_252 = arith.constant 0 : index
    %294 = vector.load %arg9[%c18, %c0_252] : memref<64x128xf32, #tpu.memory_space<vmem>>, vector<1x128xf32>
    %c12_253 = arith.constant 12 : index
    %c0_254 = arith.constant 0 : index
    %c0_255 = arith.constant 0 : index
    %295 = vector.load %arg4[%c12_253, %c0_254, %c0_255] : memref<25x128x128xf32, #tpu.memory_space<vmem>>, vector<1x128x128xf32>
    %296 = vector.shape_cast %295 : vector<1x128x128xf32> to vector<128x128xf32>
    %cst_256 = arith.constant dense<0.000000e+00> : vector<1x128xf32>
    %297 = tpu.matmul %294, %296, %cst_256 {dimension_numbers = #tpu.dot_dimension_numbers<[1], [0], [0], [1], [0, 0, 1, 1], [], []>} : vector<1x128xf32>, vector<128x128xf32>, vector<1x128xf32> -> vector<1x128xf32>
    %298 = arith.addf %293, %297 : vector<1x128xf32>
    %c19 = arith.constant 19 : index
    %c0_257 = arith.constant 0 : index
    %299 = vector.load %arg9[%c19, %c0_257] : memref<64x128xf32, #tpu.memory_space<vmem>>, vector<1x128xf32>
    %c13 = arith.constant 13 : index
    %c0_258 = arith.constant 0 : index
    %c0_259 = arith.constant 0 : index
    %300 = vector.load %arg4[%c13, %c0_258, %c0_259] : memref<25x128x128xf32, #tpu.memory_space<vmem>>, vector<1x128x128xf32>
    %301 = vector.shape_cast %300 : vector<1x128x128xf32> to vector<128x128xf32>
    %cst_260 = arith.constant dense<0.000000e+00> : vector<1x128xf32>
    %302 = tpu.matmul %299, %301, %cst_260 {dimension_numbers = #tpu.dot_dimension_numbers<[1], [0], [0], [1], [0, 0, 1, 1], [], []>} : vector<1x128xf32>, vector<128x128xf32>, vector<1x128xf32> -> vector<1x128xf32>
    %303 = arith.addf %298, %302 : vector<1x128xf32>
    %c20 = arith.constant 20 : index
    %c0_261 = arith.constant 0 : index
    %304 = vector.load %arg9[%c20, %c0_261] : memref<64x128xf32, #tpu.memory_space<vmem>>, vector<1x128xf32>
    %c14 = arith.constant 14 : index
    %c0_262 = arith.constant 0 : index
    %c0_263 = arith.constant 0 : index
    %305 = vector.load %arg4[%c14, %c0_262, %c0_263] : memref<25x128x128xf32, #tpu.memory_space<vmem>>, vector<1x128x128xf32>
    %306 = vector.shape_cast %305 : vector<1x128x128xf32> to vector<128x128xf32>
    %cst_264 = arith.constant dense<0.000000e+00> : vector<1x128xf32>
    %307 = tpu.matmul %304, %306, %cst_264 {dimension_numbers = #tpu.dot_dimension_numbers<[1], [0], [0], [1], [0, 0, 1, 1], [], []>} : vector<1x128xf32>, vector<128x128xf32>, vector<1x128xf32> -> vector<1x128xf32>
    %308 = arith.addf %303, %307 : vector<1x128xf32>
    %c24 = arith.constant 24 : index
    %c0_265 = arith.constant 0 : index
    %309 = vector.load %arg9[%c24, %c0_265] : memref<64x128xf32, #tpu.memory_space<vmem>>, vector<1x128xf32>
    %c15 = arith.constant 15 : index
    %c0_266 = arith.constant 0 : index
    %c0_267 = arith.constant 0 : index
    %310 = vector.load %arg4[%c15, %c0_266, %c0_267] : memref<25x128x128xf32, #tpu.memory_space<vmem>>, vector<1x128x128xf32>
    %311 = vector.shape_cast %310 : vector<1x128x128xf32> to vector<128x128xf32>
    %cst_268 = arith.constant dense<0.000000e+00> : vector<1x128xf32>
    %312 = tpu.matmul %309, %311, %cst_268 {dimension_numbers = #tpu.dot_dimension_numbers<[1], [0], [0], [1], [0, 0, 1, 1], [], []>} : vector<1x128xf32>, vector<128x128xf32>, vector<1x128xf32> -> vector<1x128xf32>
    %313 = arith.addf %308, %312 : vector<1x128xf32>
    %c25 = arith.constant 25 : index
    %c0_269 = arith.constant 0 : index
    %314 = vector.load %arg9[%c25, %c0_269] : memref<64x128xf32, #tpu.memory_space<vmem>>, vector<1x128xf32>
    %c16_270 = arith.constant 16 : index
    %c0_271 = arith.constant 0 : index
    %c0_272 = arith.constant 0 : index
    %315 = vector.load %arg4[%c16_270, %c0_271, %c0_272] : memref<25x128x128xf32, #tpu.memory_space<vmem>>, vector<1x128x128xf32>
    %316 = vector.shape_cast %315 : vector<1x128x128xf32> to vector<128x128xf32>
    %cst_273 = arith.constant dense<0.000000e+00> : vector<1x128xf32>
    %317 = tpu.matmul %314, %316, %cst_273 {dimension_numbers = #tpu.dot_dimension_numbers<[1], [0], [0], [1], [0, 0, 1, 1], [], []>} : vector<1x128xf32>, vector<128x128xf32>, vector<1x128xf32> -> vector<1x128xf32>
    %318 = arith.addf %313, %317 : vector<1x128xf32>
    %c26 = arith.constant 26 : index
    %c0_274 = arith.constant 0 : index
    %319 = vector.load %arg9[%c26, %c0_274] : memref<64x128xf32, #tpu.memory_space<vmem>>, vector<1x128xf32>
    %c17_275 = arith.constant 17 : index
    %c0_276 = arith.constant 0 : index
    %c0_277 = arith.constant 0 : index
    %320 = vector.load %arg4[%c17_275, %c0_276, %c0_277] : memref<25x128x128xf32, #tpu.memory_space<vmem>>, vector<1x128x128xf32>
    %321 = vector.shape_cast %320 : vector<1x128x128xf32> to vector<128x128xf32>
    %cst_278 = arith.constant dense<0.000000e+00> : vector<1x128xf32>
    %322 = tpu.matmul %319, %321, %cst_278 {dimension_numbers = #tpu.dot_dimension_numbers<[1], [0], [0], [1], [0, 0, 1, 1], [], []>} : vector<1x128xf32>, vector<128x128xf32>, vector<1x128xf32> -> vector<1x128xf32>
    %323 = arith.addf %318, %322 : vector<1x128xf32>
    %c27 = arith.constant 27 : index
    %c0_279 = arith.constant 0 : index
    %324 = vector.load %arg9[%c27, %c0_279] : memref<64x128xf32, #tpu.memory_space<vmem>>, vector<1x128xf32>
    %c18_280 = arith.constant 18 : index
    %c0_281 = arith.constant 0 : index
    %c0_282 = arith.constant 0 : index
    %325 = vector.load %arg4[%c18_280, %c0_281, %c0_282] : memref<25x128x128xf32, #tpu.memory_space<vmem>>, vector<1x128x128xf32>
    %326 = vector.shape_cast %325 : vector<1x128x128xf32> to vector<128x128xf32>
    %cst_283 = arith.constant dense<0.000000e+00> : vector<1x128xf32>
    %327 = tpu.matmul %324, %326, %cst_283 {dimension_numbers = #tpu.dot_dimension_numbers<[1], [0], [0], [1], [0, 0, 1, 1], [], []>} : vector<1x128xf32>, vector<128x128xf32>, vector<1x128xf32> -> vector<1x128xf32>
    %328 = arith.addf %323, %327 : vector<1x128xf32>
    %c28 = arith.constant 28 : index
    %c0_284 = arith.constant 0 : index
    %329 = vector.load %arg9[%c28, %c0_284] : memref<64x128xf32, #tpu.memory_space<vmem>>, vector<1x128xf32>
    %c19_285 = arith.constant 19 : index
    %c0_286 = arith.constant 0 : index
    %c0_287 = arith.constant 0 : index
    %330 = vector.load %arg4[%c19_285, %c0_286, %c0_287] : memref<25x128x128xf32, #tpu.memory_space<vmem>>, vector<1x128x128xf32>
    %331 = vector.shape_cast %330 : vector<1x128x128xf32> to vector<128x128xf32>
    %cst_288 = arith.constant dense<0.000000e+00> : vector<1x128xf32>
    %332 = tpu.matmul %329, %331, %cst_288 {dimension_numbers = #tpu.dot_dimension_numbers<[1], [0], [0], [1], [0, 0, 1, 1], [], []>} : vector<1x128xf32>, vector<128x128xf32>, vector<1x128xf32> -> vector<1x128xf32>
    %333 = arith.addf %328, %332 : vector<1x128xf32>
    %c32 = arith.constant 32 : index
    %c0_289 = arith.constant 0 : index
    %334 = vector.load %arg9[%c32, %c0_289] : memref<64x128xf32, #tpu.memory_space<vmem>>, vector<1x128xf32>
    %c20_290 = arith.constant 20 : index
    %c0_291 = arith.constant 0 : index
    %c0_292 = arith.constant 0 : index
    %335 = vector.load %arg4[%c20_290, %c0_291, %c0_292] : memref<25x128x128xf32, #tpu.memory_space<vmem>>, vector<1x128x128xf32>
    %336 = vector.shape_cast %335 : vector<1x128x128xf32> to vector<128x128xf32>
    %cst_293 = arith.constant dense<0.000000e+00> : vector<1x128xf32>
    %337 = tpu.matmul %334, %336, %cst_293 {dimension_numbers = #tpu.dot_dimension_numbers<[1], [0], [0], [1], [0, 0, 1, 1], [], []>} : vector<1x128xf32>, vector<128x128xf32>, vector<1x128xf32> -> vector<1x128xf32>
    %338 = arith.addf %333, %337 : vector<1x128xf32>
    %c33 = arith.constant 33 : index
    %c0_294 = arith.constant 0 : index
    %339 = vector.load %arg9[%c33, %c0_294] : memref<64x128xf32, #tpu.memory_space<vmem>>, vector<1x128xf32>
    %c21 = arith.constant 21 : index
    %c0_295 = arith.constant 0 : index
    %c0_296 = arith.constant 0 : index
    %340 = vector.load %arg4[%c21, %c0_295, %c0_296] : memref<25x128x128xf32, #tpu.memory_space<vmem>>, vector<1x128x128xf32>
    %341 = vector.shape_cast %340 : vector<1x128x128xf32> to vector<128x128xf32>
    %cst_297 = arith.constant dense<0.000000e+00> : vector<1x128xf32>
    %342 = tpu.matmul %339, %341, %cst_297 {dimension_numbers = #tpu.dot_dimension_numbers<[1], [0], [0], [1], [0, 0, 1, 1], [], []>} : vector<1x128xf32>, vector<128x128xf32>, vector<1x128xf32> -> vector<1x128xf32>
    %343 = arith.addf %338, %342 : vector<1x128xf32>
    %c34 = arith.constant 34 : index
    %c0_298 = arith.constant 0 : index
    %344 = vector.load %arg9[%c34, %c0_298] : memref<64x128xf32, #tpu.memory_space<vmem>>, vector<1x128xf32>
    %c22 = arith.constant 22 : index
    %c0_299 = arith.constant 0 : index
    %c0_300 = arith.constant 0 : index
    %345 = vector.load %arg4[%c22, %c0_299, %c0_300] : memref<25x128x128xf32, #tpu.memory_space<vmem>>, vector<1x128x128xf32>
    %346 = vector.shape_cast %345 : vector<1x128x128xf32> to vector<128x128xf32>
    %cst_301 = arith.constant dense<0.000000e+00> : vector<1x128xf32>
    %347 = tpu.matmul %344, %346, %cst_301 {dimension_numbers = #tpu.dot_dimension_numbers<[1], [0], [0], [1], [0, 0, 1, 1], [], []>} : vector<1x128xf32>, vector<128x128xf32>, vector<1x128xf32> -> vector<1x128xf32>
    %348 = arith.addf %343, %347 : vector<1x128xf32>
    %c35 = arith.constant 35 : index
    %c0_302 = arith.constant 0 : index
    %349 = vector.load %arg9[%c35, %c0_302] : memref<64x128xf32, #tpu.memory_space<vmem>>, vector<1x128xf32>
    %c23 = arith.constant 23 : index
    %c0_303 = arith.constant 0 : index
    %c0_304 = arith.constant 0 : index
    %350 = vector.load %arg4[%c23, %c0_303, %c0_304] : memref<25x128x128xf32, #tpu.memory_space<vmem>>, vector<1x128x128xf32>
    %351 = vector.shape_cast %350 : vector<1x128x128xf32> to vector<128x128xf32>
    %cst_305 = arith.constant dense<0.000000e+00> : vector<1x128xf32>
    %352 = tpu.matmul %349, %351, %cst_305 {dimension_numbers = #tpu.dot_dimension_numbers<[1], [0], [0], [1], [0, 0, 1, 1], [], []>} : vector<1x128xf32>, vector<128x128xf32>, vector<1x128xf32> -> vector<1x128xf32>
    %353 = arith.addf %348, %352 : vector<1x128xf32>
    %c36 = arith.constant 36 : index
    %c0_306 = arith.constant 0 : index
    %354 = vector.load %arg9[%c36, %c0_306] : memref<64x128xf32, #tpu.memory_space<vmem>>, vector<1x128xf32>
    %c24_307 = arith.constant 24 : index
    %c0_308 = arith.constant 0 : index
    %c0_309 = arith.constant 0 : index
    %355 = vector.load %arg4[%c24_307, %c0_308, %c0_309] : memref<25x128x128xf32, #tpu.memory_space<vmem>>, vector<1x128x128xf32>
    %356 = vector.shape_cast %355 : vector<1x128x128xf32> to vector<128x128xf32>
    %cst_310 = arith.constant dense<0.000000e+00> : vector<1x128xf32>
    %357 = tpu.matmul %354, %356, %cst_310 {dimension_numbers = #tpu.dot_dimension_numbers<[1], [0], [0], [1], [0, 0, 1, 1], [], []>} : vector<1x128xf32>, vector<128x128xf32>, vector<1x128xf32> -> vector<1x128xf32>
    %358 = arith.addf %353, %357 : vector<1x128xf32>
    %c2_311 = arith.constant 2 : index
    %c0_312 = arith.constant 0 : index
    %359 = vector.load %arg6[%c2_311, %c0_312] : memref<8x128xf32, #tpu.memory_space<vmem>>, vector<1x128xf32>
    %360 = arith.addf %358, %359 : vector<1x128xf32>
    %cst_313 = arith.constant 0.000000e+00 : f32
    %361 = vector.broadcast %cst_313 : f32 to vector<1x128xf32>
    %362 = arith.maximumf %360, %361 : vector<1x128xf32>
    %c0_314 = arith.constant 0 : index
    %c0_315 = arith.constant 0 : index
    %c0_316 = arith.constant 0 : index
    %363 = vector.load %arg5[%c0_314, %c0_315, %c0_316] : memref<2x128x128xf32, #tpu.memory_space<vmem>>, vector<1x128x128xf32>
    %364 = vector.shape_cast %363 : vector<1x128x128xf32> to vector<128x128xf32>
    %cst_317 = arith.constant dense<0.000000e+00> : vector<1x128xf32>
    %365 = tpu.matmul %362, %364, %cst_317 {dimension_numbers = #tpu.dot_dimension_numbers<[1], [0], [0], [1], [0, 0, 1, 1], [], []>} : vector<1x128xf32>, vector<128x128xf32>, vector<1x128xf32> -> vector<1x128xf32>
    %c3_318 = arith.constant 3 : index
    %c0_319 = arith.constant 0 : index
    %366 = vector.load %arg6[%c3_318, %c0_319] : memref<8x128xf32, #tpu.memory_space<vmem>>, vector<1x128xf32>
    %367 = arith.addf %365, %366 : vector<1x128xf32>
    %cst_320 = arith.constant 0.000000e+00 : f32
    %368 = vector.broadcast %cst_320 : f32 to vector<1x128xf32>
    %369 = arith.maximumf %367, %368 : vector<1x128xf32>
    %c1_321 = arith.constant 1 : index
    %c0_322 = arith.constant 0 : index
    %c0_323 = arith.constant 0 : index
    %370 = vector.load %arg5[%c1_321, %c0_322, %c0_323] : memref<2x128x128xf32, #tpu.memory_space<vmem>>, vector<1x128x128xf32>
    %371 = vector.shape_cast %370 : vector<1x128x128xf32> to vector<128x128xf32>
    %cst_324 = arith.constant dense<0.000000e+00> : vector<1x128xf32>
    %372 = tpu.matmul %369, %371, %cst_324 {dimension_numbers = #tpu.dot_dimension_numbers<[1], [0], [0], [1], [0, 0, 1, 1], [], []>} : vector<1x128xf32>, vector<128x128xf32>, vector<1x128xf32> -> vector<1x128xf32>
    %c4_325 = arith.constant 4 : index
    %c0_326 = arith.constant 0 : index
    %373 = vector.load %arg6[%c4_325, %c0_326] : memref<8x128xf32, #tpu.memory_space<vmem>>, vector<1x128xf32>
    %374 = arith.addf %372, %373 : vector<1x128xf32>
    %375 = vector.shape_cast %374 : vector<1x128xf32> to vector<1x128xf32>
    %376 = vector.broadcast %375 : vector<1x128xf32> to vector<8x128xf32>
    %c0_327 = arith.constant 0 : index
    %c0_328 = arith.constant 0 : index
    %c0_329 = arith.constant 0 : index
    %377 = vector.load %arg7[%c0_327, %c0_328, %c0_329] : memref<1x8x128xf32, #tpu.memory_space<vmem>>, vector<1x8x128xf32>
    %378 = vector.shape_cast %377 : vector<1x8x128xf32> to vector<8x128xf32>
    %379 = vector.shape_cast %376 : vector<8x128xf32> to vector<1x8x128xf32>
    tpu.vector_store %arg7[%c0_327, %c0_328, %c0_329], %379 {strides = array<i32>} : memref<1x8x128xf32, #tpu.memory_space<vmem>>, vector<1x8x128xf32>,
    return
  }
  func.func @transform_0(%arg0: i32) -> (i32, i32, i32) {
    %c0_i32 = arith.constant 0 : i32
    %c0_i32_0 = arith.constant 0 : i32
    %c0_i32_1 = arith.constant 0 : i32
    return %arg0, %c0_i32, %c0_i32_0 : i32, i32, i32
  }
  func.func @transform_1(%arg0: i32) -> (i32, i32) {
    %c0_i32 = arith.constant 0 : i32
    %c0_i32_0 = arith.constant 0 : i32
    %c0_i32_1 = arith.constant 0 : i32
    return %c0_i32, %c0_i32_0 : i32, i32
  }
  func.func @transform_2(%arg0: i32) -> (i32, i32, i32) {
    %c0_i32 = arith.constant 0 : i32
    %c0_i32_0 = arith.constant 0 : i32
    %c0_i32_1 = arith.constant 0 : i32
    %c0_i32_2 = arith.constant 0 : i32
    return %c0_i32, %c0_i32_0, %c0_i32_1 : i32, i32, i32
  }
  func.func @transform_3(%arg0: i32) -> (i32, i32, i32) {
    %c0_i32 = arith.constant 0 : i32
    %c0_i32_0 = arith.constant 0 : i32
    %c0_i32_1 = arith.constant 0 : i32
    %c0_i32_2 = arith.constant 0 : i32
    return %c0_i32, %c0_i32_0, %c0_i32_1 : i32, i32, i32
  }
  func.func @transform_4(%arg0: i32) -> (i32, i32, i32) {
    %c0_i32 = arith.constant 0 : i32
    %c0_i32_0 = arith.constant 0 : i32
    %c0_i32_1 = arith.constant 0 : i32
    %c0_i32_2 = arith.constant 0 : i32
    return %c0_i32, %c0_i32_0, %c0_i32_1 : i32, i32, i32
  }
  func.func @transform_5(%arg0: i32) -> (i32, i32) {
    %c0_i32 = arith.constant 0 : i32
    %c0_i32_0 = arith.constant 0 : i32
    %c0_i32_1 = arith.constant 0 : i32
    return %c0_i32, %c0_i32_0 : i32, i32
  }
  func.func @transform_6(%arg0: i32) -> (i32, i32, i32) {
    %c0_i32 = arith.constant 0 : i32
    %c0_i32_0 = arith.constant 0 : i32
    %c0_i32_1 = arith.constant 0 : i32
    return %arg0, %c0_i32, %c0_i32_0 : i32, i32, i32
  }
}

</mosaic_0001>

<bundles_post_ra>
// kernel: net_forward.1
= control target key start
LH: loop header
LB: loop body
LE: loop exit
PB: predicated region body
PF: predicated region fallthrough
CT: control target
= control target key end

     0   :  { %s10992_s21 = smov 0   ;;  %s16012_s0 = inlined_call_operand.vmem [shape: f32[2,1024,32], index: 0, kind: input, shape index: {}]   ;;  %s16013_s1 = inlined_call_operand.vmem [shape: f32[32,128], index: 1, kind: input, shape index: {}]   ;;  %s16014_s2 = inlined_call_operand.vmem [shape: f32[5,128,128], index: 2, kind: input, shape index: {}]   ;;  %s16015_s3 = inlined_call_operand.vmem [shape: f32[25,128,128], index: 3, kind: input, shape index: {}]   ;;  %s16016_s4 = inlined_call_operand.vmem [shape: f32[2,128,128], index: 4, kind: input, shape index: {}]   ;;  %s16017_s5 = inlined_call_operand.vmem [shape: f32[8,128], index: 5, kind: input, shape index: {}]   ;;  %s16018_s6 = inlined_call_operand.vmem [shape: f32[2,8,128], index: 6, kind: output, shape index: {}]  }
   0x1 LB: > { %s7132_s22 = sadd.s32 4294967295, %s10949_s21   ;;  %p7136_p0 = scmp.ge.s32.totalorder %s10949_s21, 1  ;;  %s10949_s21 = sphi %s10992_s21, %s16_s21  }
   0x2   : > { %p212_p1 = scmp.lt.s32.totalorder %s10949_s21, 3 }
   0x4   : > { %p213_p2 = pnand %p7136_p0, %p212_p1 }
   0x6   : > { %216 = sbr.rel (%p213_p2) target bundleno = 2278 (0x8e6), region = 44 }
   0xb   : > { %v381_v0 = vld [vmem:[%s16013_s1 + $0x18] sm:$0xff]  ;;  %v380_v1 = vld [vmem:[%s16013_s1 + $0x10] sm:$0xff]  ;;  %p241_p3 = scmp.lt.s32.totalorder %s7132_s22, 1  ;;  %v379_v2 = vld [vmem:[%s16013_s1 + $0x8] sm:$0xff]  ;;  %vm382_vm0 = vcmask 261120   ;;  %s10951_s13 = smov 16  }
   0xc   : > { %8808 = vmatprep.subr.mxu0 %v381_v0  ;;  %v378_v3 = vld [vmem:[%s16013_s1] sm:$0xff]  ;;  %s10952_s14 = smov 32   ;;  %s10953_s15 = smov 8   ;;  %vm10956_vm3 = vmmov 0  }
   0xd   : > { %8809 = vmatpush3.msra.mxu0 %v381_v0  ;;  %s16533_s22 = smov (!%p241_p3, %s7132_s22), 1  ;;  %s10954_s16 = smov 24  }
   0xe   : > { %8810 = vmatprep.subr.mxu0 %v380_v1  ;;  %s7736_s7 = sshll.u32 %s16533_s22, 10  ;;  %s7139_s9 = sshll.u32 %s16533_s22, 3 }
   0xf   : > { %8811 = vmatpush3.msra.mxu0 %v380_v1  ;;  %s11018_s10 = scalar_lea.vmem %s16012_s0, %s7736_s7  ;;  %s249_s12 = scalar_lea.vmem %s16018_s6, %s7139_s9 }
  0x10   : > { %8812 = vmatprep.subr.mxu0 %v379_v2  ;;  %v250_v4 = vld [vmem:[%s11018_s10] sm:$0xff]  ;;  %v251_v5 = vld [vmem:[%s11018_s10 + $0x8] sm:$0xff]  ;;  %v252_v6 = vld [vmem:[%s11018_s10 + $0x10] sm:$0xff] }
  0x11   : > { %8813 = vmatpush3.msra.mxu0 %v379_v2  ;;  %8816 = vmatprep.mubr.msk.f32.mxu0 %vm382_vm0, %v250_v4  ;;  %v253_v7 = vld [vmem:[%s11018_s10 + $0x18] sm:$0xff]  ;;  %v254_v8 = vld [vmem:[%s11018_s10 + $0x20] sm:$0xff]  ;;  %v255_v9 = vld [vmem:[%s11018_s10 + $0x28] sm:$0xff] }
  0x12   : > { %8814 = vmatprep.subr.mxu0 %v378_v3  ;;  %v256_v10 = vld [vmem:[%s11018_s10 + $0x30] sm:$0xff]  ;;  %v257_v11 = vld [vmem:[%s11018_s10 + $0x38] sm:$0xff]  ;;  %v258_v12 = vld [vmem:[%s11018_s10 + $0x40] sm:$0xff] }
  0x13   : > { %8815 = vmatpush3.msra.mxu0 %v378_v3  ;;  %v259_v13 = vld [vmem:[%s11018_s10 + $0x48] sm:$0xff]  ;;  %v260_v14 = vld [vmem:[%s11018_s10 + $0x50] sm:$0xff]  ;;  %v261_v15 = vld [vmem:[%s11018_s10 + $0x58] sm:$0xff] }
  0x14   : > { %8817 = vmatmul.mubr.msk.f32.vlgmr.msra.gmra.mxu0 %vm382_vm0, %v251_v5  ;;  %v262_v16 = vld [vmem:[%s11018_s10 + $0x60] sm:$0xff]  ;;  %v263_v17 = vld [vmem:[%s11018_s10 + $0x68] sm:$0xff]  ;;  %v264_v18 = vld [vmem:[%s11018_s10 + $0x70] sm:$0xff] }
  0x15   : > { %8819 = vmatprep.mubr.msk.f32.mxu0 %vm382_vm0, %v252_v6  ;;  %v265_v19 = vld [vmem:[%s11018_s10 + $0x78] sm:$0xff]  ;;  %v266_v20 = vld [vmem:[%s11018_s10 + $0x80] sm:$0xff]  ;;  %v267_v21 = vld [vmem:[%s11018_s10 + $0x88] sm:$0xff] }
  0x16   : > { %v268_v22 = vld [vmem:[%s11018_s10 + $0x90] sm:$0xff]  ;;  %v269_v23 = vld [vmem:[%s11018_s10 + $0x98] sm:$0xff]  ;;  %v270_v24 = vld [vmem:[%s11018_s10 + $0xa0] sm:$0xff] }
  0x17   : > { %v271_v25 = vld [vmem:[%s11018_s10 + $0xa8] sm:$0xff]  ;;  %v272_v26 = vld [vmem:[%s11018_s10 + $0xb0] sm:$0xff]  ;;  %v273_v27 = vld [vmem:[%s11018_s10 + $0xb8] sm:$0xff] }
  0x18   : > { %8820 = vmatmul.mubr.msk.f32.gmra.mxu0 %vm382_vm0, %v253_v7  ;;  %v274_v28 = vld [vmem:[%s11018_s10 + $0xc0] sm:$0xff]  ;;  %v275_v29 = vld [vmem:[%s11018_s10 + $0xc8] sm:$0xff]  ;;  %v276_v30 = vld [vmem:[%s11018_s10 + $0xd0] sm:$0xff] }
  0x19   : > { %8822 = vmatprep.mubr.msk.f32.mxu0 %vm382_vm0, %v254_v8  ;;  %v277_v31 = vld [vmem:[%s11018_s10 + $0xd8] sm:$0xff]  ;;  %v278_v32 = vld [vmem:[%s11018_s10 + $0xe0] sm:$0xff]  ;;  %v279_v33 = vld [vmem:[%s11018_s10 + $0xe8] sm:$0xff] }
  0x1a   : > { %v280_v34 = vld [vmem:[%s11018_s10 + $0xf0] sm:$0xff]  ;;  %v281_v35 = vld [vmem:[%s11018_s10 + $0xf8] sm:$0xff]  ;;  %v282_v36 = vld [vmem:[%s11018_s10 + $0x100] sm:$0xff] }
  0x1b   : > { %v283_v37 = vld [vmem:[%s11018_s10 + $0x108] sm:$0xff]  ;;  %v284_v38 = vld [vmem:[%s11018_s10 + $0x110] sm:$0xff]  ;;  %v285_v39 = vld [vmem:[%s11018_s10 + $0x118] sm:$0xff] }
  0x1c   : > { %8823 = vmatmul.mubr.msk.f32.gmra.mxu0 %vm382_vm0, %v255_v9  ;;  %v286_v40 = vld [vmem:[%s11018_s10 + $0x120] sm:$0xff]  ;;  %v287_v41 = vld [vmem:[%s11018_s10 + $0x128] sm:$0xff]  ;;  %v288_v42 = vld [vmem:[%s11018_s10 + $0x130] sm:$0xff] }
  0x1d   : > { %8825 = vmatprep.mubr.msk.f32.mxu0 %vm382_vm0, %v256_v10  ;;  %v289_v43 = vld [vmem:[%s11018_s10 + $0x138] sm:$0xff]  ;;  %v290_v44 = vld [vmem:[%s11018_s10 + $0x140] sm:$0xff]  ;;  %v291_v45 = vld [vmem:[%s11018_s10 + $0x148] sm:$0xff] }
  0x1e   : > { %v292_v46 = vld [vmem:[%s11018_s10 + $0x150] sm:$0xff]  ;;  %v293_v47 = vld [vmem:[%s11018_s10 + $0x158] sm:$0xff]  ;;  %v294_v48 = vld [vmem:[%s11018_s10 + $0x160] sm:$0xff] }
  0x1f   : > { %v295_v49 = vld [vmem:[%s11018_s10 + $0x168] sm:$0xff]  ;;  %v296_v50 = vld [vmem:[%s11018_s10 + $0x170] sm:$0xff]  ;;  %v297_v51 = vld [vmem:[%s11018_s10 + $0x178] sm:$0xff] }
  0x20   : > { %8826 = vmatmul.mubr.msk.f32.gmra.mxu0 %vm382_vm0, %v257_v11  ;;  %v298_v52 = vld [vmem:[%s11018_s10 + $0x180] sm:$0xff]  ;;  %v299_v53 = vld [vmem:[%s11018_s10 + $0x188] sm:$0xff]  ;;  %v300_v54 = vld [vmem:[%s11018_s10 + $0x190] sm:$0xff] }
  0x21   : > { %8828 = vmatprep.mubr.msk.f32.mxu0 %vm382_vm0, %v258_v12  ;;  %v301_v55 = vld [vmem:[%s11018_s10 + $0x198] sm:$0xff]  ;;  %v302_v56 = vld [vmem:[%s11018_s10 + $0x1a0] sm:$0xff]  ;;  %v303_v57 = vld [vmem:[%s11018_s10 + $0x1a8] sm:$0xff] }
  0x22   : > { %v304_v58 = vld [vmem:[%s11018_s10 + $0x1b0] sm:$0xff]  ;;  %v305_v59 = vld [vmem:[%s11018_s10 + $0x1b8] sm:$0xff]  ;;  %v306_v60 = vld [vmem:[%s11018_s10 + $0x1c0] sm:$0xff] }
  0x23   : > { %v307_v61 = vld [vmem:[%s11018_s10 + $0x1c8] sm:$0xff]  ;;  %v308_v62 = vld [vmem:[%s11018_s10 + $0x1d0] sm:$0xff]  ;;  %v309_v63 = vld [vmem:[%s11018_s10 + $0x1d8] sm:$0xff] }
  0x24   : > { %8829 = vmatmul.mubr.msk.f32.gmra.mxu0 %vm382_vm0, %v259_v13  ;;  %v310_v0 = vld [vmem:[%s11018_s10 + $0x1e0] sm:$0xff]  ;;  %v311_v1 = vld [vmem:[%s11018_s10 + $0x1e8] sm:$0xff]  ;;  %v312_v2 = vld [vmem:[%s11018_s10 + $0x1f0] sm:$0xff] }
  0x25   : > { %8831 = vmatprep.mubr.msk.f32.mxu0 %vm382_vm0, %v260_v14  ;;  %v313_v3 = vld [vmem:[%s11018_s10 + $0x1f8] sm:$0xff]  ;;  %v314_v4 = vld [vmem:[%s11018_s10 + $0x200] sm:$0xff]  ;;  %v315_v5 = vld [vmem:[%s11018_s10 + $0x208] sm:$0xff] }
  0x26   : > { %v316_v6 = vld [vmem:[%s11018_s10 + $0x210] sm:$0xff]  ;;  %v317_v7 = vld [vmem:[%s11018_s10 + $0x218] sm:$0xff]  ;;  %v318_v8 = vld [vmem:[%s11018_s10 + $0x220] sm:$0xff] }
  0x27   : > { %v319_v9 = vld [vmem:[%s11018_s10 + $0x228] sm:$0xff]  ;;  %v320_v10 = vld [vmem:[%s11018_s10 + $0x230] sm:$0xff]  ;;  %v321_v11 = vld [vmem:[%s11018_s10 + $0x238] sm:$0xff] }
  0x28   : > { %8832 = vmatmul.mubr.msk.f32.gmra.mxu0 %vm382_vm0, %v261_v15  ;;  %v322_v12 = vld [vmem:[%s11018_s10 + $0x240] sm:$0xff]  ;;  %v323_v13 = vld [vmem:[%s11018_s10 + $0x248] sm:$0xff]  ;;  %v324_v14 = vld [vmem:[%s11018_s10 + $0x250] sm:$0xff] }
  0x29   : > { %8834 = vmatprep.mubr.msk.f32.mxu0 %vm382_vm0, %v262_v16  ;;  %v325_v15 = vld [vmem:[%s11018_s10 + $0x258] sm:$0xff]  ;;  %v326_v16 = vld [vmem:[%s11018_s10 + $0x260] sm:$0xff] }
  0x2c   : > { %8835 = vmatmul.mubr.msk.f32.gmra.mxu0 %vm382_vm0, %v263_v17  ;;  %v327_v17 = vld [vmem:[%s11018_s10 + $0x268] sm:$0xff] }
  0x2d   : > { %8837 = vmatprep.mubr.msk.f32.mxu0 %vm382_vm0, %v264_v18  ;;  %v328_v18 = vld [vmem:[%s11018_s10 + $0x270] sm:$0xff] }
  0x30   : > { %8838 = vmatmul.mubr.msk.f32.gmra.mxu0 %vm382_vm0, %v265_v19  ;;  %v329_v19 = vld [vmem:[%s11018_s10 + $0x278] sm:$0xff] }
  0x31   : > { %8840 = vmatprep.mubr.msk.f32.mxu0 %vm382_vm0, %v266_v20  ;;  %v330_v20 = vld [vmem:[%s11018_s10 + $0x280] sm:$0xff] }
  0x34   : > { %8841 = vmatmul.mubr.msk.f32.gmra.mxu0 %vm382_vm0, %v267_v21  ;;  %v331_v21 = vld [vmem:[%s11018_s10 + $0x288] sm:$0xff] }
  0x35   : > { %8843 = vmatprep.mubr.msk.f32.mxu0 %vm382_vm0, %v268_v22  ;;  %v332_v22 = vld [vmem:[%s11018_s10 + $0x290] sm:$0xff] }
  0x38   : > { %8844 = vmatmul.mubr.msk.f32.gmra.mxu0 %vm382_vm0, %v269_v23  ;;  %v333_v23 = vld [vmem:[%s11018_s10 + $0x298] sm:$0xff] }
  0x39   : > { %8846 = vmatprep.mubr.msk.f32.mxu0 %vm382_vm0, %v270_v24  ;;  %v334_v24 = vld [vmem:[%s11018_s10 + $0x2a0] sm:$0xff] }
  0x3c   : > { %8847 = vmatmul.mubr.msk.f32.gmra.mxu0 %vm382_vm0, %v271_v25  ;;  %v335_v25 = vld [vmem:[%s11018_s10 + $0x2a8] sm:$0xff] }
  0x3d   : > { %8849 = vmatprep.mubr.msk.f32.mxu0 %vm382_vm0, %v272_v26  ;;  %v336_v26 = vld [vmem:[%s11018_s10 + $0x2b0] sm:$0xff] }
  0x40   : > { %8850 = vmatmul.mubr.msk.f32.gmra.mxu0 %vm382_vm0, %v273_v27  ;;  %v337_v27 = vld [vmem:[%s11018_s10 + $0x2b8] sm:$0xff] }
  0x41   : > { %8852 = vmatprep.mubr.msk.f32.mxu0 %vm382_vm0, %v274_v28  ;;  %v338_v28 = vld [vmem:[%s11018_s10 + $0x2c0] sm:$0xff] }
  0x44   : > { %8853 = vmatmul.mubr.msk.f32.gmra.mxu0 %vm382_vm0, %v275_v29  ;;  %v339_v29 = vld [vmem:[%s11018_s10 + $0x2c8] sm:$0xff] }
  0x45   : > { %8855 = vmatprep.mubr.msk.f32.mxu0 %vm382_vm0, %v276_v30  ;;  %v340_v30 = vld [vmem:[%s11018_s10 + $0x2d0] sm:$0xff] }
  0x48   : > { %8856 = vmatmul.mubr.msk.f32.gmra.mxu0 %vm382_vm0, %v277_v31  ;;  %v341_v31 = vld [vmem:[%s11018_s10 + $0x2d8] sm:$0xff] }
  0x49   : > { %8858 = vmatprep.mubr.msk.f32.mxu0 %vm382_vm0, %v278_v32  ;;  %v342_v32 = vld [vmem:[%s11018_s10 + $0x2e0] sm:$0xff] }
  0x4c   : > { %8859 = vmatmul.mubr.msk.f32.gmra.mxu0 %vm382_vm0, %v279_v33  ;;  %v343_v33 = vld [vmem:[%s11018_s10 + $0x2e8] sm:$0xff] }
  0x4d   : > { %8861 = vmatprep.mubr.msk.f32.mxu0 %vm382_vm0, %v280_v34  ;;  %v344_v34 = vld [vmem:[%s11018_s10 + $0x2f0] sm:$0xff] }
  0x50   : > { %8862 = vmatmul.mubr.msk.f32.gmra.mxu0 %vm382_vm0, %v281_v35  ;;  %v345_v35 = vld [vmem:[%s11018_s10 + $0x2f8] sm:$0xff] }
  0x51   : > { %8864 = vmatprep.mubr.msk.f32.mxu0 %vm382_vm0, %v282_v36  ;;  %v346_v36 = vld [vmem:[%s11018_s10 + $0x300] sm:$0xff] }
  0x54   : > { %8865 = vmatmul.mubr.msk.f32.gmra.mxu0 %vm382_vm0, %v283_v37  ;;  %v347_v37 = vld [vmem:[%s11018_s10 + $0x308] sm:$0xff] }
  0x55   : > { %8867 = vmatprep.mubr.msk.f32.mxu0 %vm382_vm0, %v284_v38  ;;  %v348_v38 = vld [vmem:[%s11018_s10 + $0x310] sm:$0xff] }
  0x58   : > { %8868 = vmatmul.mubr.msk.f32.gmra.mxu0 %vm382_vm0, %v285_v39 }
  0x59   : > { %8870 = vmatprep.mubr.msk.f32.mxu0 %vm382_vm0, %v286_v40  ;;  %v349_v40 = vld [vmem:[%s11018_s10 + $0x318] sm:$0xff] }
  0x5c   : > { %8871 = vmatmul.mubr.msk.f32.gmra.mxu0 %vm382_vm0, %v287_v41 }
  0x5d   : > { %8873 = vmatprep.mubr.msk.f32.mxu0 %vm382_vm0, %v288_v42  ;;  %v350_v42 = vld [vmem:[%s11018_s10 + $0x320] sm:$0xff] }
  0x60   : > { %8874 = vmatmul.mubr.msk.f32.gmra.mxu0 %vm382_vm0, %v289_v43 }
  0x61   : > { %8876 = vmatprep.mubr.msk.f32.mxu0 %vm382_vm0, %v290_v44  ;;  %v351_v44 = vld [vmem:[%s11018_s10 + $0x328] sm:$0xff] }
  0x64   : > { %8877 = vmatmul.mubr.msk.f32.gmra.mxu0 %vm382_vm0, %v291_v45 }
  0x65   : > { %8879 = vmatprep.mubr.msk.f32.mxu0 %vm382_vm0, %v292_v46  ;;  %v352_v46 = vld [vmem:[%s11018_s10 + $0x330] sm:$0xff] }
  0x68   : > { %8880 = vmatmul.mubr.msk.f32.gmra.mxu0 %vm382_vm0, %v293_v47 }
  0x69   : > { %8882 = vmatprep.mubr.msk.f32.mxu0 %vm382_vm0, %v294_v48  ;;  %v353_v48 = vld [vmem:[%s11018_s10 + $0x338] sm:$0xff] }
  0x6c   : > { %8883 = vmatmul.mubr.msk.f32.gmra.mxu0 %vm382_vm0, %v295_v49 }
  0x6d   : > { %8885 = vmatprep.mubr.msk.f32.mxu0 %vm382_vm0, %v296_v50  ;;  %v354_v50 = vld [vmem:[%s11018_s10 + $0x340] sm:$0xff] }
  0x70   : > { %8886 = vmatmul.mubr.msk.f32.gmra.mxu0 %vm382_vm0, %v297_v51 }
  0x71   : > { %8888 = vmatprep.mubr.msk.f32.mxu0 %vm382_vm0, %v298_v52  ;;  %v355_v52 = vld [vmem:[%s11018_s10 + $0x348] sm:$0xff] }
  0x74   : > { %8889 = vmatmul.mubr.msk.f32.gmra.mxu0 %vm382_vm0, %v299_v53 }
  0x75   : > { %8891 = vmatprep.mubr.msk.f32.mxu0 %vm382_vm0, %v300_v54  ;;  %v356_v54 = vld [vmem:[%s11018_s10 + $0x350] sm:$0xff] }
  0x78   : > { %8892 = vmatmul.mubr.msk.f32.gmra.mxu0 %vm382_vm0, %v301_v55 }
  0x79   : > { %8894 = vmatprep.mubr.msk.f32.mxu0 %vm382_vm0, %v302_v56  ;;  %v357_v56 = vld [vmem:[%s11018_s10 + $0x358] sm:$0xff] }
  0x7c   : > { %8895 = vmatmul.mubr.msk.f32.gmra.mxu0 %vm382_vm0, %v303_v57 }
  0x7d   : > { %8897 = vmatprep.mubr.msk.f32.mxu0 %vm382_vm0, %v304_v58  ;;  %v358_v58 = vld [vmem:[%s11018_s10 + $0x360] sm:$0xff] }
  0x80   : > { %8898 = vmatmul.mubr.msk.f32.gmra.mxu0 %vm382_vm0, %v305_v59 }
  0x81   : > { %8900 = vmatprep.mubr.msk.f32.mxu0 %vm382_vm0, %v306_v60  ;;  %v359_v60 = vld [vmem:[%s11018_s10 + $0x368] sm:$0xff] }
  0x84   : > { %8901 = vmatmul.mubr.msk.f32.gmra.mxu0 %vm382_vm0, %v307_v61 }
  0x85   : > { %8903 = vmatprep.mubr.msk.f32.mxu0 %vm382_vm0, %v308_v62  ;;  %v360_v62 = vld [vmem:[%s11018_s10 + $0x370] sm:$0xff] }
  0x88   : > { %8904 = vmatmul.mubr.msk.f32.gmra.mxu0 %vm382_vm0, %v309_v63 }
  0x89   : > { %8906 = vmatprep.mubr.msk.f32.mxu0 %vm382_vm0, %v310_v0  ;;  %v361_v0 = vld [vmem:[%s11018_s10 + $0x378] sm:$0xff] }
  0x8c   : > { %8907 = vmatmul.mubr.msk.f32.gmra.mxu0 %vm382_vm0, %v311_v1 }
  0x8d   : > { %8909 = vmatprep.mubr.msk.f32.mxu0 %vm382_vm0, %v312_v2  ;;  %v362_v2 = vld [vmem:[%s11018_s10 + $0x380] sm:$0xff] }
  0x90   : > { %8910 = vmatmul.mubr.msk.f32.gmra.mxu0 %vm382_vm0, %v313_v3 }
  0x91   : > { %8912 = vmatprep.mubr.msk.f32.mxu0 %vm382_vm0, %v314_v4  ;;  %v363_v4 = vld [vmem:[%s11018_s10 + $0x388] sm:$0xff] }
  0x94   : > { %8913 = vmatmul.mubr.msk.f32.gmra.mxu0 %vm382_vm0, %v315_v5 }
  0x95   : > { %8915 = vmatprep.mubr.msk.f32.mxu0 %vm382_vm0, %v316_v6  ;;  %v364_v6 = vld [vmem:[%s11018_s10 + $0x390] sm:$0xff] }
  0x98   : > { %8916 = vmatmul.mubr.msk.f32.gmra.mxu0 %vm382_vm0, %v317_v7 }
  0x99   : > { %8918 = vmatprep.mubr.msk.f32.mxu0 %vm382_vm0, %v318_v8  ;;  %v365_v8 = vld [vmem:[%s11018_s10 + $0x398] sm:$0xff] }
  0x9c   : > { %8919 = vmatmul.mubr.msk.f32.gmra.mxu0 %vm382_vm0, %v319_v9 }
  0x9d   : > { %8921 = vmatprep.mubr.msk.f32.mxu0 %vm382_vm0, %v320_v10  ;;  %v366_v10 = vld [vmem:[%s11018_s10 + $0x3a0] sm:$0xff] }
  0xa0   : > { %8922 = vmatmul.mubr.msk.f32.gmra.mxu0 %vm382_vm0, %v321_v11 }
  0xa1   : > { %8924 = vmatprep.mubr.msk.f32.mxu0 %vm382_vm0, %v322_v12  ;;  %v367_v12 = vld [vmem:[%s11018_s10 + $0x3a8] sm:$0xff] }
  0xa4   : > { %8925 = vmatmul.mubr.msk.f32.gmra.mxu0 %vm382_vm0, %v323_v13 }
  0xa5   : > { %8927 = vmatprep.mubr.msk.f32.mxu0 %vm382_vm0, %v324_v14  ;;  %v368_v14 = vld [vmem:[%s11018_s10 + $0x3b0] sm:$0xff] }
  0xa8   : > { %8928 = vmatmul.mubr.msk.f32.gmra.mxu0 %vm382_vm0, %v325_v15 }
  0xa9   : > { %8930 = vmatprep.mubr.msk.f32.mxu0 %vm382_vm0, %v326_v16  ;;  %v369_v16 = vld [vmem:[%s11018_s10 + $0x3b8] sm:$0xff] }
  0xac   : > { %8931 = vmatmul.mubr.msk.f32.gmra.mxu0 %vm382_vm0, %v327_v17 }
  0xad   : > { %8933 = vmatprep.mubr.msk.f32.mxu0 %vm382_vm0, %v328_v18  ;;  %v370_v18 = vld [vmem:[%s11018_s10 + $0x3c0] sm:$0xff] }
  0xb0   : > { %8934 = vmatmul.mubr.msk.f32.gmra.mxu0 %vm382_vm0, %v329_v19 }
  0xb1   : > { %8936 = vmatprep.mubr.msk.f32.mxu0 %vm382_vm0, %v330_v20  ;;  %v371_v20 = vld [vmem:[%s11018_s10 + $0x3c8] sm:$0xff] }
  0xb4   : > { %8937 = vmatmul.mubr.msk.f32.gmra.mxu0 %vm382_vm0, %v331_v21 }
  0xb5   : > { %8939 = vmatprep.mubr.msk.f32.mxu0 %vm382_vm0, %v332_v22  ;;  %v372_v22 = vld [vmem:[%s11018_s10 + $0x3d0] sm:$0xff] }
  0xb8   : > { %8940 = vmatmul.mubr.msk.f32.gmra.mxu0 %vm382_vm0, %v333_v23 }
  0xb9   : > { %8942 = vmatprep.mubr.msk.f32.mxu0 %vm382_vm0, %v334_v24  ;;  %v373_v24 = vld [vmem:[%s11018_s10 + $0x3d8] sm:$0xff] }
  0xbc   : > { %8943 = vmatmul.mubr.msk.f32.gmra.mxu0 %vm382_vm0, %v335_v25 }
  0xbd   : > { %8945 = vmatprep.mubr.msk.f32.mxu0 %vm382_vm0, %v336_v26  ;;  %v374_v26 = vld [vmem:[%s11018_s10 + $0x3e0] sm:$0xff] }
  0xc0   : > { %8946 = vmatmul.mubr.msk.f32.gmra.mxu0 %vm382_vm0, %v337_v27 }
  0xc1   : > { %8948 = vmatprep.mubr.msk.f32.mxu0 %vm382_vm0, %v338_v28  ;;  %v375_v28 = vld [vmem:[%s11018_s10 + $0x3e8] sm:$0xff] }
  0xc4   : > { %8949 = vmatmul.mubr.msk.f32.gmra.mxu0 %vm382_vm0, %v339_v29 }
  0xc5   : > { %8951 = vmatprep.mubr.msk.f32.mxu0 %vm382_vm0, %v340_v30  ;;  %v376_v30 = vld [vmem:[%s11018_s10 + $0x3f0] sm:$0xff] }
  0xc8   : > { %8952 = vmatmul.mubr.msk.f32.gmra.mxu0 %vm382_vm0, %v341_v31 }
  0xc9   : > { %8954 = vmatprep.mubr.msk.f32.mxu0 %vm382_vm0, %v342_v32  ;;  %v377_v32 = vld [vmem:[%s11018_s10 + $0x3f8] sm:$0xff] }
  0xcc   : > { %8955 = vmatmul.mubr.msk.f32.gmra.mxu0 %vm382_vm0, %v343_v33 }
  0xcd   : > { %8957 = vmatprep.mubr.msk.f32.mxu0 %vm382_vm0, %v344_v34 }
  0xd0   : > { %8958 = vmatmul.mubr.msk.f32.gmra.mxu0 %vm382_vm0, %v345_v35 }
  0xd1   : > { %8960 = vmatprep.mubr.msk.f32.mxu0 %vm382_vm0, %v346_v36 }
  0xd4   : > { %v11216_v39 = vpop.f32.mrf.mxu0  ;;  %8961 = vmatmul.mubr.msk.f32.gmra.mxu0 %vm382_vm0, %v347_v37 }
  0xd5   : > { %8963 = vmatprep.mubr.msk.f32.mxu0 %vm382_vm0, %v348_v38 }
  0xd6   : > { %v11221_v41 = vpop.f32.mrf.mxu0 }
  0xd8   : > { %v11224_v43 = vpop.f32.mrf.mxu0  ;;  %8964 = vmatmul.mubr.msk.f32.gmra.mxu0 %vm382_vm0, %v349_v40 }
  0xd9   : > { %8966 = vmatprep.mubr.msk.f32.mxu0 %vm382_vm0, %v350_v42 }
  0xda   : > { %v11229_v45 = vpop.f32.mrf.mxu0 }
  0xdc   : > { %v11232_v47 = vpop.f32.mrf.mxu0  ;;  %8967 = vmatmul.mubr.msk.f32.gmra.mxu0 %vm382_vm0, %v351_v44 }
  0xdd   : > { %8969 = vmatprep.mubr.msk.f32.mxu0 %vm382_vm0, %v352_v46 }
  0xde   : > { %v11237_v49 = vpop.f32.mrf.mxu0 }
  0xe0   : > { %v11240_v51 = vpop.f32.mrf.mxu0  ;;  %8970 = vmatmul.mubr.msk.f32.gmra.mxu0 %vm382_vm0, %v353_v48 }
  0xe1   : > { %8972 = vmatprep.mubr.msk.f32.mxu0 %vm382_vm0, %v354_v50 }
  0xe2   : > { %v11245_v53 = vpop.f32.mrf.mxu0 }
  0xe4   : > { %v11248_v55 = vpop.f32.mrf.mxu0  ;;  %8973 = vmatmul.mubr.msk.f32.gmra.mxu0 %vm382_vm0, %v355_v52 }
  0xe5   : > { %8975 = vmatprep.mubr.msk.f32.mxu0 %vm382_vm0, %v356_v54 }
  0xe6   : > { %v11253_v57 = vpop.f32.mrf.mxu0 }
  0xe8   : > { %v11256_v59 = vpop.f32.mrf.mxu0  ;;  %8976 = vmatmul.mubr.msk.f32.gmra.mxu0 %vm382_vm0, %v357_v56 }
  0xe9   : > { %8978 = vmatprep.mubr.msk.f32.mxu0 %vm382_vm0, %v358_v58 }
  0xea   : > { %v11261_v61 = vpop.f32.mrf.mxu0 }
  0xec   : > { %v11264_v63 = vpop.f32.mrf.mxu0  ;;  %8979 = vmatmul.mubr.msk.f32.gmra.mxu0 %vm382_vm0, %v359_v60 }
  0xed   : > { %8981 = vmatprep.mubr.msk.f32.mxu0 %vm382_vm0, %v360_v62 }
  0xee   : > { %v11269_v1 = vpop.f32.mrf.mxu0 }
  0xf0   : > { %v11272_v3 = vpop.f32.mrf.mxu0  ;;  %8982 = vmatmul.mubr.msk.f32.gmra.mxu0 %vm382_vm0, %v361_v0 }
  0xf1   : > { %8984 = vmatprep.mubr.msk.f32.mxu0 %vm382_vm0, %v362_v2 }
  0xf2   : > { %v11277_v5 = vpop.f32.mrf.mxu0 }
  0xf4   : > { %v11280_v7 = vpop.f32.mrf.mxu0  ;;  %8985 = vmatmul.mubr.msk.f32.gmra.mxu0 %vm382_vm0, %v363_v4 }
  0xf5   : > { %16205 = vst [vmem:[#allocation4_spill] sm:$0xff] %v11280_v7  ;;  %8987 = vmatprep.mubr.msk.f32.mxu0 %vm382_vm0, %v364_v6 }
  0xf6   : > { %v11285_v9 = vpop.f32.mrf.mxu0 }
  0xf7   : > { %16206 = vst [vmem:[#allocation5_spill] sm:$0xff] %v11285_v9 }
  0xf8   : > { %v11288_v11 = vpop.f32.mrf.mxu0  ;;  %8988 = vmatmul.mubr.msk.f32.gmra.mxu0 %vm382_vm0, %v365_v8 }
  0xf9   : > { %16207 = vst [vmem:[#allocation6_spill] sm:$0xff] %v11288_v11  ;;  %8990 = vmatprep.mubr.msk.f32.mxu0 %vm382_vm0, %v366_v10 }
  0xfa   : > { %v11293_v13 = vpop.f32.mrf.mxu0 }
  0xfb   : > { %16208 = vst [vmem:[#allocation7_spill] sm:$0xff] %v11293_v13 }
  0xfc   : > { %v11296_v15 = vpop.f32.mrf.mxu0  ;;  %8991 = vmatmul.mubr.msk.f32.gmra.mxu0 %vm382_vm0, %v367_v12 }
  0xfd   : > { %16209 = vst [vmem:[#allocation8_spill] sm:$0xff] %v11296_v15  ;;  %8993 = vmatprep.mubr.msk.f32.mxu0 %vm382_vm0, %v368_v14 }
  0xfe   : > { %v11301_v17 = vpop.f32.mrf.mxu0 }
  0xff   : > { %16210 = vst [vmem:[#allocation9_spill] sm:$0xff] %v11301_v17 }
 0x100   : > { %v11304_v19 = vpop.f32.mrf.mxu0  ;;  %8994 = vmatmul.mubr.msk.f32.gmra.mxu0 %vm382_vm0, %v369_v16 }
 0x101   : > { %16211 = vst [vmem:[#allocation10_spill] sm:$0xff] %v11304_v19  ;;  %8996 = vmatprep.mubr.msk.f32.mxu0 %vm382_vm0, %v370_v18 }
 0x102   : > { %v11309_v21 = vpop.f32.mrf.mxu0 }
 0x103   : > { %16212 = vst [vmem:[#allocation11_spill] sm:$0xff] %v11309_v21 }
 0x104   : > { %v11312_v23 = vpop.f32.mrf.mxu0  ;;  %8997 = vmatmul.mubr.msk.f32.gmra.mxu0 %vm382_vm0, %v371_v20 }
 0x105   : > { %16213 = vst [vmem:[#allocation12_spill] sm:$0xff] %v11312_v23  ;;  %8999 = vmatprep.mubr.msk.f32.mxu0 %vm382_vm0, %v372_v22 }
 0x106   : > { %v11317_v25 = vpop.f32.mrf.mxu0 }
 0x107   : > { %16214 = vst [vmem:[#allocation13_spill] sm:$0xff] %v11317_v25 }
 0x108   : > { %v11320_v27 = vpop.f32.mrf.mxu0  ;;  %9000 = vmatmul.mubr.msk.f32.gmra.mxu0 %vm382_vm0, %v373_v24 }
 0x109   : > { %16215 = vst [vmem:[#allocation14_spill] sm:$0xff] %v11320_v27  ;;  %9002 = vmatprep.mubr.msk.f32.mxu0 %vm382_vm0, %v374_v26 }
 0x10a   : > { %v11325_v29 = vpop.f32.mrf.mxu0 }
 0x10b   : > { %16216 = vst [vmem:[#allocation15_spill] sm:$0xff] %v11325_v29 }
 0x10c   : > { %v11328_v31 = vpop.f32.mrf.mxu0  ;;  %9003 = vmatmul.mubr.msk.f32.gmra.mxu0 %vm382_vm0, %v375_v28 }
 0x10d   : > { %16217 = vst [vmem:[#allocation16_spill] sm:$0xff] %v11328_v31  ;;  %9005 = vmatprep.mubr.msk.f32.mxu0 %vm382_vm0, %v376_v30 }
 0x10e   : > { %v11333_v33 = vpop.f32.mrf.mxu0 }
 0x10f   : > { %16218 = vst [vmem:[#allocation17_spill] sm:$0xff] %v11333_v33 }
 0x110   : > { %v11335_v34 = vpop.f32.mrf.mxu0  ;;  %9006 = vmatmul.mubr.msk.f32.gmra.mxu0 %vm382_vm0, %v377_v32 }
 0x111   : > { %16219 = vst [vmem:[#allocation18_spill] sm:$0xff] %v11335_v34 }
 0x112   : > { %v11338_v35 = vpop.f32.mrf.mxu0 }
 0x113   : > { %16220 = vst [vmem:[#allocation19_spill] sm:$0xff] %v11338_v35 }
 0x114   : > { %v11340_v36 = vpop.f32.mrf.mxu0 }
 0x116   : > { %v11344_v38 = vpop.f32.mrf.mxu0 }
 0x118   : > { %v11346_v40 = vpop.f32.mrf.mxu0 }
 0x11a   : > { %v11350_v44 = vpop.f32.mrf.mxu0 }
 0x11c   : > { %v11352_v46 = vpop.f32.mrf.mxu0 }
 0x11e   : > { %v11356_v50 = vpop.f32.mrf.mxu0 }
 0x120   : > { %v11358_v52 = vpop.f32.mrf.mxu0 }
 0x122   : > { %v11362_v56 = vpop.f32.mrf.mxu0 }
 0x124   : > { %v11364_v58 = vpop.f32.mrf.mxu0 }
 0x126   : > { %v11368_v62 = vpop.f32.mrf.mxu0 }
 0x128   : > { %v11370_v0 = vpop.f32.mrf.mxu0 }
 0x12a   : > { %v11374_v4 = vpop.f32.mrf.mxu0 }
 0x12c   : > { %v11376_v6 = vpop.f32.mrf.mxu0 }
 0x12e   : > { %v11380_v10 = vpop.f32.mrf.mxu0 }
 0x130   : > { %v11382_v12 = vpop.f32.mrf.mxu0 }
 0x132   : > { %v11386_v16 = vpop.f32.mrf.mxu0 }
 0x134   : > { %v11388_v18 = vpop.f32.mrf.mxu0 }
 0x135   : > { %16221 = vst [vmem:[#allocation20_spill] sm:$0xff] %v11388_v18 }
 0x136   : > { %v11392_v22 = vpop.f32.mrf.mxu0 }
 0x137   : > { %16222 = vst [vmem:[#allocation21_spill] sm:$0xff] %v11392_v22 }
 0x138   : > { %v11394_v24 = vpop.f32.mrf.mxu0 }
 0x139   : > { %16223 = vst [vmem:[#allocation22_spill] sm:$0xff] %v11394_v24 }
 0x13a   : > { %v11398_v28 = vpop.f32.mrf.mxu0 }
 0x13b   : > { %16224 = vst [vmem:[#allocation23_spill] sm:$0xff] %v11398_v28 }
 0x13c   : > { %v11400_v30 = vpop.f32.mrf.mxu0 }
 0x13d   : > { %16225 = vst [vmem:[#allocation24_spill] sm:$0xff] %v11400_v30 }
 0x13e   : > { %v11404_v14 = vpop.f32.mrf.mxu0 }
 0x13f   : > { %16226 = vst [vmem:[#allocation25_spill] sm:$0xff] %v11404_v14 }
 0x140   : > { %v11406_v8 = vpop.f32.mrf.mxu0 }
 0x141   : > { %16227 = vst [vmem:[#allocation26_spill] sm:$0xff] %v11406_v8 }
 0x142   : > { %v11410_v2 = vpop.f32.mrf.mxu0 }
 0x143   : > { %16228 = vst [vmem:[#allocation27_spill] sm:$0xff] %v11410_v2 }
 0x144   : > { %v11412_v60 = vpop.f32.mrf.mxu0 }
 0x145   : > { %16229 = vst [vmem:[#allocation28_spill] sm:$0xff] %v11412_v60 }
 0x146   : > { %v11416_v54 = vpop.f32.mrf.mxu0 }
 0x147   : > { %16230 = vst [vmem:[#allocation29_spill] sm:$0xff] %v11416_v54 }
 0x148   : > { %v11418_v48 = vpop.f32.mrf.mxu0 }
 0x149   : > { %16231 = vst [vmem:[#allocation30_spill] sm:$0xff] %v11418_v48 }
 0x14a   : > { %v11422_v42 = vpop.f32.mrf.mxu0 }
 0x14b   : > { %16232 = vst [vmem:[#allocation31_spill] sm:$0xff] %v11422_v42 }
 0x14c   : > { %v11424_v37 = vpop.f32.mrf.mxu0 }
 0x14d   : > { %16233 = vst [vmem:[#allocation32_spill] sm:$0xff] %v11424_v37 }
 0x14e   : > { %v11428_v29 = vpop.f32.mrf.mxu0 }
 0x14f   : > { %16234 = vst [vmem:[#allocation33_spill] sm:$0xff] %v11428_v29 }
 0x150   : > { %v11430_v35 = vpop.f32.mrf.mxu0 }
 0x151   : > { %16235 = vst [vmem:[#allocation34_spill] sm:$0xff] %v11430_v35 }
 0x152   : > { %v11434_v33 = vpop.f32.mrf.mxu0 }
 0x153   : > { %16236 = vst [vmem:[#allocation35_spill] sm:$0xff] %v11434_v33 }
 0x154   : > { %v8914_v60 = vpop.f32.mrf.mxu0 }
 0x156   : > { %v1153_v23 = vpop.f32.mrf.mxu0 }
 0x158   : > { %v8917_v25 = vpop.f32.mrf.mxu0 }
 0x15a   : > { %v1163_v32 = vpop.f32.mrf.mxu0 }
 0x15c   : > { %v8920_v48 = vpop.f32.mrf.mxu0 }
 0x15e   : > { %v11436_v42 = vpop.f32.mrf.mxu0 }
 0x160   : > { %v11438_v27 = vpop.f32.mrf.mxu0 }
 0x162   : > { %v11440_v54 = vpop.f32.mrf.mxu0 }
 0x164   : > { %v11442_v20 = vpop.f32.mrf.mxu0 }
 0x166   : > { %v11444_v37 = vpop.f32.mrf.mxu0 }
 0x168   : > { %v11446_v31 = vpop.f32.mrf.mxu0 }
 0x16a   : > { %v11448_v26 = vpop.f32.mrf.mxu0 }
 0x16c   : > { %v11450_v35 = vpop.f32.mrf.mxu0 }
 0x16e   : > { %v11452_v34 = vpop.f32.mrf.mxu0 }
 0x170   : > { %v11454_v33 = vpop.f32.mrf.mxu0 }
 0x172   : > { %v11456_v29 = vpop.f32.mrf.mxu0 }
 0x174   : > { %v11458_v8 = vpop.f32.mrf.mxu0 }
 0x176   : > { %v11460_v19 = vpop.f32.mrf.mxu0 }
 0x177   : > { %16237 = vst [vmem:[#allocation36_spill] sm:$0xff] %v11460_v19 }
 0x178   : > { %v11462_v30 = vpop.f32.mrf.mxu0 }
 0x179   : > { %16238 = vst [vmem:[#allocation37_spill] sm:$0xff] %v11462_v30 }
 0x17a   : > { %v11464_v15 = vpop.f32.mrf.mxu0 }
 0x17b   : > { %16239 = vst [vmem:[#allocation38_spill] sm:$0xff] %v11464_v15 }
 0x17c   : > { %v11466_v21 = vpop.f32.mrf.mxu0 }
 0x17d   : > { %16240 = vst [vmem:[#allocation39_spill] sm:$0xff] %v11466_v21 }
 0x17e   : > { %v11468_v2 = vpop.f32.mrf.mxu0 }
 0x17f   : > { %16241 = vst [vmem:[#allocation40_spill] sm:$0xff] %v11468_v2 }
 0x180   : > { %v11470_v17 = vpop.f32.mrf.mxu0 }
 0x181   : > { %16242 = vst [vmem:[#allocation41_spill] sm:$0xff] %v11470_v17 }
 0x182   : > { %v11472_v14 = vpop.f32.mrf.mxu0 }
 0x183   : > { %16243 = vst [vmem:[#allocation42_spill] sm:$0xff] %v11472_v14  ;;  %v1669_v14 = vlaneseq }
 0x184   : > { %v11474_v24 = vpop.f32.mrf.mxu0 }
 0x185   : > { %16244 = vst [vmem:[#allocation43_spill] sm:$0xff] %v11474_v24  ;;  %v11493_v24 = vld [vmem:[%s16017_s5] ss:$0 sm:$0xff] }
 0x186   : > { %v11476_v11 = vpop.f32.mrf.mxu0 }
 0x187   : > { %16245 = vst [vmem:[#allocation44_spill] sm:$0xff] %v11476_v11 }
 0x188   : > { %v11478_v13 = vpop.f32.mrf.mxu0 }
 0x189   : > { %16246 = vst [vmem:[#allocation45_spill] sm:$0xff] %v11478_v13  ;;  %v1472_v13 = vmax.f32 %v11221_v41, %v11344_v38  ;;  %v16253_v41 = vmax.f32 %v11224_v43, %v11346_v40  ;;  %v16257_v43 = vmax.f32 %v11232_v47, %v11352_v46 }
 0x18a   : > { %v11480_v28 = vpop.f32.mrf.mxu0 }
 0x18b   : > { %16247 = vst [vmem:[#allocation46_spill] sm:$0xff] %v11480_v28  ;;  %v16252_v28 = vmax.f32 %v11216_v39, %v11340_v36  ;;  %v11507_v39 = vshrl.u32 %v1669_v14, 7 }
 0x18c   : > { %v11482_v19 = vpop.f32.mrf.mxu0 }
 0x18d   : > { %16248 = vst [vmem:[#allocation47_spill] sm:$0xff] %v11482_v19  ;;  %16254 = vst [vmem:[#allocation51_spill] sm:$0xff] %v11507_v39  ;;  %vm1671_vm1 = vcmp.lt.s32.totalorder %v11507_v39, 7  ;;  %vm1736_vm2 = vcmp.lt.s32.totalorder %v11507_v39, 6 }
 0x18e   : > { %v11484_v30 = vpop.f32.mrf.mxu0 }
 0x18f   : > { %16249 = vst [vmem:[#allocation48_spill] sm:$0xff] %v11484_v30 }
 0x190   : > { %v11486_v15 = vpop.f32.mrf.mxu0 }
 0x191   : > { %16250 = vst [vmem:[#allocation49_spill] sm:$0xff] %v11486_v15 }
 0x192   : > { %v11488_v21 = vpop.f32.mrf.mxu0 }
 0x193   : > { %16251 = vst [vmem:[#allocation50_spill] sm:$0xff] %v11488_v21 }
 0x194   : > { %v8962_v2 = vpop.f32.mrf.mxu0 }
 0x195   : > { %v1505_v17 = vmax.f32 %v8914_v60, %v8962_v2  ;;  %v1474_v2 = vmax.f32 %v11229_v45, %v11350_v44  ;;  %v1476_v45 = vmax.f32 %v11237_v49, %v11356_v50 }
 0x196   : > { %v1313_v11 = vpop.f32.mrf.mxu0 }
 0x197   : > { %v1537_v19 = vmax.f32 %v16252_v28, %v1505_v17  ;;  %v1504_v30 = vmax.f32 %v1153_v23, %v1313_v11 }
 0x198   : > { %v8965_v15 = vpop.f32.mrf.mxu0 }
 0x199   : > { %v1574_v21 = vadd.f32 %v11493_v24, %v1537_v19  ;;  %v1536_v18 = vmax.f32 %v1472_v13, %v1504_v30  ;;  %v1507_v60 = vmax.f32 %v8917_v25, %v8965_v15 }
 0x19a   : > { %v1323_v7 = vpop.f32.mrf.mxu0 }
 0x19b   : > { %v1573_v9 = vadd.f32 %v11493_v24, %v1536_v18  ;;  %v1539_v38 = vmax.f32 %v16253_v41, %v1507_v60  ;;  %v1506_v22 = vmax.f32 %v1163_v32, %v1323_v7  ;;  %v11509_v11 = vmax.f32 %v1574_v21, 0.0 }
 0x19c   : > { %v8968_v17 = vpop.f32.mrf.mxu0  ;;  %v1480_v60 = vmax.f32 %v11253_v57, %v11368_v62 }
 0x19d   : > { %16255 = vst [vmem:[#allocation52_spill] sm:$0xff] %v11509_v11  ;;  %v11511_v23 = vmax.f32 %v1573_v9, 0.0  ;;  %v1538_v13 = vmax.f32 %v1474_v2, %v1506_v22  ;;  %v1509_v15 = vmax.f32 %v8920_v48, %v8968_v17  ;;  %v1576_v19 = vadd.f32 %v11493_v24, %v1539_v38 }
 0x19e   : > { %v1333_v25 = vpop.f32.mrf.mxu0  ;;  %v1638_v44 = vrot.slane %v11509_v11, 1  ;;  %v1478_v22 = vmax.f32 %v11245_v53, %v11362_v56  ;;  %v1705_v53 = vrot.slane %v11509_v11, 2 }
 0x19f   : > { %16256 = vst [vmem:[#allocation53_spill] sm:$0xff] %v11511_v23  ;;  %v1575_v36 = vadd.f32 %v11493_v24, %v1538_v13  ;;  %v1541_v7 = vmax.f32 %v16257_v43, %v1509_v15  ;;  %v1508_v21 = vmax.f32 %v11436_v42, %v1333_v25  ;;  %v16042_v40 = vrot.slane %v11511_v23, 1 }
 0x1a0   : > { %v8971_v9 = vpop.f32.mrf.mxu0  ;;  %v11528_v18 = vmax.f32 %v1576_v19, 0.0  ;;  %v16041_v46 = vrot.slane %v11511_v23, 2 }
 0x1a1   : > { %v11524_v48 = vmax.f32 %v1575_v36, 0.0  ;;  %v1578_v49 = vadd.f32 %v11493_v24, %v1541_v7  ;;  %v1540_v50 = vmax.f32 %v1476_v45, %v1508_v21  ;;  %v1511_v14 = vmax.f32 %v11438_v27, %v8971_v9 }
 0x1a2   : > { %v11534_v47 = vsel %vm1671_vm1, %v16042_v40, %v1638_v44  ;;  %v1343_v42 = vpop.f32.mrf.mxu0  ;;  %v16259_v27 = vmax.f32 %v11240_v51, %v11358_v52  ;;  %v16035_v15 = vrot.slane %v11528_v18, 2  ;;  %v1640_v43 = vrot.slane %v11528_v18, 1 }
 0x1a3   : > { %16258 = vst [vmem:[#allocation54_spill] sm:$0xff] %v11524_v48  ;;  %v1577_v28 = vadd.f32 %v11493_v24, %v1540_v50  ;;  %1793 = vrot.lane.b32.xlu0 %v11534_v47, %s10951_s13  ;;  %v1510_v32 = vmax.f32 %v11440_v54, %v1343_v42  ;;  %v11549_v2 = vmax.f32 %v1578_v49, 0.0  ;;  %v1706_v56 = vrot.slane %v11524_v48, 2 }
 0x1a4   : > { %v1543_v30 = vmax.f32 %v16259_v27, %v1511_v14  ;;  %v8974_v41 = vpop.f32.mrf.mxu0  ;;  %v11561_v54 = vsel %vm1736_vm2, %v16041_v46, %v1705_v53  ;;  %v1639_v13 = vrot.slane %v11524_v48, 1  ;;  %v1482_v49 = vmax.f32 %v11261_v61, %v11374_v4 }
 0x1a5   : > { %16260 = vst [vmem:[#allocation55_spill] sm:$0xff] %v11549_v2  ;;  %v11553_v38 = vmax.f32 %v1577_v28, 0.0  ;;  %v1542_v52 = vmax.f32 %v1478_v22, %v1510_v32  ;;  %v1513_v17 = vmax.f32 %v11442_v20, %v8974_v41  ;;  %16262 = vst [vmem:[#allocation57_spill] sm:$0xff] %v11561_v54  ;;  %v11565_v57 = vsel %vm1736_vm2, %v1705_v53, %v1706_v56 }
 0x1a6   : > { %v1580_v51 = vadd.f32 %v11493_v24, %v1543_v30  ;;  %16263 = vst [vmem:[#allocation58_spill] sm:$0xff] %v11565_v57  ;;  %v1353_v62 = vpop.f32.mrf.mxu0  ;;  %v16264_v20 = vmax.f32 %v11248_v55, %v11364_v58  ;;  %1843 = vrot.lane.b32.xlu1 %v11565_v57, %s10952_s14  ;;  %v16040_v21 = vrot.slane %v11549_v2, 1  ;;  %v11587_v55 = vsel %vm1736_vm2, %v1706_v56, %v16035_v15  ;;  %v16310_v15 = vld [vmem:[#allocation13_spill] sm:$0xff]  ;;  %v16326_v57 = vld [vmem:[#allocation32_spill] sm:$0xff] }
 0x1a7   : > { %16261 = vst [vmem:[#allocation56_spill] sm:$0xff] %v11553_v38  ;;  %v11570_v45 = vadd.f32 %v11493_v24, %v1542_v52  ;;  %1841 = vrot.lane.b32.xlu0 %v11561_v54, %s10952_s14  ;;  %v1512_v25 = vmax.f32 %v11444_v37, %v1353_v62  ;;  %v1641_v7 = vrot.slane %v11553_v38, 1  ;;  %v11594_v37 = vsel %vm1671_vm1, %v1638_v44, %v1639_v13  ;;  %v16330_v54 = vld [vmem:[#allocation35_spill] sm:$0xff] }
 0x1a8   : > { %v1545_v19 = vmax.f32 %v16264_v20, %v1513_v17  ;;  %v8977_v36 = vpop.f32.mrf.mxu0  ;;  %v16266_v61 = vmax.f32 %v11256_v59, %v11370_v0  ;;  %v11615_v22 = vmax.f32 %v1580_v51, 0.0  ;;  %v1484_v0 = vmax.f32 %v11269_v1, %v11380_v10 }
 0x1a9   : > { %v1544_v58 = vmax.f32 %v1480_v60, %v1512_v25  ;;  %v1515_v9 = vmax.f32 %v11446_v31, %v8977_v36  ;;  %v11598_v50 = vsel %vm1671_vm1, %v1640_v43, %v1641_v7  ;;  %v11604_v42 = vsel %vm1671_vm1, %v1641_v7, %v16040_v21 }
 0x1aa   : > { %16265 = vst [vmem:[#allocation59_spill] sm:$0xff] %v11598_v50  ;;  %v1363_v14 = vpop.f32.mrf.mxu0  ;;  %1799 = vrot.lane.b32.xlu1 %v11598_v50, %s10951_s13  ;;  %16267 = vst [vmem:[#allocation60_spill] sm:$0xff] %v11615_v22  ;;  %v1582_v28 = vadd.f32 %v11493_v24, %v1545_v19  ;;  %v11626_v41 = vsel %vm1671_vm1, %v1639_v13, %v1640_v43  ;;  %v16270_v51 = vmax.f32 %v11264_v63, %v11376_v6  ;;  %v16324_v50 = vld [vmem:[#allocation17_spill] sm:$0xff] }
 0x1ab   : > { %v1581_v31 = vadd.f32 %v11493_v24, %v1544_v58  ;;  %v1547_v4 = vmax.f32 %v16266_v61, %v1515_v9  ;;  %1795 = vrot.lane.b32.xlu0 %v11594_v37, %s10951_s13  ;;  %v1514_v44 = vmax.f32 %v11448_v26, %v1363_v14  ;;  %16268 = vst [vmem:[#allocation61_spill] sm:$0xff] %v11626_v41  ;;  %v16038_v62 = vrot.slane %v11615_v22, 1  ;;  %v16275_v61 = vld [vmem:[#allocation21_spill] sm:$0xff] }
 0x1ac   : > { %v8980_v27 = vpop.f32.mrf.mxu0  ;;  %v11637_v17 = vmax.f32 %v1582_v28, 0.0  ;;  %v1486_v25 = vmax.f32 %v11277_v5, %v11386_v16 }
 0x1ad   : > { %v11618_v30 = vmax.f32 %v1581_v31, 0.0  ;;  %v1584_v32 = vadd.f32 %v11493_v24, %v1547_v4  ;;  %v1546_v60 = vmax.f32 %v1482_v49, %v1514_v44  ;;  %v1517_v59 = vmax.f32 %v11450_v35, %v8980_v27  ;;  %v16277_v27 = vld [vmem:[#allocation4_spill] sm:$0xff] }
 0x1ae   : > { %v1373_v26 = vpop.f32.mrf.mxu0  ;;  %16271 = vst [vmem:[#allocation63_spill] sm:$0xff] %v11637_v17  ;;  %v1646_v9 = vrot.slane %v11637_v17, 1 }
 0x1af   : > { %v11628_v53 = vmax.f32 %v1584_v32, 0.0  ;;  %v1583_v56 = vadd.f32 %v11493_v24, %v1546_v60  ;;  %v1549_v52 = vmax.f32 %v16270_v51, %v1517_v59  ;;  %1797 = vrot.lane.b32.xlu0 %v11626_v41, %s10951_s13  ;;  %v1516_v35 = vmax.f32 %v11452_v34, %v1373_v26  ;;  %v16278_v32 = vld [vmem:[#allocation20_spill] sm:$0xff] }
 0x1b0   : > { %v8983_v1 = vpop.f32.mrf.mxu0  ;;  %v1645_v10 = vrot.slane %v11618_v30, 1  ;;  %v16280_v59 = vld [vmem:[#allocation36_spill] sm:$0xff] }
 0x1b1   : > { %16269 = vst [vmem:[#allocation62_spill] sm:$0xff] %v11628_v53  ;;  %v11641_v13 = vmax.f32 %v1583_v56, 0.0  ;;  %v11644_v20 = vadd.f32 %v11493_v24, %v1549_v52  ;;  %v1548_v19 = vmax.f32 %v1484_v0, %v1516_v35  ;;  %v1519_v63 = vmax.f32 %v11454_v33, %v8983_v1  ;;  %1775 = vrot.lane.b32.xlu1 %v11628_v53, %s10953_s15  ;;  %v16281_v52 = vld [vmem:[#allocation37_spill] sm:$0xff] }
 0x1b2   : > { %v1383_v34 = vpop.f32.mrf.mxu0  ;;  %v11653_v6 = vsel %vm1671_vm1, %v16038_v62, %v1645_v10  ;;  %v16274_v33 = vmax.f32 %v11272_v3, %v11382_v12  ;;  %v16039_v14 = vrot.slane %v11628_v53, 1  ;;  %v16276_v3 = vld [vmem:[#allocation5_spill] sm:$0xff]  ;;  %v11698_v1 = vsel %vm1671_vm1, %v1645_v10, %v1646_v9 }
 0x1b3   : > { %16272 = vst [vmem:[#allocation64_spill] sm:$0xff] %v11641_v13  ;;  %16273 = vst [vmem:[#allocation65_spill] sm:$0xff] %v11653_v6  ;;  %v11658_v36 = vadd.f32 %v11493_v24, %v1548_v19  ;;  %1771 = vrot.lane.b32.xlu0 %v11637_v17, %s10953_s15  ;;  %v1518_v7 = vmax.f32 %v11456_v29, %v1383_v34  ;;  %v1647_v49 = vrot.slane %v11641_v13, 1  ;;  %v16283_v34 = vld [vmem:[#allocation7_spill] sm:$0xff] }
 0x1b4   : > { %v1551_v43 = vmax.f32 %v16274_v33, %v1519_v63  ;;  %v8986_v58 = vpop.f32.mrf.mxu0  ;;  %v1488_v12 = vmax.f32 %v16276_v3, %v16275_v61  ;;  %v16282_v63 = vld [vmem:[#allocation23_spill] sm:$0xff] }
 0x1b5   : > { %v1550_v16 = vmax.f32 %v1486_v25, %v1518_v7  ;;  %v1521_v31 = vmax.f32 %v11458_v8, %v8986_v58  ;;  %v11675_v4 = vsel %vm1671_vm1, %v1646_v9, %v1647_v49  ;;  %v11681_v44 = vsel %vm1671_vm1, %v1647_v49, %v16039_v14  ;;  %v16285_v7 = vld [vmem:[#allocation22_spill] sm:$0xff] }
 0x1b6   : > { %v1588_v5 = vadd.f32 %v11493_v24, %v1551_v43  ;;  %v1393_v29 = vpop.f32.mrf.mxu0  ;;  %v16279_v8 = vmax.f32 %v16277_v27, %v16278_v32  ;;  %1819 = vrot.lane.b32.xlu1 %v11675_v4, %s10954_s16  ;;  %v1490_v25 = vmax.f32 %v16283_v34, %v16282_v63  ;;  %v16284_v43 = vld [vmem:[#allocation6_spill] sm:$0xff]  ;;  %v16289_v32 = vld [vmem:[#allocation25_spill] sm:$0xff]  ;;  %v16296_v63 = vld [vmem:[#allocation24_spill] sm:$0xff] }
 0x1b7   : > { %v11684_v28 = vadd.f32 %v11493_v24, %v1550_v16  ;;  %1769 = vrot.lane.b32.xlu0 %v11618_v30, %s10953_s15  ;;  %v1520_v0 = vmax.f32 %v16280_v59, %v1393_v29  ;;  %v16286_v58 = vmax.f32 %v16284_v43, %v16285_v7  ;;  %v16287_v16 = vld [vmem:[#allocation38_spill] sm:$0xff]  ;;  %v16288_v29 = vld [vmem:[#allocation39_spill] sm:$0xff] }
 0x1b8   : > { %v1553_v60 = vmax.f32 %v16279_v8, %v1521_v31  ;;  %v8989_v26 = vpop.f32.mrf.mxu0  ;;  %v16290_v8 = vld [vmem:[#allocation9_spill] sm:$0xff]  ;;  %v16291_v59 = vld [vmem:[#allocation27_spill] sm:$0xff] }
 0x1b9   : > { %v1552_v51 = vmax.f32 %v1488_v12, %v1520_v0  ;;  %v1523_v35 = vmax.f32 %v16281_v52, %v8989_v26  ;;  %v16292_v0 = vld [vmem:[#allocation11_spill] sm:$0xff] }
 0x1ba   : > { %v1590_v56 = vadd.f32 %v11493_v24, %v1553_v60  ;;  %v1403_v19 = vpop.f32.mrf.mxu0  ;;  %v1492_v60 = vmax.f32 %v16290_v8, %v16289_v32  ;;  %v1494_v26 = vmax.f32 %v16292_v0, %v16291_v59 }
 0x1bb   : > { %v1589_v33 = vadd.f32 %v11493_v24, %v1552_v51  ;;  %v1555_v49 = vmax.f32 %v16286_v58, %v1523_v35  ;;  %1817 = vrot.lane.b32.xlu0 %v11698_v1, %s10954_s16  ;;  %v1522_v31 = vmax.f32 %v16287_v16, %v1403_v19  ;;  %v11719_v51 = vmax.f32 %v1588_v5, 0.0  ;;  %v16295_v19 = vld [vmem:[#allocation8_spill] sm:$0xff] }
 0x1bc   : > { %v11709_v61 = vmax.f32 %v1590_v56, 0.0  ;;  %v8992_v3 = vpop.f32.mrf.mxu0  ;;  %v16297_v34 = vmax.f32 %v16295_v19, %v16296_v63  ;;  %v16301_v19 = vld [vmem:[#allocation26_spill] sm:$0xff] }
 0x1bd   : > { %v11711_v10 = vmax.f32 %v1589_v33, 0.0  ;;  %v1592_v9 = vadd.f32 %v11493_v24, %v1555_v49  ;;  %v1554_v12 = vmax.f32 %v1490_v25, %v1522_v31  ;;  %v1525_v27 = vmax.f32 %v16288_v29, %v8992_v3  ;;  %16293 = vst [vmem:[#allocation21_spill] sm:$0xff] %v11719_v51  ;;  %v16298_v25 = vld [vmem:[#allocation40_spill] sm:$0xff] }
 0x1be   : > { %v1413_v52 = vpop.f32.mrf.mxu0  ;;  %v1721_v5 = vrot.slane %v11709_v61, 2  ;;  %v1654_v16 = vrot.slane %v11709_v61, 1  ;;  %v16036_v59 = vrot.slane %v11719_v51, 1  ;;  %v16037_v0 = vrot.slane %v11719_v51, 2 }
 0x1bf   : > { %v11721_v35 = vmax.f32 %v1592_v9, 0.0  ;;  %v1591_v56 = vadd.f32 %v11493_v24, %v1554_v12  ;;  %v1557_v33 = vmax.f32 %v16297_v34, %v1525_v27  ;;  %1773 = vrot.lane.b32.xlu0 %v11641_v13, %s10953_s15  ;;  %v1524_v43 = vmax.f32 %v16298_v25, %v1413_v52  ;;  %v16299_v12 = vld [vmem:[#allocation41_spill] sm:$0xff]  ;;  %v16303_v34 = vld [vmem:[#allocation42_spill] sm:$0xff] }
 0x1c0   : > { %v8995_v7 = vpop.f32.mrf.mxu0  ;;  %v1720_v58 = vrot.slane %v11711_v10, 2  ;;  %v1653_v49 = vrot.slane %v11711_v10, 1 }
 0x1c1   : > { %16294 = vst [vmem:[#allocation5_spill] sm:$0xff] %v11721_v35  ;;  %v11734_v31 = vmax.f32 %v1591_v56, 0.0  ;;  %v1594_v3 = vadd.f32 %v11493_v24, %v1557_v33  ;;  %v1556_v9 = vmax.f32 %v1492_v60, %v1524_v43  ;;  %v1527_v29 = vmax.f32 %v16299_v12, %v8995_v7  ;;  %v16300_v56 = vld [vmem:[#allocation10_spill] sm:$0xff] }
 0x1c2   : > { %v11740_v27 = vsel %vm1736_vm2, %v1720_v58, %v1721_v5  ;;  %v11744_v32 = vsel %vm1671_vm1, %v1653_v49, %v1654_v16  ;;  %v1423_v8 = vpop.f32.mrf.mxu0  ;;  %v16302_v60 = vmax.f32 %v16300_v56, %v16301_v19  ;;  %v16043_v25 = vrot.slane %v11721_v35, 1 }
 0x1c3   : > { %v1593_v52 = vadd.f32 %v11493_v24, %v1556_v9  ;;  %2054 = vrot.lane.b32.xlu0 %v11740_v27, %s10952_s14  ;;  %2006 = vrot.lane.b32.xlu1 %v11744_v32, %s10951_s13  ;;  %v1526_v33 = vmax.f32 %v16303_v34, %v1423_v8  ;;  %v11758_v43 = vmax.f32 %v1594_v3, 0.0  ;;  %v1655_v12 = vrot.slane %v11734_v31, 1  ;;  %v16308_v3 = vld [vmem:[#allocation43_spill] sm:$0xff]  ;;  %v16309_v34 = vld [vmem:[#allocation29_spill] sm:$0xff] }
 0x1c4   : > { %v1559_v63 = vmax.f32 %v16302_v60, %v1527_v29  ;;  %v8998_v7 = vpop.f32.mrf.mxu0  ;;  %v11765_v9 = vsel %vm1671_vm1, %v16036_v59, %v1653_v49  ;;  %v11771_v29 = vsel %vm1736_vm2, %v16037_v0, %v1720_v58  ;;  %v11779_v60 = vld [vmem:[%s16014_s2 + $0xf8] sm:$0xff]  ;;  %v1496_v49 = vmax.f32 %v16310_v15, %v16309_v34  ;;  %v7283_v0 = vld [vmem:[%s16014_s2 + $0xf0] sm:$0xff] }
 0x1c5   : > { %16304 = vst [vmem:[#allocation4_spill] sm:$0xff] %v11758_v43  ;;  %16305 = vst [vmem:[#allocation20_spill] sm:$0xff] %v11765_v9  ;;  %v11773_v8 = vmax.f32 %v1593_v52, 0.0  ;;  %v1558_v56 = vmax.f32 %v1494_v26, %v1526_v33  ;;  %v1529_v19 = vmax.f32 %v16308_v3, %v8998_v7  ;;  %v11785_v59 = vsel %vm1671_vm1, %v1654_v16, %v1655_v12  ;;  %v16311_v7 = vld [vmem:[#allocation12_spill] sm:$0xff] }
 0x1c6   : > { %16306 = vst [vmem:[#allocation36_spill] sm:$0xff] %v11771_v29  ;;  %v11791_v58 = vsel %vm1671_vm1, %v1655_v12, %v16043_v25  ;;  %v1433_v26 = vpop.f32.mrf.mxu0  ;;  %v1722_v52 = vrot.slane %v11734_v31, 2  ;;  %9008 = vmatprep.subr.mxu1 %v11779_v60  ;;  %v16312_v3 = vld [vmem:[#allocation28_spill] sm:$0xff]  ;;  %v1723_v25 = vrot.slane %v11721_v35, 2 }
 0x1c7   : > { %16307 = vst [vmem:[#allocation37_spill] sm:$0xff] %v11773_v8  ;;  %v1595_v33 = vadd.f32 %v11493_v24, %v1558_v56  ;;  %v16313_v15 = vmax.f32 %v16311_v7, %v16312_v3  ;;  %2008 = vrot.lane.b32.xlu1 %v11785_v59, %s10951_s13  ;;  %2010 = vrot.lane.b32.xlu0 %v11791_v58, %s10951_s13  ;;  %v16314_v16 = vld [vmem:[#allocation44_spill] sm:$0xff]  ;;  %v1657_v14 = vrot.slane %v11773_v8, 1  ;;  %v1658_v56 = vrot.slane %v11758_v43, 1  ;;  %v16315_v3 = vld [vmem:[#allocation45_spill] sm:$0xff] }
 0x1c8   : > { %v1528_v12 = vmax.f32 %v16314_v16, %v1433_v26  ;;  %v9001_v62 = vpop.f32.mrf.mxu0  ;;  %9009 = vmatpush3.msra.mxu1 %v11779_v60  ;;  %v7282_v26 = vld [vmem:[%s16014_s2 + $0xe8] sm:$0xff]  ;;  %v11819_v21 = vsel %vm1736_vm2, %v1721_v5, %v1722_v52  ;;  %v7281_v5 = vld [vmem:[%s16014_s2 + $0xe0] sm:$0xff] }
 0x1c9   : > { %v1561_v34 = vmax.f32 %v16313_v15, %v1529_v19  ;;  %v1531_v15 = vmax.f32 %v16315_v3, %v9001_v62  ;;  %9010 = vmatprep.subr.mxu1 %v7283_v0  ;;  %v11815_v16 = vmax.f32 %v1595_v33, 0.0  ;;  %v11823_v46 = vsel %vm1671_vm1, %v1657_v14, %v1658_v56 }
 0x1ca   : > { %v1560_v7 = vmax.f32 %v1496_v49, %v1528_v12  ;;  %v11825_v40 = vpop.f32.mrf.mxu0  ;;  %9011 = vmatpush3.msra.mxu1 %v7283_v0  ;;  %v16319_v12 = vld [vmem:[#allocation30_spill] sm:$0xff]  ;;  %v1596_v0 = vadd.f32 %v11493_v24, %v1559_v63  ;;  %v7280_v63 = vld [vmem:[%s16014_s2 + $0xd8] sm:$0xff] }
 0x1cb   : > { %v1598_v19 = vadd.f32 %v11493_v24, %v1561_v34  ;;  %16316 = vst [vmem:[#allocation23_spill] sm:$0xff] %v11815_v16  ;;  %v16318_v34 = vld [vmem:[#allocation14_spill] sm:$0xff]  ;;  %2056 = vrot.lane.b32.xlu1 %v11819_v21, %s10952_s14  ;;  %2014 = vrot.lane.b32.xlu0 %v11823_v46, %s10951_s13  ;;  %v1659_v48 = vrot.slane %v11815_v16, 1 }
 0x1cc   : > { %v1597_v62 = vadd.f32 %v11493_v24, %v1560_v7  ;;  %v16320_v3 = vmax.f32 %v16318_v34, %v16319_v12  ;;  %9012 = vmatprep.subr.mxu1 %v7282_v26  ;;  %v16322_v34 = vld [vmem:[#allocation47_spill] sm:$0xff] }
 0x1cd   : > { %v11827_v49 = vmax.f32 %v1598_v19, 0.0  ;;  %v9004_v19 = vpop.f32.mrf.mxu0  ;;  %9013 = vmatpush3.msra.mxu1 %v7282_v26 }
 0x1ce   : > { %v1563_v33 = vmax.f32 %v16320_v3, %v1531_v15  ;;  %v11842_v7 = vmax.f32 %v1597_v62, 0.0  ;;  %v1533_v12 = vmax.f32 %v16322_v34, %v9004_v19  ;;  %v11850_v3 = vsel %vm1736_vm2, %v1722_v52, %v1723_v25  ;;  %9014 = vmatprep.subr.mxu1 %v7281_v5  ;;  %v16323_v62 = vld [vmem:[#allocation33_spill] sm:$0xff]  ;;  %v16328_v52 = vld [vmem:[#allocation48_spill] sm:$0xff] }
 0x1cf   : > { %16317 = vst [vmem:[#allocation7_spill] sm:$0xff] %v11827_v49  ;;  %v1453_v29 = vpop.f32.mrf.mxu0  ;;  %v1500_v11 = vmax.f32 %v16324_v50, %v16323_v62  ;;  %2058 = vrot.lane.b32.xlu1 %v11850_v3, %s10952_s14  ;;  %1984 = vrot.lane.b32.xlu0 %v11827_v49, %s10953_s15  ;;  %v11866_v34 = vmax.f32 %v1596_v0, 0.0  ;;  %v16331_v50 = vld [vmem:[#allocation19_spill] sm:$0xff]  ;;  %v16333_v0 = vrot.slane %v11721_v35, 1 }
 0x1d0   : > { %16321 = vst [vmem:[#allocation6_spill] sm:$0xff] %v11842_v7  ;;  %v11845_v15 = vadd.f32 %v11493_v24, %v1563_v33  ;;  %v16325_v33 = vld [vmem:[#allocation16_spill] sm:$0xff]  ;;  %v1532_v26 = vmax.f32 %v16328_v52, %v1453_v29  ;;  %9015 = vmatpush3.msra.mxu1 %v7281_v5  ;;  %v1502_v62 = vmax.f32 %v16331_v50, %v16330_v54  ;;  %v7279_v29 = vld [vmem:[%s16014_s2 + $0xd0] sm:$0xff] }
 0x1d1   : > { %v16327_v13 = vmax.f32 %v16325_v33, %v16326_v57  ;;  %16329 = vst [vmem:[#allocation22_spill] sm:$0xff] %v11866_v34  ;;  %v9007_v41 = vpop.f32.mrf.mxu0  ;;  %9016 = vmatprep.subr.mxu1 %v7280_v63  ;;  %v11882_v52 = vsel %vm1671_vm1, %v16333_v0, %v1657_v14  ;;  %v11886_v54 = vsel %vm1671_vm1, %v1658_v56, %v1659_v48  ;;  %v16335_v50 = vld [vmem:[#allocation34_spill] sm:$0xff]  ;;  %v7278_v0 = vld [vmem:[%s16014_s2 + $0xc8] sm:$0xff] }
 0x1d2   : > { %9017 = vmatpush3.msra.mxu1 %v7280_v63  ;;  %v16337_v14 = vld [vmem:[#allocation50_spill] sm:$0xff]  ;;  %v1660_v63 = vrot.slane %v11866_v34, 1 }
 0x1d3   : > { %v1565_v19 = vmax.f32 %v16327_v13, %v1533_v12  ;;  %v1564_v13 = vmax.f32 %v1500_v11, %v1532_v26  ;;  %v16332_v12 = vld [vmem:[#allocation49_spill] sm:$0xff]  ;;  %v1463_v5 = vpop.f32.mrf.mxu0  ;;  %v1724_v11 = vrot.slane %v11773_v8, 2  ;;  %v16334_v26 = vld [vmem:[#allocation18_spill] sm:$0xff]  ;;  %2012 = vrot.lane.b32.xlu1 %v11882_v52, %s10951_s13  ;;  %2016 = vrot.lane.b32.xlu0 %v11886_v54, %s10951_s13 }
 0x1d4   : > { %v1535_v33 = vmax.f32 %v16332_v12, %v9007_v41  ;;  %v16054_v41 = vrot.slane %v11827_v49, 2  ;;  %v16336_v12 = vmax.f32 %v16334_v26, %v16335_v50  ;;  %v1534_v56 = vmax.f32 %v16337_v14, %v1463_v5  ;;  %9018 = vmatprep.subr.mxu1 %v7279_v29  ;;  %v7277_v14 = vld [vmem:[%s16014_s2 + $0xc0] sm:$0xff] }
 0x1d5   : > { %v11872_v57 = vadd.f32 %v11493_v24, %v1565_v19  ;;  %v11891_v19 = vadd.f32 %v11493_v24, %v1564_v13  ;;  %v16338_v13 = vrot.slane %v11842_v7, 2  ;;  %9019 = vmatpush3.msra.mxu1 %v7279_v29  ;;  %v11916_v5 = vsel %vm1736_vm2, %v1723_v25, %v1724_v11  ;;  %v7276_v29 = vld [vmem:[%s16014_s2 + $0xb8] sm:$0xff] }
 0x1d6   : > { %v1567_v17 = vmax.f32 %v16336_v12, %v1535_v33  ;;  %v1566_v50 = vmax.f32 %v1502_v62, %v1534_v56  ;;  %v11920_v12 = vsel %vm1671_vm1, %v1659_v48, %v1660_v63  ;;  %9020 = vmatprep.subr.mxu1 %v7278_v0  ;;  %v16340_v48 = vld [vmem:[#allocation46_spill] sm:$0xff]  ;;  %v16343_v62 = vrot.slane %v11511_v23, 1 }
 0x1d7   : > { %v11911_v33 = vsel %vm1736_vm2, %v16338_v13, %v16054_v41  ;;  %2060 = vrot.lane.b32.xlu1 %v11916_v5, %s10952_s14  ;;  %2018 = vrot.lane.b32.xlu0 %v11920_v12, %s10951_s13  ;;  %v1530_v25 = vmax.f32 %v16340_v48, %v11825_v40  ;;  %v16342_v40 = vld [vmem:[#allocation15_spill] sm:$0xff] }
 0x1d8   : > { %v1604_v26 = vadd.f32 %v11493_v24, %v1567_v17  ;;  %v11928_v41 = vadd.f32 %v11493_v24, %v1566_v50  ;;  %v1725_v17 = vrot.slane %v11758_v43, 2  ;;  %9021 = vmatpush3.msra.mxu1 %v7278_v0  ;;  %v1661_v50 = vrot.slane %v11842_v7, 1  ;;  %v16341_v43 = vld [vmem:[#allocation31_spill] sm:$0xff] }
 0x1d9   : > { %9022 = vmatprep.subr.mxu1 %v7277_v14  ;;  %v1498_v48 = vmax.f32 %v16342_v40, %v16341_v43  ;;  %v1662_v43 = vrot.slane %v11827_v49, 1  ;;  %v16345_v40 = vrot.slane %v11511_v23, 2  ;;  %v7274_v23 = vld [vmem:[%s16014_s2 + $0xa8] sm:$0xff] }
 0x1da   : > { %v11925_v13 = vmax.f32 %v1604_v26, 0.0  ;;  %v11943_v56 = vsel %vm1736_vm2, %v1724_v11, %v1725_v17  ;;  %v1726_v26 = vrot.slane %v11815_v16, 2  ;;  %9023 = vmatpush3.msra.mxu1 %v7277_v14  ;;  %v7275_v14 = vld [vmem:[%s16014_s2 + $0xb0] sm:$0xff] }
 0x1db   : > { %2062 = vrot.lane.b32.xlu1 %v11943_v56, %s10952_s14  ;;  %1982 = vrot.lane.b32.xlu0 %v11842_v7, %s10953_s15  ;;  %v1562_v35 = vmax.f32 %v1498_v48, %v1530_v25  ;;  %v1727_v25 = vrot.slane %v11866_v34, 2 }
 0x1dc   : > { %16339 = vst [vmem:[#allocation38_spill] sm:$0xff] %v11925_v13  ;;  %v16060_v0 = vrot.slane %v11925_v13, 2  ;;  %v16344_v11 = vrot.slane %v11925_v13, 1  ;;  %9024 = vmatprep.subr.mxu1 %v7276_v29 }
 0x1dd   : > { %9025 = vmatpush3.msra.mxu1 %v7276_v29  ;;  %v7273_v29 = vld [vmem:[%s16014_s2 + $0xa0] sm:$0xff]  ;;  %v11996_v48 = vsel %vm1736_vm2, %v1726_v26, %v1727_v25 }
 0x1de   : > { %v11960_v16 = vsel %vm1671_vm1, %v16344_v11, %v16343_v62  ;;  %v11972_v8 = vsel %vm1736_vm2, %v16060_v0, %v16345_v40  ;;  %v11976_v62 = vsel %vm1736_vm2, %v1725_v17, %v1726_v26  ;;  %v11980_v11 = vsel %vm1671_vm1, %v1661_v50, %v1662_v43  ;;  %9026 = vmatprep.subr.mxu1 %v7275_v14  ;;  %v7271_v26 = vld [vmem:[%s16014_s2 + $0x90] sm:$0xff] }
 0x1df   : > { %2064 = vrot.lane.b32.xlu1 %v11976_v62, %s10952_s14  ;;  %2030 = vrot.lane.b32.xlu0 %v11980_v11, %s10954_s16  ;;  %v1599_v17 = vadd.f32 %v11493_v24, %v1562_v35  ;;  %v12000_v40 = vsel %vm1671_vm1, %v1660_v63, %v1661_v50  ;;  %v7272_v24 = vld [vmem:[%s16014_s2 + $0x98] sm:$0xff]  ;;  %v12015_v63 = vmax.f32 %v11845_v15, 0.0  ;;  %v12029_v15 = vmax.f32 %v11872_v57, 0.0  ;;  %v7270_v50 = vld [vmem:[%s16014_s2 + $0x88] sm:$0xff] }
 0x1e0   : > { %9027 = vmatpush3.msra.mxu1 %v7275_v14  ;;  %v12012_v35 = vld [vmem:[%s16014_s2 + $0x1f8] sm:$0xff]  ;;  %v16348_v14 = vrot.slane %v11842_v7, 2  ;;  %v7269_v57 = vld [vmem:[%s16014_s2 + $0x80] sm:$0xff]  ;;  %v12109_v7 = vmax.f32 %v11570_v45, 0.0 }
 0x1e1   : > { %9028 = vmatprep.subr.mxu1 %v7274_v23  ;;  %16346 = vst [vmem:[#allocation39_spill] sm:$0xff] %v12012_v35  ;;  %9360 = vmatprep.subr.mxu0 %v12012_v35  ;;  %v1666_v0 = vrot.slane %v12029_v15, 1 }
 0x1e2   : > { %9029 = vmatpush3.msra.mxu1 %v7274_v23  ;;  %v12017_v23 = vmax.f32 %v1599_v17, 0.0  ;;  %9361 = vmatpush3.msra.mxu0 %v12012_v35  ;;  %v12038_v17 = vsel %vm1736_vm2, %v1727_v25, %v16348_v14  ;;  %v12076_v14 = vmax.f32 %v11928_v41, 0.0  ;;  %v12094_v41 = vmax.f32 %v11658_v36, 0.0  ;;  %16353 = vst [vmem:[#allocation24_spill] sm:$0xff] %v12109_v7 }
 0x1e3   : > { %2066 = vrot.lane.b32.xlu1 %v11996_v48, %s10952_s14  ;;  %2020 = vrot.lane.b32.xlu0 %v12000_v40, %s10951_s13  ;;  %v12106_v35 = vmax.f32 %v11644_v20, 0.0  ;;  %v1643_v36 = vrot.slane %v12109_v7, 1  ;;  %v16354_v20 = vrot.slane %v11549_v2, 1 }
 0x1e4   : > { %9030 = vmatprep.subr.mxu1 %v7273_v29  ;;  %16347 = vst [vmem:[#allocation25_spill] sm:$0xff] %v12017_v23  ;;  %16349 = vst [vmem:[#allocation9_spill] sm:$0xff] %v12076_v14  ;;  %v1649_v34 = vrot.slane %v12094_v41, 1 }
 0x1e5   : > { %9031 = vmatpush3.msra.mxu1 %v7273_v29  ;;  %v1663_v29 = vrot.slane %v12017_v23, 1  ;;  %16351 = vst [vmem:[#allocation11_spill] sm:$0xff] %v12094_v41  ;;  %16352 = vst [vmem:[#allocation8_spill] sm:$0xff] %v12106_v35  ;;  %v12125_v45 = vsel %vm1671_vm1, %v16354_v20, %v1643_v36  ;;  %v12142_v20 = vmax.f32 %v11684_v28, 0.0 }
 0x1e6   : > { %9032 = vmatprep.subr.mxu1 %v7272_v24  ;;  %16355 = vst [vmem:[#allocation40_spill] sm:$0xff] %v12125_v45 }
 0x1e7   : > { %1988 = vrot.lane.b32.xlu1 %v12015_v63, %s10953_s15  ;;  %1986 = vrot.lane.b32.xlu0 %v12017_v23, %s10953_s15  ;;  %v12053_v25 = vsel %vm1671_vm1, %v1662_v43, %v1663_v29  ;;  %16358 = vst [vmem:[#allocation26_spill] sm:$0xff] %v12142_v20 }
 0x1e8   : > { %9033 = vmatpush3.msra.mxu1 %v7272_v24  ;;  %v12049_v24 = vmax.f32 %v11891_v19, 0.0  ;;  %v1664_v19 = vrot.slane %v12015_v63, 1 }
 0x1e9   : > { %9034 = vmatprep.subr.mxu1 %v7271_v26 }
 0x1ea   : > { %9035 = vmatpush3.msra.mxu1 %v7271_v26  ;;  %v12058_v26 = vld [vmem:[%s16014_s2 + $0x78] sm:$0xff]  ;;  %v12068_v43 = vsel %vm1671_vm1, %v1663_v29, %v1664_v19  ;;  %v12085_v29 = vld [vmem:[%s16014_s2 + $0x1f0] sm:$0xff] }
 0x1eb   : > { %2068 = vrot.lane.b32.xlu1 %v12038_v17, %s10952_s14  ;;  %1992 = vrot.lane.b32.xlu0 %v12029_v15, %s10953_s15  ;;  %16350 = vst [vmem:[#allocation27_spill] sm:$0xff] %v12085_v29 }
 0x1ec   : > { %9036 = vmatprep.subr.mxu1 %v7270_v50  ;;  %9362 = vmatprep.subr.mxu0 %v12085_v29 }
 0x1ed   : > { %9037 = vmatpush3.msra.mxu1 %v7270_v50  ;;  %v1665_v50 = vrot.slane %v12049_v24, 1  ;;  %9363 = vmatpush3.msra.mxu0 %v12085_v29 }
 0x1ee   : > { %9038 = vmatprep.subr.mxu1 %v7269_v57 }
 0x1ef   : > { %2032 = vrot.lane.b32.xlu1 %v12053_v25, %s10954_s16  ;;  %1990 = vrot.lane.b32.xlu0 %v12049_v24, %s10953_s15 }
 0x1f0   : > { %9039 = vmatpush3.msra.mxu1 %v7269_v57  ;;  %v12080_v57 = vsel %vm1671_vm1, %v1664_v19, %v1665_v50  ;;  %v12099_v19 = vsel %vm1671_vm1, %v1665_v50, %v1666_v0  ;;  %v1667_v50 = vrot.slane %v12076_v14, 1 }
 0x1f1   : > { %9052 = vmatprep.subr.mxu1 %v12058_v26 }
 0x1f2   : > { %v12129_v29 = vsel %vm1671_vm1, %v1666_v0, %v1667_v50  ;;  %v16359_v0 = vrot.slane %v11925_v13, 1 }
 0x1f3   : > { %2034 = vrot.lane.b32.xlu1 %v12068_v43, %s10954_s16  ;;  %1996 = vrot.lane.b32.xlu0 %v11925_v13, %s10953_s15  ;;  %16356 = vst [vmem:[#allocation41_spill] sm:$0xff] %v12129_v29  ;;  %v1651_v13 = vrot.slane %v12142_v20, 1 }
 0x1f7   : > { %2036 = vrot.lane.b32.xlu1 %v12080_v57, %s10954_s16  ;;  %1994 = vrot.lane.b32.xlu0 %v12076_v14, %s10953_s15  ;;  %v12138_v14 = vld [vmem:[%s16014_s2 + $0x1e8] sm:$0xff] }
 0x1f8   : > { %16357 = vst [vmem:[#allocation10_spill] sm:$0xff] %v12138_v14  ;;  %9364 = vmatprep.subr.mxu0 %v12138_v14 }
 0x1f9   : > { %9365 = vmatpush3.msra.mxu0 %v12138_v14  ;;  %v1708_v14 = vrot.slane %v11553_v38, 2 }
 0x1fb   : > { %2038 = vrot.lane.b32.xlu1 %v12099_v19, %s10954_s16  ;;  %1777 = vrot.lane.b32.xlu0 %v12094_v41, %s10953_s15  ;;  %v16362_v41 = vrot.slane %v11528_v18, 2 }
 0x1ff   : > { %1821 = vrot.lane.b32.xlu1 %v11681_v44, %s10954_s16  ;;  %1779 = vrot.lane.b32.xlu0 %v12106_v35, %s10953_s15 }
 0x203   : > { %2044 = vrot.lane.b32.xlu1 %v11960_v16, %s10954_s16  ;;  %1801 = vrot.lane.b32.xlu0 %v11604_v42, %s10951_s13 }
 0x207   : > { %1803 = vrot.lane.b32.xlu0 %v12125_v45, %s10951_s13  ;;  %2040 = vrot.lane.b32.xlu1 %v12129_v29, %s10954_s16  ;;  %v12149_v45 = vsel %vm1671_vm1, %v1667_v50, %v16359_v0  ;;  %v16360_v29 = vrot.slane %v11628_v53, 1  ;;  %v16361_v50 = vrot.slane %v11615_v22, 1  ;;  %v12183_v53 = vsel %vm1736_vm2, %v16362_v41, %v1708_v14 }
 0x208   : > { %16363 = vst [vmem:[#allocation42_spill] sm:$0xff] %v12183_v53  ;;  %v16365_v41 = vrot.slane %v11719_v51, 1 }
 0x209   : > { %v12160_v28 = vsel %vm1671_vm1, %v16360_v29, %v1649_v34  ;;  %v12170_v0 = vsel %vm1671_vm1, %v1643_v36, %v16361_v50  ;;  %v12189_v36 = vld [vmem:[%s16014_s2 + $0x1e0] sm:$0xff]  ;;  %v1650_v50 = vrot.slane %v12106_v35, 1 }
 0x20a   : > { %16364 = vst [vmem:[#allocation43_spill] sm:$0xff] %v12189_v36  ;;  %9366 = vmatprep.subr.mxu0 %v12189_v36 }
 0x20b   : > { %1781 = vrot.lane.b32.xlu0 %v12142_v20, %s10953_s15  ;;  %2042 = vrot.lane.b32.xlu1 %v12149_v45, %s10954_s16  ;;  %v12204_v20 = vsel %vm1671_vm1, %v1651_v13, %v16365_v41 }
 0x20c   : > { %9367 = vmatpush3.msra.mxu0 %v12189_v36  ;;  %16366 = vst [vmem:[#allocation29_spill] sm:$0xff] %v12204_v20  ;;  %v1711_v36 = vrot.slane %v11615_v22, 2 }
 0x20f   : > { %1783 = vrot.lane.b32.xlu0 %v11719_v51, %s10953_s15  ;;  %1823 = vrot.lane.b32.xlu1 %v12160_v28, %s10954_s16  ;;  %v1709_v51 = vrot.slane %v11549_v2, 2 }
 0x213   : > { %1805 = vrot.lane.b32.xlu0 %v12170_v0, %s10951_s13  ;;  %1845 = vrot.lane.b32.xlu1 %v11587_v55, %s10952_s14 }
 0x215   : > { %v12177_v29 = vpop.permute.xlu0 %1793 }
 0x217   : > { %1807 = vrot.lane.b32.xlu0 %v11653_v6, %s10951_s13  ;;  %1847 = vrot.lane.b32.xlu1 %v12183_v53, %s10952_s14  ;;  %v12208_v6 = vsel %vm1671_vm1, %v1649_v34, %v1650_v50  ;;  %v1710_v53 = vrot.slane %v12109_v7, 2  ;;  %v12224_v34 = vsel %vm1671_vm1, %v1650_v50, %v1651_v13 }
 0x218   : > { %v12231_v7 = vpop.permute.xlu1 %1843 }
 0x219   : > { %v12197_v38 = vpop.permute.xlu0 %1841  ;;  %v12220_v41 = vsel %vm1736_vm2, %v1710_v53, %v1711_v36  ;;  %v12247_v50 = vsel %vm1736_vm2, %v1709_v51, %v1710_v53  ;;  %v16098_v53 = vrot.slane %v11618_v30, 2 }
 0x21a   : > { %16367 = vst [vmem:[#allocation13_spill] sm:$0xff] %v12220_v41  ;;  %16369 = vst [vmem:[#allocation28_spill] sm:$0xff] %v12247_v50 }
 0x21b   : > { %1829 = vrot.lane.b32.xlu0 %v12204_v20, %s10954_s16  ;;  %1825 = vrot.lane.b32.xlu1 %v12208_v6, %s10954_s16  ;;  %v12237_v20 = vsel %vm1736_vm2, %v1708_v14, %v1709_v51  ;;  %v12277_v14 = vsel %vm1736_vm2, %v1711_v36, %v16098_v53 }
 0x21c   : > { %16368 = vst [vmem:[#allocation12_spill] sm:$0xff] %v12237_v20  ;;  %v12254_v2 = vpop.permute.xlu1 %1799  ;;  %16371 = vst [vmem:[#allocation45_spill] sm:$0xff] %v12277_v14 }
 0x21d   : > { %v12216_v35 = vpop.permute.xlu0 %1795 }
 0x21f   : > { %1853 = vrot.lane.b32.xlu0 %v12220_v41, %s10952_s14  ;;  %1827 = vrot.lane.b32.xlu1 %v12224_v34, %s10954_s16  ;;  %v12252_v41 = vld [vmem:[%s16014_s2 + $0x1d8] sm:$0xff] }
 0x220   : > { %16370 = vst [vmem:[#allocation44_spill] sm:$0xff] %v12252_v41  ;;  %9368 = vmatprep.subr.mxu0 %v12252_v41 }
 0x221   : > { %v12233_v22 = vpop.permute.xlu0 %1797  ;;  %9369 = vmatpush3.msra.mxu0 %v12252_v41 }
 0x223   : > { %2089 = vrot.lane.b32.xlu0 %v11744_v32, %s10953_s15  ;;  %1849 = vrot.lane.b32.xlu1 %v12237_v20, %s10952_s14  ;;  %v12265_v51 = vpop.permute.xlu1 %1775  ;;  %v1730_v20 = vrot.slane %v12017_v23, 2  ;;  %v16377_v23 = vrot.slane %v11827_v49, 2 }
 0x225   : > { %v12243_v13 = vpop.permute.xlu0 %1771 }
 0x227   : > { %2113 = vrot.lane.b32.xlu0 %v11980_v11, %s10951_s13  ;;  %1851 = vrot.lane.b32.xlu1 %v12247_v50, %s10952_s14  ;;  %v12290_v50 = vld [vmem:[%s16014_s2 + $0x1d0] sm:$0xff] }
 0x228   : > { %v12283_v41 = vpop.permute.xlu1 %1819  ;;  %16372 = vst [vmem:[#allocation14_spill] sm:$0xff] %v12290_v50  ;;  %9370 = vmatprep.subr.mxu0 %v12290_v50 }
 0x229   : > { %v12261_v32 = vpop.permute.xlu0 %1769  ;;  %9371 = vmatpush3.msra.mxu0 %v12290_v50  ;;  %v12324_v50 = vld [vmem:[%s16014_s2 + $0x1b8] sm:$0xff] }
 0x22a   : > { %16375 = vst [vmem:[#allocation33_spill] sm:$0xff] %v12324_v50 }
 0x22b   : > { %2137 = vrot.lane.b32.xlu0 %v11740_v27, %s10954_s16  ;;  %1831 = vrot.lane.b32.xlu1 %v11765_v9, %s10954_s16 }
 0x22d   : > { %v12271_v11 = vpop.permute.xlu0 %1817 }
 0x22f   : > { %2161 = vrot.lane.b32.xlu0 %v11911_v33, %s10952_s14  ;;  %1855 = vrot.lane.b32.xlu1 %v12277_v14, %s10952_s14  ;;  %v12300_v33 = vld [vmem:[%s16014_s2 + $0x1c8] sm:$0xff] }
 0x230   : > { %16373 = vst [vmem:[#allocation30_spill] sm:$0xff] %v12300_v33  ;;  %9372 = vmatprep.subr.mxu0 %v12300_v33 }
 0x231   : > { %v12285_v27 = vpop.permute.xlu0 %1773  ;;  %9373 = vmatpush3.msra.mxu0 %v12300_v33 }
 0x233   : > { %2093 = vrot.lane.b32.xlu0 %v11791_v58, %s10953_s15  ;;  %2091 = vrot.lane.b32.xlu1 %v11785_v59, %s10953_s15  ;;  %v12309_v58 = vld [vmem:[%s16014_s2 + $0x1c0] sm:$0xff] }
 0x234   : > { %16374 = vst [vmem:[#allocation47_spill] sm:$0xff] %v12309_v58  ;;  %9374 = vmatprep.subr.mxu0 %v12309_v58 }
 0x235   : > { %v12302_v36 = vpop.permute.xlu0 %2054  ;;  %v2007_v53 = vpop.permute.xlu1 %2006  ;;  %9375 = vmatpush3.msra.mxu0 %v12309_v58 }
 0x236   : > { %9376 = vmatprep.subr.mxu0 %v12324_v50 }
 0x237   : > { %2117 = vrot.lane.b32.xlu0 %v12068_v43, %s10951_s13  ;;  %2115 = vrot.lane.b32.xlu1 %v12053_v25, %s10951_s13  ;;  %v12335_v25 = vld [vmem:[%s16014_s2 + $0x1b0] sm:$0xff] }
 0x238   : > { %16376 = vst [vmem:[#allocation17_spill] sm:$0xff] %v12335_v25  ;;  %9377 = vmatpush3.msra.mxu0 %v12324_v50 }
 0x239   : > { %v12316_v59 = vpop.permute.xlu1 %2008  ;;  %v12318_v14 = vpop.permute.xlu0 %2010  ;;  %9378 = vmatprep.subr.mxu0 %v12335_v25 }
 0x23a   : > { %9379 = vmatpush3.msra.mxu0 %v12335_v25 }
 0x23b   : > { %2097 = vrot.lane.b32.xlu0 %v11823_v46, %s10953_s15  ;;  %2139 = vrot.lane.b32.xlu1 %v11819_v21, %s10954_s16  ;;  %v1742_v46 = vsel %vm1736_vm2, %v16377_v23, %v1730_v20  ;;  %v12351_v21 = vld [vmem:[%s16014_s2 + $0x1a8] sm:$0xff]  ;;  %v12363_v23 = vld [vmem:[%s16014_s2 + $0x1a0] sm:$0xff] }
 0x23c   : > { %16378 = vst [vmem:[#allocation16_spill] sm:$0xff] %v12351_v21  ;;  %9380 = vmatprep.subr.mxu0 %v12351_v21  ;;  %16379 = vst [vmem:[#allocation32_spill] sm:$0xff] %v12363_v23 }
 0x23d   : > { %v12338_v43 = vpop.permute.xlu1 %2056  ;;  %v12340_v33 = vpop.permute.xlu0 %2014  ;;  %9381 = vmatpush3.msra.mxu0 %v12351_v21 }
 0x23e   : > { %9382 = vmatprep.subr.mxu0 %v12363_v23 }
 0x23f   : > { %2099 = vrot.lane.b32.xlu0 %v11886_v54, %s10953_s15  ;;  %2163 = vrot.lane.b32.xlu1 %v1742_v46, %s10952_s14  ;;  %v12373_v54 = vld [vmem:[%s16014_s2 + $0x198] sm:$0xff] }
 0x240   : > { %16380 = vst [vmem:[#allocation48_spill] sm:$0xff] %v12373_v54  ;;  %9383 = vmatpush3.msra.mxu0 %v12363_v23  ;;  %v12400_v23 = vld [vmem:[%s16014_s2 + $0x188] sm:$0xff] }
 0x241   : > { %v12357_v50 = vpop.permute.xlu1 %2058  ;;  %v1985_v58 = vpop.permute.xlu0 %1984  ;;  %9384 = vmatprep.subr.mxu0 %v12373_v54  ;;  %16382 = vst [vmem:[#allocation19_spill] sm:$0xff] %v12400_v23 }
 0x242   : > { %9385 = vmatpush3.msra.mxu0 %v12373_v54 }
 0x243   : > { %2121 = vrot.lane.b32.xlu0 %v12099_v19, %s10951_s13  ;;  %2095 = vrot.lane.b32.xlu1 %v11882_v52, %s10953_s15  ;;  %v12385_v19 = vld [vmem:[%s16014_s2 + $0x190] sm:$0xff] }
 0x244   : > { %16381 = vst [vmem:[#allocation35_spill] sm:$0xff] %v12385_v19  ;;  %9386 = vmatprep.subr.mxu0 %v12385_v19 }
 0x245   : > { %v12376_v46 = vpop.permute.xlu1 %2012  ;;  %v12378_v25 = vpop.permute.xlu0 %2016  ;;  %9387 = vmatpush3.msra.mxu0 %v12385_v19 }
 0x246   : > { %9388 = vmatprep.subr.mxu0 %v12400_v23 }
 0x247   : > { %2101 = vrot.lane.b32.xlu0 %v11920_v12, %s10953_s15  ;;  %2119 = vrot.lane.b32.xlu1 %v12080_v57, %s10951_s13  ;;  %v12410_v12 = vld [vmem:[%s16014_s2 + $0x180] sm:$0xff] }
 0x248   : > { %9389 = vmatpush3.msra.mxu0 %v12400_v23 }
 0x249   : > { %v12392_v52 = vpop.permute.xlu1 %2060  ;;  %v12394_v21 = vpop.permute.xlu0 %2018  ;;  %9390 = vmatprep.subr.mxu0 %v12410_v12 }
 0x24a   : > { %9391 = vmatpush3.msra.mxu0 %v12410_v12 }
 0x24b   : > { %2103 = vrot.lane.b32.xlu0 %v12000_v40, %s10953_s15  ;;  %2141 = vrot.lane.b32.xlu1 %v11850_v3, %s10954_s16  ;;  %v1731_v40 = vrot.slane %v12015_v63, 2 }
 0x24c   : > { %9448 = vmatprep.subr.mxu0 %v11779_v60 }
 0x24d   : > { %v12413_v57 = vpop.permute.xlu1 %2062  ;;  %v1983_v54 = vpop.permute.xlu0 %1982 }
 0x24e   : > { %v1998_v19 = vadd.f32 %v1983_v54, %v11711_v10  ;;  %v1741_v10 = vsel %vm1736_vm2, %v1730_v20, %v1731_v40  ;;  %v1732_v54 = vrot.slane %v12049_v24, 2  ;;  %v1999_v20 = vadd.f32 %v1985_v58, %v11709_v61  ;;  %v16384_v58 = vld [vmem:[#allocation57_spill] sm:$0xff] }
 0x24f   : > { %2127 = vrot.lane.b32.xlu0 %v11960_v16, %s10951_s13  ;;  %2143 = vrot.lane.b32.xlu1 %v11916_v5, %s10954_s16 }
 0x250   : > { %v2022_v3 = vadd.f32 %v2007_v53, %v1998_v19  ;;  %v2023_v19 = vadd.f32 %v12316_v59, %v1999_v20 }
 0x251   : > { %v12424_v49 = vpop.permute.xlu1 %2064  ;;  %v2031_v9 = vpop.permute.xlu0 %2030 }
 0x252   : > { %v2046_v23 = vadd.f32 %v2031_v9, %v2022_v3  ;;  %v1740_v9 = vsel %vm1736_vm2, %v1731_v40, %v1732_v54 }
 0x253   : > { %1875 = vrot.lane.b32.xlu0 %v11534_v47, %s10953_s15  ;;  %2165 = vrot.lane.b32.xlu1 %v1741_v10, %s10952_s14  ;;  %v16386_v10 = vld [vmem:[#allocation63_spill] sm:$0xff] }
 0x254   : > { %v12434_v16 = vadd.f32 %v12302_v36, %v2046_v23 }
 0x255   : > { %v12436_v5 = vpop.permute.xlu1 %2066  ;;  %v12438_v53 = vpop.permute.xlu0 %2020 }
 0x256   : > { %16383 = vst [vmem:[#allocation49_spill] sm:$0xff] %v12434_v16  ;;  %9040 = vmatprep.mubr.f32.mxu1 %v12434_v16 }
 0x257   : > { %1877 = vrot.lane.b32.xlu0 %v11594_v37, %s10953_s15  ;;  %2167 = vrot.lane.b32.xlu1 %v1740_v9, %s10952_s14  ;;  %v1713_v9 = vrot.slane %v16386_v10, 2 }
 0x259   : > { %v1989_v47 = vpop.permute.xlu1 %1988  ;;  %v1987_v60 = vpop.permute.xlu0 %1986 }
 0x25a   : > { %v2000_v37 = vadd.f32 %v1987_v60, %v11734_v31 }
 0x25b   : > { %1899 = vrot.lane.b32.xlu0 %v11698_v1, %s10951_s13  ;;  %2145 = vrot.lane.b32.xlu1 %v11943_v56, %s10954_s16  ;;  %v16124_v1 = vrot.slane %v12029_v15, 2 }
 0x25c   : > { %v2024_v59 = vadd.f32 %v12318_v14, %v2000_v37  ;;  %v16388_v14 = vld [vmem:[#allocation37_spill] sm:$0xff] }
 0x25d   : > { %v12451_v36 = vpop.permute.xlu1 %2068  ;;  %v12453_v23 = vpop.permute.xlu0 %1992  ;;  %v1739_v61 = vsel %vm1736_vm2, %v1732_v54, %v16124_v1  ;;  %v16387_v54 = vrot.slane %v11618_v30, 2  ;;  %v16400_v1 = vld [vmem:[#allocation22_spill] sm:$0xff] }
 0x25f   : > { %1901 = vrot.lane.b32.xlu0 %v11675_v4, %s10951_s13  ;;  %2147 = vrot.lane.b32.xlu1 %v11976_v62, %s10954_s16  ;;  %v16385_v4 = vld [vmem:[#allocation5_spill] sm:$0xff] }
 0x260   : > { %v2001_v62 = vadd.f32 %v1989_v47, %v16385_v4 }
 0x261   : > { %v2033_v3 = vpop.permute.xlu1 %2032  ;;  %v1991_v56 = vpop.permute.xlu0 %1990 }
 0x262   : > { %v2047_v40 = vadd.f32 %v2033_v3, %v2023_v19  ;;  %v1759_v3 = vsel %vm1736_vm2, %v16387_v54, %v1713_v9  ;;  %v2002_v47 = vadd.f32 %v1991_v56, %v16388_v14  ;;  %v16394_v14 = vld [vmem:[#allocation4_spill] sm:$0xff] }
 0x263   : > { %1923 = vrot.lane.b32.xlu0 %v16384_v58, %s10954_s16  ;;  %2169 = vrot.lane.b32.xlu1 %v1739_v61, %s10952_s14  ;;  %v12499_v61 = vld [vmem:[%s16014_s2 + $0x68] sm:$0xff] }
 0x264   : > { %v12471_v31 = vadd.f32 %v12338_v43, %v2047_v40  ;;  %v12485_v43 = vld [vmem:[%s16014_s2 + $0x70] sm:$0xff]  ;;  %v2025_v40 = vadd.f32 %v12376_v46, %v2001_v62  ;;  %v2026_v46 = vadd.f32 %v12340_v33, %v2002_v47  ;;  %v2003_v47 = vadd.f32 %v12453_v23, %v16394_v14  ;;  %v16396_v23 = vld [vmem:[#allocation41_spill] sm:$0xff]  ;;  %v16399_v14 = vld [vmem:[#allocation23_spill] sm:$0xff] }
 0x265   : > { %v2035_v60 = vpop.permute.xlu1 %2034  ;;  %v12475_v20 = vpop.permute.xlu0 %1996 }
 0x266   : > { %v2048_v19 = vadd.f32 %v2035_v60, %v2024_v59  ;;  %9041 = vmatmul.mubr.f32.vlgmr.msra.gmra.mxu1 %v12471_v31  ;;  %v12525_v60 = vld [vmem:[%s16014_s2 + $0x58] sm:$0xff]  ;;  %v2005_v16 = vadd.f32 %v12475_v20, %v16400_v1 }
 0x267   : > { %1947 = vrot.lane.b32.xlu0 %v1759_v3, %s10952_s14  ;;  %2149 = vrot.lane.b32.xlu1 %v11996_v48, %s10954_s16  ;;  %v12507_v48 = vld [vmem:[%s16014_s2 + $0x60] sm:$0xff] }
 0x268   : > { %v12492_v37 = vadd.f32 %v12357_v50, %v2048_v19  ;;  %9053 = vmatpush3.msra.mxu1 %v12058_v26  ;;  %v16390_v26 = vld [vmem:[#allocation61_spill] sm:$0xff] }
 0x269   : > { %9054 = vmatprep.subr.mxu1 %v12485_v43  ;;  %v2037_v58 = vpop.permute.xlu1 %2036  ;;  %v1995_v4 = vpop.permute.xlu0 %1994 }
 0x26a   : > { %16389 = vst [vmem:[#allocation18_spill] sm:$0xff] %v12492_v37  ;;  %v2049_v59 = vadd.f32 %v2037_v58, %v2025_v40  ;;  %9043 = vmatprep.mubr.f32.mxu1 %v12492_v37  ;;  %9055 = vmatpush3.msra.mxu1 %v12485_v43  ;;  %v16395_v40 = vld [vmem:[#allocation58_spill] sm:$0xff] }
 0x26b   : > { %9056 = vmatprep.subr.mxu1 %v12499_v61  ;;  %1879 = vrot.lane.b32.xlu0 %v16390_v26, %s10953_s15 }
 0x26c   : > { %v12513_v50 = vadd.f32 %v12392_v52, %v2049_v59  ;;  %2151 = vrot.lane.b32.xlu1 %v12038_v17, %s10954_s16  ;;  %9057 = vmatpush3.msra.mxu1 %v12499_v61  ;;  %v12534_v17 = vld [vmem:[%s16014_s2 + $0x50] sm:$0xff] }
 0x26d   : > { %9058 = vmatprep.subr.mxu1 %v12507_v48  ;;  %v2039_v56 = vpop.permute.xlu1 %2038  ;;  %v12520_v62 = vpop.permute.xlu0 %1777 }
 0x26e   : > { %16391 = vst [vmem:[#allocation34_spill] sm:$0xff] %v12513_v50  ;;  %v2050_v19 = vadd.f32 %v2039_v56, %v2026_v46  ;;  %9044 = vmatmul.mubr.f32.gmra.mxu1 %v12513_v50  ;;  %v12587_v46 = vld [vmem:[%s16014_s2 + $0x30] sm:$0xff]  ;;  %v16398_v56 = vld [vmem:[#allocation53_spill] sm:$0xff] }
 0x26f   : > { %9059 = vmatpush3.msra.mxu1 %v12507_v48  ;;  %1903 = vrot.lane.b32.xlu0 %v11681_v44, %s10951_s13  ;;  %v12550_v44 = vld [vmem:[%s16014_s2 + $0x48] sm:$0xff]  ;;  %16397 = vst [vmem:[#allocation46_spill] sm:$0xff] %v12587_v46 }
 0x270   : > { %v12537_v33 = vadd.f32 %v12413_v57, %v2050_v19  ;;  %9060 = vmatprep.subr.mxu1 %v12525_v60  ;;  %2175 = vrot.lane.b32.xlu1 %v11972_v8, %s10952_s14  ;;  %v12560_v8 = vld [vmem:[%s16014_s2 + $0x40] sm:$0xff]  ;;  %v1785_v19 = vadd.f32 %v12261_v32, %v16398_v56  ;;  %v12603_v32 = vld [vmem:[%s16014_s2 + $0x28] sm:$0xff] }
 0x271   : > { %9061 = vmatpush3.msra.mxu1 %v12525_v60  ;;  %v12543_v52 = vpop.permute.xlu1 %1821  ;;  %v12545_v54 = vpop.permute.xlu0 %1779  ;;  %v16393_v57 = vld [vmem:[#allocation64_spill] sm:$0xff]  ;;  %16401 = vst [vmem:[#allocation31_spill] sm:$0xff] %v12603_v32 }
 0x272   : > { %16392 = vst [vmem:[#allocation50_spill] sm:$0xff] %v12537_v33  ;;  %9062 = vmatprep.subr.mxu1 %v12534_v17  ;;  %9046 = vmatprep.mubr.f32.mxu1 %v12537_v33  ;;  %v16126_v3 = vrot.slane %v16393_v57, 2  ;;  %v16402_v56 = vld [vmem:[#allocation52_spill] sm:$0xff]  ;;  %v1809_v1 = vadd.f32 %v12177_v29, %v1785_v19  ;;  %v12631_v29 = vld [vmem:[%s16014_s2 + $0x18] sm:$0xff] }
 0x273   : > { %9063 = vmatpush3.msra.mxu1 %v12534_v17  ;;  %1883 = vrot.lane.b32.xlu0 %v11604_v42, %s10953_s15  ;;  %v12574_v42 = vld [vmem:[%s16014_s2 + $0x38] sm:$0xff]  ;;  %16406 = vst [vmem:[#allocation5_spill] sm:$0xff] %v12631_v29 }
 0x274   : > { %9064 = vmatprep.subr.mxu1 %v12550_v44  ;;  %1925 = vrot.lane.b32.xlu1 %v16395_v40, %s10954_s16  ;;  %v1758_v26 = vsel %vm1736_vm2, %v1713_v9, %v16126_v3  ;;  %v2004_v40 = vadd.f32 %v1995_v4, %v16399_v14 }
 0x275   : > { %9065 = vmatpush3.msra.mxu1 %v12550_v44  ;;  %v2045_v58 = vpop.permute.xlu1 %2044  ;;  %v12569_v59 = vpop.permute.xlu0 %1801 }
 0x276   : > { %9066 = vmatprep.subr.mxu1 %v12560_v8 }
 0x277   : > { %9067 = vmatpush3.msra.mxu1 %v12560_v8  ;;  %2123 = vrot.lane.b32.xlu0 %v16396_v23, %s10951_s13  ;;  %v2027_v23 = vadd.f32 %v12378_v25, %v2003_v47  ;;  %v12614_v25 = vld [vmem:[%s16014_s2 + $0x20] sm:$0xff]  ;;  %v2029_v47 = vadd.f32 %v12438_v53, %v2005_v16 }
 0x278   : > { %9068 = vmatprep.subr.mxu1 %v12574_v42  ;;  %1949 = vrot.lane.b32.xlu1 %v1758_v26, %s10952_s14  ;;  %v1786_v26 = vadd.f32 %v12243_v13, %v16402_v56  ;;  %16403 = vst [vmem:[#allocation15_spill] sm:$0xff] %v12614_v25  ;;  %v2028_v13 = vadd.f32 %v12394_v21, %v2004_v40  ;;  %v16408_v53 = vld [vmem:[#allocation40_spill] sm:$0xff]  ;;  %v12644_v40 = vld [vmem:[%s16014_s2 + $0x10] sm:$0xff]  ;;  %v12659_v56 = vld [vmem:[%s16014_s2 + $0x8] sm:$0xff] }
 0x279   : > { %9069 = vmatpush3.msra.mxu1 %v12574_v42  ;;  %v12598_v9 = vpop.permute.xlu0 %1803  ;;  %v2041_v3 = vpop.permute.xlu1 %2040  ;;  %v2053_v16 = vadd.f32 %v2045_v58, %v2029_v47  ;;  %16409 = vst [vmem:[#allocation63_spill] sm:$0xff] %v12644_v40  ;;  %16411 = vst [vmem:[#allocation61_spill] sm:$0xff] %v12659_v56 }
 0x27a   : > { %9070 = vmatprep.subr.mxu1 %v12587_v46  ;;  %v2051_v4 = vadd.f32 %v2041_v3, %v2027_v23  ;;  %v16405_v3 = vld [vmem:[#allocation59_spill] sm:$0xff]  ;;  %v1810_v21 = vadd.f32 %v12216_v35, %v1786_v26 }
 0x27b   : > { %9071 = vmatpush3.msra.mxu1 %v12587_v46  ;;  %2125 = vrot.lane.b32.xlu0 %v12149_v45, %s10951_s13  ;;  %v12668_v26 = vadd.f32 %v12451_v36, %v2053_v16 }
 0x27c   : > { %v12618_v20 = vadd.f32 %v12424_v49, %v2051_v4  ;;  %9072 = vmatprep.subr.mxu1 %v12603_v32  ;;  %1881 = vrot.lane.b32.xlu1 %v16405_v3, %s10953_s15  ;;  %v16407_v49 = vld [vmem:[#allocation54_spill] sm:$0xff] }
 0x27d   : > { %9073 = vmatpush3.msra.mxu1 %v12603_v32  ;;  %v12626_v45 = vpop.permute.xlu0 %1781  ;;  %v2043_v14 = vpop.permute.xlu1 %2042  ;;  %v1787_v19 = vadd.f32 %v12285_v27, %v16407_v49  ;;  %v1833_v27 = vadd.f32 %v12271_v11, %v1809_v1  ;;  %v1788_v11 = vadd.f32 %v12265_v51, %v11528_v18  ;;  %16412 = vst [vmem:[#allocation4_spill] sm:$0xff] %v12668_v26  ;;  %v16413_v1 = vld [vmem:[#allocation9_spill] sm:$0xff] }
 0x27e   : > { %16404 = vst [vmem:[#allocation57_spill] sm:$0xff] %v12618_v20  ;;  %9074 = vmatprep.subr.mxu1 %v12614_v25  ;;  %v2052_v23 = vadd.f32 %v2043_v14, %v2028_v13  ;;  %9047 = vmatmul.mubr.f32.gmra.mxu1 %v12618_v20  ;;  %v1734_v3 = vrot.slane %v16413_v1, 2 }
 0x27f   : > { %9075 = vmatpush3.msra.mxu1 %v12614_v25  ;;  %1885 = vrot.lane.b32.xlu0 %v16408_v53, %s10953_s15  ;;  %v1857_v18 = vadd.f32 %v12197_v38, %v1833_v27  ;;  %v1812_v36 = vadd.f32 %v12254_v2, %v1788_v11  ;;  %v16415_v2 = vrot.slane %v12029_v15, 2  ;;  %v12738_v53 = vld [vmem:[%s16014_s2 + $0x160] sm:$0xff]  ;;  %v16418_v11 = vld [vmem:[#allocation65_spill] sm:$0xff] }
 0x280   : > { %v12648_v4 = vadd.f32 %v12436_v5, %v2052_v23  ;;  %9076 = vmatprep.subr.mxu1 %v12631_v29  ;;  %1905 = vrot.lane.b32.xlu1 %v12160_v28, %s10951_s13  ;;  %v1811_v5 = vadd.f32 %v12233_v22, %v1787_v19  ;;  %v1834_v28 = vadd.f32 %v12283_v41, %v1810_v21  ;;  %v12682_v41 = vld [vmem:[%s16014_s2] sm:$0xff]  ;;  %v12724_v19 = vld [vmem:[%s16014_s2 + $0x168] sm:$0xff]  ;;  %v16416_v23 = vld [vmem:[#allocation38_spill] sm:$0xff] }
 0x281   : > { %9077 = vmatpush3.msra.mxu1 %v12631_v29  ;;  %v12654_v35 = vpop.permute.xlu0 %1783  ;;  %v1824_v58 = vpop.permute.xlu1 %1823  ;;  %16414 = vst [vmem:[#allocation58_spill] sm:$0xff] %v12682_v41  ;;  %v1738_v13 = vsel %vm1736_vm2, %v16415_v2, %v1734_v3  ;;  %v16417_v21 = vrot.slane %v16416_v23, 2  ;;  %v16462_v29 = vld [vmem:[#allocation48_spill] sm:$0xff] }
 0x282   : > { %16410 = vst [vmem:[#allocation37_spill] sm:$0xff] %v12648_v4  ;;  %9078 = vmatprep.subr.mxu1 %v12644_v40  ;;  %9049 = vmatprep.mubr.f32.mxu1 %v12648_v4  ;;  %v1835_v22 = vadd.f32 %v12543_v52, %v1811_v5  ;;  %v12697_v52 = vadd.f32 %v12231_v7, %v1834_v28  ;;  %v12711_v7 = vld [vmem:[%s16014_s2 + $0x170] sm:$0xff]  ;;  %v16419_v5 = vld [vmem:[#allocation56_spill] sm:$0xff] }
 0x283   : > { %9079 = vmatpush3.msra.mxu1 %v12644_v40  ;;  %1907 = vrot.lane.b32.xlu0 %v12208_v6, %s10951_s13  ;;  %v1836_v47 = vadd.f32 %v1824_v58, %v1812_v36  ;;  %v1737_v16 = vsel %vm1736_vm2, %v1734_v3, %v16417_v21  ;;  %v12746_v58 = vld [vmem:[%s16014_s2 + $0x158] sm:$0xff]  ;;  %v1789_v28 = vadd.f32 %v12520_v62, %v16419_v5  ;;  %v16420_v3 = vld [vmem:[#allocation42_spill] sm:$0xff]  ;;  %v12768_v62 = vld [vmem:[%s16014_s2 + $0x148] sm:$0xff] }
 0x284   : > { %9080 = vmatprep.subr.mxu1 %v12659_v56  ;;  %1927 = vrot.lane.b32.xlu1 %v11587_v55, %s10954_s16  ;;  %v12694_v55 = vld [vmem:[%s16014_s2 + $0x178] sm:$0xff]  ;;  %v16421_v36 = vld [vmem:[#allocation62_spill] sm:$0xff] }
 0x285   : > { %9050 = vmatmul.mubr.f32.gmra.mxu1 %v12668_v26  ;;  %v12685_v51 = vpop.permute.xlu0 %1805  ;;  %v1846_v6 = vpop.permute.xlu1 %1845  ;;  %v1715_v2 = vrot.slane %v16421_v36, 2 }
 0x286   : > { %9081 = vmatpush3.msra.mxu1 %v12659_v56  ;;  %9084 = vmatprep.mubr.f32.mxu1 %v1857_v18  ;;  %v12689_v38 = vadd.f32 %v1846_v6, %v1835_v22  ;;  %v12759_v18 = vld [vmem:[%s16014_s2 + $0x150] sm:$0xff] }
 0x287   : > { %9082 = vmatprep.subr.mxu1 %v12682_v41  ;;  %1909 = vrot.lane.b32.xlu0 %v12224_v34, %s10951_s13 }
 0x288   : > { %9083 = vmatpush3.msra.mxu1 %v12682_v41  ;;  %2171 = vrot.lane.b32.xlu1 %v1738_v13, %s10952_s14  ;;  %v1813_v13 = vadd.f32 %v12569_v59, %v1789_v28  ;;  %v16425_v59 = vld [vmem:[#allocation55_spill] sm:$0xff] }
 0x289   : > { %9096 = vmatprep.subr.mxu1 %v12694_v55  ;;  %9085 = vmatmul.mubr.f32.vlgmr.msra.gmra.mxu1 %v12697_v52  ;;  %v12715_v34 = vpop.permute.xlu0 %1807  ;;  %v1848_v14 = vpop.permute.xlu1 %1847  ;;  %v1790_v5 = vadd.f32 %v12545_v54, %v16425_v59 }
 0x28a   : > { %9087 = vmatprep.mubr.f32.mxu1 %v12689_v38  ;;  %9097 = vmatpush3.msra.mxu1 %v12694_v55  ;;  %v12719_v49 = vadd.f32 %v1848_v14, %v1836_v47  ;;  %v16422_v47 = vld [vmem:[#allocation29_spill] sm:$0xff]  ;;  %v16423_v14 = vrot.slane %v16393_v57, 2  ;;  %v16460_v57 = vld [vmem:[#allocation32_spill] sm:$0xff] }
 0x28b   : > { %9098 = vmatprep.subr.mxu1 %v12711_v7  ;;  %1887 = vrot.lane.b32.xlu0 %v12170_v0, %s10953_s15 }
 0x28c   : > { %9099 = vmatpush3.msra.mxu1 %v12711_v7  ;;  %2173 = vrot.lane.b32.xlu1 %v1737_v16, %s10952_s14  ;;  %v1757_v21 = vsel %vm1736_vm2, %v16423_v14, %v1715_v2  ;;  %v16424_v16 = vld [vmem:[#allocation11_spill] sm:$0xff]  ;;  %v1814_v14 = vadd.f32 %v12598_v9, %v1790_v5  ;;  %v12813_v5 = vld [vmem:[%s16014_s2 + $0x130] sm:$0xff] }
 0x28d   : > { %9100 = vmatprep.subr.mxu1 %v12724_v19  ;;  %9088 = vmatmul.mubr.f32.gmra.mxu1 %v12719_v49  ;;  %v1830_v27 = vpop.permute.xlu0 %1829  ;;  %v1826_v0 = vpop.permute.xlu1 %1825  ;;  %16430 = vst [vmem:[#allocation41_spill] sm:$0xff] %v12813_v5 }
 0x28e   : > { %9101 = vmatpush3.msra.mxu1 %v12724_v19  ;;  %v1837_v28 = vadd.f32 %v1826_v0, %v1813_v13  ;;  %v12797_v0 = vld [vmem:[%s16014_s2 + $0x138] sm:$0xff]  ;;  %v16427_v13 = vld [vmem:[#allocation20_spill] sm:$0xff] }
 0x28f   : > { %9102 = vmatprep.subr.mxu1 %v12738_v53  ;;  %1889 = vrot.lane.b32.xlu0 %v16418_v11, %s10953_s15  ;;  %v16426_v11 = vld [vmem:[#allocation24_spill] sm:$0xff] }
 0x290   : > { %9103 = vmatpush3.msra.mxu1 %v12738_v53  ;;  %1929 = vrot.lane.b32.xlu1 %v16420_v3, %s10954_s16  ;;  %v12785_v3 = vld [vmem:[%s16014_s2 + $0x140] sm:$0xff]  ;;  %v1791_v36 = vadd.f32 %v12626_v45, %v16426_v11 }
 0x291   : > { %9104 = vmatprep.subr.mxu1 %v12746_v58  ;;  %v1854_v22 = vpop.permute.xlu0 %1853  ;;  %v1828_v6 = vpop.permute.xlu1 %1827 }
 0x292   : > { %9105 = vmatpush3.msra.mxu1 %v12746_v58  ;;  %v1815_v45 = vadd.f32 %v12685_v51, %v1791_v36  ;;  %v1838_v11 = vadd.f32 %v1828_v6, %v1814_v14  ;;  %v12823_v36 = vld [vmem:[%s16014_s2 + $0x128] sm:$0xff] }
 0x293   : > { %9106 = vmatprep.subr.mxu1 %v12759_v18  ;;  %1911 = vrot.lane.b32.xlu0 %v16422_v47, %s10951_s13  ;;  %16431 = vst [vmem:[#allocation53_spill] sm:$0xff] %v12823_v36 }
 0x294   : > { %9107 = vmatpush3.msra.mxu1 %v12759_v18  ;;  %1951 = vrot.lane.b32.xlu1 %v1757_v21, %s10952_s14  ;;  %v16428_v21 = vrot.slane %v16424_v16, 2 }
 0x295   : > { %9108 = vmatprep.subr.mxu1 %v12768_v62  ;;  %v2090_v47 = vpop.permute.xlu0 %2089  ;;  %v1850_v41 = vpop.permute.xlu1 %1849 }
 0x296   : > { %9109 = vmatpush3.msra.mxu1 %v12768_v62  ;;  %v12792_v54 = vadd.f32 %v1850_v41, %v1837_v28  ;;  %v1756_v9 = vsel %vm1736_vm2, %v1715_v2, %v16428_v21  ;;  %v16429_v41 = vld [vmem:[#allocation6_spill] sm:$0xff]  ;;  %v16433_v21 = vld [vmem:[#allocation13_spill] sm:$0xff] }
 0x297   : > { %9110 = vmatprep.subr.mxu1 %v12785_v3  ;;  %1913 = vrot.lane.b32.xlu0 %v16427_v13, %s10951_s13  ;;  %v2105_v59 = vadd.f32 %v2090_v47, %v16429_v41  ;;  %v1839_v13 = vadd.f32 %v1830_v27, %v1815_v45  ;;  %v16432_v47 = vld [vmem:[#allocation26_spill] sm:$0xff]  ;;  %v12839_v41 = vld [vmem:[%s16014_s2 + $0x120] sm:$0xff] }
 0x298   : > { %9111 = vmatpush3.msra.mxu1 %v12785_v3  ;;  %1953 = vrot.lane.b32.xlu1 %v1756_v9, %s10952_s14  ;;  %v1718_v14 = vrot.slane %v16432_v47, 2  ;;  %v16434_v9 = vld [vmem:[#allocation60_spill] sm:$0xff]  ;;  %16436 = vst [vmem:[#allocation23_spill] sm:$0xff] %v12839_v41 }
 0x299   : > { %9112 = vmatprep.subr.mxu1 %v12797_v0  ;;  %9090 = vmatprep.mubr.f32.mxu1 %v12792_v54  ;;  %v2114_v28 = vpop.permute.xlu0 %2113  ;;  %v1852_v2 = vpop.permute.xlu1 %1851  ;;  %v1792_v27 = vadd.f32 %v12654_v35, %v16434_v9  ;;  %v12831_v45 = vadd.f32 %v1854_v22, %v1839_v13  ;;  %v12853_v9 = vld [vmem:[%s16014_s2 + $0x118] sm:$0xff] }
 0x29a   : > { %9113 = vmatpush3.msra.mxu1 %v12797_v0  ;;  %v2129_v51 = vadd.f32 %v2114_v28, %v2105_v59  ;;  %v12818_v6 = vadd.f32 %v1852_v2, %v1838_v11  ;;  %v16435_v11 = vld [vmem:[#allocation12_spill] sm:$0xff]  ;;  %v16437_v2 = vld [vmem:[#allocation21_spill] sm:$0xff]  ;;  %16439 = vst [vmem:[#allocation22_spill] sm:$0xff] %v12853_v9 }
 0x29b   : > { %9114 = vmatprep.subr.mxu1 %v12813_v5  ;;  %1935 = vrot.lane.b32.xlu0 %v16433_v21, %s10954_s16  ;;  %v1816_v35 = vadd.f32 %v12715_v34, %v1792_v27  ;;  %v16438_v13 = vrot.slane %v16437_v2, 2  ;;  %v12863_v27 = vld [vmem:[%s16014_s2 + $0x110] sm:$0xff] }
 0x29c   : > { %9115 = vmatpush3.msra.mxu1 %v12813_v5  ;;  %1931 = vrot.lane.b32.xlu1 %v16435_v11, %s10954_s16  ;;  %16441 = vst [vmem:[#allocation52_spill] sm:$0xff] %v12863_v27 }
 0x29d   : > { %9116 = vmatprep.subr.mxu1 %v12823_v36  ;;  %9091 = vmatmul.mubr.f32.gmra.mxu1 %v12818_v6  ;;  %v2138_v59 = vpop.permute.xlu0 %2137  ;;  %v1832_v28 = vpop.permute.xlu1 %1831  ;;  %v1753_v21 = vsel %vm1736_vm2, %v1718_v14, %v16438_v13  ;;  %v16442_v13 = vld [vmem:[#allocation8_spill] sm:$0xff] }
 0x29e   : > { %9117 = vmatpush3.msra.mxu1 %v12823_v36  ;;  %v2153_v22 = vadd.f32 %v2138_v59, %v2129_v51  ;;  %9093 = vmatprep.mubr.f32.mxu1 %v12831_v45  ;;  %v1840_v34 = vadd.f32 %v1832_v28, %v1816_v35  ;;  %v16440_v51 = vld [vmem:[#allocation28_spill] sm:$0xff]  ;;  %v1717_v2 = vrot.slane %v16442_v13, 2  ;;  %v12875_v35 = vld [vmem:[%s16014_s2 + $0x108] sm:$0xff] }
 0x29f   : > { %9118 = vmatprep.subr.mxu1 %v12839_v41  ;;  %1959 = vrot.lane.b32.xlu0 %v1753_v21, %s10952_s14  ;;  %16443 = vst [vmem:[#allocation59_spill] sm:$0xff] %v12875_v35 }
 0x2a0   : > { %9119 = vmatpush3.msra.mxu1 %v12839_v41  ;;  %1933 = vrot.lane.b32.xlu1 %v16440_v51, %s10954_s16  ;;  %v16444_v51 = vrot.slane %v16424_v16, 2  ;;  %v16447_v16 = vld [vmem:[#allocation27_spill] sm:$0xff] }
 0x2a1   : > { %9120 = vmatprep.subr.mxu1 %v12853_v9  ;;  %v2162_v11 = vpop.permute.xlu0 %2161  ;;  %v1856_v59 = vpop.permute.xlu1 %1855 }
 0x2a2   : > { %9121 = vmatpush3.msra.mxu1 %v12853_v9  ;;  %v12868_v21 = vadd.f32 %v2162_v11, %v2153_v22  ;;  %v12870_v28 = vadd.f32 %v1856_v59, %v1840_v34  ;;  %v1755_v47 = vsel %vm1736_vm2, %v16444_v51, %v1717_v2  ;;  %v12887_v22 = vld [vmem:[%s16014_s2 + $0x100] sm:$0xff]  ;;  %v16446_v59 = vld [vmem:[#allocation39_spill] sm:$0xff] }
 0x2a3   : > { %9122 = vmatprep.subr.mxu1 %v12863_v27  ;;  %16445 = vst [vmem:[#allocation54_spill] sm:$0xff] %v12887_v22 }
 0x2a4   : > { %9123 = vmatpush3.msra.mxu1 %v12863_v27  ;;  %1955 = vrot.lane.b32.xlu1 %v1755_v47, %s10952_s14  ;;  %v1754_v47 = vsel %vm1736_vm2, %v1717_v2, %v1718_v14  ;;  %v16449_v14 = vld [vmem:[#allocation45_spill] sm:$0xff]  ;;  %v16450_v2 = vld [vmem:[#allocation10_spill] sm:$0xff] }
 0x2a5   : > { %9124 = vmatprep.subr.mxu1 %v12875_v35  ;;  %9094 = vmatmul.mubr.f32.gmra.mxu1 %v12870_v28  ;;  %v2094_v34 = vpop.permute.xlu0 %2093  ;;  %v2092_v11 = vpop.permute.xlu1 %2091 }
 0x2a6   : > { %9125 = vmatpush3.msra.mxu1 %v12875_v35  ;;  %9128 = vmatprep.mubr.f32.mxu1 %v12697_v52  ;;  %v16448_v35 = vld [vmem:[#allocation7_spill] sm:$0xff] }
 0x2a7   : > { %9126 = vmatprep.subr.mxu1 %v12887_v22  ;;  %v2106_v56 = vadd.f32 %v2092_v11, %v16448_v35  ;;  %v16453_v11 = vld [vmem:[#allocation44_spill] sm:$0xff] }
 0x2a8   : > { %9127 = vmatpush3.msra.mxu1 %v12887_v22  ;;  %1957 = vrot.lane.b32.xlu1 %v1754_v47, %s10952_s14 }
 0x2a9   : > { %9140 = vmatprep.subr.mxu1 %v16446_v59  ;;  %9129 = vmatmul.mubr.f32.vlgmr.msra.gmra.mxu1 %v12689_v38  ;;  %v2118_v51 = vpop.permute.xlu0 %2117  ;;  %v2116_v13 = vpop.permute.xlu1 %2115 }
 0x2aa   : > { %9141 = vmatpush3.msra.mxu1 %v16446_v59  ;;  %9131 = vmatprep.mubr.f32.mxu1 %v12719_v49  ;;  %v2130_v22 = vadd.f32 %v2116_v13, %v2106_v56  ;;  %v16451_v59 = vld [vmem:[#allocation43_spill] sm:$0xff]  ;;  %v16454_v13 = vld [vmem:[#allocation14_spill] sm:$0xff] }
 0x2ab   : > { %9142 = vmatprep.subr.mxu1 %v16447_v16 }
 0x2ac   : > { %9143 = vmatpush3.msra.mxu1 %v16447_v16  ;;  %1937 = vrot.lane.b32.xlu1 %v16449_v14, %s10954_s16  ;;  %v16452_v16 = vld [vmem:[#allocation36_spill] sm:$0xff] }
 0x2ad   : > { %9144 = vmatprep.subr.mxu1 %v16450_v2  ;;  %9132 = vmatmul.mubr.f32.gmra.mxu1 %v12792_v54  ;;  %v12909_v47 = vpop.permute.xlu0 %2097  ;;  %v2140_v39 = vpop.permute.xlu1 %2139 }
 0x2ae   : > { %9145 = vmatpush3.msra.mxu1 %v16450_v2  ;;  %9134 = vmatprep.mubr.f32.mxu1 %v12818_v6  ;;  %v2154_v35 = vadd.f32 %v2140_v39, %v2130_v22  ;;  %v16455_v39 = vld [vmem:[#allocation30_spill] sm:$0xff]  ;;  %v16139_v22 = vmov 0.0  }
 0x2af   : > { %9146 = vmatprep.subr.mxu1 %v16451_v59 }
 0x2b0   : > { %9147 = vmatpush3.msra.mxu1 %v16451_v59  ;;  %1961 = vrot.lane.b32.xlu1 %v16452_v16, %s10952_s14 }
 0x2b1   : > { %9148 = vmatprep.subr.mxu1 %v16453_v11  ;;  %9135 = vmatmul.mubr.f32.gmra.mxu1 %v12831_v45  ;;  %v12919_v14 = vpop.permute.xlu0 %2099  ;;  %v2164_v27 = vpop.permute.xlu1 %2163 }
 0x2b2   : > { %9149 = vmatpush3.msra.mxu1 %v16453_v11  ;;  %9137 = vmatprep.mubr.f32.mxu1 %v12870_v28  ;;  %v12923_v56 = vadd.f32 %v2164_v27, %v2154_v35  ;;  %v16456_v27 = vld [vmem:[#allocation47_spill] sm:$0xff]  ;;  %v16457_v35 = vld [vmem:[#allocation33_spill] sm:$0xff] }
 0x2b3   : > { %9150 = vmatprep.subr.mxu1 %v16454_v13 }
 0x2b4   : > { %9151 = vmatpush3.msra.mxu1 %v16454_v13  ;;  %9392 = vmatprep.mubr.f32.mxu0 %v12923_v56  ;;  %v16458_v13 = vld [vmem:[#allocation17_spill] sm:$0xff] }
 0x2b5   : > { %9152 = vmatprep.subr.mxu1 %v16455_v39  ;;  %9138 = vmatmul.mubr.f32.gmra.mxu1 %v16139_v22  ;;  %v12930_v2 = vpop.permute.xlu0 %2121  ;;  %v2096_v59 = vpop.permute.xlu1 %2095  ;;  %v16459_v22 = vld [vmem:[#allocation16_spill] sm:$0xff] }
 0x2b6   : > { %9153 = vmatpush3.msra.mxu1 %v16455_v39  ;;  %9172 = vmatprep.mubr.f32.mxu1 %v12471_v31  ;;  %v2108_v36 = vadd.f32 %v2096_v59, %v12015_v63 }
 0x2b7   : > { %9154 = vmatprep.subr.mxu1 %v16456_v27 }
 0x2b8   : > { %9155 = vmatpush3.msra.mxu1 %v16456_v27  ;;  %v16461_v27 = vld [vmem:[#allocation25_spill] sm:$0xff] }
 0x2b9   : > { %9156 = vmatprep.subr.mxu1 %v16457_v35  ;;  %v12937_v16 = vpop.permute.xlu0 %2101  ;;  %v2120_v11 = vpop.permute.xlu1 %2119  ;;  %v2107_v9 = vadd.f32 %v2094_v34, %v16461_v27 }
 0x2ba   : > { %9157 = vmatpush3.msra.mxu1 %v16457_v35  ;;  %v2132_v27 = vadd.f32 %v2120_v11, %v2108_v36  ;;  %v13009_v11 = vld [vmem:[%s16014_s2 + $0x258] sm:$0xff] }
 0x2bb   : > { %9158 = vmatprep.subr.mxu1 %v16458_v13  ;;  %v2131_v25 = vadd.f32 %v2118_v51, %v2107_v9  ;;  %v12998_v9 = vld [vmem:[%s16014_s2 + $0x260] sm:$0xff]  ;;  %16469 = vst [vmem:[#allocation56_spill] sm:$0xff] %v13009_v11 }
 0x2bc   : > { %9159 = vmatpush3.msra.mxu1 %v16458_v13  ;;  %v16463_v13 = vld [vmem:[#allocation35_spill] sm:$0xff]  ;;  %16468 = vst [vmem:[#allocation65_spill] sm:$0xff] %v12998_v9 }
 0x2bd   : > { %9160 = vmatprep.subr.mxu1 %v16459_v22  ;;  %v12943_v39 = vpop.permute.xlu0 %2103  ;;  %v2142_v40 = vpop.permute.xlu1 %2141 }
 0x2be   : > { %9161 = vmatpush3.msra.mxu1 %v16459_v22  ;;  %v2155_v32 = vadd.f32 %v2142_v40, %v2131_v25  ;;  %v16464_v22 = vld [vmem:[#allocation19_spill] sm:$0xff]  ;;  %v12973_v25 = vld [vmem:[%s16014_s2 + $0x270] sm:$0xff] }
 0x2bf   : > { %9162 = vmatprep.subr.mxu1 %v16460_v57  ;;  %16466 = vst [vmem:[#allocation9_spill] sm:$0xff] %v12973_v25 }
 0x2c0   : > { %9163 = vmatpush3.msra.mxu1 %v16460_v57 }
 0x2c1   : > { %9164 = vmatprep.subr.mxu1 %v16462_v29  ;;  %v12950_v35 = vpop.permute.xlu0 %2127  ;;  %v2144_v41 = vpop.permute.xlu1 %2143 }
 0x2c2   : > { %9165 = vmatpush3.msra.mxu1 %v16462_v29  ;;  %v12965_v29 = vld [vmem:[%s16014_s2 + $0x278] sm:$0xff]  ;;  %v2156_v63 = vadd.f32 %v2144_v41, %v2132_v27  ;;  %v13025_v27 = vld [vmem:[%s16014_s2 + $0x250] sm:$0xff] }
 0x2c3   : > { %9166 = vmatprep.subr.mxu1 %v16463_v13  ;;  %16465 = vst [vmem:[#allocation40_spill] sm:$0xff] %v12965_v29  ;;  %v12990_v41 = vld [vmem:[%s16014_s2 + $0xf8] sm:$0xff]  ;;  %16470 = vst [vmem:[#allocation42_spill] sm:$0xff] %v13025_v27 }
 0x2c4   : > { %9167 = vmatpush3.msra.mxu1 %v16463_v13  ;;  %v13015_v13 = vld [vmem:[%s16014_s2 + $0xf0] sm:$0xff] }
 0x2c5   : > { %9168 = vmatprep.subr.mxu1 %v16464_v22  ;;  %v12957_v34 = vpop.permute.xlu0 %1875  ;;  %v2166_v57 = vpop.permute.xlu1 %2165 }
 0x2c6   : > { %9169 = vmatpush3.msra.mxu1 %v16464_v22  ;;  %v12960_v5 = vadd.f32 %v2166_v57, %v2155_v32  ;;  %v2109_v22 = vadd.f32 %v12909_v47, %v12049_v24  ;;  %v13040_v47 = vld [vmem:[%s16014_s2 + $0x248] sm:$0xff] }
 0x2c7   : > { %9170 = vmatprep.subr.mxu1 %v12410_v12  ;;  %16471 = vst [vmem:[#allocation29_spill] sm:$0xff] %v13040_v47 }
 0x2c8   : > { %9171 = vmatpush3.msra.mxu1 %v12410_v12  ;;  %9393 = vmatmul.mubr.f32.vlgmr.msra.gmra.mxu0 %v12960_v5  ;;  %v12984_v12 = vld [vmem:[%s16014_s2 + $0x268] sm:$0xff]  ;;  %v2133_v24 = vadd.f32 %v12930_v2, %v2109_v22  ;;  %v13053_v22 = vld [vmem:[%s16014_s2 + $0x240] sm:$0xff] }
 0x2c9   : > { %9173 = vmatmul.mubr.f32.vlgmr.msra.gmra.mxu1 %v12492_v37  ;;  %9184 = vmatprep.subr.mxu1 %v12965_v29  ;;  %v1878_v32 = vpop.permute.xlu0 %1877  ;;  %v2168_v40 = vpop.permute.xlu1 %2167  ;;  %16467 = vst [vmem:[#allocation38_spill] sm:$0xff] %v12984_v12  ;;  %16472 = vst [vmem:[#allocation55_spill] sm:$0xff] %v13053_v22  ;;  %v13176_v37 = vld [vmem:[%s16014_s2 + $0xb0] sm:$0xff] }
 0x2ca   : > { %9175 = vmatprep.mubr.f32.mxu1 %v12513_v50  ;;  %9185 = vmatpush3.msra.mxu1 %v12965_v29  ;;  %v12979_v36 = vadd.f32 %v2168_v40, %v2156_v63  ;;  %v1892_v57 = vadd.f32 %v1878_v32, %v16386_v10  ;;  %v13046_v32 = vld [vmem:[%s16014_s2 + $0xe8] sm:$0xff]  ;;  %v13160_v50 = vld [vmem:[%s16014_s2 + $0xb8] sm:$0xff] }
 0x2cb   : > { %9186 = vmatprep.subr.mxu1 %v12973_v25  ;;  %9449 = vmatpush3.msra.mxu0 %v12990_v41 }
 0x2cc   : > { %9187 = vmatpush3.msra.mxu1 %v12973_v25  ;;  %9395 = vmatprep.mubr.f32.mxu0 %v12979_v36 }
 0x2cd   : > { %9176 = vmatmul.mubr.f32.gmra.mxu1 %v12537_v33  ;;  %9188 = vmatprep.subr.mxu1 %v12984_v12  ;;  %v13002_v51 = vpop.permute.xlu0 %1899  ;;  %v2146_v59 = vpop.permute.xlu1 %2145  ;;  %v13144_v33 = vld [vmem:[%s16014_s2 + $0xc0] sm:$0xff] }
 0x2ce   : > { %9178 = vmatprep.mubr.f32.mxu1 %v12618_v20  ;;  %9189 = vmatpush3.msra.mxu1 %v12984_v12  ;;  %v2157_v2 = vadd.f32 %v2146_v59, %v2133_v24  ;;  %v13067_v24 = vld [vmem:[%s16014_s2 + $0x238] sm:$0xff]  ;;  %v13130_v12 = vld [vmem:[%s16014_s2 + $0xc8] sm:$0xff] }
 0x2cf   : > { %9190 = vmatprep.subr.mxu1 %v12998_v9  ;;  %9450 = vmatprep.subr.mxu0 %v13015_v13  ;;  %16474 = vst [vmem:[#allocation24_spill] sm:$0xff] %v13067_v24  ;;  %v13125_v20 = vld [vmem:[%s16014_s2 + $0x218] sm:$0xff] }
 0x2d0   : > { %9191 = vmatpush3.msra.mxu1 %v12998_v9  ;;  %9451 = vmatpush3.msra.mxu0 %v13015_v13  ;;  %16479 = vst [vmem:[#allocation12_spill] sm:$0xff] %v13125_v20 }
 0x2d1   : > { %9179 = vmatmul.mubr.f32.gmra.mxu1 %v12648_v4  ;;  %9192 = vmatprep.subr.mxu1 %v13009_v11  ;;  %v1902_v63 = vpop.permute.xlu0 %1901  ;;  %v13030_v40 = vpop.permute.xlu1 %2147  ;;  %v13112_v4 = vld [vmem:[%s16014_s2 + $0xd0] sm:$0xff] }
 0x2d2   : > { %9181 = vmatprep.mubr.f32.mxu1 %v12668_v26  ;;  %9193 = vmatpush3.msra.mxu1 %v13009_v11  ;;  %v13035_v10 = vadd.f32 %v1902_v63, %v1892_v57  ;;  %v16473_v57 = vmov 0.0   ;;  %v13098_v11 = vld [vmem:[%s16014_s2 + $0xd8] sm:$0xff] }
 0x2d3   : > { %9194 = vmatprep.subr.mxu1 %v13025_v27  ;;  %9452 = vmatprep.subr.mxu0 %v13046_v32 }
 0x2d4   : > { %9195 = vmatpush3.msra.mxu1 %v13025_v27  ;;  %9453 = vmatpush3.msra.mxu0 %v13046_v32  ;;  %v13073_v27 = vld [vmem:[%s16014_s2 + $0xe0] sm:$0xff] }
 0x2d5   : > { %9182 = vmatmul.mubr.f32.gmra.mxu1 %v16473_v57  ;;  %9196 = vmatprep.subr.mxu1 %v13040_v47  ;;  %v13058_v63 = vpop.permute.xlu0 %1923  ;;  %v2170_v26 = vpop.permute.xlu1 %2169 }
 0x2d6   : > { %9197 = vmatpush3.msra.mxu1 %v13040_v47  ;;  %9216 = vmatprep.mubr.f32.mxu1 %v12689_v38  ;;  %v13062_v59 = vadd.f32 %v2170_v26, %v2157_v2  ;;  %v13081_v26 = vld [vmem:[%s16014_s2 + $0x230] sm:$0xff] }
 0x2d7   : > { %9198 = vmatprep.subr.mxu1 %v13053_v22  ;;  %9454 = vmatprep.subr.mxu0 %v13073_v27  ;;  %16475 = vst [vmem:[#allocation20_spill] sm:$0xff] %v13081_v26 }
 0x2d8   : > { %9199 = vmatpush3.msra.mxu1 %v13053_v22  ;;  %9396 = vmatmul.mubr.f32.gmra.mxu0 %v13062_v59  ;;  %v13093_v22 = vld [vmem:[%s16014_s2 + $0x228] sm:$0xff] }
 0x2d9   : > { %9200 = vmatprep.subr.mxu1 %v13067_v24  ;;  %v13084_v2 = vpop.permute.xlu0 %1947  ;;  %v13086_v47 = vpop.permute.xlu1 %2149  ;;  %9455 = vmatpush3.msra.mxu0 %v13073_v27  ;;  %16476 = vst [vmem:[#allocation6_spill] sm:$0xff] %v13093_v22 }
 0x2da   : > { %9201 = vmatpush3.msra.mxu1 %v13067_v24  ;;  %9456 = vmatprep.subr.mxu0 %v13098_v11  ;;  %v13107_v24 = vld [vmem:[%s16014_s2 + $0x220] sm:$0xff] }
 0x2db   : > { %9202 = vmatprep.subr.mxu1 %v13081_v26  ;;  %9457 = vmatpush3.msra.mxu0 %v13098_v11  ;;  %16477 = vst [vmem:[#allocation13_spill] sm:$0xff] %v13107_v24 }
 0x2dc   : > { %9203 = vmatpush3.msra.mxu1 %v13081_v26  ;;  %9458 = vmatprep.subr.mxu0 %v13112_v4 }
 0x2dd   : > { %9204 = vmatprep.subr.mxu1 %v13093_v22  ;;  %9459 = vmatpush3.msra.mxu0 %v13112_v4  ;;  %v13118_v9 = vpop.permute.xlu0 %1879 }
 0x2de   : > { %9205 = vmatpush3.msra.mxu1 %v13093_v22  ;;  %16478 = vst [vmem:[#allocation60_spill] sm:$0xff] %v13118_v9  ;;  %v13120_v26 = vpop.permute.xlu1 %2151  ;;  %9460 = vmatprep.subr.mxu0 %v13130_v12  ;;  %v13139_v22 = vld [vmem:[%s16014_s2 + $0x210] sm:$0xff] }
 0x2df   : > { %9206 = vmatprep.subr.mxu1 %v13107_v24  ;;  %9461 = vmatpush3.msra.mxu0 %v13130_v12  ;;  %16480 = vst [vmem:[#allocation28_spill] sm:$0xff] %v13139_v22 }
 0x2e0   : > { %9207 = vmatpush3.msra.mxu1 %v13107_v24  ;;  %9462 = vmatprep.subr.mxu0 %v13144_v33  ;;  %v13155_v24 = vld [vmem:[%s16014_s2 + $0x208] sm:$0xff] }
 0x2e1   : > { %9208 = vmatprep.subr.mxu1 %v13125_v20  ;;  %9463 = vmatpush3.msra.mxu0 %v13144_v33  ;;  %16481 = vst [vmem:[#allocation39_spill] sm:$0xff] %v13155_v24  ;;  %v13165_v29 = vpop.permute.xlu0 %1903 }
 0x2e2   : > { %9209 = vmatpush3.msra.mxu1 %v13125_v20  ;;  %v13150_v25 = vpop.permute.xlu1 %2175  ;;  %9464 = vmatprep.subr.mxu0 %v13160_v50  ;;  %16482 = vst [vmem:[#allocation27_spill] sm:$0xff] %v13165_v29  ;;  %v13171_v20 = vld [vmem:[%s16014_s2 + $0x200] sm:$0xff] }
 0x2e3   : > { %9210 = vmatprep.subr.mxu1 %v13139_v22  ;;  %9465 = vmatpush3.msra.mxu0 %v13160_v50  ;;  %16483 = vst [vmem:[#allocation7_spill] sm:$0xff] %v13171_v20 }
 0x2e4   : > { %9211 = vmatpush3.msra.mxu1 %v13139_v22  ;;  %9466 = vmatprep.subr.mxu0 %v13176_v37  ;;  %v13185_v22 = vld [vmem:[%s16014_s2 + $0xa8] sm:$0xff] }
 0x2e5   : > { %9212 = vmatprep.subr.mxu1 %v13155_v24  ;;  %9467 = vmatpush3.msra.mxu0 %v13176_v37  ;;  %v13200_v46 = vpop.permute.xlu0 %1883 }
 0x2e6   : > { %9213 = vmatpush3.msra.mxu1 %v13155_v24  ;;  %v1926_v29 = vpop.permute.xlu1 %1925  ;;  %9468 = vmatprep.subr.mxu0 %v13185_v22  ;;  %v13195_v24 = vld [vmem:[%s16014_s2 + $0xa0] sm:$0xff] }
 0x2e7   : > { %9214 = vmatprep.subr.mxu1 %v13171_v20  ;;  %v1940_v9 = vadd.f32 %v1926_v29, %v13035_v10  ;;  %9469 = vmatpush3.msra.mxu0 %v13185_v22 }
 0x2e8   : > { %9215 = vmatpush3.msra.mxu1 %v13171_v20  ;;  %9470 = vmatprep.subr.mxu0 %v13195_v24  ;;  %v10859_v20 = vld [vmem:[%s16014_s2 + $0x98] sm:$0xff] }
 0x2e9   : > { %9217 = vmatmul.mubr.f32.vlgmr.msra.gmra.mxu1 %v12719_v49  ;;  %9228 = vmatprep.subr.mxu1 %v12990_v41 }
 0x2ea   : > { %9219 = vmatprep.mubr.f32.mxu1 %v12792_v54  ;;  %9229 = vmatpush3.msra.mxu1 %v12990_v41  ;;  %v1950_v29 = vpop.permute.xlu1 %1949 }
 0x2eb   : > { %9230 = vmatprep.subr.mxu1 %v13015_v13  ;;  %v13205_v10 = vadd.f32 %v1950_v29, %v1940_v9  ;;  %9471 = vmatpush3.msra.mxu0 %v13195_v24  ;;  %v2124_v9 = vpop.permute.xlu0 %2123  ;;  %v2110_v29 = vadd.f32 %v12919_v14, %v12029_v15  ;;  %v10862_v14 = vld [vmem:[%s16014_s2 + $0x80] sm:$0xff] }
 0x2ec   : > { %9231 = vmatpush3.msra.mxu1 %v13015_v13  ;;  %9472 = vmatprep.subr.mxu0 %v10859_v20  ;;  %v10860_v13 = vld [vmem:[%s16014_s2 + $0x90] sm:$0xff] }
 0x2ed   : > { %16484 = vst [vmem:[#allocation45_spill] sm:$0xff] %v13205_v10  ;;  %9220 = vmatmul.mubr.f32.gmra.mxu1 %v12818_v6  ;;  %9232 = vmatprep.subr.mxu1 %v13046_v32  ;;  %v2134_v10 = vadd.f32 %v2124_v9, %v2110_v29  ;;  %v2112_v29 = vadd.f32 %v12943_v39, %v16416_v23 }
 0x2ee   : > { %9222 = vmatprep.mubr.f32.mxu1 %v12831_v45  ;;  %9233 = vmatpush3.msra.mxu1 %v13046_v32  ;;  %v13216_v41 = vpop.permute.xlu1 %1881 }
 0x2ef   : > { %9234 = vmatprep.subr.mxu1 %v13073_v27  ;;  %9473 = vmatpush3.msra.mxu0 %v10859_v20 }
 0x2f0   : > { %9235 = vmatpush3.msra.mxu1 %v13073_v27  ;;  %9474 = vmatprep.subr.mxu0 %v10860_v13  ;;  %v10861_v27 = vld [vmem:[%s16014_s2 + $0x88] sm:$0xff] }
 0x2f1   : > { %9223 = vmatmul.mubr.f32.gmra.mxu1 %v12870_v28  ;;  %9236 = vmatprep.subr.mxu1 %v13098_v11 }
 0x2f2   : > { %9237 = vmatpush3.msra.mxu1 %v13098_v11  ;;  %v13226_v32 = vpop.permute.xlu1 %1905  ;;  %9225 = vmatprep.mubr.f32.mxu1 %v16473_v57  ;;  %v2126_v11 = vpop.permute.xlu0 %2125 }
 0x2f3   : > { %9238 = vmatprep.subr.mxu1 %v13112_v4  ;;  %9475 = vmatpush3.msra.mxu0 %v10860_v13 }
 0x2f4   : > { %9239 = vmatpush3.msra.mxu1 %v13112_v4  ;;  %9476 = vmatprep.subr.mxu0 %v10861_v27  ;;  %v2111_v4 = vadd.f32 %v12937_v16, %v16413_v1  ;;  %v2136_v16 = vadd.f32 %v12950_v35, %v2112_v29  ;;  %v16496_v29 = vld [vmem:[#allocation52_spill] sm:$0xff] }
 0x2f5   : > { %9226 = vmatmul.mubr.f32.gmra.mxu1 %v16473_v57  ;;  %9240 = vmatprep.subr.mxu1 %v13130_v12 }
 0x2f6   : > { %9241 = vmatpush3.msra.mxu1 %v13130_v12  ;;  %9260 = vmatprep.mubr.f32.mxu1 %v12868_v21  ;;  %v13240_v15 = vpop.permute.xlu1 %1927  ;;  %v2135_v9 = vadd.f32 %v2126_v11, %v2111_v4  ;;  %v2158_v12 = vadd.f32 %v13030_v40, %v2134_v10  ;;  %v2160_v23 = vadd.f32 %v13120_v26, %v2136_v16  ;;  %v16493_v11 = vld [vmem:[#allocation64_spill] sm:$0xff] }
 0x2f7   : > { %9242 = vmatprep.subr.mxu1 %v13144_v33  ;;  %9477 = vmatpush3.msra.mxu0 %v10861_v27  ;;  %v16494_v4 = vld [vmem:[#allocation60_spill] sm:$0xff] }
 0x2f8   : > { %9243 = vmatpush3.msra.mxu1 %v13144_v33  ;;  %9478 = vmatprep.subr.mxu0 %v10862_v14  ;;  %v2159_v40 = vadd.f32 %v13086_v47, %v2135_v9  ;;  %v13269_v10 = vadd.f32 %v13150_v25, %v2160_v23  ;;  %v1891_v25 = vadd.f32 %v12957_v34, %v11618_v30  ;;  %v16495_v9 = vld [vmem:[#allocation63_spill] sm:$0xff] }
 0x2f9   : > { %9244 = vmatprep.subr.mxu1 %v13160_v50  ;;  %9479 = vmatpush3.msra.mxu0 %v10862_v14 }
 0x2fa   : > { %9245 = vmatpush3.msra.mxu1 %v13160_v50  ;;  %v2172_v1 = vpop.permute.xlu1 %2171  ;;  %9536 = vmatprep.subr.mxu0 %v12694_v55  ;;  %v1915_v47 = vadd.f32 %v13002_v51, %v1891_v25  ;;  %v16500_v25 = vld [vmem:[#allocation62_spill] sm:$0xff] }
 0x2fb   : > { %9246 = vmatprep.subr.mxu1 %v13176_v37  ;;  %v13256_v33 = vadd.f32 %v2172_v1, %v2158_v12  ;;  %v16497_v1 = vld [vmem:[#allocation27_spill] sm:$0xff] }
 0x2fc   : > { %9247 = vmatpush3.msra.mxu1 %v13176_v37  ;;  %v13276_v37 = vpop.permute.xlu0 %1885  ;;  %v1939_v30 = vadd.f32 %v13058_v63, %v1915_v47  ;;  %v1894_v47 = vadd.f32 %v13216_v41, %v16500_v25  ;;  %v16504_v41 = vld [vmem:[#allocation45_spill] sm:$0xff] }
 0x2fd   : > { %9248 = vmatprep.subr.mxu1 %v13185_v22  ;;  %9398 = vmatprep.mubr.f32.mxu0 %v13256_v33 }
 0x2fe   : > { %9249 = vmatpush3.msra.mxu1 %v13185_v22  ;;  %v2174_v50 = vpop.permute.xlu1 %2173  ;;  %v1963_v34 = vadd.f32 %v13084_v2, %v1939_v30  ;;  %v16486_v22 = vld [vmem:[#allocation41_spill] sm:$0xff]  ;;  %v16490_v2 = vld [vmem:[#allocation23_spill] sm:$0xff] }
 0x2ff   : > { %9250 = vmatprep.subr.mxu1 %v13195_v24  ;;  %v13266_v39 = vadd.f32 %v2174_v50, %v2159_v40  ;;  %v16498_v40 = vld [vmem:[#allocation61_spill] sm:$0xff]  ;;  %v16499_v50 = vld [vmem:[#allocation59_spill] sm:$0xff] }
 0x300   : > { %9251 = vmatpush3.msra.mxu1 %v13195_v24  ;;  %v13297_v35 = vpop.permute.xlu0 %1907  ;;  %v16488_v24 = vld [vmem:[#allocation53_spill] sm:$0xff] }
 0x301   : > { %9252 = vmatprep.subr.mxu1 %v10859_v20  ;;  %9399 = vmatmul.mubr.f32.gmra.mxu0 %v13266_v39 }
 0x302   : > { %9253 = vmatpush3.msra.mxu1 %v10859_v20  ;;  %9401 = vmatprep.mubr.f32.mxu0 %v13269_v10  ;;  %v13282_v20 = vld [vmem:[%s16014_s2 + $0x78] sm:$0xff] }
 0x303   : > { %9254 = vmatprep.subr.mxu1 %v10860_v13 }
 0x304   : > { %9255 = vmatpush3.msra.mxu1 %v10860_v13  ;;  %v16491_v13 = vld [vmem:[#allocation5_spill] sm:$0xff] }
 0x305   : > { %9256 = vmatprep.subr.mxu1 %v10861_v27  ;;  %9402 = vmatmul.mubr.f32.gmra.mxu0 %v16473_v57 }
 0x306   : > { %9257 = vmatpush3.msra.mxu1 %v10861_v27  ;;  %9480 = vmatprep.mubr.f32.mxu0 %v12697_v52  ;;  %v13291_v52 = vpop.permute.xlu1 %1929  ;;  %v16492_v27 = vld [vmem:[#allocation22_spill] sm:$0xff] }
 0x307   : > { %9258 = vmatprep.subr.mxu1 %v10862_v14 }
 0x308   : > { %9259 = vmatpush3.msra.mxu1 %v10862_v14  ;;  %v1893_v14 = vadd.f32 %v16494_v4, %v16493_v11  ;;  %v16505_v4 = vld [vmem:[#allocation18_spill] sm:$0xff] }
 0x309   : > { %9261 = vmatmul.mubr.f32.vlgmr.msra.gmra.mxu1 %v12923_v56  ;;  %9272 = vmatprep.subr.mxu1 %v13282_v20 }
 0x30a   : > { %9263 = vmatprep.mubr.f32.mxu1 %v12960_v5  ;;  %9273 = vmatpush3.msra.mxu1 %v13282_v20  ;;  %v1917_v16 = vadd.f32 %v16497_v1, %v1893_v14 }
 0x30b   : > { %9481 = vmatmul.mubr.f32.vlgmr.msra.gmra.mxu0 %v12689_v38  ;;  %9274 = vmatprep.subr.mxu1 %v12485_v43 }
 0x30c   : > { %9537 = vmatpush3.msra.mxu0 %v12694_v55  ;;  %9483 = vmatprep.mubr.f32.mxu0 %v12719_v49  ;;  %v1941_v30 = vadd.f32 %v13240_v15, %v1917_v16  ;;  %v16508_v16 = vld [vmem:[#allocation8_spill] sm:$0xff] }
 0x30d   : > { %9538 = vmatprep.subr.mxu0 %v12711_v7  ;;  %9275 = vmatpush3.msra.mxu1 %v12485_v43  ;;  %v13307_v43 = vpop.permute.xlu1 %1951 }
 0x30e   : > { %9539 = vmatpush3.msra.mxu0 %v12711_v7  ;;  %9264 = vmatmul.mubr.f32.gmra.mxu1 %v12979_v36  ;;  %v13391_v11 = vadd.f32 %v13307_v43, %v1941_v30  ;;  %v16507_v43 = vld [vmem:[#allocation34_spill] sm:$0xff] }
 0x30f   : > { %9276 = vmatprep.subr.mxu1 %v12499_v61  ;;  %9540 = vmatprep.subr.mxu0 %v12724_v19 }
 0x310   : > { %9266 = vmatprep.mubr.f32.mxu1 %v13062_v59  ;;  %9277 = vmatpush3.msra.mxu1 %v12499_v61  ;;  %v13315_v61 = vpop.permute.xlu0 %1909 }
 0x311   : > { %9484 = vmatmul.mubr.f32.gmra.mxu0 %v12792_v54  ;;  %9278 = vmatprep.subr.mxu1 %v12507_v48 }
 0x312   : > { %9541 = vmatpush3.msra.mxu0 %v12724_v19  ;;  %9486 = vmatprep.mubr.f32.mxu0 %v12818_v6 }
 0x313   : > { %9542 = vmatprep.subr.mxu0 %v12738_v53  ;;  %9279 = vmatpush3.msra.mxu1 %v12507_v48  ;;  %v13327_v48 = vpop.permute.xlu1 %1953 }
 0x314   : > { %9543 = vmatpush3.msra.mxu0 %v12738_v53  ;;  %9267 = vmatmul.mubr.f32.gmra.mxu1 %v13256_v33 }
 0x315   : > { %9280 = vmatprep.subr.mxu1 %v12525_v60  ;;  %9544 = vmatprep.subr.mxu0 %v12746_v58 }
 0x316   : > { %9269 = vmatprep.mubr.f32.mxu1 %v13266_v39  ;;  %9281 = vmatpush3.msra.mxu1 %v12525_v60  ;;  %v13334_v60 = vpop.permute.xlu0 %1887 }
 0x317   : > { %9487 = vmatmul.mubr.f32.gmra.mxu0 %v12831_v45  ;;  %9282 = vmatprep.subr.mxu1 %v12534_v17 }
 0x318   : > { %9545 = vmatpush3.msra.mxu0 %v12746_v58  ;;  %9489 = vmatprep.mubr.f32.mxu0 %v12870_v28 }
 0x319   : > { %9546 = vmatprep.subr.mxu0 %v12759_v18  ;;  %9283 = vmatpush3.msra.mxu1 %v12534_v17  ;;  %v1932_v17 = vpop.permute.xlu1 %1931 }
 0x31a   : > { %9547 = vmatpush3.msra.mxu0 %v12759_v18  ;;  %9270 = vmatmul.mubr.f32.gmra.mxu1 %v13269_v10  ;;  %v13347_v51 = vpop.permute.xlu0 %1889 }
 0x31b   : > { %9284 = vmatprep.subr.mxu1 %v12550_v44  ;;  %9548 = vmatprep.subr.mxu0 %v12768_v62 }
 0x31c   : > { %9285 = vmatpush3.msra.mxu1 %v12550_v44  ;;  %9304 = vmatprep.mubr.f32.mxu1 %v1963_v34  ;;  %v16485_v44 = vld [vmem:[#allocation46_spill] sm:$0xff] }
 0x31d   : > { %9490 = vmatmul.mubr.f32.gmra.mxu0 %v16473_v57  ;;  %9286 = vmatprep.subr.mxu1 %v12560_v8  ;;  %v13357_v63 = vpop.permute.xlu1 %1933  ;;  %v16501_v34 = vld [vmem:[#allocation58_spill] sm:$0xff] }
 0x31e   : > { %9549 = vmatpush3.msra.mxu0 %v12768_v62  ;;  %9568 = vmatprep.mubr.f32.mxu0 %v12471_v31  ;;  %v1912_v26 = vpop.permute.xlu0 %1911 }
 0x31f   : > { %9550 = vmatprep.subr.mxu0 %v12785_v3  ;;  %9287 = vmatpush3.msra.mxu1 %v12560_v8  ;;  %v16487_v8 = vld [vmem:[#allocation31_spill] sm:$0xff] }
 0x320   : > { %9551 = vmatpush3.msra.mxu0 %v12785_v3  ;;  %9288 = vmatprep.subr.mxu1 %v12574_v42 }
 0x321   : > { %9552 = vmatprep.subr.mxu0 %v12797_v0  ;;  %9289 = vmatpush3.msra.mxu1 %v12574_v42  ;;  %v16489_v42 = vld [vmem:[#allocation15_spill] sm:$0xff]  ;;  %v1956_v12 = vpop.permute.xlu1 %1955 }
 0x322   : > { %9553 = vmatpush3.msra.mxu0 %v12797_v0  ;;  %9290 = vmatprep.subr.mxu1 %v16485_v44  ;;  %v1914_v23 = vpop.permute.xlu0 %1913 }
 0x323   : > { %9554 = vmatprep.subr.mxu0 %v16486_v22  ;;  %9291 = vmatpush3.msra.mxu1 %v16485_v44  ;;  %v16502_v44 = vld [vmem:[#allocation54_spill] sm:$0xff] }
 0x324   : > { %9555 = vmatpush3.msra.mxu0 %v16486_v22  ;;  %9292 = vmatprep.subr.mxu1 %v16487_v8 }
 0x325   : > { %9556 = vmatprep.subr.mxu0 %v16488_v24  ;;  %9293 = vmatpush3.msra.mxu1 %v16487_v8  ;;  %v16503_v8 = vld [vmem:[#allocation11_spill] sm:$0xff]  ;;  %v1958_v15 = vpop.permute.xlu1 %1957 }
 0x326   : > { %9557 = vmatpush3.msra.mxu0 %v16488_v24  ;;  %9294 = vmatprep.subr.mxu1 %v16489_v42  ;;  %v13399_v1 = vpop.f32.mrf.mxu1 }
 0x327   : > { %9558 = vmatprep.subr.mxu0 %v16490_v2  ;;  %9295 = vmatpush3.msra.mxu1 %v16489_v42  ;;  %v1895_v42 = vadd.f32 %v13200_v46, %v16503_v8  ;;  %v16506_v46 = vld [vmem:[#allocation40_spill] sm:$0xff] }
 0x328   : > { %9559 = vmatpush3.msra.mxu0 %v16490_v2  ;;  %9296 = vmatprep.subr.mxu1 %v16491_v13 }
 0x329   : > { %9560 = vmatprep.subr.mxu0 %v16492_v27  ;;  %9297 = vmatpush3.msra.mxu1 %v16491_v13  ;;  %v1918_v13 = vadd.f32 %v13226_v32, %v1894_v47  ;;  %v1919_v14 = vadd.f32 %v13297_v35, %v1895_v42  ;;  %v1936_v32 = vpop.permute.xlu0 %1935  ;;  %v16513_v42 = vld [vmem:[#allocation57_spill] sm:$0xff] }
 0x32a   : > { %9561 = vmatpush3.msra.mxu0 %v16492_v27  ;;  %9298 = vmatprep.subr.mxu1 %v16495_v9 }
 0x32b   : > { %9562 = vmatprep.subr.mxu0 %v16496_v29  ;;  %9299 = vmatpush3.msra.mxu1 %v16495_v9  ;;  %v1942_v9 = vadd.f32 %v13291_v52, %v1918_v13  ;;  %v1943_v35 = vadd.f32 %v1932_v17, %v1919_v14  ;;  %v16509_v52 = vld [vmem:[#allocation9_spill] sm:$0xff]  ;;  %v16511_v17 = vld [vmem:[#allocation50_spill] sm:$0xff] }
 0x32c   : > { %9563 = vmatpush3.msra.mxu0 %v16496_v29  ;;  %9300 = vmatprep.subr.mxu1 %v16498_v40  ;;  %v16514_v13 = vld [vmem:[#allocation21_spill] sm:$0xff] }
 0x32d   : > { %9564 = vmatprep.subr.mxu0 %v16499_v50  ;;  %9301 = vmatpush3.msra.mxu1 %v16498_v40  ;;  %v1896_v40 = vadd.f32 %v13276_v37, %v16508_v16  ;;  %v13408_v25 = vadd.f32 %v13327_v48, %v1942_v9  ;;  %v13419_v37 = vpop.f32.mrf.mxu1  ;;  %v1938_v48 = vpop.permute.xlu1 %1937  ;;  %v1898_v14 = vadd.f32 %v13347_v51, %v16514_v13  ;;  %v16523_v13 = vld [vmem:[#allocation20_spill] sm:$0xff] }
 0x32e   : > { %9565 = vmatpush3.msra.mxu0 %v16499_v50  ;;  %9302 = vmatprep.subr.mxu1 %v16501_v34 }
 0x32f   : > { %9566 = vmatprep.subr.mxu0 %v16502_v44  ;;  %9303 = vmatpush3.msra.mxu1 %v16501_v34  ;;  %v1920_v47 = vadd.f32 %v13315_v61, %v1896_v40  ;;  %v13417_v34 = vadd.f32 %v1956_v12, %v1943_v35  ;;  %v16512_v61 = vld [vmem:[#allocation38_spill] sm:$0xff]  ;;  %v1960_v12 = vpop.permute.xlu0 %1959  ;;  %v16517_v35 = vld [vmem:[#allocation56_spill] sm:$0xff] }
 0x330   : > { %9567 = vmatpush3.msra.mxu0 %v16502_v44  ;;  %9305 = vmatmul.mubr.f32.vlgmr.msra.gmra.mxu1 %v16504_v41 }
 0x331   : > { %9316 = vmatprep.subr.mxu1 %v12694_v55  ;;  %9569 = vmatmul.mubr.f32.vlgmr.msra.gmra.mxu0 %v16505_v4  ;;  %v1962_v51 = vpop.permute.xlu1 %1961 }
 0x332   : > { %9624 = vmatprep.subr.mxu0 %v16506_v46  ;;  %9307 = vmatprep.mubr.f32.mxu1 %v13391_v11 }
 0x333   : > { %9317 = vmatpush3.msra.mxu1 %v12694_v55  ;;  %9571 = vmatprep.mubr.f32.mxu0 %v16507_v43  ;;  %v16510_v55 = vld [vmem:[#allocation26_spill] sm:$0xff] }
 0x334   : > { %9625 = vmatpush3.msra.mxu0 %v16506_v46  ;;  %9318 = vmatprep.subr.mxu1 %v12711_v7  ;;  %v1897_v30 = vadd.f32 %v13334_v60, %v16510_v55  ;;  %v13428_v60 = vpop.f32.mrf.mxu1  ;;  %v16519_v55 = vld [vmem:[#allocation42_spill] sm:$0xff] }
 0x335   : > { %9626 = vmatprep.subr.mxu0 %v16509_v52  ;;  %9319 = vmatpush3.msra.mxu1 %v12711_v7  ;;  %v1944_v7 = vadd.f32 %v13357_v63, %v1920_v47  ;;  %v16515_v63 = vld [vmem:[#allocation65_spill] sm:$0xff] }
 0x336   : > { %9627 = vmatpush3.msra.mxu0 %v16509_v52  ;;  %9308 = vmatmul.mubr.f32.gmra.mxu1 %v13408_v25  ;;  %v1921_v8 = vadd.f32 %v1912_v26, %v1897_v30  ;;  %v1922_v26 = vadd.f32 %v1914_v23, %v1898_v14  ;;  %v16518_v23 = vld [vmem:[#allocation4_spill] sm:$0xff]  ;;  %v16524_v14 = vld [vmem:[#allocation6_spill] sm:$0xff] }
 0x337   : > { %9320 = vmatprep.subr.mxu1 %v12724_v19  ;;  %9572 = vmatmul.mubr.f32.gmra.mxu0 %v16511_v17  ;;  %v13434_v16 = vadd.f32 %v1958_v15, %v1944_v7  ;;  %v16516_v15 = vld [vmem:[#allocation37_spill] sm:$0xff]  ;;  %v16522_v7 = vld [vmem:[#allocation24_spill] sm:$0xff] }
 0x338   : > { %9628 = vmatprep.subr.mxu0 %v16512_v61  ;;  %9310 = vmatprep.mubr.f32.mxu1 %v13417_v34  ;;  %v1945_v9 = vadd.f32 %v1936_v32, %v1921_v8  ;;  %v1946_v32 = vadd.f32 %v1938_v48, %v1922_v26  ;;  %v13562_v26 = vld [vmem:[%s16014_s2 + $0x58] sm:$0xff] }
 0x339   : > { %9321 = vmatpush3.msra.mxu1 %v12724_v19  ;;  %9574 = vmatprep.mubr.f32.mxu0 %v16513_v42  ;;  %v13444_v19 = vpop.f32.mrf.mxu1 }
 0x33a   : > { %9629 = vmatpush3.msra.mxu0 %v16512_v61  ;;  %9322 = vmatprep.subr.mxu1 %v12738_v53  ;;  %v13440_v40 = vadd.f32 %v1960_v12, %v1945_v9  ;;  %v13452_v47 = vadd.f32 %v1962_v51, %v1946_v32  ;;  %v16525_v9 = vld [vmem:[#allocation13_spill] sm:$0xff]  ;;  %v13572_v51 = vld [vmem:[%s16014_s2 + $0x50] sm:$0xff] }
 0x33b   : > { %9630 = vmatprep.subr.mxu0 %v16515_v63  ;;  %9323 = vmatpush3.msra.mxu1 %v12738_v53 }
 0x33c   : > { %9631 = vmatpush3.msra.mxu0 %v16515_v63  ;;  %9311 = vmatmul.mubr.f32.gmra.mxu1 %v13434_v16 }
 0x33d   : > { %9324 = vmatprep.subr.mxu1 %v12746_v58  ;;  %9575 = vmatmul.mubr.f32.gmra.mxu0 %v16516_v15 }
 0x33e   : > { %9632 = vmatprep.subr.mxu0 %v16517_v35  ;;  %9313 = vmatprep.mubr.f32.mxu1 %v13440_v40  ;;  %v9048_v53 = vpop.f32.mrf.mxu1 }
 0x33f   : > { %9325 = vmatpush3.msra.mxu1 %v12746_v58  ;;  %9577 = vmatprep.mubr.f32.mxu0 %v16518_v23  ;;  %v16520_v58 = vld [vmem:[#allocation29_spill] sm:$0xff] }
 0x340   : > { %9633 = vmatpush3.msra.mxu0 %v16517_v35  ;;  %9326 = vmatprep.subr.mxu1 %v12759_v18  ;;  %v13458_v30 = vpop.f32.mrf.mxu1 }
 0x341   : > { %9634 = vmatprep.subr.mxu0 %v16519_v55  ;;  %9327 = vmatpush3.msra.mxu1 %v12759_v18  ;;  %v16521_v18 = vld [vmem:[#allocation55_spill] sm:$0xff] }
 0x342   : > { %9635 = vmatpush3.msra.mxu0 %v16519_v55  ;;  %9314 = vmatmul.mubr.f32.gmra.mxu1 %v13452_v47 }
 0x343   : > { %9328 = vmatprep.subr.mxu1 %v12768_v62  ;;  %9578 = vmatmul.mubr.f32.gmra.mxu0 %v16473_v57 }
 0x344   : > { %9636 = vmatprep.subr.mxu0 %v16520_v58  ;;  %9329 = vmatpush3.msra.mxu1 %v12768_v62 }
 0x345   : > { %9348 = vmatprep.mubr.f32.mxu1 %v16504_v41  ;;  %9637 = vmatpush3.msra.mxu0 %v16520_v58  ;;  %v9051_v48 = vpop.f32.mrf.mxu1 }
 0x346   : > { %9656 = vmatprep.mubr.f32.mxu0 %v16505_v4  ;;  %9330 = vmatprep.subr.mxu1 %v12785_v3 }
 0x347   : > { %9638 = vmatprep.subr.mxu0 %v16521_v18  ;;  %9331 = vmatpush3.msra.mxu1 %v12785_v3  ;;  %v2342_v8 = vpop.f32.mrf.mxu1 }
 0x348   : > { %9639 = vmatpush3.msra.mxu0 %v16521_v18  ;;  %9332 = vmatprep.subr.mxu1 %v12797_v0 }
 0x349   : > { %9640 = vmatprep.subr.mxu0 %v16522_v7  ;;  %9333 = vmatpush3.msra.mxu1 %v12797_v0  ;;  %v9086_v62 = vpop.f32.mrf.mxu1 }
 0x34a   : > { %9641 = vmatpush3.msra.mxu0 %v16522_v7  ;;  %9334 = vmatprep.subr.mxu1 %v16486_v22  ;;  %v13479_v12 = vadd.f32 %v9086_v62, %v13399_v1  ;;  %v13603_v62 = vld [vmem:[%s16014_s2 + $0x40] sm:$0xff] }
 0x34b   : > { %9642 = vmatprep.subr.mxu0 %v16523_v13  ;;  %9335 = vmatpush3.msra.mxu1 %v16486_v22  ;;  %v13483_v3 = vpop.f32.mrf.mxu1  ;;  %v16526_v22 = vld [vmem:[#allocation12_spill] sm:$0xff] }
 0x34c   : > { %9643 = vmatpush3.msra.mxu0 %v16523_v13  ;;  %9336 = vmatprep.subr.mxu1 %v16488_v24 }
 0x34d   : > { %9644 = vmatprep.subr.mxu0 %v16524_v14  ;;  %9337 = vmatpush3.msra.mxu1 %v16488_v24  ;;  %v9089_v0 = vpop.f32.mrf.mxu1  ;;  %v16527_v24 = vld [vmem:[#allocation28_spill] sm:$0xff] }
 0x34e   : > { %9645 = vmatpush3.msra.mxu0 %v16524_v14  ;;  %9338 = vmatprep.subr.mxu1 %v16490_v2  ;;  %v13492_v1 = vadd.f32 %v9089_v0, %v13428_v60 }
 0x34f   : > { %9646 = vmatprep.subr.mxu0 %v16525_v9  ;;  %9339 = vmatpush3.msra.mxu1 %v16490_v2  ;;  %v16528_v2 = vld [vmem:[#allocation39_spill] sm:$0xff] }
 0x350   : > { %9647 = vmatpush3.msra.mxu0 %v16525_v9  ;;  %9340 = vmatprep.subr.mxu1 %v16492_v27 }
 0x351   : > { %9648 = vmatprep.subr.mxu0 %v16526_v22  ;;  %9341 = vmatpush3.msra.mxu1 %v16492_v27  ;;  %v16529_v27 = vld [vmem:[#allocation7_spill] sm:$0xff] }
 0x352   : > { %9649 = vmatpush3.msra.mxu0 %v16526_v22  ;;  %9342 = vmatprep.subr.mxu1 %v16496_v29 }
 0x353   : > { %9650 = vmatprep.subr.mxu0 %v16527_v24  ;;  %9343 = vmatpush3.msra.mxu1 %v16496_v29  ;;  %v13520_v29 = vpop.f32.mrf.mxu1 }
 0x354   : > { %9651 = vmatpush3.msra.mxu0 %v16527_v24  ;;  %9344 = vmatprep.subr.mxu1 %v16499_v50 }
 0x355   : > { %9652 = vmatprep.subr.mxu0 %v16528_v2  ;;  %9345 = vmatpush3.msra.mxu1 %v16499_v50  ;;  %v13527_v50 = vld [vmem:[%s16014_s2 + $0x70] sm:$0xff] }
 0x356   : > { %9653 = vmatpush3.msra.mxu0 %v16528_v2  ;;  %9346 = vmatprep.subr.mxu1 %v16502_v44 }
 0x357   : > { %9654 = vmatprep.subr.mxu0 %v16529_v27  ;;  %9347 = vmatpush3.msra.mxu1 %v16502_v44 }
 0x358   : > { %9655 = vmatpush3.msra.mxu0 %v16529_v27  ;;  %9349 = vmatmul.mubr.f32.vlgmr.msra.gmra.mxu1 %v13391_v11 }
 0x359   : > { %9404 = vmatprep.subr.mxu1 %v16506_v46  ;;  %9657 = vmatmul.mubr.f32.vlgmr.msra.gmra.mxu0 %v16507_v43 }
 0x35a   : > { %9712 = vmatprep.subr.mxu0 %v13282_v20  ;;  %9351 = vmatprep.mubr.f32.mxu1 %v13408_v25 }
 0x35b   : > { %9405 = vmatpush3.msra.mxu1 %v16506_v46  ;;  %9659 = vmatprep.mubr.f32.mxu0 %v16511_v17  ;;  %v13538_v46 = vld [vmem:[%s16014_s2 + $0x68] sm:$0xff] }
 0x35c   : > { %9713 = vmatpush3.msra.mxu0 %v13282_v20  ;;  %9406 = vmatprep.subr.mxu1 %v16509_v52 }
 0x35d   : > { %9714 = vmatprep.subr.mxu0 %v13527_v50  ;;  %9407 = vmatpush3.msra.mxu1 %v16509_v52  ;;  %v9092_v44 = vpop.f32.mrf.mxu1  ;;  %v13549_v52 = vld [vmem:[%s16014_s2 + $0x60] sm:$0xff] }
 0x35e   : > { %9715 = vmatpush3.msra.mxu0 %v13527_v50  ;;  %9352 = vmatmul.mubr.f32.gmra.mxu1 %v13417_v34  ;;  %v13712_v44 = vld [vmem:[%s16014_s2 + $0x1e8] sm:$0xff] }
 0x35f   : > { %9408 = vmatprep.subr.mxu1 %v16512_v61  ;;  %9660 = vmatmul.mubr.f32.gmra.mxu0 %v16513_v42  ;;  %v13553_v60 = vpop.f32.mrf.mxu1 }
 0x360   : > { %9716 = vmatprep.subr.mxu0 %v13538_v46  ;;  %9354 = vmatprep.mubr.f32.mxu1 %v13434_v16 }
 0x361   : > { %9409 = vmatpush3.msra.mxu1 %v16512_v61  ;;  %9662 = vmatprep.mubr.f32.mxu0 %v16516_v15 }
 0x362   : > { %9717 = vmatpush3.msra.mxu0 %v13538_v46  ;;  %9410 = vmatprep.subr.mxu1 %v16515_v63 }
 0x363   : > { %9718 = vmatprep.subr.mxu0 %v13549_v52  ;;  %9411 = vmatpush3.msra.mxu1 %v16515_v63 }
 0x364   : > { %9719 = vmatpush3.msra.mxu0 %v13549_v52  ;;  %9355 = vmatmul.mubr.f32.gmra.mxu1 %v13440_v40 }
 0x365   : > { %9412 = vmatprep.subr.mxu1 %v16517_v35  ;;  %9663 = vmatmul.mubr.f32.gmra.mxu0 %v16518_v23  ;;  %v9095_v61 = vpop.f32.mrf.mxu1 }
 0x366   : > { %9720 = vmatprep.subr.mxu0 %v13562_v26  ;;  %9357 = vmatprep.mubr.f32.mxu1 %v13452_v47 }
 0x367   : > { %9413 = vmatpush3.msra.mxu1 %v16517_v35  ;;  %9721 = vmatpush3.msra.mxu0 %v13562_v26  ;;  %v2447_v63 = vpop.f32.mrf.mxu1 }
 0x368   : > { %9414 = vmatprep.subr.mxu1 %v16519_v55  ;;  %9722 = vmatprep.subr.mxu0 %v13572_v51  ;;  %v13726_v63 = vld [vmem:[%s16014_s2 + $0x1e0] sm:$0xff] }
 0x369   : > { %9415 = vmatpush3.msra.mxu1 %v16519_v55  ;;  %9665 = vmatprep.mubr.f32.mxu0 %v16473_v57  ;;  %v9130_v32 = vpop.f32.mrf.mxu1  ;;  %v13589_v55 = vld [vmem:[%s16014_s2 + $0x48] sm:$0xff] }
 0x36a   : > { %9723 = vmatpush3.msra.mxu0 %v13572_v51  ;;  %9358 = vmatmul.mubr.f32.gmra.mxu1 %v16473_v57  ;;  %v13580_v35 = vadd.f32 %v9130_v32, %v13479_v12 }
 0x36b   : > { %9416 = vmatprep.subr.mxu1 %v16520_v58  ;;  %9666 = vmatmul.mubr.f32.gmra.mxu0 %v16473_v57  ;;  %v13584_v53 = vpop.f32.mrf.mxu1 }
 0x36c   : > { %9724 = vmatprep.subr.mxu0 %v13589_v55  ;;  %9417 = vmatpush3.msra.mxu1 %v16520_v58 }
 0x36d   : > { %9436 = vmatprep.mubr.f32.mxu1 %v13391_v11  ;;  %9725 = vmatpush3.msra.mxu0 %v13589_v55  ;;  %v9133_v48 = vpop.f32.mrf.mxu1 }
 0x36e   : > { %9744 = vmatprep.mubr.f32.mxu0 %v12868_v21  ;;  %9418 = vmatprep.subr.mxu1 %v16521_v18  ;;  %v13598_v8 = vadd.f32 %v9133_v48, %v13492_v1  ;;  %v13614_v21 = vld [vmem:[%s16014_s2 + $0x38] sm:$0xff] }
 0x36f   : > { %9726 = vmatprep.subr.mxu0 %v13603_v62  ;;  %9419 = vmatpush3.msra.mxu1 %v16521_v18  ;;  %v13607_v58 = vpop.f32.mrf.mxu1  ;;  %v13623_v18 = vld [vmem:[%s16014_s2 + $0x30] sm:$0xff] }
 0x370   : > { %9727 = vmatpush3.msra.mxu0 %v13603_v62  ;;  %9420 = vmatprep.subr.mxu1 %v16522_v7 }
 0x371   : > { %9728 = vmatprep.subr.mxu0 %v13614_v21  ;;  %9421 = vmatpush3.msra.mxu1 %v16522_v7  ;;  %v9136_v12 = vpop.f32.mrf.mxu1  ;;  %v13634_v7 = vld [vmem:[%s16014_s2 + $0x28] sm:$0xff] }
 0x372   : > { %9729 = vmatpush3.msra.mxu0 %v13614_v21  ;;  %9422 = vmatprep.subr.mxu1 %v16523_v13  ;;  %v13754_v12 = vld [vmem:[%s16014_s2 + $0x1d0] sm:$0xff] }
 0x373   : > { %9730 = vmatprep.subr.mxu0 %v13623_v18  ;;  %9423 = vmatpush3.msra.mxu1 %v16523_v13  ;;  %v13627_v0 = vpop.f32.mrf.mxu1  ;;  %v13643_v13 = vld [vmem:[%s16014_s2 + $0x20] sm:$0xff] }
 0x374   : > { %9731 = vmatpush3.msra.mxu0 %v13623_v18  ;;  %9424 = vmatprep.subr.mxu1 %v16524_v14 }
 0x375   : > { %9732 = vmatprep.subr.mxu0 %v13634_v7  ;;  %9425 = vmatpush3.msra.mxu1 %v16524_v14  ;;  %v9139_v1 = vpop.f32.mrf.mxu1  ;;  %v13652_v14 = vld [vmem:[%s16014_s2 + $0x18] sm:$0xff] }
 0x376   : > { %9733 = vmatpush3.msra.mxu0 %v13634_v7  ;;  %9426 = vmatprep.subr.mxu1 %v16525_v9  ;;  %v13768_v1 = vld [vmem:[%s16014_s2 + $0x1c8] sm:$0xff] }
 0x377   : > { %9734 = vmatprep.subr.mxu0 %v13643_v13  ;;  %9427 = vmatpush3.msra.mxu1 %v16525_v9  ;;  %v13661_v9 = vld [vmem:[%s16014_s2 + $0x10] sm:$0xff] }
 0x378   : > { %9735 = vmatpush3.msra.mxu0 %v13643_v13  ;;  %9428 = vmatprep.subr.mxu1 %v16526_v22 }
 0x379   : > { %9736 = vmatprep.subr.mxu0 %v13652_v14  ;;  %9429 = vmatpush3.msra.mxu1 %v16526_v22  ;;  %v13670_v22 = vld [vmem:[%s16014_s2 + $0x8] sm:$0xff] }
 0x37a   : > { %9737 = vmatpush3.msra.mxu0 %v13652_v14  ;;  %9430 = vmatprep.subr.mxu1 %v16527_v24 }
 0x37b   : > { %9738 = vmatprep.subr.mxu0 %v13661_v9  ;;  %9431 = vmatpush3.msra.mxu1 %v16527_v24  ;;  %v13679_v24 = vld [vmem:[%s16014_s2] sm:$0xff] }
 0x37c   : > { %9739 = vmatpush3.msra.mxu0 %v13661_v9  ;;  %9432 = vmatprep.subr.mxu1 %v16528_v2 }
 0x37d   : > { %9740 = vmatprep.subr.mxu0 %v13670_v22  ;;  %9433 = vmatpush3.msra.mxu1 %v16528_v2  ;;  %v13690_v2 = vld [vmem:[%s16014_s2 + $0x1f8] sm:$0xff] }
 0x37e   : > { %9741 = vmatpush3.msra.mxu0 %v13670_v22  ;;  %9434 = vmatprep.subr.mxu1 %v16529_v27 }
 0x37f   : > { %9742 = vmatprep.subr.mxu0 %v13679_v24  ;;  %9435 = vmatpush3.msra.mxu1 %v16529_v27  ;;  %v13701_v27 = vld [vmem:[%s16014_s2 + $0x1f0] sm:$0xff] }
 0x380   : > { %9743 = vmatpush3.msra.mxu0 %v13679_v24  ;;  %9437 = vmatmul.mubr.f32.vlgmr.msra.gmra.mxu1 %v13408_v25 }
 0x381   : > { %9492 = vmatprep.subr.mxu1 %v13282_v20  ;;  %9745 = vmatmul.mubr.f32.vlgmr.msra.gmra.mxu0 %v12923_v56 }
 0x382   : > { %9800 = vmatprep.subr.mxu0 %v13690_v2  ;;  %9439 = vmatprep.mubr.f32.mxu1 %v13417_v34 }
 0x383   : > { %9493 = vmatpush3.msra.mxu1 %v13282_v20  ;;  %9747 = vmatprep.mubr.f32.mxu0 %v12960_v5  ;;  %v2577_v20 = vpop.f32.mrf.mxu1 }
 0x384   : > { %9801 = vmatpush3.msra.mxu0 %v13690_v2  ;;  %9494 = vmatprep.subr.mxu1 %v13527_v50 }
 0x385   : > { %9802 = vmatprep.subr.mxu0 %v13701_v27  ;;  %9495 = vmatpush3.msra.mxu1 %v13527_v50 }
 0x386   : > { %9803 = vmatpush3.msra.mxu0 %v13701_v27  ;;  %9440 = vmatmul.mubr.f32.gmra.mxu1 %v13434_v16 }
 0x387   : > { %9496 = vmatprep.subr.mxu1 %v13538_v46  ;;  %9748 = vmatmul.mubr.f32.gmra.mxu0 %v12979_v36 }
 0x388   : > { %9804 = vmatprep.subr.mxu0 %v13712_v44  ;;  %9442 = vmatprep.mubr.f32.mxu1 %v13440_v40 }
 0x389   : > { %9497 = vmatpush3.msra.mxu1 %v13538_v46  ;;  %9750 = vmatprep.mubr.f32.mxu0 %v13062_v59  ;;  %v9174_v50 = vpop.f32.mrf.mxu1 }
 0x38a   : > { %9805 = vmatpush3.msra.mxu0 %v13712_v44  ;;  %9498 = vmatprep.subr.mxu1 %v13549_v52  ;;  %v13721_v61 = vadd.f32 %v9174_v50, %v13580_v35  ;;  %v13739_v35 = vld [vmem:[%s16014_s2 + $0x1d8] sm:$0xff]  ;;  %v13779_v50 = vld [vmem:[%s16014_s2 + $0x1c0] sm:$0xff] }
 0x38b   : > { %9806 = vmatprep.subr.mxu0 %v13726_v63  ;;  %9499 = vmatpush3.msra.mxu1 %v13549_v52  ;;  %v13730_v46 = vpop.f32.mrf.mxu1 }
 0x38c   : > { %9807 = vmatpush3.msra.mxu0 %v13726_v63  ;;  %9443 = vmatmul.mubr.f32.gmra.mxu1 %v13452_v47 }
 0x38d   : > { %9500 = vmatprep.subr.mxu1 %v13562_v26  ;;  %9751 = vmatmul.mubr.f32.gmra.mxu0 %v13256_v33  ;;  %v9177_v32 = vpop.f32.mrf.mxu1 }
 0x38e   : > { %9808 = vmatprep.subr.mxu0 %v13739_v35  ;;  %9501 = vmatpush3.msra.mxu1 %v13562_v26  ;;  %v13744_v52 = vadd.f32 %v9177_v32, %v13598_v8 }
 0x38f   : > { %9753 = vmatprep.mubr.f32.mxu0 %v13266_v39  ;;  %9809 = vmatpush3.msra.mxu0 %v13739_v35  ;;  %v13748_v48 = vpop.f32.mrf.mxu1 }
 0x390   : > { %9502 = vmatprep.subr.mxu1 %v13572_v51  ;;  %9810 = vmatprep.subr.mxu0 %v13754_v12 }
 0x391   : > { %9445 = vmatprep.mubr.f32.mxu1 %v16473_v57  ;;  %9503 = vmatpush3.msra.mxu1 %v13572_v51  ;;  %v9180_v26 = vpop.f32.mrf.mxu1  ;;  %v16530_v51 = vld [vmem:[#allocation49_spill] sm:$0xff] }
 0x392   : > { %9811 = vmatpush3.msra.mxu0 %v13754_v12  ;;  %9446 = vmatmul.mubr.f32.gmra.mxu1 %v16473_v57  ;;  %v2428_v26 = vadd.f32 %v13520_v29, %v13444_v19  ;;  %v2438_v19 = vadd.f32 %v13553_v60, %v13458_v30 }
 0x393   : > { %9504 = vmatprep.subr.mxu1 %v13589_v55  ;;  %9754 = vmatmul.mubr.f32.gmra.mxu0 %v13269_v10  ;;  %v13763_v8 = vpop.f32.mrf.mxu1 }
 0x394   : > { %9812 = vmatprep.subr.mxu0 %v13768_v1  ;;  %9505 = vmatpush3.msra.mxu1 %v13589_v55  ;;  %v13788_v55 = vld [vmem:[%s16014_s2 + $0x1b8] sm:$0xff] }
 0x395   : > { %9524 = vmatprep.mubr.f32.mxu1 %v16530_v51  ;;  %9813 = vmatpush3.msra.mxu0 %v13768_v1  ;;  %v9183_v20 = vpop.f32.mrf.mxu1 }
 0x396   : > { %9832 = vmatprep.mubr.f32.mxu0 %v13391_v11  ;;  %9506 = vmatprep.subr.mxu1 %v13603_v62  ;;  %v10907_v20 = vld [vmem:[%s16014_s2 + $0x98] sm:$0xff] }
 0x397   : > { %9814 = vmatprep.subr.mxu0 %v13779_v50  ;;  %9507 = vmatpush3.msra.mxu1 %v13603_v62  ;;  %v13797_v62 = vld [vmem:[%s16014_s2 + $0x1b0] sm:$0xff]  ;;  %v2715_v32 = vpop.f32.mrf.mxu1 }
 0x398   : > { %9815 = vmatpush3.msra.mxu0 %v13779_v50  ;;  %9508 = vmatprep.subr.mxu1 %v13614_v21 }
 0x399   : > { %9816 = vmatprep.subr.mxu0 %v13788_v55  ;;  %9509 = vmatpush3.msra.mxu1 %v13614_v21  ;;  %v13806_v21 = vld [vmem:[%s16014_s2 + $0x1a8] sm:$0xff] }
 0x39a   : > { %9817 = vmatpush3.msra.mxu0 %v13788_v55  ;;  %9510 = vmatprep.subr.mxu1 %v13623_v18 }
 0x39b   : > { %9818 = vmatprep.subr.mxu0 %v13797_v62  ;;  %9511 = vmatpush3.msra.mxu1 %v13623_v18  ;;  %v13815_v18 = vld [vmem:[%s16014_s2 + $0x1a0] sm:$0xff] }
 0x39c   : > { %9819 = vmatpush3.msra.mxu0 %v13797_v62  ;;  %9512 = vmatprep.subr.mxu1 %v13634_v7 }
 0x39d   : > { %9820 = vmatprep.subr.mxu0 %v13806_v21  ;;  %9513 = vmatpush3.msra.mxu1 %v13634_v7  ;;  %v13824_v7 = vld [vmem:[%s16014_s2 + $0x198] sm:$0xff] }
 0x39e   : > { %9821 = vmatpush3.msra.mxu0 %v13806_v21  ;;  %9514 = vmatprep.subr.mxu1 %v13643_v13 }
 0x39f   : > { %9822 = vmatprep.subr.mxu0 %v13815_v18  ;;  %9515 = vmatpush3.msra.mxu1 %v13643_v13  ;;  %v13833_v13 = vld [vmem:[%s16014_s2 + $0x190] sm:$0xff] }
 0x3a0   : > { %9823 = vmatpush3.msra.mxu0 %v13815_v18  ;;  %9516 = vmatprep.subr.mxu1 %v13652_v14 }
 0x3a1   : > { %9824 = vmatprep.subr.mxu0 %v13824_v7  ;;  %9517 = vmatpush3.msra.mxu1 %v13652_v14  ;;  %v13842_v14 = vld [vmem:[%s16014_s2 + $0x188] sm:$0xff] }
 0x3a2   : > { %9825 = vmatpush3.msra.mxu0 %v13824_v7  ;;  %9518 = vmatprep.subr.mxu1 %v13661_v9 }
 0x3a3   : > { %9826 = vmatprep.subr.mxu0 %v13833_v13  ;;  %9519 = vmatpush3.msra.mxu1 %v13661_v9  ;;  %v13851_v9 = vld [vmem:[%s16014_s2 + $0x180] sm:$0xff] }
 0x3a4   : > { %9827 = vmatpush3.msra.mxu0 %v13833_v13  ;;  %9520 = vmatprep.subr.mxu1 %v13670_v22 }
 0x3a5   : > { %9828 = vmatprep.subr.mxu0 %v13842_v14  ;;  %9521 = vmatpush3.msra.mxu1 %v13670_v22 }
 0x3a6   : > { %9829 = vmatpush3.msra.mxu0 %v13842_v14  ;;  %9522 = vmatprep.subr.mxu1 %v13679_v24 }
 0x3a7   : > { %9830 = vmatprep.subr.mxu0 %v13851_v9  ;;  %9523 = vmatpush3.msra.mxu1 %v13679_v24  ;;  %v2588_v24 = vadd.f32 %v13607_v58, %v2428_v26  ;;  %v10916_v26 = vld [vmem:[%s16014_s2 + $0x150] sm:$0xff] }
 0x3a8   : > { %9831 = vmatpush3.msra.mxu0 %v13851_v9  ;;  %9525 = vmatmul.mubr.f32.vlgmr.msra.gmra.mxu1 %v12471_v31 }
 0x3a9   : > { %9580 = vmatprep.subr.mxu1 %v13690_v2  ;;  %9833 = vmatmul.mubr.f32.vlgmr.msra.gmra.mxu0 %v13408_v25  ;;  %v9218_v22 = vpop.f32.mrf.mxu1  ;;  %v2726_v29 = vadd.f32 %v13748_v48, %v2588_v24  ;;  %v10904_v48 = vld [vmem:[%s16014_s2 + $0xb0] sm:$0xff] }
 0x3aa   : > { %9527 = vmatprep.mubr.f32.mxu1 %v16505_v4  ;;  %9581 = vmatpush3.msra.mxu1 %v13690_v2  ;;  %v13864_v51 = vadd.f32 %v9218_v22, %v13721_v61  ;;  %v2590_v2 = vadd.f32 %v13627_v0, %v2438_v19  ;;  %v10918_v19 = vld [vmem:[%s16014_s2 + $0x140] sm:$0xff] }
 0x3ab   : > { %9835 = vmatprep.mubr.f32.mxu0 %v13417_v34  ;;  %9582 = vmatprep.subr.mxu1 %v13701_v27  ;;  %v13868_v31 = vpop.f32.mrf.mxu1 }
 0x3ac   : > { %9583 = vmatpush3.msra.mxu1 %v13701_v27  ;;  %9888 = vmatprep.subr.mxu0 %v16473_v57 }
 0x3ad   : > { %9528 = vmatmul.mubr.f32.gmra.mxu1 %v16507_v43  ;;  %9584 = vmatprep.subr.mxu1 %v13712_v44  ;;  %v9221_v4 = vpop.f32.mrf.mxu1 }
 0x3ae   : > { %9836 = vmatmul.mubr.f32.gmra.mxu0 %v13434_v16  ;;  %9530 = vmatprep.mubr.f32.mxu1 %v16511_v17  ;;  %v13881_v58 = vadd.f32 %v9221_v4, %v13744_v52  ;;  %v2728_v17 = vadd.f32 %v13763_v8, %v2590_v2  ;;  %v10903_v52 = vld [vmem:[%s16014_s2 + $0xb8] sm:$0xff]  ;;  %v10906_v8 = vld [vmem:[%s16014_s2 + $0xa0] sm:$0xff] }
 0x3af   : > { %9585 = vmatpush3.msra.mxu1 %v13712_v44  ;;  %9838 = vmatprep.mubr.f32.mxu0 %v13440_v40  ;;  %v2833_v43 = vpop.f32.mrf.mxu1 }
 0x3b0   : > { %9586 = vmatprep.subr.mxu1 %v13726_v63  ;;  %v13887_v27 = vadd.f32 %v2833_v43, %v2726_v29  ;;  %v10919_v43 = vld [vmem:[%s16014_s2 + $0x138] sm:$0xff] }
 0x3b1   : > { %9587 = vmatpush3.msra.mxu1 %v13726_v63  ;;  %v9224_v30 = vpop.f32.mrf.mxu1  ;;  %v10902_v63 = vld [vmem:[%s16014_s2 + $0xc0] sm:$0xff] }
 0x3b2   : > { %9531 = vmatmul.mubr.f32.gmra.mxu1 %v16513_v42  ;;  %9588 = vmatprep.subr.mxu1 %v13739_v35 }
 0x3b3   : > { %9839 = vmatmul.mubr.f32.gmra.mxu0 %v13452_v47  ;;  %9533 = vmatprep.mubr.f32.mxu1 %v16516_v15  ;;  %v2843_v60 = vpop.f32.mrf.mxu1  ;;  %v10896_v15 = vld [vmem:[%s16014_s2 + $0xf0] sm:$0xff] }
 0x3b4   : > { %9589 = vmatpush3.msra.mxu1 %v13739_v35  ;;  %v13896_v0 = vadd.f32 %v2843_v60, %v2728_v17  ;;  %9841 = vmatprep.mubr.f32.mxu0 %v16473_v57  ;;  %v10921_v17 = vld [vmem:[%s16014_s2 + $0x128] sm:$0xff] }
 0x3b5   : > { %9590 = vmatprep.subr.mxu1 %v13754_v12  ;;  %v9227_v44 = vpop.f32.mrf.mxu1 }
 0x3b6   : > { %9591 = vmatpush3.msra.mxu1 %v13754_v12  ;;  %v10905_v12 = vld [vmem:[%s16014_s2 + $0xa8] sm:$0xff]  ;;  %v10922_v44 = vld [vmem:[%s16014_s2 + $0x120] sm:$0xff] }
 0x3b7   : > { %9534 = vmatmul.mubr.f32.gmra.mxu1 %v16518_v23  ;;  %9592 = vmatprep.subr.mxu1 %v13768_v1  ;;  %v2853_v42 = vpop.f32.mrf.mxu1 }
 0x3b8   : > { %9593 = vmatpush3.msra.mxu1 %v13768_v1  ;;  %9612 = vmatprep.mubr.f32.mxu1 %v12689_v38  ;;  %v10895_v38 = vld [vmem:[%s16014_s2 + $0xf8] sm:$0xff] }
 0x3b9   : > { %9594 = vmatprep.subr.mxu1 %v13779_v50  ;;  %9842 = vmatmul.mubr.f32.gmra.mxu0 %v16473_v57 }
 0x3ba   : > { %9595 = vmatpush3.msra.mxu1 %v13779_v50  ;;  %v10908_v50 = vld [vmem:[%s16014_s2 + $0x90] sm:$0xff]  ;;  %9920 = vmatprep.mubr.msk.f32.mxu0 %vm10956_vm3, %v16473_v57 }
 0x3bb   : > { %9596 = vmatprep.subr.mxu1 %v13788_v55 }
 0x3bc   : > { %9597 = vmatpush3.msra.mxu1 %v13788_v55 }
 0x3bd   : > { %9598 = vmatprep.subr.mxu1 %v13797_v62 }
 0x3be   : > { %9599 = vmatpush3.msra.mxu1 %v13797_v62  ;;  %v10909_v62 = vld [vmem:[%s16014_s2 + $0x88] sm:$0xff] }
 0x3bf   : > { %9600 = vmatprep.subr.mxu1 %v13806_v21 }
 0x3c0   : > { %9601 = vmatpush3.msra.mxu1 %v13806_v21  ;;  %v10910_v21 = vld [vmem:[%s16014_s2 + $0x80] sm:$0xff] }
 0x3c1   : > { %9602 = vmatprep.subr.mxu1 %v13815_v18 }
 0x3c2   : > { %9603 = vmatpush3.msra.mxu1 %v13815_v18 }
 0x3c3   : > { %9604 = vmatprep.subr.mxu1 %v13824_v7 }
 0x3c4   : > { %9605 = vmatpush3.msra.mxu1 %v13824_v7  ;;  %v10911_v7 = vld [vmem:[%s16014_s2 + $0x178] sm:$0xff] }
 0x3c5   : > { %9606 = vmatprep.subr.mxu1 %v13833_v13 }
 0x3c6   : > { %9607 = vmatpush3.msra.mxu1 %v13833_v13  ;;  %v10912_v13 = vld [vmem:[%s16014_s2 + $0x170] sm:$0xff] }
 0x3c7   : > { %9608 = vmatprep.subr.mxu1 %v13842_v14 }
 0x3c8   : > { %9609 = vmatpush3.msra.mxu1 %v13842_v14 }
 0x3c9   : > { %9610 = vmatprep.subr.mxu1 %v13851_v9  ;;  %v13940_v23 = vpop.f32.mrf.mxu1 }
 0x3ca   : > { %9611 = vmatpush3.msra.mxu1 %v13851_v9 }
 0x3cb   : > { %9613 = vmatmul.mubr.f32.vlgmr.msra.gmra.mxu1 %v12719_v49  ;;  %9668 = vmatprep.subr.mxu1 %v10895_v38  ;;  %v10897_v49 = vld [vmem:[%s16014_s2 + $0xe8] sm:$0xff]  ;;  %v2972_v61 = vpop.f32.mrf.mxu1 }
 0x3cc   : > { %9615 = vmatprep.mubr.f32.mxu1 %v12792_v54  ;;  %9669 = vmatpush3.msra.mxu1 %v10895_v38  ;;  %v10898_v54 = vld [vmem:[%s16014_s2 + $0xe0] sm:$0xff]  ;;  %v10923_v38 = vld [vmem:[%s16014_s2 + $0x118] sm:$0xff] }
 0x3cd   : > { %9670 = vmatprep.subr.mxu1 %v10896_v15 }
 0x3ce   : > { %9671 = vmatpush3.msra.mxu1 %v10896_v15  ;;  %v9265_v35 = vpop.f32.mrf.mxu1 }
 0x3cf   : > { %9616 = vmatmul.mubr.f32.gmra.mxu1 %v12818_v6  ;;  %9672 = vmatprep.subr.mxu1 %v10897_v49  ;;  %v10899_v6 = vld [vmem:[%s16014_s2 + $0xd8] sm:$0xff] }
 0x3d0   : > { %9618 = vmatprep.mubr.f32.mxu1 %v12831_v45  ;;  %9673 = vmatpush3.msra.mxu1 %v10897_v49  ;;  %v10900_v45 = vld [vmem:[%s16014_s2 + $0xd0] sm:$0xff] }
 0x3d1   : > { %9674 = vmatprep.subr.mxu1 %v10898_v54  ;;  %v10924_v49 = vld [vmem:[%s16014_s2 + $0x110] sm:$0xff] }
 0x3d2   : > { %9675 = vmatpush3.msra.mxu1 %v10898_v54  ;;  %v10925_v54 = vld [vmem:[%s16014_s2 + $0x108] sm:$0xff] }
 0x3d3   : > { %9619 = vmatmul.mubr.f32.gmra.mxu1 %v12870_v28  ;;  %9676 = vmatprep.subr.mxu1 %v10899_v6  ;;  %v10901_v28 = vld [vmem:[%s16014_s2 + $0xc8] sm:$0xff] }
 0x3d4   : > { %9677 = vmatpush3.msra.mxu1 %v10899_v6  ;;  %9621 = vmatprep.mubr.f32.mxu1 %v16473_v57  ;;  %v10927_v6 = vld [vmem:[%s16014_s2 + $0x278] sm:$0xff] }
 0x3d5   : > { %9678 = vmatprep.subr.mxu1 %v10900_v45 }
 0x3d6   : > { %9679 = vmatpush3.msra.mxu1 %v10900_v45  ;;  %v10928_v45 = vld [vmem:[%s16014_s2 + $0x270] sm:$0xff] }
 0x3d7   : > { %9622 = vmatmul.mubr.f32.gmra.mxu1 %v16473_v57  ;;  %9680 = vmatprep.subr.mxu1 %v10901_v28 }
 0x3d8   : > { %9681 = vmatpush3.msra.mxu1 %v10901_v28  ;;  %9700 = vmatprep.mubr.f32.mxu1 %v16504_v41  ;;  %v2982_v41 = vpop.f32.mrf.mxu1  ;;  %v10930_v28 = vld [vmem:[%s16014_s2 + $0x260] sm:$0xff] }
 0x3d9   : > { %9682 = vmatprep.subr.mxu1 %v10902_v63 }
 0x3da   : > { %9683 = vmatpush3.msra.mxu1 %v10902_v63  ;;  %v9268_v1 = vpop.f32.mrf.mxu1  ;;  %v10931_v63 = vld [vmem:[%s16014_s2 + $0x258] sm:$0xff] }
 0x3db   : > { %9684 = vmatprep.subr.mxu1 %v10903_v52  ;;  %v10935_v1 = vld [vmem:[%s16014_s2 + $0x238] sm:$0xff] }
 0x3dc   : > { %9685 = vmatpush3.msra.mxu1 %v10903_v52  ;;  %v2992_v55 = vpop.f32.mrf.mxu1  ;;  %v10933_v52 = vld [vmem:[%s16014_s2 + $0x248] sm:$0xff] }
 0x3dd   : > { %9686 = vmatprep.subr.mxu1 %v10904_v48 }
 0x3de   : > { %9687 = vmatpush3.msra.mxu1 %v10904_v48  ;;  %v9271_v18 = vpop.f32.mrf.mxu1 }
 0x3df   : > { %9688 = vmatprep.subr.mxu1 %v10905_v12  ;;  %v10938_v18 = vld [vmem:[%s16014_s2 + $0x220] sm:$0xff] }
 0x3e0   : > { %9689 = vmatpush3.msra.mxu1 %v10905_v12  ;;  %v3002_v14 = vpop.f32.mrf.mxu1 }
 0x3e1   : > { %9690 = vmatprep.subr.mxu1 %v10906_v8 }
 0x3e2   : > { %9691 = vmatpush3.msra.mxu1 %v10906_v8 }
 0x3e3   : > { %9692 = vmatprep.subr.mxu1 %v10907_v20 }
 0x3e4   : > { %9693 = vmatpush3.msra.mxu1 %v10907_v20 }
 0x3e5   : > { %9694 = vmatprep.subr.mxu1 %v10908_v50 }
 0x3e6   : > { %9695 = vmatpush3.msra.mxu1 %v10908_v50 }
 0x3e7   : > { %9696 = vmatprep.subr.mxu1 %v10909_v62 }
 0x3e8   : > { %9697 = vmatpush3.msra.mxu1 %v10909_v62 }
 0x3e9   : > { %9698 = vmatprep.subr.mxu1 %v10910_v21 }
 0x3ea   : > { %9699 = vmatpush3.msra.mxu1 %v10910_v21 }
 0x3eb   : > { %9701 = vmatmul.mubr.f32.vlgmr.msra.gmra.mxu1 %v13391_v11  ;;  %9756 = vmatprep.subr.mxu1 %v10911_v7  ;;  %v10913_v11 = vld [vmem:[%s16014_s2 + $0x168] sm:$0xff] }
 0x3ec   : > { %9703 = vmatprep.mubr.f32.mxu1 %v13408_v25  ;;  %9757 = vmatpush3.msra.mxu1 %v10911_v7  ;;  %v10914_v25 = vld [vmem:[%s16014_s2 + $0x160] sm:$0xff] }
 0x3ed   : > { %9758 = vmatprep.subr.mxu1 %v10912_v13 }
 0x3ee   : > { %9759 = vmatpush3.msra.mxu1 %v10912_v13  ;;  %v10939_v13 = vld [vmem:[%s16014_s2 + $0x218] sm:$0xff] }
 0x3ef   : > { %9704 = vmatmul.mubr.f32.gmra.mxu1 %v13417_v34  ;;  %9760 = vmatprep.subr.mxu1 %v10913_v11  ;;  %v10915_v34 = vld [vmem:[%s16014_s2 + $0x158] sm:$0xff] }
 0x3f0   : > { %9706 = vmatprep.mubr.f32.mxu1 %v13434_v16  ;;  %9761 = vmatpush3.msra.mxu1 %v10913_v11  ;;  %v9306_v9 = vpop.f32.mrf.mxu1  ;;  %v10940_v11 = vld [vmem:[%s16014_s2 + $0x210] sm:$0xff] }
 0x3f1   : > { %9762 = vmatprep.subr.mxu1 %v10914_v25  ;;  %v13999_v32 = vadd.f32 %v9306_v9, %v13940_v23  ;;  %v10926_v23 = vld [vmem:[%s16014_s2 + $0x100] sm:$0xff] }
 0x3f2   : > { %9763 = vmatpush3.msra.mxu1 %v10914_v25  ;;  %v3077_v22 = vpop.f32.mrf.mxu1  ;;  %v10941_v25 = vld [vmem:[%s16014_s2 + $0x208] sm:$0xff] }
 0x3f3   : > { %9707 = vmatmul.mubr.f32.gmra.mxu1 %v13440_v40  ;;  %9764 = vmatprep.subr.mxu1 %v10915_v34  ;;  %v14005_v16 = vadd.f32 %v3077_v22, %v2972_v61  ;;  %v10917_v40 = vld [vmem:[%s16014_s2 + $0x148] sm:$0xff]  ;;  %v10942_v22 = vld [vmem:[%s16014_s2 + $0x200] sm:$0xff] }
 0x3f4   : > { %9709 = vmatprep.mubr.f32.mxu1 %v13452_v47  ;;  %9765 = vmatpush3.msra.mxu1 %v10915_v34  ;;  %v10929_v61 = vld [vmem:[%s16014_s2 + $0x268] sm:$0xff] }
 0x3f5   : > { %9766 = vmatprep.subr.mxu1 %v10916_v26 }
 0x3f6   : > { %9767 = vmatpush3.msra.mxu1 %v10916_v26  ;;  %v9309_v24 = vpop.f32.mrf.mxu1  ;;  %v2418_v26 = vadd.f32 %v13483_v3, %v13419_v37 }
 0x3f7   : > { %9710 = vmatmul.mubr.f32.gmra.mxu1 %v16473_v57  ;;  %9768 = vmatprep.subr.mxu1 %v10917_v40  ;;  %v14015_v4 = vadd.f32 %v9309_v24, %v9265_v35  ;;  %v10932_v35 = vld [vmem:[%s16014_s2 + $0x250] sm:$0xff]  ;;  %v9394_v24 = vpop.f32.mrf.mxu0 }
 0x3f8   : > { %9769 = vmatpush3.msra.mxu1 %v10917_v40  ;;  %9788 = vmatprep.mubr.f32.mxu1 %v12923_v56  ;;  %v3087_v47 = vpop.f32.mrf.mxu1  ;;  %v10920_v56 = vld [vmem:[%s16014_s2 + $0x130] sm:$0xff] }
 0x3f9   : > { %9770 = vmatprep.subr.mxu1 %v10918_v19  ;;  %v14021_v29 = vadd.f32 %v3087_v47, %v2982_v41  ;;  %v10934_v41 = vld [vmem:[%s16014_s2 + $0x240] sm:$0xff] }
 0x3fa   : > { %9771 = vmatpush3.msra.mxu1 %v10918_v19 }
 0x3fb   : > { %9772 = vmatprep.subr.mxu1 %v10919_v43 }
 0x3fc   : > { %9773 = vmatpush3.msra.mxu1 %v10919_v43  ;;  %v9312_v2 = vpop.f32.mrf.mxu1 }
 0x3fd   : > { %9774 = vmatprep.subr.mxu1 %v10920_v56 }
 0x3fe   : > { %9775 = vmatpush3.msra.mxu1 %v10920_v56  ;;  %v3097_v30 = vpop.f32.mrf.mxu1 }
 0x3ff   : > { %9776 = vmatprep.subr.mxu1 %v10921_v17  ;;  %v14032_v60 = vadd.f32 %v3097_v30, %v2992_v55  ;;  %v10937_v55 = vld [vmem:[%s16014_s2 + $0x228] sm:$0xff] }
 0x400   : > { %9777 = vmatpush3.msra.mxu1 %v10921_v17 }
 0x401   : > { %9778 = vmatprep.subr.mxu1 %v10922_v44 }
 0x402   : > { %9779 = vmatpush3.msra.mxu1 %v10922_v44  ;;  %v9315_v42 = vpop.f32.mrf.mxu1 }
 0x403   : > { %9780 = vmatprep.subr.mxu1 %v10923_v38 }
 0x404   : > { %9781 = vmatpush3.msra.mxu1 %v10923_v38  ;;  %v3107_v15 = vpop.f32.mrf.mxu1 }
 0x405   : > { %9782 = vmatprep.subr.mxu1 %v10924_v49 }
 0x406   : > { %9783 = vmatpush3.msra.mxu1 %v10924_v49 }
 0x407   : > { %9784 = vmatprep.subr.mxu1 %v10925_v54 }
 0x408   : > { %9785 = vmatpush3.msra.mxu1 %v10925_v54 }
 0x409   : > { %9786 = vmatprep.subr.mxu1 %v10926_v23 }
 0x40a   : > { %9787 = vmatpush3.msra.mxu1 %v10926_v23 }
 0x40b   : > { %9789 = vmatmul.mubr.f32.vlgmr.msra.gmra.mxu1 %v12960_v5  ;;  %9844 = vmatprep.subr.mxu1 %v10927_v6 }
 0x40c   : > { %9791 = vmatprep.mubr.f32.mxu1 %v12979_v36  ;;  %9845 = vmatpush3.msra.mxu1 %v10927_v6 }
 0x40d   : > { %9846 = vmatprep.subr.mxu1 %v10928_v45 }
 0x40e   : > { %9847 = vmatpush3.msra.mxu1 %v10928_v45 }
 0x40f   : > { %9792 = vmatmul.mubr.f32.gmra.mxu1 %v13062_v59  ;;  %9848 = vmatprep.subr.mxu1 %v10929_v61 }
 0x410   : > { %9794 = vmatprep.mubr.f32.mxu1 %v13256_v33  ;;  %9849 = vmatpush3.msra.mxu1 %v10929_v61 }
 0x411   : > { %9850 = vmatprep.subr.mxu1 %v10930_v28 }
 0x412   : > { %9851 = vmatpush3.msra.mxu1 %v10930_v28 }
 0x413   : > { %9795 = vmatmul.mubr.f32.gmra.mxu1 %v13266_v39  ;;  %9852 = vmatprep.subr.mxu1 %v10931_v63 }
 0x414   : > { %9797 = vmatprep.mubr.f32.mxu1 %v13269_v10  ;;  %9853 = vmatpush3.msra.mxu1 %v10931_v63 }
 0x415   : > { %9854 = vmatprep.subr.mxu1 %v10932_v35 }
 0x416   : > { %9855 = vmatpush3.msra.mxu1 %v10932_v35 }
 0x417   : > { %9798 = vmatmul.mubr.f32.gmra.mxu1 %v16473_v57  ;;  %9856 = vmatprep.subr.mxu1 %v10933_v52 }
 0x418   : > { %9857 = vmatpush3.msra.mxu1 %v10933_v52  ;;  %9876 = vmatprep.mubr.f32.mxu1 %v12960_v5  ;;  %v9350_v48 = vpop.f32.mrf.mxu1  ;;  %v10936_v5 = vld [vmem:[%s16014_s2 + $0x230] sm:$0xff] }
 0x419   : > { %9858 = vmatprep.subr.mxu1 %v10934_v41  ;;  %v3230_v12 = vadd.f32 %v9350_v48, %v13999_v32 }
 0x41a   : > { %9859 = vmatpush3.msra.mxu1 %v10934_v41  ;;  %v3190_v8 = vpop.f32.mrf.mxu1 }
 0x41b   : > { %9860 = vmatprep.subr.mxu1 %v10935_v1  ;;  %v3229_v20 = vadd.f32 %v3190_v8, %v14005_v16 }
 0x41c   : > { %9861 = vmatpush3.msra.mxu1 %v10935_v1 }
 0x41d   : > { %9862 = vmatprep.subr.mxu1 %v10936_v5 }
 0x41e   : > { %9863 = vmatpush3.msra.mxu1 %v10936_v5  ;;  %v9353_v50 = vpop.f32.mrf.mxu1 }
 0x41f   : > { %9864 = vmatprep.subr.mxu1 %v10937_v55  ;;  %v3232_v62 = vadd.f32 %v9353_v50, %v14015_v4 }
 0x420   : > { %9865 = vmatpush3.msra.mxu1 %v10937_v55  ;;  %v3200_v21 = vpop.f32.mrf.mxu1 }
 0x421   : > { %9866 = vmatprep.subr.mxu1 %v10938_v18  ;;  %v3231_v7 = vadd.f32 %v3200_v21, %v14021_v29 }
 0x422   : > { %9867 = vmatpush3.msra.mxu1 %v10938_v18 }
 0x423   : > { %9868 = vmatprep.subr.mxu1 %v10939_v13 }
 0x424   : > { %9869 = vmatpush3.msra.mxu1 %v10939_v13  ;;  %v9356_v14 = vpop.f32.mrf.mxu1 }
 0x425   : > { %9870 = vmatprep.subr.mxu1 %v10940_v11 }
 0x426   : > { %9871 = vmatpush3.msra.mxu1 %v10940_v11  ;;  %v3210_v9 = vpop.f32.mrf.mxu1 }
 0x427   : > { %9872 = vmatprep.subr.mxu1 %v10941_v25  ;;  %v3233_v32 = vadd.f32 %v3210_v9, %v14032_v60  ;;  %v7349_v9 = vld [vmem:[%s16015_s3 + $0xf8] sm:$0xff] }
 0x428   : > { %9873 = vmatpush3.msra.mxu1 %v10941_v25  ;;  %v7348_v25 = vld [vmem:[%s16015_s3 + $0xf0] sm:$0xff]  ;;  %9889 = vmatpush3.msra.mxu0 %v7349_v9 }
 0x429   : > { %9874 = vmatprep.subr.mxu1 %v10942_v22  ;;  %9890 = vmatprep.subr.mxu0 %v16473_v57 }
 0x42a   : > { %9875 = vmatpush3.msra.mxu1 %v10942_v22  ;;  %v9359_v34 = vpop.f32.mrf.mxu1  ;;  %v7347_v22 = vld [vmem:[%s16015_s3 + $0xe8] sm:$0xff]  ;;  %9891 = vmatpush3.msra.mxu0 %v7348_v25 }
 0x42b   : > { %9877 = vmatmul.mubr.f32.vlgmr.msra.gmra.mxu1 %v12979_v36  ;;  %9923 = vmatprep.subr.mxu1 %v16473_v57  ;;  %v2586_v36 = vadd.f32 %v13584_v53, %v2418_v26  ;;  %v4687_v34 = vld [vmem:[%s16015_s3 + $0x68] sm:$0xff]  ;;  %v4686_v26 = vld [vmem:[%s16015_s3 + $0x60] sm:$0xff] }
 0x42c   : > { %9879 = vmatprep.mubr.f32.mxu1 %v13062_v59  ;;  %v3220_v16 = vpop.f32.mrf.mxu1  ;;  %v3311_v59 = vpop.f32.mrf.mxu0  ;;  %9892 = vmatprep.subr.mxu0 %v16473_v57 }
 0x42d   : > { %v2724_v40 = vadd.f32 %v13730_v46, %v2586_v36  ;;  %v3350_v3 = vadd.f32 %v3311_v59, %v3229_v20  ;;  %v7346_v16 = vld [vmem:[%s16015_s3 + $0xe0] sm:$0xff]  ;;  %9893 = vmatpush3.msra.mxu0 %v7347_v22  ;;  %v7344_v59 = vld [vmem:[%s16015_s3 + $0xd0] sm:$0xff] }
 0x42e   : > { %v9397_v4 = vpop.f32.mrf.mxu0  ;;  %9894 = vmatprep.subr.mxu0 %v16473_v57 }
 0x42f   : > { %9880 = vmatmul.mubr.f32.gmra.mxu1 %v13256_v33  ;;  %v14125_v33 = vld [vmem:[%s16017_s5 + $0x1] ss:$0 sm:$0xff]  ;;  %9895 = vmatpush3.msra.mxu0 %v7346_v16 }
 0x430   : > { %9882 = vmatprep.mubr.f32.mxu1 %v13266_v39  ;;  %v2862_v39 = vadd.f32 %v13868_v31, %v2724_v40  ;;  %v2875_v19 = vadd.f32 %v14125_v33, %v13864_v51  ;;  %v3321_v2 = vpop.f32.mrf.mxu0  ;;  %v3353_v31 = vadd.f32 %v9397_v4, %v3232_v62  ;;  %v2877_v44 = vadd.f32 %v14125_v33, %v13881_v58  ;;  %v4685_v40 = vld [vmem:[%s16015_s3 + $0x58] sm:$0xff]  ;;  %v7343_v4 = vld [vmem:[%s16015_s3 + $0xc8] sm:$0xff] }
 0x431   : > { %v3352_v54 = vadd.f32 %v3321_v2, %v3231_v7  ;;  %v2876_v23 = vadd.f32 %v14125_v33, %v13887_v27  ;;  %v2878_v27 = vadd.f32 %v14125_v33, %v13896_v0  ;;  %v4689_v0 = vld [vmem:[%s16015_s3 + $0x78] sm:$0xff]  ;;  %9896 = vmatprep.subr.mxu0 %v16473_v57  ;;  %v4680_v2 = vld [vmem:[%s16015_s3 + $0x30] sm:$0xff] }
 0x432   : > { %v2874_v53 = vadd.f32 %v14125_v33, %v2862_v39  ;;  %v2883_v56 = vmax.f32 %v2875_v19, 0.0  ;;  %v9400_v42 = vpop.f32.mrf.mxu0  ;;  %v2885_v35 = vmax.f32 %v2877_v44, 0.0  ;;  %9924 = vmatpush3.msra.mxu1 %v4689_v0  ;;  %v4684_v39 = vld [vmem:[%s16015_s3 + $0x50] sm:$0xff]  ;;  %v4678_v44 = vld [vmem:[%s16015_s3 + $0x20] sm:$0xff] }
 0x433   : > { %9883 = vmatmul.mubr.f32.gmra.mxu1 %v13269_v10  ;;  %v3351_v10 = vadd.f32 %v9394_v24, %v3230_v12  ;;  %v2884_v48 = vmax.f32 %v2876_v23, 0.0  ;;  %v2886_v21 = vmax.f32 %v2878_v27, 0.0  ;;  %9925 = vmatprep.subr.mxu1 %v16473_v57  ;;  %v7345_v24 = vld [vmem:[%s16015_s3 + $0xd8] sm:$0xff]  ;;  %v7336_v23 = vld [vmem:[%s16015_s3 + $0x90] sm:$0xff] }
 0x434   : > { %9885 = vmatprep.mubr.f32.mxu1 %v16473_v57  ;;  %v2882_v60 = vmax.f32 %v2874_v53, 0.0  ;;  %v3331_v63 = vpop.f32.mrf.mxu0  ;;  %9897 = vmatpush3.msra.mxu0 %v7345_v24 }
 0x435   : > { %v3354_v1 = vadd.f32 %v3331_v63, %v3233_v32  ;;  %v4688_v32 = vld [vmem:[%s16015_s3 + $0x70] sm:$0xff]  ;;  %9898 = vmatprep.subr.mxu0 %v16473_v57 }
 0x436   : > { %v9403_v20 = vpop.f32.mrf.mxu0  ;;  %9926 = vmatpush3.msra.mxu1 %v4688_v32  ;;  %9899 = vmatpush3.msra.mxu0 %v7344_v59 }
 0x437   : > { %9886 = vmatmul.mubr.f32.gmra.mxu1 %v16473_v57  ;;  %9927 = vmatprep.subr.mxu1 %v16473_v57 }
 0x438   : > { %v3341_v18 = vpop.f32.mrf.mxu0  ;;  %9928 = vmatpush3.msra.mxu1 %v4687_v34  ;;  %9900 = vmatprep.subr.mxu0 %v16473_v57 }
 0x439   : > { %9929 = vmatprep.subr.mxu1 %v16473_v57  ;;  %9901 = vmatpush3.msra.mxu0 %v7343_v4 }
 0x43a   : > { %v14180_v36 = vpop.f32.mrf.mxu0  ;;  %9930 = vmatpush3.msra.mxu1 %v4686_v26  ;;  %9902 = vmatprep.subr.mxu0 %v16473_v57 }
 0x43b   : > { %9931 = vmatprep.subr.mxu1 %v16473_v57  ;;  %9955 = vmatprep.mubr.msk.f32.mxu1 %vm10956_vm3, %v16473_v57 }
 0x43c   : > { %9932 = vmatpush3.msra.mxu1 %v4685_v40 }
 0x43d   : > { %9933 = vmatprep.subr.mxu1 %v16473_v57 }
 0x43e   : > { %9934 = vmatpush3.msra.mxu1 %v4684_v39 }
 0x43f   : > { %9935 = vmatprep.subr.mxu1 %v16473_v57 }
 0x440   : > { %v9438_v47 = vpop.f32.mrf.mxu1 }
 0x441   : > { %v3472_v37 = vadd.f32 %v9438_v47, %v3351_v10  ;;  %v14198_v10 = vpop.f32.mrf.mxu0  ;;  %v4683_v47 = vld [vmem:[%s16015_s3 + $0x48] sm:$0xff] }
 0x442   : > { %v3432_v29 = vpop.f32.mrf.mxu1  ;;  %9936 = vmatpush3.msra.mxu1 %v4683_v47 }
 0x443   : > { %v3480_v46 = vadd.f32 %v14125_v33, %v3472_v37  ;;  %v3471_v43 = vadd.f32 %v3432_v29, %v3350_v3  ;;  %v14210_v19 = vpop.f32.mrf.mxu0  ;;  %9937 = vmatprep.subr.mxu1 %v16473_v57  ;;  %v7342_v37 = vld [vmem:[%s16015_s3 + $0xc0] sm:$0xff]  ;;  %v7341_v29 = vld [vmem:[%s16015_s3 + $0xb8] sm:$0xff] }
 0x444   : > { %v4682_v3 = vld [vmem:[%s16015_s3 + $0x40] sm:$0xff]  ;;  %9903 = vmatpush3.msra.mxu0 %v7342_v37 }
 0x445   : > { %v3488_v30 = vmax.f32 %v3480_v46, 0.0  ;;  %v3479_v17 = vadd.f32 %v14125_v33, %v3471_v43  ;;  %9938 = vmatpush3.msra.mxu1 %v4682_v3  ;;  %v14220_v53 = vpop.f32.mrf.mxu0  ;;  %9904 = vmatprep.subr.mxu0 %v16473_v57  ;;  %v4681_v46 = vld [vmem:[%s16015_s3 + $0x38] sm:$0xff]  ;;  %v7340_v43 = vld [vmem:[%s16015_s3 + $0xb0] sm:$0xff] }
 0x446   : > { %v9441_v51 = vpop.f32.mrf.mxu1  ;;  %9939 = vmatprep.subr.mxu1 %v16473_v57  ;;  %9905 = vmatpush3.msra.mxu0 %v7341_v29 }
 0x447   : > { %v14135_v38 = vmax.f32 %v2883_v56, %v3488_v30  ;;  %v3487_v15 = vmax.f32 %v3479_v17, 0.0  ;;  %v3474_v49 = vadd.f32 %v9441_v51, %v3353_v31  ;;  %9940 = vmatpush3.msra.mxu1 %v4681_v46  ;;  %9906 = vmatprep.subr.mxu0 %v16473_v57  ;;  %v9488_v56 = vpop.f32.mrf.mxu0  ;;  %v7339_v30 = vld [vmem:[%s16015_s3 + $0xa8] sm:$0xff]  ;;  %v7337_v51 = vld [vmem:[%s16015_s3 + $0x98] sm:$0xff] }
 0x448   : > { %v3442_v6 = vpop.f32.mrf.mxu1  ;;  %9941 = vmatprep.subr.mxu1 %v16473_v57  ;;  %9907 = vmatpush3.msra.mxu0 %v7340_v43  ;;  %v4679_v17 = vld [vmem:[%s16015_s3 + $0x28] sm:$0xff] }
 0x449   : > { %v14139_v45 = vmax.f32 %v2882_v60, %v3487_v15  ;;  %v3482_v61 = vadd.f32 %v14125_v33, %v3474_v49  ;;  %v3473_v28 = vadd.f32 %v3442_v6, %v3352_v54  ;;  %9942 = vmatpush3.msra.mxu1 %v4680_v2  ;;  %9908 = vmatprep.subr.mxu0 %v16473_v57  ;;  %v7338_v60 = vld [vmem:[%s16015_s3 + $0xa0] sm:$0xff]  ;;  %v14256_v42 = vpop.f32.mrf.mxu0  ;;  %v4677_v15 = vld [vmem:[%s16015_s3 + $0x18] sm:$0xff]  ;;  %v4676_v6 = vld [vmem:[%s16015_s3 + $0x10] sm:$0xff] }
 0x44a   : > { %9943 = vmatprep.subr.mxu1 %v16473_v57  ;;  %9909 = vmatpush3.msra.mxu0 %v7339_v30 }
 0x44b   : > { %v3490_v52 = vmax.f32 %v3482_v61, 0.0  ;;  %v3481_v58 = vadd.f32 %v14125_v33, %v3473_v28  ;;  %9944 = vmatpush3.msra.mxu1 %v4679_v17  ;;  %9910 = vmatprep.subr.mxu0 %v16473_v57  ;;  %v9491_v54 = vpop.f32.mrf.mxu0  ;;  %v7335_v61 = vld [vmem:[%s16015_s3 + $0x88] sm:$0xff] }
 0x44c   : > { %v9444_v41 = vpop.f32.mrf.mxu1  ;;  %9945 = vmatprep.subr.mxu1 %v16473_v57  ;;  %9911 = vmatpush3.msra.mxu0 %v7338_v60  ;;  %v4675_v28 = vld [vmem:[%s16015_s3 + $0x8] sm:$0xff] }
 0x44d   : > { %v14143_v12 = vmax.f32 %v2885_v35, %v3490_v52  ;;  %v3489_v8 = vmax.f32 %v3481_v58, 0.0  ;;  %9946 = vmatpush3.msra.mxu1 %v4678_v44  ;;  %9912 = vmatprep.subr.mxu0 %v16473_v57  ;;  %v3599_v35 = vpop.f32.mrf.mxu0  ;;  %v7334_v52 = vld [vmem:[%s16015_s3 + $0x80] sm:$0xff] }
 0x44e   : > { %v3452_v5 = vpop.f32.mrf.mxu1  ;;  %9947 = vmatprep.subr.mxu1 %v16473_v57  ;;  %9913 = vmatpush3.msra.mxu0 %v7337_v51  ;;  %v4674_v58 = vld [vmem:[%s16015_s3] sm:$0xff] }
 0x44f   : > { %v14147_v50 = vmax.f32 %v2884_v48, %v3489_v8  ;;  %v3475_v55 = vadd.f32 %v3452_v5, %v3354_v1  ;;  %9948 = vmatpush3.msra.mxu1 %v4677_v15  ;;  %9914 = vmatprep.subr.mxu0 %v16473_v57  ;;  %v9570_v41 = vpop.f32.mrf.mxu0 }
 0x450   : > { %9949 = vmatprep.subr.mxu1 %v16473_v57  ;;  %9915 = vmatpush3.msra.mxu0 %v7336_v23 }
 0x451   : > { %v3483_v62 = vadd.f32 %v14125_v33, %v3475_v55  ;;  %9950 = vmatpush3.msra.mxu1 %v4676_v6  ;;  %9916 = vmatprep.subr.mxu0 %v16473_v57  ;;  %v3779_v1 = vpop.f32.mrf.mxu0 }
 0x452   : > { %v9447_v7 = vpop.f32.mrf.mxu1  ;;  %9951 = vmatprep.subr.mxu1 %v16473_v57  ;;  %9917 = vmatpush3.msra.mxu0 %v7335_v61 }
 0x453   : > { %v3491_v13 = vmax.f32 %v3483_v62, 0.0  ;;  %9952 = vmatpush3.msra.mxu1 %v4675_v28  ;;  %9918 = vmatprep.subr.mxu0 %v16473_v57  ;;  %v9573_v20 = vpop.f32.mrf.mxu0 }
 0x454   : > { %v3462_v14 = vpop.f32.mrf.mxu1  ;;  %9953 = vmatprep.subr.mxu1 %v16473_v57  ;;  %9919 = vmatpush3.msra.mxu0 %v7334_v52 }
 0x455   : > { %v14150_v11 = vmax.f32 %v2886_v21, %v3491_v13  ;;  %9954 = vmatpush3.msra.mxu1 %v4674_v58  ;;  %9958 = vmatprep.subr.mxu0 %v16473_v57  ;;  %v3789_v55 = vpop.f32.mrf.mxu0 }
 0x456   : > { %9993 = vmatprep.subr.mxu1 %v16473_v57 }
 0x457   : > { %v9576_v21 = vpop.f32.mrf.mxu0 }
 0x459   : > { %v3799_v7 = vpop.f32.mrf.mxu0 }
 0x45b   : > { %v9579_v14 = vpop.f32.mrf.mxu0 }
 0x45d   : > { %v3809_v0 = vpop.f32.mrf.mxu0 }
 0x45f   : > { %v9658_v32 = vpop.f32.mrf.mxu0 }
 0x461   : > { %v4013_v34 = vpop.f32.mrf.mxu0 }
 0x463   : > { %v9661_v26 = vpop.f32.mrf.mxu0 }
 0x465   : > { %v4023_v40 = vpop.f32.mrf.mxu0 }
 0x467   : > { %v9664_v39 = vpop.f32.mrf.mxu0 }
 0x468   : > { %v14246_v31 = vpop.f32.mrf.mxu1 }
 0x469   : > { %v14300_v47 = vpop.f32.mrf.mxu0  ;;  %v3680_v28 = vadd.f32 %v14246_v31, %v14180_v36 }
 0x46a   : > { %v14266_v49 = vpop.f32.mrf.mxu1 }
 0x46b   : > { %v9667_v3 = vpop.f32.mrf.mxu0  ;;  %v3675_v52 = vadd.f32 %v14266_v49, %v14198_v10 }
 0x46d   : > { %v14284_v63 = vpop.f32.mrf.mxu1  ;;  %v4043_v46 = vpop.f32.mrf.mxu0  ;;  %v3818_v14 = vadd.f32 %v3779_v1, %v3675_v52 }
 0x46f   : > { %v3684_v48 = vpop.f32.mrf.mxu1  ;;  %v9746_v2 = vpop.f32.mrf.mxu0 }
 0x471   : > { %v4255_v30 = vpop.f32.mrf.mxu0 }
 0x472   : > { %v9532_v8 = vpop.f32.mrf.mxu1 }
 0x473   : > { %v9749_v60 = vpop.f32.mrf.mxu0  ;;  %v3819_v8 = vadd.f32 %v9570_v41, %v3680_v28 }
 0x474   : > { %v3694_v27 = vpop.f32.mrf.mxu1 }
 0x475   : > { %v4265_v51 = vpop.f32.mrf.mxu0  ;;  %v3695_v49 = vadd.f32 %v3694_v27, %v14256_v42 }
 0x477   : > { %v9535_v5 = vpop.f32.mrf.mxu1  ;;  %v9752_v54 = vpop.f32.mrf.mxu0 }
 0x479   : > { %v3704_v62 = vpop.f32.mrf.mxu1  ;;  %v4275_v6 = vpop.f32.mrf.mxu0 }
 0x47a   : > { %v3690_v62 = vadd.f32 %v14284_v63, %v14210_v19 }
 0x47b   : > { %v9755_v35 = vpop.f32.mrf.mxu0 }
 0x47c   : > { %v3821_v39 = vadd.f32 %v9573_v20, %v3690_v62 }
 0x47d   : > { %v4285_v5 = vpop.f32.mrf.mxu0 }
 0x48b   : > { %v9614_v18 = vpop.f32.mrf.mxu1 }
 0x48c   : > { %v3932_v21 = vadd.f32 %v9614_v18, %v3819_v8 }
 0x48d   : > { %v3892_v13 = vpop.f32.mrf.mxu1 }
 0x48e   : > { %v4053_v3 = vadd.f32 %v9658_v32, %v3932_v21 }
 0x48f   : > { %v9617_v9 = vpop.f32.mrf.mxu1 }
 0x490   : > { %v3934_v46 = vadd.f32 %v9617_v9, %v3821_v39 }
 0x491   : > { %v3902_v25 = vpop.f32.mrf.mxu1 }
 0x492   : > { %v4055_v1 = vadd.f32 %v9661_v26, %v3934_v46 }
 0x493   : > { %v9620_v22 = vpop.f32.mrf.mxu1 }
 0x494   : > { %v9834_v22 = vpop.f32.mrf.mxu0  ;;  %v4063_v9 = vadd.f32 %v14125_v33, %v4055_v1 }
 0x495   : > { %v3912_v16 = vpop.f32.mrf.mxu1 }
 0x496   : > { %v4473_v31 = vpop.f32.mrf.mxu0 }
 0x497   : > { %v9623_v24 = vpop.f32.mrf.mxu1 }
 0x498   : > { %v3685_v24 = vadd.f32 %v3684_v48, %v14220_v53  ;;  %v9837_v63 = vpop.f32.mrf.mxu0  ;;  %v3822_v53 = vadd.f32 %v3799_v7, %v3695_v49 }
 0x499   : > { %v3922_v59 = vpop.f32.mrf.mxu1 }
 0x49a   : > { %v3931_v59 = vadd.f32 %v3892_v13, %v3818_v14  ;;  %v4483_v32 = vpop.f32.mrf.mxu0  ;;  %v3935_v42 = vadd.f32 %v3912_v16, %v3822_v53 }
 0x49c   : > { %v4052_v10 = vadd.f32 %v4013_v34, %v3931_v59  ;;  %v9840_v52 = vpop.f32.mrf.mxu0  ;;  %v4056_v8 = vadd.f32 %v14300_v47, %v3935_v42  ;;  %v7363_v42 = vld [vmem:[%s16015_s3 + $0x168] sm:$0xff] }
 0x49d   : > { %v7360_v52 = vld [vmem:[%s16015_s3 + $0x150] sm:$0xff] }
 0x49e   : > { %v4060_v18 = vadd.f32 %v14125_v33, %v4052_v10 }
 0x4a0   : > { %v4068_v54 = vmax.f32 %v4060_v18, 0.0 }
 0x4ab   : > { %v9702_v4 = vpop.f32.mrf.mxu1 }
 0x4ac   : > { %v4261_v48 = vadd.f32 %v9746_v2, %v9702_v4 }
 0x4ad   : > { %v4150_v37 = vpop.f32.mrf.mxu1 }
 0x4af   : > { %v9705_v29 = vpop.f32.mrf.mxu1 }
 0x4b1   : > { %v4160_v43 = vpop.f32.mrf.mxu1 }
 0x4b2   : > { %v4266_v7 = vadd.f32 %v4265_v51, %v4160_v43 }
 0x4b3   : > { %v9708_v56 = vpop.f32.mrf.mxu1 }
 0x4b4   : > { %v3820_v56 = vadd.f32 %v3789_v55, %v3685_v24  ;;  %v4256_v55 = vadd.f32 %v4255_v30, %v4150_v37  ;;  %v4076_v37 = vmax.f32 %v14139_v45, %v4068_v54 }
 0x4b5   : > { %v14302_v17 = vpop.f32.mrf.mxu1 }
 0x4b6   : > { %v3933_v41 = vadd.f32 %v3902_v25, %v3820_v56  ;;  %v4271_v25 = vadd.f32 %v9749_v60, %v9705_v29  ;;  %v4276_v29 = vadd.f32 %v4275_v6, %v14302_v17 }
 0x4b7   : > { %v9711_v44 = vpop.f32.mrf.mxu1 }
 0x4b8   : > { %v4061_v44 = vadd.f32 %v14125_v33, %v4053_v3 }
 0x4b9   : > { %v4180_v15 = vpop.f32.mrf.mxu1 }
 0x4ba   : > { %v4054_v15 = vadd.f32 %v4023_v40, %v3933_v41  ;;  %v4069_v20 = vmax.f32 %v4061_v44, 0.0  ;;  %v4071_v40 = vmax.f32 %v4063_v9, 0.0 }
 0x4bc   : > { %v4062_v27 = vadd.f32 %v14125_v33, %v4054_v15  ;;  %v4077_v26 = vmax.f32 %v14135_v38, %v4069_v20  ;;  %v4079_v43 = vmax.f32 %v14143_v12, %v4071_v40  ;;  %v7376_v40 = vld [vmem:[%s16015_s3 + $0x1d0] sm:$0xff] }
 0x4be   : > { %v4070_v30 = vmax.f32 %v4062_v27, 0.0  ;;  %v7379_v27 = vld [vmem:[%s16015_s3 + $0x1e8] sm:$0xff] }
 0x4c0   : > { %v4078_v44 = vmax.f32 %v14147_v50, %v4070_v30  ;;  %v7365_v50 = vld [vmem:[%s16015_s3 + $0x178] sm:$0xff]  ;;  %v7356_v30 = vld [vmem:[%s16015_s3 + $0x130] sm:$0xff] }
 0x4cb   : > { %v9790_v23 = vpop.f32.mrf.mxu1 }
 0x4cc   : > { %v4400_v34 = vadd.f32 %v9790_v23, %v4261_v48 }
 0x4cd   : > { %v4360_v61 = vpop.f32.mrf.mxu1 }
 0x4ce   : > { %v4399_v28 = vadd.f32 %v4360_v61, %v4256_v55  ;;  %v4513_v2 = vadd.f32 %v9834_v22, %v4400_v34  ;;  %v4493_v61 = vpop.f32.mrf.mxu0  ;;  %v7381_v55 = vld [vmem:[%s16015_s3 + $0x1f8] sm:$0xff] }
 0x4cf   : > { %v9793_v58 = vpop.f32.mrf.mxu1 }
 0x4d0   : > { %v4402_v4 = vadd.f32 %v9793_v58, %v4271_v25  ;;  %v4512_v62 = vadd.f32 %v4473_v31, %v4399_v28  ;;  %v4064_v58 = vadd.f32 %v14125_v33, %v4056_v8  ;;  %v9843_v22 = vpop.f32.mrf.mxu0  ;;  %v7362_v25 = vld [vmem:[%s16015_s3 + $0x160] sm:$0xff] }
 0x4d1   : > { %v4370_v0 = vpop.f32.mrf.mxu1  ;;  %v7378_v28 = vld [vmem:[%s16015_s3 + $0x1e0] sm:$0xff]  ;;  %v7397_v22 = vld [vmem:[%s16015_s3 + $0x278] sm:$0xff] }
 0x4d2   : > { %v4401_v23 = vadd.f32 %v4370_v0, %v4266_v7  ;;  %v4515_v51 = vadd.f32 %v9837_v63, %v4402_v4  ;;  %v4503_v12 = vpop.f32.mrf.mxu0  ;;  %v4072_v41 = vmax.f32 %v4064_v58, 0.0  ;;  %v7359_v7 = vld [vmem:[%s16015_s3 + $0x148] sm:$0xff]  ;;  %v7374_v8 = vld [vmem:[%s16015_s3 + $0x1c0] sm:$0xff] }
 0x4d3   : > { %v9796_v36 = vpop.f32.mrf.mxu1  ;;  %v7375_v4 = vld [vmem:[%s16015_s3 + $0x1c8] sm:$0xff]  ;;  %v7392_v12 = vld [vmem:[%s16015_s3 + $0x250] sm:$0xff] }
 0x4d4   : > { %v4514_v59 = vadd.f32 %v4483_v32, %v4401_v23  ;;  %v4080_v20 = vmax.f32 %v14150_v11, %v4072_v41  ;;  %v7380_v11 = vld [vmem:[%s16015_s3 + $0x1f0] sm:$0xff]  ;;  %v7367_v58 = vld [vmem:[%s16015_s3 + $0x188] sm:$0xff]  ;;  %v7390_v41 = vld [vmem:[%s16015_s3 + $0x240] sm:$0xff] }
 0x4d5   : > { %v4380_v19 = vpop.f32.mrf.mxu1  ;;  %v7372_v23 = vld [vmem:[%s16015_s3 + $0x1b0] sm:$0xff] }
 0x4d6   : > { %v4403_v47 = vadd.f32 %v4380_v19, %v4276_v29  ;;  %v7354_v29 = vld [vmem:[%s16015_s3 + $0x120] sm:$0xff] }
 0x4d7   : > { %v9799_v13 = vpop.f32.mrf.mxu1 }
 0x4d8   : > { %v4516_v46 = vadd.f32 %v4493_v61, %v4403_v47  ;;  %v7353_v61 = vld [vmem:[%s16015_s3 + $0x118] sm:$0xff]  ;;  %v7350_v47 = vld [vmem:[%s16015_s3 + $0x100] sm:$0xff] }
 0x4d9   : > { %v4390_v35 = vpop.f32.mrf.mxu1 }
 0x4da   : > { %v7361_v35 = vld [vmem:[%s16015_s3 + $0x158] sm:$0xff] }
 0x4eb   : > { %v9878_v5 = vpop.f32.mrf.mxu1 }
 0x4ec   : > { %v4634_v16 = vadd.f32 %v9878_v5, %v4513_v2  ;;  %v7358_v2 = vld [vmem:[%s16015_s3 + $0x140] sm:$0xff]  ;;  %v7357_v5 = vld [vmem:[%s16015_s3 + $0x138] sm:$0xff] }
 0x4ed   : > { %v4594_v60 = vpop.f32.mrf.mxu1 }
 0x4ee   : > { %v4642_v38 = vadd.f32 %v14125_v33, %v4634_v16  ;;  %v4633_v21 = vadd.f32 %v4594_v60, %v4512_v62  ;;  %v7355_v16 = vld [vmem:[%s16015_s3 + $0x128] sm:$0xff]  ;;  %v7370_v60 = vld [vmem:[%s16015_s3 + $0x1a0] sm:$0xff] }
 0x4ef   : > { %v9881_v14 = vpop.f32.mrf.mxu1  ;;  %v7371_v62 = vld [vmem:[%s16015_s3 + $0x1a8] sm:$0xff] }
 0x4f0   : > { %v4650_v45 = vmax.f32 %v4642_v38, 0.0  ;;  %v4641_v0 = vadd.f32 %v14125_v33, %v4633_v21  ;;  %v4636_v24 = vadd.f32 %v9881_v14, %v4515_v51  ;;  %v7369_v38 = vld [vmem:[%s16015_s3 + $0x198] sm:$0xff]  ;;  %v7352_v21 = vld [vmem:[%s16015_s3 + $0x110] sm:$0xff]  ;;  %v7351_v51 = vld [vmem:[%s16015_s3 + $0x108] sm:$0xff] }
 0x4f1   : > { %v4604_v39 = vpop.f32.mrf.mxu1  ;;  %v7366_v14 = vld [vmem:[%s16015_s3 + $0x180] sm:$0xff] }
 0x4f2   : > { %v4658_v17 = vmax.f32 %v4077_v26, %v4650_v45  ;;  %v4649_v6 = vmax.f32 %v4641_v0, 0.0  ;;  %v4644_v3 = vadd.f32 %v14125_v33, %v4636_v24  ;;  %v4635_v36 = vadd.f32 %v4604_v39, %v4514_v59  ;;  %v7377_v26 = vld [vmem:[%s16015_s3 + $0x1d8] sm:$0xff]  ;;  %v7396_v59 = vld [vmem:[%s16015_s3 + $0x270] sm:$0xff] }
 0x4f3   : > { %v9884_v31 = vpop.f32.mrf.mxu1  ;;  %v7413_v24 = vld [vmem:[%s16015_s3 + $0x2f8] sm:$0xff]  ;;  %v7412_v39 = vld [vmem:[%s16015_s3 + $0x2f0] sm:$0xff] }
 0x4f4   : > { %4666 = vst [vmem:[#allocation3 + $0x8] sm:$0xff] %v4658_v17  ;;  %v4657_v56 = vmax.f32 %v4076_v37, %v4649_v6  ;;  %v4652_v10 = vmax.f32 %v4644_v3, 0.0  ;;  %v4643_v49 = vadd.f32 %v14125_v33, %v4635_v36  ;;  %v7373_v37 = vld [vmem:[%s16015_s3 + $0x1b8] sm:$0xff]  ;;  %v7395_v17 = vld [vmem:[%s16015_s3 + $0x268] sm:$0xff]  ;;  %v7394_v3 = vld [vmem:[%s16015_s3 + $0x260] sm:$0xff] }
 0x4f5   : > { %v4614_v19 = vpop.f32.mrf.mxu1  ;;  %v7411_v6 = vld [vmem:[%s16015_s3 + $0x2e8] sm:$0xff]  ;;  %v7410_v36 = vld [vmem:[%s16015_s3 + $0x2e0] sm:$0xff]  ;;  %v7393_v31 = vld [vmem:[%s16015_s3 + $0x258] sm:$0xff] }
 0x4f6   : > { %4665 = vst [vmem:[#allocation3] sm:$0xff] %v4657_v56  ;;  %v4660_v63 = vmax.f32 %v4079_v43, %v4652_v10  ;;  %v4651_v1 = vmax.f32 %v4643_v49, 0.0  ;;  %v4637_v18 = vadd.f32 %v4614_v19, %v4516_v46  ;;  %v7368_v43 = vld [vmem:[%s16015_s3 + $0x190] sm:$0xff]  ;;  %v7409_v46 = vld [vmem:[%s16015_s3 + $0x2d8] sm:$0xff]  ;;  %v7391_v10 = vld [vmem:[%s16015_s3 + $0x248] sm:$0xff] }
 0x4f7   : > { %v9887_v15 = vpop.f32.mrf.mxu1  ;;  %v7408_v56 = vld [vmem:[%s16015_s3 + $0x2d0] sm:$0xff]  ;;  %v7407_v49 = vld [vmem:[%s16015_s3 + $0x2c8] sm:$0xff]  ;;  %v7389_v19 = vld [vmem:[%s16015_s3 + $0x238] sm:$0xff] }
 0x4f8   : > { %4668 = vst [vmem:[#allocation3 + $0x18] sm:$0xff] %v4660_v63  ;;  %v4659_v53 = vmax.f32 %v4078_v44, %v4651_v1  ;;  %v4645_v48 = vadd.f32 %v14125_v33, %v4637_v18  ;;  %v7364_v33 = vld [vmem:[%s16015_s3 + $0x170] sm:$0xff]  ;;  %v7406_v44 = vld [vmem:[%s16015_s3 + $0x2c0] sm:$0xff]  ;;  %v7405_v63 = vld [vmem:[%s16015_s3 + $0x2b8] sm:$0xff] }
 0x4f9   : > { %v4624_v13 = vpop.f32.mrf.mxu1  ;;  %v7388_v1 = vld [vmem:[%s16015_s3 + $0x230] sm:$0xff]  ;;  %v7387_v15 = vld [vmem:[%s16015_s3 + $0x228] sm:$0xff] }
 0x4fa   : > { %4667 = vst [vmem:[#allocation3 + $0x10] sm:$0xff] %v4659_v53  ;;  %v4653_v32 = vmax.f32 %v4645_v48, 0.0  ;;  %v7404_v18 = vld [vmem:[%s16015_s3 + $0x2b0] sm:$0xff]  ;;  %v7403_v53 = vld [vmem:[%s16015_s3 + $0x2a8] sm:$0xff]  ;;  %v7386_v48 = vld [vmem:[%s16015_s3 + $0x220] sm:$0xff] }
 0x4fb   : > { %v7385_v13 = vld [vmem:[%s16015_s3 + $0x218] sm:$0xff] }
 0x4fc   : > { %v4661_v9 = vmax.f32 %v4080_v20, %v4653_v32  ;;  %v7402_v20 = vld [vmem:[%s16015_s3 + $0x2a0] sm:$0xff]  ;;  %v7401_v32 = vld [vmem:[%s16015_s3 + $0x298] sm:$0xff] }
 0x4fd   : > { %v4690_v34 = vld [vmem:[#allocation3 + $0x1] sm:$0x1]  ;;  %v4673_v54 = vld [vmem:[#allocation3] sm:$0x1]  ;;  %v4848_v45 = vld [vmem:[#allocation3 + $0x2] sm:$0x1] }
 0x4fe   : > { %4669 = vst [vmem:[#allocation3 + $0x20] sm:$0xff] %v4661_v9  ;;  %9921 = vmatmul.mubr.f32.vlgmr.msra.gmra.mxu0 %v4690_v34  ;;  %9956 = vmatmul.mubr.f32.vlgmr.msra.gmra.mxu1 %v4673_v54  ;;  %v4937_v0 = vld [vmem:[#allocation3 + $0x3] sm:$0x1]  ;;  %v7384_v9 = vld [vmem:[%s16015_s3 + $0x210] sm:$0xff]  ;;  %v7399_v34 = vld [vmem:[%s16015_s3 + $0x288] sm:$0xff] }
 0x4ff   : > { %9959 = vmatpush3.msra.mxu0 %v7365_v50  ;;  %9994 = vmatpush3.msra.mxu1 %v7381_v55  ;;  %v7400_v50 = vld [vmem:[%s16015_s3 + $0x290] sm:$0xff]  ;;  %v7383_v55 = vld [vmem:[%s16015_s3 + $0x208] sm:$0xff]  ;;  %v7382_v54 = vld [vmem:[%s16015_s3 + $0x200] sm:$0xff] }
 0x500   : > { %9960 = vmatprep.subr.mxu0 %v16473_v57  ;;  %9995 = vmatprep.subr.mxu1 %v16473_v57 }
 0x501   : > { %9961 = vmatpush3.msra.mxu0 %v7364_v33  ;;  %9996 = vmatpush3.msra.mxu1 %v7380_v11  ;;  %v7398_v33 = vld [vmem:[%s16015_s3 + $0x280] sm:$0xff]  ;;  %v7429_v11 = vld [vmem:[%s16015_s3 + $0x378] sm:$0xff] }
 0x502   : > { %9962 = vmatprep.subr.mxu0 %v16473_v57  ;;  %9997 = vmatprep.subr.mxu1 %v16473_v57 }
 0x503   : > { %9963 = vmatpush3.msra.mxu0 %v7363_v42  ;;  %9998 = vmatpush3.msra.mxu1 %v7379_v27  ;;  %v5026_v42 = vld [vmem:[#allocation3 + $0x4] sm:$0x1]  ;;  %v5115_v27 = vld [vmem:[#allocation3 + $0x8] sm:$0x1] }
 0x504   : > { %9964 = vmatprep.subr.mxu0 %v16473_v57  ;;  %9999 = vmatprep.subr.mxu1 %v16473_v57 }
 0x505   : > { %9965 = vmatpush3.msra.mxu0 %v7362_v25  ;;  %10000 = vmatpush3.msra.mxu1 %v7378_v28  ;;  %v7445_v25 = vld [vmem:[%s16015_s3 + $0x3f8] sm:$0xff]  ;;  %v7428_v28 = vld [vmem:[%s16015_s3 + $0x370] sm:$0xff] }
 0x506   : > { %9966 = vmatprep.subr.mxu0 %v16473_v57  ;;  %10001 = vmatprep.subr.mxu1 %v16473_v57 }
 0x507   : > { %9967 = vmatpush3.msra.mxu0 %v7361_v35  ;;  %10002 = vmatpush3.msra.mxu1 %v7377_v26  ;;  %v7444_v35 = vld [vmem:[%s16015_s3 + $0x3f0] sm:$0xff]  ;;  %v7427_v26 = vld [vmem:[%s16015_s3 + $0x368] sm:$0xff] }
 0x508   : > { %9968 = vmatprep.subr.mxu0 %v16473_v57  ;;  %10003 = vmatprep.subr.mxu1 %v16473_v57 }
 0x509   : > { %9969 = vmatpush3.msra.mxu0 %v7360_v52  ;;  %10004 = vmatpush3.msra.mxu1 %v7376_v40  ;;  %v7443_v52 = vld [vmem:[%s16015_s3 + $0x3e8] sm:$0xff]  ;;  %v7426_v40 = vld [vmem:[%s16015_s3 + $0x360] sm:$0xff] }
 0x50a   : > { %9970 = vmatprep.subr.mxu0 %v16473_v57  ;;  %10005 = vmatprep.subr.mxu1 %v16473_v57 }
 0x50b   : > { %9971 = vmatpush3.msra.mxu0 %v7359_v7  ;;  %10006 = vmatpush3.msra.mxu1 %v7375_v4  ;;  %v7442_v7 = vld [vmem:[%s16015_s3 + $0x3e0] sm:$0xff]  ;;  %v7425_v4 = vld [vmem:[%s16015_s3 + $0x358] sm:$0xff] }
 0x50c   : > { %9972 = vmatprep.subr.mxu0 %v16473_v57  ;;  %10007 = vmatprep.subr.mxu1 %v16473_v57 }
 0x50d   : > { %9973 = vmatpush3.msra.mxu0 %v7358_v2  ;;  %10008 = vmatpush3.msra.mxu1 %v7374_v8  ;;  %v7441_v2 = vld [vmem:[%s16015_s3 + $0x3d8] sm:$0xff]  ;;  %v7424_v8 = vld [vmem:[%s16015_s3 + $0x350] sm:$0xff] }
 0x50e   : > { %9974 = vmatprep.subr.mxu0 %v16473_v57  ;;  %10009 = vmatprep.subr.mxu1 %v16473_v57 }
 0x50f   : > { %9975 = vmatpush3.msra.mxu0 %v7357_v5  ;;  %10010 = vmatpush3.msra.mxu1 %v7373_v37  ;;  %v7440_v5 = vld [vmem:[%s16015_s3 + $0x3d0] sm:$0xff]  ;;  %v7423_v37 = vld [vmem:[%s16015_s3 + $0x348] sm:$0xff] }
 0x510   : > { %9976 = vmatprep.subr.mxu0 %v16473_v57  ;;  %10011 = vmatprep.subr.mxu1 %v16473_v57 }
 0x511   : > { %9977 = vmatpush3.msra.mxu0 %v7356_v30  ;;  %10012 = vmatpush3.msra.mxu1 %v7372_v23  ;;  %v7439_v30 = vld [vmem:[%s16015_s3 + $0x3c8] sm:$0xff]  ;;  %v7422_v23 = vld [vmem:[%s16015_s3 + $0x340] sm:$0xff] }
 0x512   : > { %9978 = vmatprep.subr.mxu0 %v16473_v57  ;;  %10013 = vmatprep.subr.mxu1 %v16473_v57 }
 0x513   : > { %9979 = vmatpush3.msra.mxu0 %v7355_v16  ;;  %10014 = vmatpush3.msra.mxu1 %v7371_v62  ;;  %v7438_v16 = vld [vmem:[%s16015_s3 + $0x3c0] sm:$0xff]  ;;  %v7421_v62 = vld [vmem:[%s16015_s3 + $0x338] sm:$0xff] }
 0x514   : > { %9980 = vmatprep.subr.mxu0 %v16473_v57  ;;  %10015 = vmatprep.subr.mxu1 %v16473_v57 }
 0x515   : > { %9981 = vmatpush3.msra.mxu0 %v7354_v29  ;;  %10016 = vmatpush3.msra.mxu1 %v7370_v60  ;;  %v7437_v29 = vld [vmem:[%s16015_s3 + $0x3b8] sm:$0xff]  ;;  %v7420_v60 = vld [vmem:[%s16015_s3 + $0x330] sm:$0xff] }
 0x516   : > { %9982 = vmatprep.subr.mxu0 %v16473_v57  ;;  %10017 = vmatprep.subr.mxu1 %v16473_v57 }
 0x517   : > { %9983 = vmatpush3.msra.mxu0 %v7353_v61  ;;  %10018 = vmatpush3.msra.mxu1 %v7369_v38  ;;  %v7436_v61 = vld [vmem:[%s16015_s3 + $0x3b0] sm:$0xff]  ;;  %v7419_v38 = vld [vmem:[%s16015_s3 + $0x328] sm:$0xff] }
 0x518   : > { %9984 = vmatprep.subr.mxu0 %v16473_v57  ;;  %10019 = vmatprep.subr.mxu1 %v16473_v57 }
 0x519   : > { %9985 = vmatpush3.msra.mxu0 %v7352_v21  ;;  %10020 = vmatpush3.msra.mxu1 %v7368_v43  ;;  %v7435_v21 = vld [vmem:[%s16015_s3 + $0x3a8] sm:$0xff]  ;;  %v7418_v43 = vld [vmem:[%s16015_s3 + $0x320] sm:$0xff] }
 0x51a   : > { %9986 = vmatprep.subr.mxu0 %v16473_v57  ;;  %10021 = vmatprep.subr.mxu1 %v16473_v57 }
 0x51b   : > { %9987 = vmatpush3.msra.mxu0 %v7351_v51  ;;  %10022 = vmatpush3.msra.mxu1 %v7367_v58  ;;  %v7434_v51 = vld [vmem:[%s16015_s3 + $0x3a0] sm:$0xff]  ;;  %v7417_v58 = vld [vmem:[%s16015_s3 + $0x318] sm:$0xff] }
 0x51c   : > { %9988 = vmatprep.subr.mxu0 %v16473_v57  ;;  %10023 = vmatprep.subr.mxu1 %v16473_v57 }
 0x51d   : > { %9989 = vmatpush3.msra.mxu0 %v7350_v47  ;;  %9990 = vmatprep.mubr.msk.f32.mxu0 %vm10956_vm3, %v16473_v57  ;;  %v7433_v47 = vld [vmem:[%s16015_s3 + $0x398] sm:$0xff] }
 0x51e   : > { %10024 = vmatpush3.msra.mxu1 %v7366_v14  ;;  %10025 = vmatprep.mubr.msk.f32.mxu1 %vm10956_vm3, %v16473_v57  ;;  %v7416_v14 = vld [vmem:[%s16015_s3 + $0x310] sm:$0xff] }
 0x51f   : > { %9991 = vmatmul.mubr.f32.vlgmr.msra.gmra.mxu0 %v4848_v45  ;;  %10026 = vmatmul.mubr.f32.vlgmr.msra.gmra.mxu1 %v4937_v0  ;;  %v7415_v45 = vld [vmem:[%s16015_s3 + $0x308] sm:$0xff] }
 0x520   : > { %10028 = vmatprep.subr.mxu0 %v16473_v57  ;;  %10063 = vmatprep.subr.mxu1 %v16473_v57  ;;  %v7431_v0 = vld [vmem:[%s16015_s3 + $0x388] sm:$0xff] }
 0x521   : > { %10029 = vmatpush3.msra.mxu0 %v7397_v22  ;;  %10064 = vmatpush3.msra.mxu1 %v7413_v24  ;;  %v7432_v22 = vld [vmem:[%s16015_s3 + $0x390] sm:$0xff]  ;;  %v7414_v24 = vld [vmem:[%s16015_s3 + $0x300] sm:$0xff] }
 0x522   : > { %10030 = vmatprep.subr.mxu0 %v16473_v57  ;;  %10065 = vmatprep.subr.mxu1 %v16473_v57 }
 0x523   : > { %10031 = vmatpush3.msra.mxu0 %v7396_v59  ;;  %10066 = vmatpush3.msra.mxu1 %v7412_v39  ;;  %v7430_v59 = vld [vmem:[%s16015_s3 + $0x380] sm:$0xff]  ;;  %v7461_v39 = vld [vmem:[%s16015_s3 + $0x478] sm:$0xff] }
 0x524   : > { %10032 = vmatprep.subr.mxu0 %v16473_v57  ;;  %10067 = vmatprep.subr.mxu1 %v16473_v57 }
 0x525   : > { %10033 = vmatpush3.msra.mxu0 %v7395_v17  ;;  %10068 = vmatpush3.msra.mxu1 %v7411_v6  ;;  %v5204_v17 = vld [vmem:[#allocation3 + $0x9] sm:$0x1]  ;;  %v5293_v6 = vld [vmem:[#allocation3 + $0xa] sm:$0x1] }
 0x526   : > { %10034 = vmatprep.subr.mxu0 %v16473_v57  ;;  %10069 = vmatprep.subr.mxu1 %v16473_v57 }
 0x527   : > { %10035 = vmatpush3.msra.mxu0 %v7394_v3  ;;  %10070 = vmatpush3.msra.mxu1 %v7410_v36  ;;  %v7477_v3 = vld [vmem:[%s16015_s3 + $0x4f8] sm:$0xff]  ;;  %v7460_v36 = vld [vmem:[%s16015_s3 + $0x470] sm:$0xff] }
 0x528   : > { %10036 = vmatprep.subr.mxu0 %v16473_v57  ;;  %10071 = vmatprep.subr.mxu1 %v16473_v57 }
 0x529   : > { %10037 = vmatpush3.msra.mxu0 %v7393_v31  ;;  %10072 = vmatpush3.msra.mxu1 %v7409_v46  ;;  %v7476_v31 = vld [vmem:[%s16015_s3 + $0x4f0] sm:$0xff]  ;;  %v7459_v46 = vld [vmem:[%s16015_s3 + $0x468] sm:$0xff] }
 0x52a   : > { %10038 = vmatprep.subr.mxu0 %v16473_v57  ;;  %10073 = vmatprep.subr.mxu1 %v16473_v57 }
 0x52b   : > { %10039 = vmatpush3.msra.mxu0 %v7392_v12  ;;  %10074 = vmatpush3.msra.mxu1 %v7408_v56  ;;  %v7475_v12 = vld [vmem:[%s16015_s3 + $0x4e8] sm:$0xff]  ;;  %v7458_v56 = vld [vmem:[%s16015_s3 + $0x460] sm:$0xff] }
 0x52c   : > { %10040 = vmatprep.subr.mxu0 %v16473_v57  ;;  %10075 = vmatprep.subr.mxu1 %v16473_v57 }
 0x52d   : > { %10041 = vmatpush3.msra.mxu0 %v7391_v10  ;;  %10076 = vmatpush3.msra.mxu1 %v7407_v49  ;;  %v7474_v10 = vld [vmem:[%s16015_s3 + $0x4e0] sm:$0xff]  ;;  %v7457_v49 = vld [vmem:[%s16015_s3 + $0x458] sm:$0xff] }
 0x52e   : > { %10042 = vmatprep.subr.mxu0 %v16473_v57  ;;  %10077 = vmatprep.subr.mxu1 %v16473_v57 }
 0x52f   : > { %10043 = vmatpush3.msra.mxu0 %v7390_v41  ;;  %10078 = vmatpush3.msra.mxu1 %v7406_v44  ;;  %v7473_v41 = vld [vmem:[%s16015_s3 + $0x4d8] sm:$0xff]  ;;  %v7456_v44 = vld [vmem:[%s16015_s3 + $0x450] sm:$0xff] }
 0x530   : > { %10044 = vmatprep.subr.mxu0 %v16473_v57  ;;  %10079 = vmatprep.subr.mxu1 %v16473_v57 }
 0x531   : > { %10045 = vmatpush3.msra.mxu0 %v7389_v19  ;;  %10080 = vmatpush3.msra.mxu1 %v7405_v63  ;;  %v7472_v19 = vld [vmem:[%s16015_s3 + $0x4d0] sm:$0xff]  ;;  %v7455_v63 = vld [vmem:[%s16015_s3 + $0x448] sm:$0xff] }
 0x532   : > { %10046 = vmatprep.subr.mxu0 %v16473_v57  ;;  %10081 = vmatprep.subr.mxu1 %v16473_v57 }
 0x533   : > { %10047 = vmatpush3.msra.mxu0 %v7388_v1  ;;  %10082 = vmatpush3.msra.mxu1 %v7404_v18  ;;  %v7471_v1 = vld [vmem:[%s16015_s3 + $0x4c8] sm:$0xff]  ;;  %v7454_v18 = vld [vmem:[%s16015_s3 + $0x440] sm:$0xff] }
 0x534   : > { %10048 = vmatprep.subr.mxu0 %v16473_v57  ;;  %10083 = vmatprep.subr.mxu1 %v16473_v57 }
 0x535   : > { %10049 = vmatpush3.msra.mxu0 %v7387_v15  ;;  %10084 = vmatpush3.msra.mxu1 %v7403_v53  ;;  %v7470_v15 = vld [vmem:[%s16015_s3 + $0x4c0] sm:$0xff]  ;;  %v7453_v53 = vld [vmem:[%s16015_s3 + $0x438] sm:$0xff] }
 0x536   : > { %10050 = vmatprep.subr.mxu0 %v16473_v57  ;;  %10085 = vmatprep.subr.mxu1 %v16473_v57 }
 0x537   : > { %10051 = vmatpush3.msra.mxu0 %v7386_v48  ;;  %10086 = vmatpush3.msra.mxu1 %v7402_v20  ;;  %v7469_v48 = vld [vmem:[%s16015_s3 + $0x4b8] sm:$0xff]  ;;  %v7452_v20 = vld [vmem:[%s16015_s3 + $0x430] sm:$0xff] }
 0x538   : > { %10052 = vmatprep.subr.mxu0 %v16473_v57  ;;  %10087 = vmatprep.subr.mxu1 %v16473_v57 }
 0x539   : > { %10053 = vmatpush3.msra.mxu0 %v7385_v13  ;;  %10088 = vmatpush3.msra.mxu1 %v7401_v32  ;;  %v7468_v13 = vld [vmem:[%s16015_s3 + $0x4b0] sm:$0xff]  ;;  %v7451_v32 = vld [vmem:[%s16015_s3 + $0x428] sm:$0xff] }
 0x53a   : > { %10054 = vmatprep.subr.mxu0 %v16473_v57  ;;  %10089 = vmatprep.subr.mxu1 %v16473_v57 }
 0x53b   : > { %10055 = vmatpush3.msra.mxu0 %v7384_v9  ;;  %10090 = vmatpush3.msra.mxu1 %v7400_v50  ;;  %v7467_v9 = vld [vmem:[%s16015_s3 + $0x4a8] sm:$0xff]  ;;  %v7450_v50 = vld [vmem:[%s16015_s3 + $0x420] sm:$0xff] }
 0x53c   : > { %10056 = vmatprep.subr.mxu0 %v16473_v57  ;;  %10091 = vmatprep.subr.mxu1 %v16473_v57 }
 0x53d   : > { %10057 = vmatpush3.msra.mxu0 %v7383_v55  ;;  %10092 = vmatpush3.msra.mxu1 %v7399_v34  ;;  %v7466_v55 = vld [vmem:[%s16015_s3 + $0x4a0] sm:$0xff]  ;;  %v7449_v34 = vld [vmem:[%s16015_s3 + $0x418] sm:$0xff] }
 0x53e   : > { %10058 = vmatprep.subr.mxu0 %v16473_v57  ;;  %10093 = vmatprep.subr.mxu1 %v16473_v57 }
 0x53f   : > { %10059 = vmatpush3.msra.mxu0 %v7382_v54  ;;  %10060 = vmatprep.mubr.msk.f32.mxu0 %vm10956_vm3, %v16473_v57  ;;  %v7465_v54 = vld [vmem:[%s16015_s3 + $0x498] sm:$0xff] }
 0x540   : > { %10094 = vmatpush3.msra.mxu1 %v7398_v33  ;;  %10095 = vmatprep.mubr.msk.f32.mxu1 %vm10956_vm3, %v16473_v57  ;;  %v7448_v33 = vld [vmem:[%s16015_s3 + $0x410] sm:$0xff] }
 0x541   : > { %10061 = vmatmul.mubr.f32.vlgmr.msra.gmra.mxu0 %v5026_v42  ;;  %10096 = vmatmul.mubr.f32.vlgmr.msra.gmra.mxu1 %v5115_v27  ;;  %v7447_v42 = vld [vmem:[%s16015_s3 + $0x408] sm:$0xff] }
 0x542   : > { %10098 = vmatprep.subr.mxu0 %v16473_v57  ;;  %10133 = vmatprep.subr.mxu1 %v16473_v57  ;;  %v7463_v27 = vld [vmem:[%s16015_s3 + $0x488] sm:$0xff] }
 0x543   : > { %10099 = vmatpush3.msra.mxu0 %v7429_v11  ;;  %10134 = vmatpush3.msra.mxu1 %v7445_v25  ;;  %v7464_v11 = vld [vmem:[%s16015_s3 + $0x490] sm:$0xff]  ;;  %v7446_v25 = vld [vmem:[%s16015_s3 + $0x400] sm:$0xff] }
 0x544   : > { %10100 = vmatprep.subr.mxu0 %v16473_v57  ;;  %10135 = vmatprep.subr.mxu1 %v16473_v57 }
 0x545   : > { %10101 = vmatpush3.msra.mxu0 %v7428_v28  ;;  %10136 = vmatpush3.msra.mxu1 %v7444_v35  ;;  %v7462_v28 = vld [vmem:[%s16015_s3 + $0x480] sm:$0xff]  ;;  %v5382_v35 = vld [vmem:[#allocation3 + $0xb] sm:$0x1] }
 0x546   : > { %10102 = vmatprep.subr.mxu0 %v16473_v57  ;;  %10137 = vmatprep.subr.mxu1 %v16473_v57 }
 0x547   : > { %10103 = vmatpush3.msra.mxu0 %v7427_v26  ;;  %10138 = vmatpush3.msra.mxu1 %v7443_v52  ;;  %v5471_v26 = vld [vmem:[#allocation3 + $0xc] sm:$0x1]  ;;  %v7493_v52 = vld [vmem:[%s16015_s3 + $0x578] sm:$0xff] }
 0x548   : > { %10104 = vmatprep.subr.mxu0 %v16473_v57  ;;  %10139 = vmatprep.subr.mxu1 %v16473_v57 }
 0x549   : > { %10105 = vmatpush3.msra.mxu0 %v7426_v40  ;;  %10140 = vmatpush3.msra.mxu1 %v7442_v7  ;;  %v7509_v40 = vld [vmem:[%s16015_s3 + $0x5f8] sm:$0xff]  ;;  %v7492_v7 = vld [vmem:[%s16015_s3 + $0x570] sm:$0xff] }
 0x54a   : > { %10106 = vmatprep.subr.mxu0 %v16473_v57  ;;  %10141 = vmatprep.subr.mxu1 %v16473_v57 }
 0x54b   : > { %10107 = vmatpush3.msra.mxu0 %v7425_v4  ;;  %10142 = vmatpush3.msra.mxu1 %v7441_v2  ;;  %v7508_v4 = vld [vmem:[%s16015_s3 + $0x5f0] sm:$0xff]  ;;  %v7491_v2 = vld [vmem:[%s16015_s3 + $0x568] sm:$0xff] }
 0x54c   : > { %10108 = vmatprep.subr.mxu0 %v16473_v57  ;;  %10143 = vmatprep.subr.mxu1 %v16473_v57 }
 0x54d   : > { %10109 = vmatpush3.msra.mxu0 %v7424_v8  ;;  %10144 = vmatpush3.msra.mxu1 %v7440_v5  ;;  %v7507_v8 = vld [vmem:[%s16015_s3 + $0x5e8] sm:$0xff]  ;;  %v7490_v5 = vld [vmem:[%s16015_s3 + $0x560] sm:$0xff] }
 0x54e   : > { %10110 = vmatprep.subr.mxu0 %v16473_v57  ;;  %10145 = vmatprep.subr.mxu1 %v16473_v57 }
 0x54f   : > { %10111 = vmatpush3.msra.mxu0 %v7423_v37  ;;  %10146 = vmatpush3.msra.mxu1 %v7439_v30  ;;  %v7506_v37 = vld [vmem:[%s16015_s3 + $0x5e0] sm:$0xff]  ;;  %v7489_v30 = vld [vmem:[%s16015_s3 + $0x558] sm:$0xff] }
 0x550   : > { %10112 = vmatprep.subr.mxu0 %v16473_v57  ;;  %10147 = vmatprep.subr.mxu1 %v16473_v57 }
 0x551   : > { %10113 = vmatpush3.msra.mxu0 %v7422_v23  ;;  %10148 = vmatpush3.msra.mxu1 %v7438_v16  ;;  %v7505_v23 = vld [vmem:[%s16015_s3 + $0x5d8] sm:$0xff]  ;;  %v7488_v16 = vld [vmem:[%s16015_s3 + $0x550] sm:$0xff] }
 0x552   : > { %10114 = vmatprep.subr.mxu0 %v16473_v57  ;;  %10149 = vmatprep.subr.mxu1 %v16473_v57 }
 0x553   : > { %10115 = vmatpush3.msra.mxu0 %v7421_v62  ;;  %10150 = vmatpush3.msra.mxu1 %v7437_v29  ;;  %v7504_v62 = vld [vmem:[%s16015_s3 + $0x5d0] sm:$0xff]  ;;  %v7487_v29 = vld [vmem:[%s16015_s3 + $0x548] sm:$0xff] }
 0x554   : > { %10116 = vmatprep.subr.mxu0 %v16473_v57  ;;  %10151 = vmatprep.subr.mxu1 %v16473_v57 }
 0x555   : > { %10117 = vmatpush3.msra.mxu0 %v7420_v60  ;;  %10152 = vmatpush3.msra.mxu1 %v7436_v61  ;;  %v7503_v60 = vld [vmem:[%s16015_s3 + $0x5c8] sm:$0xff]  ;;  %v7486_v61 = vld [vmem:[%s16015_s3 + $0x540] sm:$0xff] }
 0x556   : > { %10118 = vmatprep.subr.mxu0 %v16473_v57  ;;  %10153 = vmatprep.subr.mxu1 %v16473_v57 }
 0x557   : > { %10119 = vmatpush3.msra.mxu0 %v7419_v38  ;;  %10154 = vmatpush3.msra.mxu1 %v7435_v21  ;;  %v7502_v38 = vld [vmem:[%s16015_s3 + $0x5c0] sm:$0xff]  ;;  %v7485_v21 = vld [vmem:[%s16015_s3 + $0x538] sm:$0xff] }
 0x558   : > { %10120 = vmatprep.subr.mxu0 %v16473_v57  ;;  %10155 = vmatprep.subr.mxu1 %v16473_v57 }
 0x559   : > { %10121 = vmatpush3.msra.mxu0 %v7418_v43  ;;  %10156 = vmatpush3.msra.mxu1 %v7434_v51  ;;  %v7501_v43 = vld [vmem:[%s16015_s3 + $0x5b8] sm:$0xff]  ;;  %v7484_v51 = vld [vmem:[%s16015_s3 + $0x530] sm:$0xff] }
 0x55a   : > { %10122 = vmatprep.subr.mxu0 %v16473_v57  ;;  %10157 = vmatprep.subr.mxu1 %v16473_v57 }
 0x55b   : > { %10123 = vmatpush3.msra.mxu0 %v7417_v58  ;;  %10158 = vmatpush3.msra.mxu1 %v7433_v47  ;;  %v7500_v58 = vld [vmem:[%s16015_s3 + $0x5b0] sm:$0xff]  ;;  %v7483_v47 = vld [vmem:[%s16015_s3 + $0x528] sm:$0xff] }
 0x55c   : > { %10124 = vmatprep.subr.mxu0 %v16473_v57  ;;  %10159 = vmatprep.subr.mxu1 %v16473_v57 }
 0x55d   : > { %10125 = vmatpush3.msra.mxu0 %v7416_v14  ;;  %10160 = vmatpush3.msra.mxu1 %v7432_v22  ;;  %v7499_v14 = vld [vmem:[%s16015_s3 + $0x5a8] sm:$0xff]  ;;  %v7482_v22 = vld [vmem:[%s16015_s3 + $0x520] sm:$0xff] }
 0x55e   : > { %10126 = vmatprep.subr.mxu0 %v16473_v57  ;;  %10161 = vmatprep.subr.mxu1 %v16473_v57 }
 0x55f   : > { %10127 = vmatpush3.msra.mxu0 %v7415_v45  ;;  %10162 = vmatpush3.msra.mxu1 %v7431_v0  ;;  %v7498_v45 = vld [vmem:[%s16015_s3 + $0x5a0] sm:$0xff]  ;;  %v7481_v0 = vld [vmem:[%s16015_s3 + $0x518] sm:$0xff] }
 0x560   : > { %10128 = vmatprep.subr.mxu0 %v16473_v57  ;;  %10163 = vmatprep.subr.mxu1 %v16473_v57 }
 0x561   : > { %10129 = vmatpush3.msra.mxu0 %v7414_v24  ;;  %10130 = vmatprep.mubr.msk.f32.mxu0 %vm10956_vm3, %v16473_v57  ;;  %v7497_v24 = vld [vmem:[%s16015_s3 + $0x598] sm:$0xff] }
 0x562   : > { %10164 = vmatpush3.msra.mxu1 %v7430_v59  ;;  %10165 = vmatprep.mubr.msk.f32.mxu1 %vm10956_vm3, %v16473_v57  ;;  %v7480_v59 = vld [vmem:[%s16015_s3 + $0x510] sm:$0xff] }
 0x563   : > { %10131 = vmatmul.mubr.f32.vlgmr.msra.gmra.mxu0 %v5204_v17  ;;  %10166 = vmatmul.mubr.f32.vlgmr.msra.gmra.mxu1 %v5293_v6  ;;  %v7479_v17 = vld [vmem:[%s16015_s3 + $0x508] sm:$0xff] }
 0x564   : > { %10168 = vmatprep.subr.mxu0 %v16473_v57  ;;  %10203 = vmatprep.subr.mxu1 %v16473_v57  ;;  %v7495_v6 = vld [vmem:[%s16015_s3 + $0x588] sm:$0xff] }
 0x565   : > { %10169 = vmatpush3.msra.mxu0 %v7461_v39  ;;  %10204 = vmatpush3.msra.mxu1 %v7477_v3  ;;  %v7496_v39 = vld [vmem:[%s16015_s3 + $0x590] sm:$0xff]  ;;  %v7478_v3 = vld [vmem:[%s16015_s3 + $0x500] sm:$0xff] }
 0x566   : > { %10170 = vmatprep.subr.mxu0 %v16473_v57  ;;  %10205 = vmatprep.subr.mxu1 %v16473_v57 }
 0x567   : > { %10171 = vmatpush3.msra.mxu0 %v7460_v36  ;;  %10206 = vmatpush3.msra.mxu1 %v7476_v31  ;;  %v7494_v36 = vld [vmem:[%s16015_s3 + $0x580] sm:$0xff]  ;;  %v5560_v31 = vld [vmem:[#allocation3 + $0x10] sm:$0x1] }
 0x568   : > { %10172 = vmatprep.subr.mxu0 %v16473_v57  ;;  %10207 = vmatprep.subr.mxu1 %v16473_v57 }
 0x569   : > { %10173 = vmatpush3.msra.mxu0 %v7459_v46  ;;  %10208 = vmatpush3.msra.mxu1 %v7475_v12  ;;  %v5649_v46 = vld [vmem:[#allocation3 + $0x11] sm:$0x1]  ;;  %v7525_v12 = vld [vmem:[%s16015_s3 + $0x678] sm:$0xff] }
 0x56a   : > { %10174 = vmatprep.subr.mxu0 %v16473_v57  ;;  %10209 = vmatprep.subr.mxu1 %v16473_v57 }
 0x56b   : > { %10175 = vmatpush3.msra.mxu0 %v7458_v56  ;;  %10210 = vmatpush3.msra.mxu1 %v7474_v10  ;;  %v7541_v56 = vld [vmem:[%s16015_s3 + $0x6f8] sm:$0xff]  ;;  %v7524_v10 = vld [vmem:[%s16015_s3 + $0x670] sm:$0xff] }
 0x56c   : > { %10176 = vmatprep.subr.mxu0 %v16473_v57  ;;  %10211 = vmatprep.subr.mxu1 %v16473_v57 }
 0x56d   : > { %10177 = vmatpush3.msra.mxu0 %v7457_v49  ;;  %10212 = vmatpush3.msra.mxu1 %v7473_v41  ;;  %v7540_v49 = vld [vmem:[%s16015_s3 + $0x6f0] sm:$0xff]  ;;  %v7523_v41 = vld [vmem:[%s16015_s3 + $0x668] sm:$0xff] }
 0x56e   : > { %10178 = vmatprep.subr.mxu0 %v16473_v57  ;;  %10213 = vmatprep.subr.mxu1 %v16473_v57 }
 0x56f   : > { %10179 = vmatpush3.msra.mxu0 %v7456_v44  ;;  %10214 = vmatpush3.msra.mxu1 %v7472_v19  ;;  %v7539_v44 = vld [vmem:[%s16015_s3 + $0x6e8] sm:$0xff]  ;;  %v7522_v19 = vld [vmem:[%s16015_s3 + $0x660] sm:$0xff] }
 0x570   : > { %10180 = vmatprep.subr.mxu0 %v16473_v57  ;;  %10215 = vmatprep.subr.mxu1 %v16473_v57 }
 0x571   : > { %10181 = vmatpush3.msra.mxu0 %v7455_v63  ;;  %10216 = vmatpush3.msra.mxu1 %v7471_v1  ;;  %v7538_v63 = vld [vmem:[%s16015_s3 + $0x6e0] sm:$0xff]  ;;  %v7521_v1 = vld [vmem:[%s16015_s3 + $0x658] sm:$0xff] }
 0x572   : > { %10182 = vmatprep.subr.mxu0 %v16473_v57  ;;  %10217 = vmatprep.subr.mxu1 %v16473_v57 }
 0x573   : > { %10183 = vmatpush3.msra.mxu0 %v7454_v18  ;;  %10218 = vmatpush3.msra.mxu1 %v7470_v15  ;;  %v7537_v18 = vld [vmem:[%s16015_s3 + $0x6d8] sm:$0xff]  ;;  %v7520_v15 = vld [vmem:[%s16015_s3 + $0x650] sm:$0xff] }
 0x574   : > { %10184 = vmatprep.subr.mxu0 %v16473_v57  ;;  %10219 = vmatprep.subr.mxu1 %v16473_v57 }
 0x575   : > { %10185 = vmatpush3.msra.mxu0 %v7453_v53  ;;  %10220 = vmatpush3.msra.mxu1 %v7469_v48  ;;  %v7536_v53 = vld [vmem:[%s16015_s3 + $0x6d0] sm:$0xff]  ;;  %v7519_v48 = vld [vmem:[%s16015_s3 + $0x648] sm:$0xff] }
 0x576   : > { %10186 = vmatprep.subr.mxu0 %v16473_v57  ;;  %10221 = vmatprep.subr.mxu1 %v16473_v57 }
 0x577   : > { %10187 = vmatpush3.msra.mxu0 %v7452_v20  ;;  %10222 = vmatpush3.msra.mxu1 %v7468_v13  ;;  %v7535_v20 = vld [vmem:[%s16015_s3 + $0x6c8] sm:$0xff]  ;;  %v7518_v13 = vld [vmem:[%s16015_s3 + $0x640] sm:$0xff] }
 0x578   : > { %10188 = vmatprep.subr.mxu0 %v16473_v57  ;;  %10223 = vmatprep.subr.mxu1 %v16473_v57 }
 0x579   : > { %10189 = vmatpush3.msra.mxu0 %v7451_v32  ;;  %10224 = vmatpush3.msra.mxu1 %v7467_v9  ;;  %v7534_v32 = vld [vmem:[%s16015_s3 + $0x6c0] sm:$0xff]  ;;  %v7517_v9 = vld [vmem:[%s16015_s3 + $0x638] sm:$0xff] }
 0x57a   : > { %10190 = vmatprep.subr.mxu0 %v16473_v57  ;;  %10225 = vmatprep.subr.mxu1 %v16473_v57 }
 0x57b   : > { %10191 = vmatpush3.msra.mxu0 %v7450_v50  ;;  %10226 = vmatpush3.msra.mxu1 %v7466_v55  ;;  %v7533_v50 = vld [vmem:[%s16015_s3 + $0x6b8] sm:$0xff]  ;;  %v7516_v55 = vld [vmem:[%s16015_s3 + $0x630] sm:$0xff] }
 0x57c   : > { %10192 = vmatprep.subr.mxu0 %v16473_v57  ;;  %10227 = vmatprep.subr.mxu1 %v16473_v57 }
 0x57d   : > { %10193 = vmatpush3.msra.mxu0 %v7449_v34  ;;  %10228 = vmatpush3.msra.mxu1 %v7465_v54  ;;  %v7532_v34 = vld [vmem:[%s16015_s3 + $0x6b0] sm:$0xff]  ;;  %v7515_v54 = vld [vmem:[%s16015_s3 + $0x628] sm:$0xff] }
 0x57e   : > { %10194 = vmatprep.subr.mxu0 %v16473_v57  ;;  %10229 = vmatprep.subr.mxu1 %v16473_v57 }
 0x57f   : > { %10195 = vmatpush3.msra.mxu0 %v7448_v33  ;;  %10230 = vmatpush3.msra.mxu1 %v7464_v11  ;;  %v7531_v33 = vld [vmem:[%s16015_s3 + $0x6a8] sm:$0xff]  ;;  %v7514_v11 = vld [vmem:[%s16015_s3 + $0x620] sm:$0xff] }
 0x580   : > { %10196 = vmatprep.subr.mxu0 %v16473_v57  ;;  %10231 = vmatprep.subr.mxu1 %v16473_v57 }
 0x581   : > { %10197 = vmatpush3.msra.mxu0 %v7447_v42  ;;  %10232 = vmatpush3.msra.mxu1 %v7463_v27  ;;  %v7530_v42 = vld [vmem:[%s16015_s3 + $0x6a0] sm:$0xff]  ;;  %v7513_v27 = vld [vmem:[%s16015_s3 + $0x618] sm:$0xff] }
 0x582   : > { %10198 = vmatprep.subr.mxu0 %v16473_v57  ;;  %10233 = vmatprep.subr.mxu1 %v16473_v57 }
 0x583   : > { %10199 = vmatpush3.msra.mxu0 %v7446_v25  ;;  %10200 = vmatprep.mubr.msk.f32.mxu0 %vm10956_vm3, %v16473_v57  ;;  %v7529_v25 = vld [vmem:[%s16015_s3 + $0x698] sm:$0xff] }
 0x584   : > { %10234 = vmatpush3.msra.mxu1 %v7462_v28  ;;  %10235 = vmatprep.mubr.msk.f32.mxu1 %vm10956_vm3, %v16473_v57 }
 0x585   : > { %10201 = vmatmul.mubr.f32.vlgmr.msra.gmra.mxu0 %v5382_v35  ;;  %10236 = vmatmul.mubr.f32.vlgmr.msra.gmra.mxu1 %v5471_v26 }
 0x586   : > { %10238 = vmatprep.subr.mxu0 %v16473_v57  ;;  %10273 = vmatprep.subr.mxu1 %v16473_v57 }
 0x587   : > { %10239 = vmatpush3.msra.mxu0 %v7493_v52  ;;  %10274 = vmatpush3.msra.mxu1 %v7509_v40  ;;  %v7512_v52 = vld [vmem:[%s16015_s3 + $0x610] sm:$0xff] }
 0x588   : > { %10240 = vmatprep.subr.mxu0 %v16473_v57  ;;  %10275 = vmatprep.subr.mxu1 %v16473_v57  ;;  %v7528_v40 = vld [vmem:[%s16015_s3 + $0x690] sm:$0xff] }
 0x589   : > { %10241 = vmatpush3.msra.mxu0 %v7492_v7  ;;  %10276 = vmatpush3.msra.mxu1 %v7508_v4 }
 0x58a   : > { %10242 = vmatprep.subr.mxu0 %v16473_v57  ;;  %10277 = vmatprep.subr.mxu1 %v16473_v57 }
 0x58b   : > { %10243 = vmatpush3.msra.mxu0 %v7491_v2  ;;  %10278 = vmatpush3.msra.mxu1 %v7507_v8  ;;  %v7511_v2 = vld [vmem:[%s16015_s3 + $0x608] sm:$0xff] }
 0x58c   : > { %10244 = vmatprep.subr.mxu0 %v16473_v57  ;;  %10279 = vmatprep.subr.mxu1 %v16473_v57  ;;  %v7527_v8 = vld [vmem:[%s16015_s3 + $0x688] sm:$0xff] }
 0x58d   : > { %10245 = vmatpush3.msra.mxu0 %v7490_v5  ;;  %10280 = vmatpush3.msra.mxu1 %v7506_v37  ;;  %v7510_v5 = vld [vmem:[%s16015_s3 + $0x600] sm:$0xff] }
 0x58e   : > { %10246 = vmatprep.subr.mxu0 %v16473_v57  ;;  %10281 = vmatprep.subr.mxu1 %v16473_v57  ;;  %v7526_v37 = vld [vmem:[%s16015_s3 + $0x680] sm:$0xff] }
 0x58f   : > { %10247 = vmatpush3.msra.mxu0 %v7489_v30  ;;  %10282 = vmatpush3.msra.mxu1 %v7505_v23  ;;  %v5738_v30 = vld [vmem:[#allocation3 + $0x12] sm:$0x1]  ;;  %v5827_v23 = vld [vmem:[#allocation3 + $0x13] sm:$0x1] }
 0x590   : > { %10248 = vmatprep.subr.mxu0 %v16473_v57  ;;  %10283 = vmatprep.subr.mxu1 %v16473_v57 }
 0x591   : > { %10249 = vmatpush3.msra.mxu0 %v7488_v16  ;;  %10284 = vmatpush3.msra.mxu1 %v7504_v62  ;;  %v7557_v16 = vld [vmem:[%s16015_s3 + $0x778] sm:$0xff] }
 0x592   : > { %10250 = vmatprep.subr.mxu0 %v16473_v57  ;;  %10285 = vmatprep.subr.mxu1 %v16473_v57  ;;  %v7573_v62 = vld [vmem:[%s16015_s3 + $0x7f8] sm:$0xff] }
 0x593   : > { %10251 = vmatpush3.msra.mxu0 %v7487_v29  ;;  %10286 = vmatpush3.msra.mxu1 %v7503_v60  ;;  %v7556_v29 = vld [vmem:[%s16015_s3 + $0x770] sm:$0xff] }
 0x594   : > { %10252 = vmatprep.subr.mxu0 %v16473_v57  ;;  %10287 = vmatprep.subr.mxu1 %v16473_v57  ;;  %v7572_v60 = vld [vmem:[%s16015_s3 + $0x7f0] sm:$0xff] }
 0x595   : > { %10253 = vmatpush3.msra.mxu0 %v7486_v61  ;;  %10288 = vmatpush3.msra.mxu1 %v7502_v38  ;;  %v7555_v61 = vld [vmem:[%s16015_s3 + $0x768] sm:$0xff] }
 0x596   : > { %10254 = vmatprep.subr.mxu0 %v16473_v57  ;;  %10289 = vmatprep.subr.mxu1 %v16473_v57  ;;  %v7571_v38 = vld [vmem:[%s16015_s3 + $0x7e8] sm:$0xff] }
 0x597   : > { %10255 = vmatpush3.msra.mxu0 %v7485_v21  ;;  %10290 = vmatpush3.msra.mxu1 %v7501_v43  ;;  %v7554_v21 = vld [vmem:[%s16015_s3 + $0x760] sm:$0xff] }
 0x598   : > { %10256 = vmatprep.subr.mxu0 %v16473_v57  ;;  %10291 = vmatprep.subr.mxu1 %v16473_v57  ;;  %v7570_v43 = vld [vmem:[%s16015_s3 + $0x7e0] sm:$0xff] }
 0x599   : > { %10257 = vmatpush3.msra.mxu0 %v7484_v51  ;;  %10292 = vmatpush3.msra.mxu1 %v7500_v58  ;;  %v7553_v51 = vld [vmem:[%s16015_s3 + $0x758] sm:$0xff] }
 0x59a   : > { %10258 = vmatprep.subr.mxu0 %v16473_v57  ;;  %10293 = vmatprep.subr.mxu1 %v16473_v57  ;;  %v7569_v58 = vld [vmem:[%s16015_s3 + $0x7d8] sm:$0xff] }
 0x59b   : > { %10259 = vmatpush3.msra.mxu0 %v7483_v47  ;;  %10294 = vmatpush3.msra.mxu1 %v7499_v14  ;;  %v7552_v47 = vld [vmem:[%s16015_s3 + $0x750] sm:$0xff] }
 0x59c   : > { %10260 = vmatprep.subr.mxu0 %v16473_v57  ;;  %10295 = vmatprep.subr.mxu1 %v16473_v57  ;;  %v7568_v14 = vld [vmem:[%s16015_s3 + $0x7d0] sm:$0xff] }
 0x59d   : > { %10261 = vmatpush3.msra.mxu0 %v7482_v22  ;;  %10296 = vmatpush3.msra.mxu1 %v7498_v45  ;;  %v7551_v22 = vld [vmem:[%s16015_s3 + $0x748] sm:$0xff] }
 0x59e   : > { %10262 = vmatprep.subr.mxu0 %v16473_v57  ;;  %10297 = vmatprep.subr.mxu1 %v16473_v57  ;;  %v7567_v45 = vld [vmem:[%s16015_s3 + $0x7c8] sm:$0xff] }
 0x59f   : > { %10263 = vmatpush3.msra.mxu0 %v7481_v0  ;;  %10298 = vmatpush3.msra.mxu1 %v7497_v24  ;;  %v7550_v0 = vld [vmem:[%s16015_s3 + $0x740] sm:$0xff] }
 0x5a0   : > { %10264 = vmatprep.subr.mxu0 %v16473_v57  ;;  %10299 = vmatprep.subr.mxu1 %v16473_v57  ;;  %v7566_v24 = vld [vmem:[%s16015_s3 + $0x7c0] sm:$0xff] }
 0x5a1   : > { %10265 = vmatpush3.msra.mxu0 %v7480_v59  ;;  %10300 = vmatpush3.msra.mxu1 %v7496_v39  ;;  %v7549_v59 = vld [vmem:[%s16015_s3 + $0x738] sm:$0xff] }
 0x5a2   : > { %10266 = vmatprep.subr.mxu0 %v16473_v57  ;;  %10301 = vmatprep.subr.mxu1 %v16473_v57  ;;  %v7565_v39 = vld [vmem:[%s16015_s3 + $0x7b8] sm:$0xff] }
 0x5a3   : > { %10267 = vmatpush3.msra.mxu0 %v7479_v17  ;;  %10302 = vmatpush3.msra.mxu1 %v7495_v6  ;;  %v7548_v17 = vld [vmem:[%s16015_s3 + $0x730] sm:$0xff] }
 0x5a4   : > { %10268 = vmatprep.subr.mxu0 %v16473_v57  ;;  %10303 = vmatprep.subr.mxu1 %v16473_v57  ;;  %v7564_v6 = vld [vmem:[%s16015_s3 + $0x7b0] sm:$0xff] }
 0x5a5   : > { %10269 = vmatpush3.msra.mxu0 %v7478_v3  ;;  %10270 = vmatprep.mubr.msk.f32.mxu0 %vm10956_vm3, %v16473_v57  ;;  %v7547_v3 = vld [vmem:[%s16015_s3 + $0x728] sm:$0xff] }
 0x5a6   : > { %10304 = vmatpush3.msra.mxu1 %v7494_v36  ;;  %10305 = vmatprep.mubr.msk.f32.mxu1 %vm10956_vm3, %v16473_v57  ;;  %v7563_v36 = vld [vmem:[%s16015_s3 + $0x7a8] sm:$0xff] }
 0x5a7   : > { %10271 = vmatmul.mubr.f32.vlgmr.msra.gmra.mxu0 %v5560_v31  ;;  %10306 = vmatmul.mubr.f32.vlgmr.msra.gmra.mxu1 %v5649_v46  ;;  %v7546_v31 = vld [vmem:[%s16015_s3 + $0x720] sm:$0xff] }
 0x5a8   : > { %10308 = vmatprep.subr.mxu0 %v16473_v57  ;;  %10343 = vmatprep.subr.mxu1 %v16473_v57  ;;  %v7562_v46 = vld [vmem:[%s16015_s3 + $0x7a0] sm:$0xff] }
 0x5a9   : > { %10309 = vmatpush3.msra.mxu0 %v7525_v12  ;;  %10344 = vmatpush3.msra.mxu1 %v7541_v56 }
 0x5aa   : > { %10310 = vmatprep.subr.mxu0 %v16473_v57  ;;  %10345 = vmatprep.subr.mxu1 %v16473_v57 }
 0x5ab   : > { %10311 = vmatpush3.msra.mxu0 %v7524_v10  ;;  %10346 = vmatpush3.msra.mxu1 %v7540_v49  ;;  %v7545_v10 = vld [vmem:[%s16015_s3 + $0x718] sm:$0xff] }
 0x5ac   : > { %10312 = vmatprep.subr.mxu0 %v16473_v57  ;;  %10347 = vmatprep.subr.mxu1 %v16473_v57  ;;  %v7561_v49 = vld [vmem:[%s16015_s3 + $0x798] sm:$0xff] }
 0x5ad   : > { %10313 = vmatpush3.msra.mxu0 %v7523_v41  ;;  %10348 = vmatpush3.msra.mxu1 %v7539_v44 }
 0x5ae   : > { %10314 = vmatprep.subr.mxu0 %v16473_v57  ;;  %10349 = vmatprep.subr.mxu1 %v16473_v57 }
 0x5af   : > { %10315 = vmatpush3.msra.mxu0 %v7522_v19  ;;  %10350 = vmatpush3.msra.mxu1 %v7538_v63  ;;  %v7544_v63 = vld [vmem:[%s16015_s3 + $0x710] sm:$0xff] }
 0x5b0   : > { %10316 = vmatprep.subr.mxu0 %v16473_v57  ;;  %10351 = vmatprep.subr.mxu1 %v16473_v57 }
 0x5b1   : > { %10317 = vmatpush3.msra.mxu0 %v7521_v1  ;;  %10352 = vmatpush3.msra.mxu1 %v7537_v18  ;;  %v7560_v1 = vld [vmem:[%s16015_s3 + $0x790] sm:$0xff] }
 0x5b2   : > { %10318 = vmatprep.subr.mxu0 %v16473_v57  ;;  %10353 = vmatprep.subr.mxu1 %v16473_v57 }
 0x5b3   : > { %10319 = vmatpush3.msra.mxu0 %v7520_v15  ;;  %10354 = vmatpush3.msra.mxu1 %v7536_v53  ;;  %v7543_v15 = vld [vmem:[%s16015_s3 + $0x708] sm:$0xff] }
 0x5b4   : > { %10320 = vmatprep.subr.mxu0 %v16473_v57  ;;  %10355 = vmatprep.subr.mxu1 %v16473_v57  ;;  %v7559_v53 = vld [vmem:[%s16015_s3 + $0x788] sm:$0xff] }
 0x5b5   : > { %10321 = vmatpush3.msra.mxu0 %v7519_v48  ;;  %10356 = vmatpush3.msra.mxu1 %v7535_v20  ;;  %v7542_v48 = vld [vmem:[%s16015_s3 + $0x700] sm:$0xff] }
 0x5b6   : > { %10322 = vmatprep.subr.mxu0 %v16473_v57  ;;  %10357 = vmatprep.subr.mxu1 %v16473_v57  ;;  %v7558_v20 = vld [vmem:[%s16015_s3 + $0x780] sm:$0xff] }
 0x5b7   : > { %10323 = vmatpush3.msra.mxu0 %v7518_v13  ;;  %10358 = vmatpush3.msra.mxu1 %v7534_v32  ;;  %v6005_v13 = vld [vmem:[#allocation3 + $0x18] sm:$0x1]  ;;  %v5916_v32 = vld [vmem:[#allocation3 + $0x14] sm:$0x1] }
 0x5b8   : > { %10324 = vmatprep.subr.mxu0 %v16473_v57  ;;  %10359 = vmatprep.subr.mxu1 %v16473_v57 }
 0x5b9   : > { %10325 = vmatpush3.msra.mxu0 %v7517_v9  ;;  %10360 = vmatpush3.msra.mxu1 %v7533_v50  ;;  %v7589_v9 = vld [vmem:[%s16015_s3 + $0x878] sm:$0xff] }
 0x5ba   : > { %10326 = vmatprep.subr.mxu0 %v16473_v57  ;;  %10361 = vmatprep.subr.mxu1 %v16473_v57  ;;  %v7605_v50 = vld [vmem:[%s16015_s3 + $0x8f8] sm:$0xff] }
 0x5bb   : > { %10327 = vmatpush3.msra.mxu0 %v7516_v55  ;;  %10362 = vmatpush3.msra.mxu1 %v7532_v34  ;;  %v7588_v55 = vld [vmem:[%s16015_s3 + $0x870] sm:$0xff] }
 0x5bc   : > { %10328 = vmatprep.subr.mxu0 %v16473_v57  ;;  %10363 = vmatprep.subr.mxu1 %v16473_v57  ;;  %v7604_v34 = vld [vmem:[%s16015_s3 + $0x8f0] sm:$0xff] }
 0x5bd   : > { %10329 = vmatpush3.msra.mxu0 %v7515_v54  ;;  %10364 = vmatpush3.msra.mxu1 %v7531_v33  ;;  %v7587_v54 = vld [vmem:[%s16015_s3 + $0x868] sm:$0xff] }
 0x5be   : > { %10330 = vmatprep.subr.mxu0 %v16473_v57  ;;  %10365 = vmatprep.subr.mxu1 %v16473_v57  ;;  %v4774_v28 = vpop.f32.mrf.mxu0  ;;  %v4844_v35 = vpop.f32.mrf.mxu1  ;;  %v7603_v33 = vld [vmem:[%s16015_s3 + $0x8e8] sm:$0xff] }
 0x5bf   : > { %10331 = vmatpush3.msra.mxu0 %v7514_v11  ;;  %10366 = vmatpush3.msra.mxu1 %v7530_v42  ;;  %v15089_v26 = vadd.f32 %v4844_v35, %v4774_v28  ;;  %v7586_v11 = vld [vmem:[%s16015_s3 + $0x860] sm:$0xff]  ;;  %v7584_v28 = vld [vmem:[%s16015_s3 + $0x850] sm:$0xff] }
 0x5c0   : > { %10332 = vmatprep.subr.mxu0 %v16473_v57  ;;  %10367 = vmatprep.subr.mxu1 %v16473_v57  ;;  %v9922_v7 = vpop.f32.mrf.mxu0  ;;  %v9957_v4 = vpop.f32.mrf.mxu1  ;;  %v7602_v42 = vld [vmem:[%s16015_s3 + $0x8e0] sm:$0xff]  ;;  %v7600_v35 = vld [vmem:[%s16015_s3 + $0x8d0] sm:$0xff] }
 0x5c1   : > { %10333 = vmatpush3.msra.mxu0 %v7513_v27  ;;  %10368 = vmatpush3.msra.mxu1 %v7529_v25  ;;  %v7585_v27 = vld [vmem:[%s16015_s3 + $0x858] sm:$0xff]  ;;  %v7598_v7 = vld [vmem:[%s16015_s3 + $0x8c0] sm:$0xff] }
 0x5c2   : > { %10334 = vmatprep.subr.mxu0 %v16473_v57  ;;  %10369 = vmatprep.subr.mxu1 %v16473_v57  ;;  %v7601_v25 = vld [vmem:[%s16015_s3 + $0x8d8] sm:$0xff] }
 0x5c3   : > { %10335 = vmatpush3.msra.mxu0 %v7512_v52  ;;  %10370 = vmatpush3.msra.mxu1 %v7528_v40  ;;  %v7599_v52 = vld [vmem:[%s16015_s3 + $0x8c8] sm:$0xff]  ;;  %v7582_v40 = vld [vmem:[%s16015_s3 + $0x840] sm:$0xff]  ;;  %v7581_v4 = vld [vmem:[%s16015_s3 + $0x838] sm:$0xff] }
 0x5c4   : > { %10336 = vmatprep.subr.mxu0 %v16473_v57  ;;  %10371 = vmatprep.subr.mxu1 %v16473_v57 }
 0x5c5   : > { %10337 = vmatpush3.msra.mxu0 %v7511_v2  ;;  %10372 = vmatpush3.msra.mxu1 %v7527_v8  ;;  %v7597_v2 = vld [vmem:[%s16015_s3 + $0x8b8] sm:$0xff]  ;;  %v7580_v8 = vld [vmem:[%s16015_s3 + $0x830] sm:$0xff] }
 0x5c6   : > { %10338 = vmatprep.subr.mxu0 %v16473_v57  ;;  %10373 = vmatprep.subr.mxu1 %v16473_v57 }
 0x5c7   : > { %10339 = vmatpush3.msra.mxu0 %v7510_v5  ;;  %10340 = vmatprep.mubr.msk.f32.mxu0 %vm10956_vm3, %v16473_v57  ;;  %v7596_v5 = vld [vmem:[%s16015_s3 + $0x8b0] sm:$0xff] }
 0x5c8   : > { %10374 = vmatpush3.msra.mxu1 %v7526_v37  ;;  %10375 = vmatprep.mubr.msk.f32.mxu1 %vm10956_vm3, %v16473_v57  ;;  %v7579_v37 = vld [vmem:[%s16015_s3 + $0x828] sm:$0xff] }
 0x5c9   : > { %10341 = vmatmul.mubr.f32.vlgmr.msra.gmra.mxu0 %v5738_v30  ;;  %10376 = vmatmul.mubr.f32.vlgmr.msra.gmra.mxu1 %v5827_v23  ;;  %v7595_v30 = vld [vmem:[%s16015_s3 + $0x8a8] sm:$0xff]  ;;  %v7578_v23 = vld [vmem:[%s16015_s3 + $0x820] sm:$0xff] }
 0x5ca   : > { %10378 = vmatprep.subr.mxu0 %v16473_v57  ;;  %10413 = vmatprep.subr.mxu1 %v16473_v57 }
 0x5cb   : > { %10379 = vmatpush3.msra.mxu0 %v7557_v16  ;;  %10414 = vmatpush3.msra.mxu1 %v7573_v62  ;;  %v7594_v16 = vld [vmem:[%s16015_s3 + $0x8a0] sm:$0xff] }
 0x5cc   : > { %10380 = vmatprep.subr.mxu0 %v16473_v57  ;;  %10415 = vmatprep.subr.mxu1 %v16473_v57 }
 0x5cd   : > { %10381 = vmatpush3.msra.mxu0 %v7556_v29  ;;  %10416 = vmatpush3.msra.mxu1 %v7572_v60  ;;  %v7577_v60 = vld [vmem:[%s16015_s3 + $0x818] sm:$0xff] }
 0x5ce   : > { %10382 = vmatprep.subr.mxu0 %v16473_v57  ;;  %10417 = vmatprep.subr.mxu1 %v16473_v57 }
 0x5cf   : > { %10383 = vmatpush3.msra.mxu0 %v7555_v61  ;;  %10418 = vmatpush3.msra.mxu1 %v7571_v38  ;;  %v7593_v61 = vld [vmem:[%s16015_s3 + $0x898] sm:$0xff] }
 0x5d0   : > { %10384 = vmatprep.subr.mxu0 %v16473_v57  ;;  %10419 = vmatprep.subr.mxu1 %v16473_v57 }
 0x5d1   : > { %10385 = vmatpush3.msra.mxu0 %v7554_v21  ;;  %10420 = vmatpush3.msra.mxu1 %v7570_v43 }
 0x5d2   : > { %10386 = vmatprep.subr.mxu0 %v16473_v57  ;;  %10421 = vmatprep.subr.mxu1 %v16473_v57 }
 0x5d3   : > { %10387 = vmatpush3.msra.mxu0 %v7553_v51  ;;  %10422 = vmatpush3.msra.mxu1 %v7569_v58  ;;  %v7576_v51 = vld [vmem:[%s16015_s3 + $0x810] sm:$0xff] }
 0x5d4   : > { %10388 = vmatprep.subr.mxu0 %v16473_v57  ;;  %10423 = vmatprep.subr.mxu1 %v16473_v57  ;;  %v7592_v58 = vld [vmem:[%s16015_s3 + $0x890] sm:$0xff] }
 0x5d5   : > { %10389 = vmatpush3.msra.mxu0 %v7552_v47  ;;  %10424 = vmatpush3.msra.mxu1 %v7568_v14  ;;  %v7575_v14 = vld [vmem:[%s16015_s3 + $0x808] sm:$0xff] }
 0x5d6   : > { %10390 = vmatprep.subr.mxu0 %v16473_v57  ;;  %10425 = vmatprep.subr.mxu1 %v16473_v57 }
 0x5d7   : > { %10391 = vmatpush3.msra.mxu0 %v7551_v22  ;;  %10426 = vmatpush3.msra.mxu1 %v7567_v45  ;;  %v7591_v22 = vld [vmem:[%s16015_s3 + $0x888] sm:$0xff]  ;;  %v7574_v45 = vld [vmem:[%s16015_s3 + $0x800] sm:$0xff] }
 0x5d8   : > { %10392 = vmatprep.subr.mxu0 %v16473_v57  ;;  %10427 = vmatprep.subr.mxu1 %v16473_v57 }
 0x5d9   : > { %10393 = vmatpush3.msra.mxu0 %v7550_v0  ;;  %10428 = vmatpush3.msra.mxu1 %v7566_v24  ;;  %v7590_v0 = vld [vmem:[%s16015_s3 + $0x880] sm:$0xff]  ;;  %v6094_v24 = vld [vmem:[#allocation3 + $0x19] sm:$0x1] }
 0x5da   : > { %10394 = vmatprep.subr.mxu0 %v16473_v57  ;;  %10429 = vmatprep.subr.mxu1 %v16473_v57 }
 0x5db   : > { %10395 = vmatpush3.msra.mxu0 %v7549_v59  ;;  %10430 = vmatpush3.msra.mxu1 %v7565_v39  ;;  %v6183_v59 = vld [vmem:[#allocation3 + $0x1a] sm:$0x1] }
 0x5dc   : > { %10396 = vmatprep.subr.mxu0 %v16473_v57  ;;  %10431 = vmatprep.subr.mxu1 %v16473_v57  ;;  %v7621_v39 = vld [vmem:[%s16015_s3 + $0x978] sm:$0xff] }
 0x5dd   : > { %10397 = vmatpush3.msra.mxu0 %v7548_v17  ;;  %10432 = vmatpush3.msra.mxu1 %v7564_v6  ;;  %v7637_v17 = vld [vmem:[%s16015_s3 + $0x9f8] sm:$0xff]  ;;  %v7620_v6 = vld [vmem:[%s16015_s3 + $0x970] sm:$0xff] }
 0x5de   : > { %10398 = vmatprep.subr.mxu0 %v16473_v57  ;;  %10433 = vmatprep.subr.mxu1 %v16473_v57 }
 0x5df   : > { %10399 = vmatpush3.msra.mxu0 %v7547_v3  ;;  %10434 = vmatpush3.msra.mxu1 %v7563_v36  ;;  %v4932_v12 = vpop.f32.mrf.mxu0  ;;  %v5021_v56 = vpop.f32.mrf.mxu1  ;;  %v7636_v3 = vld [vmem:[%s16015_s3 + $0x9f0] sm:$0xff]  ;;  %v7619_v36 = vld [vmem:[%s16015_s3 + $0x968] sm:$0xff] }
 0x5e0   : > { %10400 = vmatprep.subr.mxu0 %v16473_v57  ;;  %10435 = vmatprep.subr.mxu1 %v16473_v57  ;;  %v4936_v41 = vadd.f32 %v4932_v12, %v15089_v26  ;;  %v7583_v26 = vld [vmem:[%s16015_s3 + $0x848] sm:$0xff]  ;;  %v7634_v12 = vld [vmem:[%s16015_s3 + $0x9e0] sm:$0xff] }
 0x5e1   : > { %10401 = vmatpush3.msra.mxu0 %v7546_v31  ;;  %10436 = vmatpush3.msra.mxu1 %v7562_v46  ;;  %v9992_v44 = vpop.f32.mrf.mxu0  ;;  %v10027_v19 = vpop.f32.mrf.mxu1  ;;  %v7635_v31 = vld [vmem:[%s16015_s3 + $0x9e8] sm:$0xff]  ;;  %v7618_v46 = vld [vmem:[%s16015_s3 + $0x960] sm:$0xff] }
 0x5e2   : > { %10402 = vmatprep.subr.mxu0 %v16473_v57  ;;  %10437 = vmatprep.subr.mxu1 %v16473_v57  ;;  %v15232_v18 = vadd.f32 %v5021_v56, %v4936_v41  ;;  %v7617_v56 = vld [vmem:[%s16015_s3 + $0x958] sm:$0xff]  ;;  %v7632_v41 = vld [vmem:[%s16015_s3 + $0x9d0] sm:$0xff]  ;;  %v7615_v44 = vld [vmem:[%s16015_s3 + $0x948] sm:$0xff] }
 0x5e3   : > { %10403 = vmatpush3.msra.mxu0 %v7545_v10  ;;  %10438 = vmatpush3.msra.mxu1 %v7561_v49  ;;  %v7633_v10 = vld [vmem:[%s16015_s3 + $0x9d8] sm:$0xff]  ;;  %v7616_v49 = vld [vmem:[%s16015_s3 + $0x950] sm:$0xff]  ;;  %v7631_v19 = vld [vmem:[%s16015_s3 + $0x9c8] sm:$0xff] }
 0x5e4   : > { %10404 = vmatprep.subr.mxu0 %v16473_v57  ;;  %10439 = vmatprep.subr.mxu1 %v16473_v57 }
 0x5e5   : > { %10405 = vmatpush3.msra.mxu0 %v7544_v63  ;;  %10440 = vmatpush3.msra.mxu1 %v7560_v1  ;;  %v7614_v63 = vld [vmem:[%s16015_s3 + $0x940] sm:$0xff] }
 0x5e6   : > { %10406 = vmatprep.subr.mxu0 %v16473_v57  ;;  %10441 = vmatprep.subr.mxu1 %v16473_v57  ;;  %v7630_v1 = vld [vmem:[%s16015_s3 + $0x9c0] sm:$0xff] }
 0x5e7   : > { %10407 = vmatpush3.msra.mxu0 %v7543_v15  ;;  %10442 = vmatpush3.msra.mxu1 %v7559_v53  ;;  %v7629_v15 = vld [vmem:[%s16015_s3 + $0x9b8] sm:$0xff]  ;;  %v7612_v53 = vld [vmem:[%s16015_s3 + $0x930] sm:$0xff] }
 0x5e8   : > { %10408 = vmatprep.subr.mxu0 %v16473_v57  ;;  %10443 = vmatprep.subr.mxu1 %v16473_v57 }
 0x5e9   : > { %10409 = vmatpush3.msra.mxu0 %v7542_v48  ;;  %10410 = vmatprep.mubr.msk.f32.mxu0 %vm10956_vm3, %v16473_v57  ;;  %v7628_v48 = vld [vmem:[%s16015_s3 + $0x9b0] sm:$0xff] }
 0x5ea   : > { %10444 = vmatpush3.msra.mxu1 %v7558_v20  ;;  %10445 = vmatprep.mubr.msk.f32.mxu1 %vm10956_vm3, %v16473_v57  ;;  %v7611_v20 = vld [vmem:[%s16015_s3 + $0x928] sm:$0xff] }
 0x5eb   : > { %10411 = vmatmul.mubr.f32.vlgmr.msra.gmra.mxu0 %v5916_v32  ;;  %10446 = vmatmul.mubr.f32.vlgmr.msra.gmra.mxu1 %v6005_v13  ;;  %v7627_v13 = vld [vmem:[%s16015_s3 + $0x9a8] sm:$0xff]  ;;  %v7610_v32 = vld [vmem:[%s16015_s3 + $0x920] sm:$0xff] }
 0x5ec   : > { %10448 = vmatprep.subr.mxu0 %v16473_v57  ;;  %10483 = vmatprep.subr.mxu1 %v16473_v57 }
 0x5ed   : > { %10449 = vmatpush3.msra.mxu0 %v7589_v9  ;;  %10484 = vmatpush3.msra.mxu1 %v7605_v50  ;;  %v7626_v9 = vld [vmem:[%s16015_s3 + $0x9a0] sm:$0xff] }
 0x5ee   : > { %10450 = vmatprep.subr.mxu0 %v16473_v57  ;;  %10485 = vmatprep.subr.mxu1 %v16473_v57 }
 0x5ef   : > { %10451 = vmatpush3.msra.mxu0 %v7588_v55  ;;  %10486 = vmatpush3.msra.mxu1 %v7604_v34  ;;  %v7609_v34 = vld [vmem:[%s16015_s3 + $0x918] sm:$0xff] }
 0x5f0   : > { %10452 = vmatprep.subr.mxu0 %v16473_v57  ;;  %10487 = vmatprep.subr.mxu1 %v16473_v57 }
 0x5f1   : > { %10453 = vmatpush3.msra.mxu0 %v7587_v54  ;;  %10488 = vmatpush3.msra.mxu1 %v7603_v33  ;;  %v7625_v54 = vld [vmem:[%s16015_s3 + $0x998] sm:$0xff] }
 0x5f2   : > { %10454 = vmatprep.subr.mxu0 %v16473_v57  ;;  %10489 = vmatprep.subr.mxu1 %v16473_v57 }
 0x5f3   : > { %10455 = vmatpush3.msra.mxu0 %v7586_v11  ;;  %10490 = vmatpush3.msra.mxu1 %v7602_v42 }
 0x5f4   : > { %10456 = vmatprep.subr.mxu0 %v16473_v57  ;;  %10491 = vmatprep.subr.mxu1 %v16473_v57 }
 0x5f5   : > { %10457 = vmatpush3.msra.mxu0 %v7585_v27  ;;  %10492 = vmatpush3.msra.mxu1 %v7601_v25  ;;  %v7608_v27 = vld [vmem:[%s16015_s3 + $0x910] sm:$0xff] }
 0x5f6   : > { %10458 = vmatprep.subr.mxu0 %v16473_v57  ;;  %10493 = vmatprep.subr.mxu1 %v16473_v57  ;;  %v7624_v25 = vld [vmem:[%s16015_s3 + $0x990] sm:$0xff] }
 0x5f7   : > { %10459 = vmatpush3.msra.mxu0 %v7584_v28  ;;  %10494 = vmatpush3.msra.mxu1 %v7600_v35  ;;  %v7607_v35 = vld [vmem:[%s16015_s3 + $0x908] sm:$0xff] }
 0x5f8   : > { %10460 = vmatprep.subr.mxu0 %v16473_v57  ;;  %10495 = vmatprep.subr.mxu1 %v16473_v57 }
 0x5f9   : > { %10461 = vmatpush3.msra.mxu0 %v7583_v26  ;;  %10496 = vmatpush3.msra.mxu1 %v7599_v52  ;;  %v7623_v26 = vld [vmem:[%s16015_s3 + $0x988] sm:$0xff]  ;;  %v7606_v52 = vld [vmem:[%s16015_s3 + $0x900] sm:$0xff] }
 0x5fa   : > { %10462 = vmatprep.subr.mxu0 %v16473_v57  ;;  %10497 = vmatprep.subr.mxu1 %v16473_v57 }
 0x5fb   : > { %10463 = vmatpush3.msra.mxu0 %v7582_v40  ;;  %10498 = vmatpush3.msra.mxu1 %v7598_v7  ;;  %v7622_v40 = vld [vmem:[%s16015_s3 + $0x980] sm:$0xff]  ;;  %v6272_v7 = vld [vmem:[#allocation3 + $0x1b] sm:$0x1] }
 0x5fc   : > { %10464 = vmatprep.subr.mxu0 %v16473_v57  ;;  %10499 = vmatprep.subr.mxu1 %v16473_v57 }
 0x5fd   : > { %10465 = vmatpush3.msra.mxu0 %v7581_v4  ;;  %10500 = vmatpush3.msra.mxu1 %v7597_v2  ;;  %v6361_v4 = vld [vmem:[#allocation3 + $0x1c] sm:$0x1] }
 0x5fe   : > { %10466 = vmatprep.subr.mxu0 %v16473_v57  ;;  %10501 = vmatprep.subr.mxu1 %v16473_v57  ;;  %v7653_v2 = vld [vmem:[%s16015_s3 + $0xa78] sm:$0xff] }
 0x5ff   : > { %10467 = vmatpush3.msra.mxu0 %v7580_v8  ;;  %10502 = vmatpush3.msra.mxu1 %v7596_v5  ;;  %v7669_v8 = vld [vmem:[%s16015_s3 + $0xaf8] sm:$0xff]  ;;  %v7652_v5 = vld [vmem:[%s16015_s3 + $0xa70] sm:$0xff] }
 0x600   : > { %10468 = vmatprep.subr.mxu0 %v16473_v57  ;;  %10503 = vmatprep.subr.mxu1 %v16473_v57 }
 0x601   : > { %10469 = vmatpush3.msra.mxu0 %v7579_v37  ;;  %10504 = vmatpush3.msra.mxu1 %v7595_v30  ;;  %v5110_v62 = vpop.f32.mrf.mxu0  ;;  %v5199_v29 = vpop.f32.mrf.mxu1  ;;  %v7668_v37 = vld [vmem:[%s16015_s3 + $0xaf0] sm:$0xff]  ;;  %v7651_v30 = vld [vmem:[%s16015_s3 + $0xa68] sm:$0xff] }
 0x602   : > { %10470 = vmatprep.subr.mxu0 %v16473_v57  ;;  %10505 = vmatprep.subr.mxu1 %v16473_v57  ;;  %v5114_v38 = vadd.f32 %v5110_v62, %v15232_v18  ;;  %v7613_v18 = vld [vmem:[%s16015_s3 + $0x938] sm:$0xff]  ;;  %v7666_v62 = vld [vmem:[%s16015_s3 + $0xae0] sm:$0xff] }
 0x603   : > { %10471 = vmatpush3.msra.mxu0 %v7578_v23  ;;  %10506 = vmatpush3.msra.mxu1 %v7594_v16  ;;  %v10062_v21 = vpop.f32.mrf.mxu0  ;;  %v10097_v43 = vpop.f32.mrf.mxu1  ;;  %v7667_v23 = vld [vmem:[%s16015_s3 + $0xae8] sm:$0xff]  ;;  %v7650_v16 = vld [vmem:[%s16015_s3 + $0xa60] sm:$0xff] }
 0x604   : > { %10472 = vmatprep.subr.mxu0 %v16473_v57  ;;  %10507 = vmatprep.subr.mxu1 %v16473_v57  ;;  %v15367_v47 = vadd.f32 %v5199_v29, %v5114_v38  ;;  %v7649_v29 = vld [vmem:[%s16015_s3 + $0xa58] sm:$0xff]  ;;  %v7664_v38 = vld [vmem:[%s16015_s3 + $0xad0] sm:$0xff]  ;;  %v7647_v21 = vld [vmem:[%s16015_s3 + $0xa48] sm:$0xff] }
 0x605   : > { %10473 = vmatpush3.msra.mxu0 %v7577_v60  ;;  %10508 = vmatpush3.msra.mxu1 %v7593_v61  ;;  %v7665_v60 = vld [vmem:[%s16015_s3 + $0xad8] sm:$0xff]  ;;  %v7648_v61 = vld [vmem:[%s16015_s3 + $0xa50] sm:$0xff]  ;;  %v7663_v43 = vld [vmem:[%s16015_s3 + $0xac8] sm:$0xff] }
 0x606   : > { %10474 = vmatprep.subr.mxu0 %v16473_v57  ;;  %10509 = vmatprep.subr.mxu1 %v16473_v57 }
 0x607   : > { %10475 = vmatpush3.msra.mxu0 %v7576_v51  ;;  %10510 = vmatpush3.msra.mxu1 %v7592_v58  ;;  %v7646_v51 = vld [vmem:[%s16015_s3 + $0xa40] sm:$0xff] }
 0x608   : > { %10476 = vmatprep.subr.mxu0 %v16473_v57  ;;  %10511 = vmatprep.subr.mxu1 %v16473_v57  ;;  %v7662_v58 = vld [vmem:[%s16015_s3 + $0xac0] sm:$0xff] }
 0x609   : > { %10477 = vmatpush3.msra.mxu0 %v7575_v14  ;;  %10512 = vmatpush3.msra.mxu1 %v7591_v22  ;;  %v7661_v14 = vld [vmem:[%s16015_s3 + $0xab8] sm:$0xff]  ;;  %v7644_v22 = vld [vmem:[%s16015_s3 + $0xa30] sm:$0xff] }
 0x60a   : > { %10478 = vmatprep.subr.mxu0 %v16473_v57  ;;  %10513 = vmatprep.subr.mxu1 %v16473_v57 }
 0x60b   : > { %10479 = vmatpush3.msra.mxu0 %v7574_v45  ;;  %10480 = vmatprep.mubr.msk.f32.mxu0 %vm10956_vm3, %v16473_v57  ;;  %v7660_v45 = vld [vmem:[%s16015_s3 + $0xab0] sm:$0xff] }
 0x60c   : > { %10514 = vmatpush3.msra.mxu1 %v7590_v0  ;;  %10515 = vmatprep.mubr.msk.f32.mxu1 %vm10956_vm3, %v16473_v57  ;;  %v7643_v0 = vld [vmem:[%s16015_s3 + $0xa28] sm:$0xff] }
 0x60d   : > { %10481 = vmatmul.mubr.f32.vlgmr.msra.gmra.mxu0 %v6094_v24  ;;  %10516 = vmatmul.mubr.f32.vlgmr.msra.gmra.mxu1 %v6183_v59  ;;  %v7659_v24 = vld [vmem:[%s16015_s3 + $0xaa8] sm:$0xff]  ;;  %v7642_v59 = vld [vmem:[%s16015_s3 + $0xa20] sm:$0xff] }
 0x60e   : > { %10518 = vmatprep.subr.mxu0 %v16473_v57  ;;  %10553 = vmatprep.subr.mxu1 %v16473_v57 }
 0x60f   : > { %10519 = vmatpush3.msra.mxu0 %v7621_v39  ;;  %10554 = vmatpush3.msra.mxu1 %v7637_v17  ;;  %v7658_v39 = vld [vmem:[%s16015_s3 + $0xaa0] sm:$0xff] }
 0x610   : > { %10520 = vmatprep.subr.mxu0 %v16473_v57  ;;  %10555 = vmatprep.subr.mxu1 %v16473_v57 }
 0x611   : > { %10521 = vmatpush3.msra.mxu0 %v7620_v6  ;;  %10556 = vmatpush3.msra.mxu1 %v7636_v3  ;;  %v7641_v3 = vld [vmem:[%s16015_s3 + $0xa18] sm:$0xff] }
 0x612   : > { %10522 = vmatprep.subr.mxu0 %v16473_v57  ;;  %10557 = vmatprep.subr.mxu1 %v16473_v57 }
 0x613   : > { %10523 = vmatpush3.msra.mxu0 %v7619_v36  ;;  %10558 = vmatpush3.msra.mxu1 %v7635_v31  ;;  %v7657_v36 = vld [vmem:[%s16015_s3 + $0xa98] sm:$0xff] }
 0x614   : > { %10524 = vmatprep.subr.mxu0 %v16473_v57  ;;  %10559 = vmatprep.subr.mxu1 %v16473_v57 }
 0x615   : > { %10525 = vmatpush3.msra.mxu0 %v7618_v46  ;;  %10560 = vmatpush3.msra.mxu1 %v7634_v12 }
 0x616   : > { %10526 = vmatprep.subr.mxu0 %v16473_v57  ;;  %10561 = vmatprep.subr.mxu1 %v16473_v57 }
 0x617   : > { %10527 = vmatpush3.msra.mxu0 %v7617_v56  ;;  %10562 = vmatpush3.msra.mxu1 %v7633_v10  ;;  %v7640_v56 = vld [vmem:[%s16015_s3 + $0xa10] sm:$0xff] }
 0x618   : > { %10528 = vmatprep.subr.mxu0 %v16473_v57  ;;  %10563 = vmatprep.subr.mxu1 %v16473_v57  ;;  %v7656_v10 = vld [vmem:[%s16015_s3 + $0xa90] sm:$0xff] }
 0x619   : > { %10529 = vmatpush3.msra.mxu0 %v7616_v49  ;;  %10564 = vmatpush3.msra.mxu1 %v7632_v41  ;;  %v7639_v41 = vld [vmem:[%s16015_s3 + $0xa08] sm:$0xff] }
 0x61a   : > { %10530 = vmatprep.subr.mxu0 %v16473_v57  ;;  %10565 = vmatprep.subr.mxu1 %v16473_v57 }
 0x61b   : > { %10531 = vmatpush3.msra.mxu0 %v7615_v44  ;;  %10566 = vmatpush3.msra.mxu1 %v7631_v19  ;;  %v7655_v44 = vld [vmem:[%s16015_s3 + $0xa88] sm:$0xff]  ;;  %v7638_v19 = vld [vmem:[%s16015_s3 + $0xa00] sm:$0xff] }
 0x61c   : > { %10532 = vmatprep.subr.mxu0 %v16473_v57  ;;  %10567 = vmatprep.subr.mxu1 %v16473_v57 }
 0x61d   : > { %10533 = vmatpush3.msra.mxu0 %v7614_v63  ;;  %10568 = vmatpush3.msra.mxu1 %v7630_v1  ;;  %v7654_v63 = vld [vmem:[%s16015_s3 + $0xa80] sm:$0xff] }
 0x61e   : > { %10534 = vmatprep.subr.mxu0 %v16473_v57  ;;  %10569 = vmatprep.subr.mxu1 %v16473_v57  ;;  %v6450_v1 = vld [vmem:[#allocation3 + $0x20] sm:$0x1] }
 0x61f   : > { %10535 = vmatpush3.msra.mxu0 %v7613_v18  ;;  %10570 = vmatpush3.msra.mxu1 %v7629_v15  ;;  %v6539_v18 = vld [vmem:[#allocation3 + $0x21] sm:$0x1]  ;;  %v7685_v15 = vld [vmem:[%s16015_s3 + $0xb78] sm:$0xff] }
 0x620   : > { %10536 = vmatprep.subr.mxu0 %v16473_v57  ;;  %10571 = vmatprep.subr.mxu1 %v16473_v57 }
 0x621   : > { %10537 = vmatpush3.msra.mxu0 %v7612_v53  ;;  %10572 = vmatpush3.msra.mxu1 %v7628_v48  ;;  %v7701_v53 = vld [vmem:[%s16015_s3 + $0xbf8] sm:$0xff]  ;;  %v7684_v48 = vld [vmem:[%s16015_s3 + $0xb70] sm:$0xff] }
 0x622   : > { %10538 = vmatprep.subr.mxu0 %v16473_v57  ;;  %10573 = vmatprep.subr.mxu1 %v16473_v57 }
 0x623   : > { %10539 = vmatpush3.msra.mxu0 %v7611_v20  ;;  %10574 = vmatpush3.msra.mxu1 %v7627_v13  ;;  %v5288_v50 = vpop.f32.mrf.mxu0  ;;  %v5377_v55 = vpop.f32.mrf.mxu1  ;;  %v7700_v20 = vld [vmem:[%s16015_s3 + $0xbf0] sm:$0xff]  ;;  %v7683_v13 = vld [vmem:[%s16015_s3 + $0xb68] sm:$0xff] }
 0x624   : > { %10540 = vmatprep.subr.mxu0 %v16473_v57  ;;  %10575 = vmatprep.subr.mxu1 %v16473_v57  ;;  %v5292_v33 = vadd.f32 %v5288_v50, %v15367_v47  ;;  %v7645_v47 = vld [vmem:[%s16015_s3 + $0xa38] sm:$0xff]  ;;  %v7698_v50 = vld [vmem:[%s16015_s3 + $0xbe0] sm:$0xff] }
 0x625   : > { %10541 = vmatpush3.msra.mxu0 %v7610_v32  ;;  %10576 = vmatpush3.msra.mxu1 %v7626_v9  ;;  %v10132_v11 = vpop.f32.mrf.mxu0  ;;  %v10167_v42 = vpop.f32.mrf.mxu1  ;;  %v7699_v32 = vld [vmem:[%s16015_s3 + $0xbe8] sm:$0xff]  ;;  %v7682_v9 = vld [vmem:[%s16015_s3 + $0xb60] sm:$0xff] }
 0x626   : > { %10542 = vmatprep.subr.mxu0 %v16473_v57  ;;  %10577 = vmatprep.subr.mxu1 %v16473_v57  ;;  %v15502_v28 = vadd.f32 %v5377_v55, %v5292_v33  ;;  %v7681_v55 = vld [vmem:[%s16015_s3 + $0xb58] sm:$0xff]  ;;  %v7696_v33 = vld [vmem:[%s16015_s3 + $0xbd0] sm:$0xff]  ;;  %v7679_v11 = vld [vmem:[%s16015_s3 + $0xb48] sm:$0xff] }
 0x627   : > { %10543 = vmatpush3.msra.mxu0 %v7609_v34  ;;  %10578 = vmatpush3.msra.mxu1 %v7625_v54  ;;  %v7697_v34 = vld [vmem:[%s16015_s3 + $0xbd8] sm:$0xff]  ;;  %v7680_v54 = vld [vmem:[%s16015_s3 + $0xb50] sm:$0xff]  ;;  %v7695_v42 = vld [vmem:[%s16015_s3 + $0xbc8] sm:$0xff] }
 0x628   : > { %10544 = vmatprep.subr.mxu0 %v16473_v57  ;;  %10579 = vmatprep.subr.mxu1 %v16473_v57 }
 0x629   : > { %10545 = vmatpush3.msra.mxu0 %v7608_v27  ;;  %10580 = vmatpush3.msra.mxu1 %v7624_v25  ;;  %v7678_v27 = vld [vmem:[%s16015_s3 + $0xb40] sm:$0xff] }
 0x62a   : > { %10546 = vmatprep.subr.mxu0 %v16473_v57  ;;  %10581 = vmatprep.subr.mxu1 %v16473_v57  ;;  %v7694_v25 = vld [vmem:[%s16015_s3 + $0xbc0] sm:$0xff] }
 0x62b   : > { %10547 = vmatpush3.msra.mxu0 %v7607_v35  ;;  %10582 = vmatpush3.msra.mxu1 %v7623_v26  ;;  %v7693_v35 = vld [vmem:[%s16015_s3 + $0xbb8] sm:$0xff]  ;;  %v7676_v26 = vld [vmem:[%s16015_s3 + $0xb30] sm:$0xff] }
 0x62c   : > { %10548 = vmatprep.subr.mxu0 %v16473_v57  ;;  %10583 = vmatprep.subr.mxu1 %v16473_v57 }
 0x62d   : > { %10549 = vmatpush3.msra.mxu0 %v7606_v52  ;;  %10550 = vmatprep.mubr.msk.f32.mxu0 %vm10956_vm3, %v16473_v57  ;;  %v7692_v52 = vld [vmem:[%s16015_s3 + $0xbb0] sm:$0xff] }
 0x62e   : > { %10584 = vmatpush3.msra.mxu1 %v7622_v40  ;;  %10585 = vmatprep.mubr.msk.f32.mxu1 %vm10956_vm3, %v16473_v57  ;;  %v7675_v40 = vld [vmem:[%s16015_s3 + $0xb28] sm:$0xff] }
 0x62f   : > { %10551 = vmatmul.mubr.f32.vlgmr.msra.gmra.mxu0 %v6272_v7  ;;  %10586 = vmatmul.mubr.f32.vlgmr.msra.gmra.mxu1 %v6361_v4  ;;  %v7691_v7 = vld [vmem:[%s16015_s3 + $0xba8] sm:$0xff]  ;;  %v7674_v4 = vld [vmem:[%s16015_s3 + $0xb20] sm:$0xff] }
 0x630   : > { %10588 = vmatprep.subr.mxu0 %v16473_v57  ;;  %10623 = vmatprep.subr.mxu1 %v16473_v57 }
 0x631   : > { %10589 = vmatpush3.msra.mxu0 %v7653_v2  ;;  %10624 = vmatpush3.msra.mxu1 %v7669_v8  ;;  %v7690_v2 = vld [vmem:[%s16015_s3 + $0xba0] sm:$0xff] }
 0x632   : > { %10590 = vmatprep.subr.mxu0 %v16473_v57  ;;  %10625 = vmatprep.subr.mxu1 %v16473_v57 }
 0x633   : > { %10591 = vmatpush3.msra.mxu0 %v7652_v5  ;;  %10626 = vmatpush3.msra.mxu1 %v7668_v37  ;;  %v7673_v37 = vld [vmem:[%s16015_s3 + $0xb18] sm:$0xff] }
 0x634   : > { %10592 = vmatprep.subr.mxu0 %v16473_v57  ;;  %10627 = vmatprep.subr.mxu1 %v16473_v57 }
 0x635   : > { %10593 = vmatpush3.msra.mxu0 %v7651_v30  ;;  %10628 = vmatpush3.msra.mxu1 %v7667_v23  ;;  %v7689_v30 = vld [vmem:[%s16015_s3 + $0xb98] sm:$0xff] }
 0x636   : > { %10594 = vmatprep.subr.mxu0 %v16473_v57  ;;  %10629 = vmatprep.subr.mxu1 %v16473_v57 }
 0x637   : > { %10595 = vmatpush3.msra.mxu0 %v7650_v16  ;;  %10630 = vmatpush3.msra.mxu1 %v7666_v62 }
 0x638   : > { %10596 = vmatprep.subr.mxu0 %v16473_v57  ;;  %10631 = vmatprep.subr.mxu1 %v16473_v57 }
 0x639   : > { %10597 = vmatpush3.msra.mxu0 %v7649_v29  ;;  %10632 = vmatpush3.msra.mxu1 %v7665_v60  ;;  %v7672_v29 = vld [vmem:[%s16015_s3 + $0xb10] sm:$0xff] }
 0x63a   : > { %10598 = vmatprep.subr.mxu0 %v16473_v57  ;;  %10633 = vmatprep.subr.mxu1 %v16473_v57  ;;  %v7688_v60 = vld [vmem:[%s16015_s3 + $0xb90] sm:$0xff] }
 0x63b   : > { %10599 = vmatpush3.msra.mxu0 %v7648_v61  ;;  %10634 = vmatpush3.msra.mxu1 %v7664_v38  ;;  %v7671_v38 = vld [vmem:[%s16015_s3 + $0xb08] sm:$0xff] }
 0x63c   : > { %10600 = vmatprep.subr.mxu0 %v16473_v57  ;;  %10635 = vmatprep.subr.mxu1 %v16473_v57 }
 0x63d   : > { %10601 = vmatpush3.msra.mxu0 %v7647_v21  ;;  %10636 = vmatpush3.msra.mxu1 %v7663_v43  ;;  %v7687_v21 = vld [vmem:[%s16015_s3 + $0xb88] sm:$0xff]  ;;  %v7670_v43 = vld [vmem:[%s16015_s3 + $0xb00] sm:$0xff] }
 0x63e   : > { %10602 = vmatprep.subr.mxu0 %v16473_v57  ;;  %10637 = vmatprep.subr.mxu1 %v16473_v57 }
 0x63f   : > { %10603 = vmatpush3.msra.mxu0 %v7646_v51  ;;  %10638 = vmatpush3.msra.mxu1 %v7662_v58  ;;  %v7686_v51 = vld [vmem:[%s16015_s3 + $0xb80] sm:$0xff] }
 0x640   : > { %10604 = vmatprep.subr.mxu0 %v16473_v57  ;;  %10639 = vmatprep.subr.mxu1 %v16473_v57  ;;  %v6628_v58 = vld [vmem:[#allocation3 + $0x22] sm:$0x1] }
 0x641   : > { %10605 = vmatpush3.msra.mxu0 %v7645_v47  ;;  %10640 = vmatpush3.msra.mxu1 %v7661_v14  ;;  %v6717_v47 = vld [vmem:[#allocation3 + $0x23] sm:$0x1]  ;;  %v7717_v14 = vld [vmem:[%s16015_s3 + $0xc78] sm:$0xff] }
 0x642   : > { %10606 = vmatprep.subr.mxu0 %v16473_v57  ;;  %10641 = vmatprep.subr.mxu1 %v16473_v57 }
 0x643   : > { %10607 = vmatpush3.msra.mxu0 %v7644_v22  ;;  %10642 = vmatpush3.msra.mxu1 %v7660_v45  ;;  %v7716_v22 = vld [vmem:[%s16015_s3 + $0xc70] sm:$0xff]  ;;  %v7715_v45 = vld [vmem:[%s16015_s3 + $0xc68] sm:$0xff] }
 0x644   : > { %10608 = vmatprep.subr.mxu0 %v16473_v57  ;;  %10643 = vmatprep.subr.mxu1 %v16473_v57 }
 0x645   : > { %10609 = vmatpush3.msra.mxu0 %v7643_v0  ;;  %10644 = vmatpush3.msra.mxu1 %v7659_v24  ;;  %v5466_v17 = vpop.f32.mrf.mxu0  ;;  %v5555_v6 = vpop.f32.mrf.mxu1  ;;  %v7714_v0 = vld [vmem:[%s16015_s3 + $0xc60] sm:$0xff]  ;;  %v7713_v24 = vld [vmem:[%s16015_s3 + $0xc58] sm:$0xff] }
 0x646   : > { %10610 = vmatprep.subr.mxu0 %v16473_v57  ;;  %10645 = vmatprep.subr.mxu1 %v16473_v57  ;;  %v5470_v31 = vadd.f32 %v5466_v17, %v15502_v28  ;;  %v7677_v28 = vld [vmem:[%s16015_s3 + $0xb38] sm:$0xff]  ;;  %v7710_v17 = vld [vmem:[%s16015_s3 + $0xc40] sm:$0xff] }
 0x647   : > { %10611 = vmatpush3.msra.mxu0 %v7642_v59  ;;  %10646 = vmatpush3.msra.mxu1 %v7658_v39  ;;  %v10202_v46 = vpop.f32.mrf.mxu0  ;;  %v10237_v12 = vpop.f32.mrf.mxu1  ;;  %v7712_v59 = vld [vmem:[%s16015_s3 + $0xc50] sm:$0xff]  ;;  %v7711_v39 = vld [vmem:[%s16015_s3 + $0xc48] sm:$0xff] }
 0x648   : > { %10612 = vmatprep.subr.mxu0 %v16473_v57  ;;  %10647 = vmatprep.subr.mxu1 %v16473_v57  ;;  %v15637_v49 = vadd.f32 %v5555_v6, %v5470_v31  ;;  %v7709_v6 = vld [vmem:[%s16015_s3 + $0xc38] sm:$0xff]  ;;  %v7706_v31 = vld [vmem:[%s16015_s3 + $0xc20] sm:$0xff] }
 0x649   : > { %10613 = vmatpush3.msra.mxu0 %v7641_v3  ;;  %10648 = vmatpush3.msra.mxu1 %v7657_v36  ;;  %v7708_v3 = vld [vmem:[%s16015_s3 + $0xc30] sm:$0xff]  ;;  %v7707_v36 = vld [vmem:[%s16015_s3 + $0xc28] sm:$0xff] }
 0x64a   : > { %10614 = vmatprep.subr.mxu0 %v16473_v57  ;;  %10649 = vmatprep.subr.mxu1 %v16473_v57 }
 0x64b   : > { %10615 = vmatpush3.msra.mxu0 %v7640_v56  ;;  %10650 = vmatpush3.msra.mxu1 %v7656_v10  ;;  %v7705_v56 = vld [vmem:[%s16015_s3 + $0xc18] sm:$0xff] }
 0x64c   : > { %10616 = vmatprep.subr.mxu0 %v16473_v57  ;;  %10651 = vmatprep.subr.mxu1 %v16473_v57 }
 0x64d   : > { %10617 = vmatpush3.msra.mxu0 %v7639_v41  ;;  %10652 = vmatpush3.msra.mxu1 %v7655_v44  ;;  %v7704_v44 = vld [vmem:[%s16015_s3 + $0xc10] sm:$0xff] }
 0x64e   : > { %10618 = vmatprep.subr.mxu0 %v16473_v57  ;;  %10653 = vmatprep.subr.mxu1 %v16473_v57 }
 0x64f   : > { %10619 = vmatpush3.msra.mxu0 %v7638_v19  ;;  %10620 = vmatprep.mubr.msk.f32.mxu0 %vm10956_vm3, %v16473_v57 }
 0x650   : > { %10654 = vmatpush3.msra.mxu1 %v7654_v63  ;;  %10655 = vmatprep.mubr.msk.f32.mxu1 %vm10956_vm3, %v16473_v57  ;;  %v7703_v63 = vld [vmem:[%s16015_s3 + $0xc08] sm:$0xff] }
 0x651   : > { %10621 = vmatmul.mubr.f32.vlgmr.msra.gmra.mxu0 %v6450_v1  ;;  %10656 = vmatmul.mubr.f32.vlgmr.msra.gmra.mxu1 %v6539_v18  ;;  %v7702_v1 = vld [vmem:[%s16015_s3 + $0xc00] sm:$0xff] }
 0x652   : > { %10658 = vmatprep.subr.mxu0 %v16473_v57  ;;  %10693 = vmatprep.subr.mxu1 %v16473_v57  ;;  %v6806_v18 = vld [vmem:[#allocation3 + $0x24] sm:$0x1] }
 0x653   : > { %10659 = vmatpush3.msra.mxu0 %v7685_v15  ;;  %10694 = vmatpush3.msra.mxu1 %v7701_v53 }
 0x654   : > { %10660 = vmatprep.subr.mxu0 %v16473_v57  ;;  %10695 = vmatprep.subr.mxu1 %v16473_v57 }
 0x655   : > { %10661 = vmatpush3.msra.mxu0 %v7684_v48  ;;  %10696 = vmatpush3.msra.mxu1 %v7700_v20 }
 0x656   : > { %10662 = vmatprep.subr.mxu0 %v16473_v57  ;;  %10697 = vmatprep.subr.mxu1 %v16473_v57 }
 0x657   : > { %10663 = vmatpush3.msra.mxu0 %v7683_v13  ;;  %10698 = vmatpush3.msra.mxu1 %v7699_v32 }
 0x658   : > { %10664 = vmatprep.subr.mxu0 %v16473_v57  ;;  %10699 = vmatprep.subr.mxu1 %v16473_v57 }
 0x659   : > { %10665 = vmatpush3.msra.mxu0 %v7682_v9  ;;  %10700 = vmatpush3.msra.mxu1 %v7698_v50  ;;  %v6913_v9 = vld [vmem:[%s16016_s4 + $0x78] sm:$0xff]  ;;  %v6912_v50 = vld [vmem:[%s16016_s4 + $0x70] sm:$0xff] }
 0x65a   : > { %10666 = vmatprep.subr.mxu0 %v16473_v57  ;;  %10701 = vmatprep.subr.mxu1 %v16473_v57 }
 0x65b   : > { %10667 = vmatpush3.msra.mxu0 %v7681_v55  ;;  %10702 = vmatpush3.msra.mxu1 %v7697_v34  ;;  %v6911_v55 = vld [vmem:[%s16016_s4 + $0x68] sm:$0xff]  ;;  %v6910_v34 = vld [vmem:[%s16016_s4 + $0x60] sm:$0xff] }
 0x65c   : > { %10668 = vmatprep.subr.mxu0 %v16473_v57  ;;  %10703 = vmatprep.subr.mxu1 %v16473_v57 }
 0x65d   : > { %10669 = vmatpush3.msra.mxu0 %v7680_v54  ;;  %10704 = vmatpush3.msra.mxu1 %v7696_v33  ;;  %v6909_v54 = vld [vmem:[%s16016_s4 + $0x58] sm:$0xff]  ;;  %v6908_v33 = vld [vmem:[%s16016_s4 + $0x50] sm:$0xff] }
 0x65e   : > { %10670 = vmatprep.subr.mxu0 %v16473_v57  ;;  %10705 = vmatprep.subr.mxu1 %v16473_v57 }
 0x65f   : > { %10671 = vmatpush3.msra.mxu0 %v7679_v11  ;;  %10706 = vmatpush3.msra.mxu1 %v7695_v42  ;;  %v6907_v11 = vld [vmem:[%s16016_s4 + $0x48] sm:$0xff]  ;;  %v6906_v42 = vld [vmem:[%s16016_s4 + $0x40] sm:$0xff] }
 0x660   : > { %10672 = vmatprep.subr.mxu0 %v16473_v57  ;;  %10707 = vmatprep.subr.mxu1 %v16473_v57 }
 0x661   : > { %10673 = vmatpush3.msra.mxu0 %v7678_v27  ;;  %10708 = vmatpush3.msra.mxu1 %v7694_v25  ;;  %v6905_v27 = vld [vmem:[%s16016_s4 + $0x38] sm:$0xff]  ;;  %v6904_v25 = vld [vmem:[%s16016_s4 + $0x30] sm:$0xff] }
 0x662   : > { %10674 = vmatprep.subr.mxu0 %v16473_v57  ;;  %10709 = vmatprep.subr.mxu1 %v16473_v57 }
 0x663   : > { %10675 = vmatpush3.msra.mxu0 %v7677_v28  ;;  %10710 = vmatpush3.msra.mxu1 %v7693_v35  ;;  %v6903_v28 = vld [vmem:[%s16016_s4 + $0x28] sm:$0xff]  ;;  %v6902_v35 = vld [vmem:[%s16016_s4 + $0x20] sm:$0xff] }
 0x664   : > { %10676 = vmatprep.subr.mxu0 %v16473_v57  ;;  %10711 = vmatprep.subr.mxu1 %v16473_v57 }
 0x665   : > { %10677 = vmatpush3.msra.mxu0 %v7676_v26  ;;  %10712 = vmatpush3.msra.mxu1 %v7692_v52 }
 0x666   : > { %10678 = vmatprep.subr.mxu0 %v16473_v57  ;;  %10713 = vmatprep.subr.mxu1 %v16473_v57 }
 0x667   : > { %10679 = vmatpush3.msra.mxu0 %v7675_v40  ;;  %10714 = vmatpush3.msra.mxu1 %v7691_v7  ;;  %v5644_v8 = vpop.f32.mrf.mxu0  ;;  %v5733_v5 = vpop.f32.mrf.mxu1 }
 0x668   : > { %10680 = vmatprep.subr.mxu0 %v16473_v57  ;;  %10715 = vmatprep.subr.mxu1 %v16473_v57  ;;  %v5648_v23 = vadd.f32 %v5644_v8, %v15637_v49  ;;  %v6901_v8 = vld [vmem:[%s16016_s4 + $0x18] sm:$0xff] }
 0x669   : > { %10681 = vmatpush3.msra.mxu0 %v7674_v4  ;;  %10716 = vmatpush3.msra.mxu1 %v7690_v2  ;;  %v10272_v16 = vpop.f32.mrf.mxu0  ;;  %v10307_v62 = vpop.f32.mrf.mxu1 }
 0x66a   : > { %10682 = vmatprep.subr.mxu0 %v16473_v57  ;;  %10717 = vmatprep.subr.mxu1 %v16473_v57  ;;  %v15772_v61 = vadd.f32 %v5733_v5, %v5648_v23  ;;  %v6900_v5 = vld [vmem:[%s16016_s4 + $0x10] sm:$0xff]  ;;  %v7733_v23 = vld [vmem:[%s16016_s4 + $0xf8] sm:$0xff]  ;;  %v7731_v62 = vld [vmem:[%s16016_s4 + $0xe8] sm:$0xff] }
 0x66b   : > { %10683 = vmatpush3.msra.mxu0 %v7673_v37  ;;  %10718 = vmatpush3.msra.mxu1 %v7689_v30  ;;  %v6899_v37 = vld [vmem:[%s16016_s4 + $0x8] sm:$0xff]  ;;  %v6898_v30 = vld [vmem:[%s16016_s4] sm:$0xff]  ;;  %v7732_v16 = vld [vmem:[%s16016_s4 + $0xf0] sm:$0xff] }
 0x66c   : > { %10684 = vmatprep.subr.mxu0 %v16473_v57  ;;  %10719 = vmatprep.subr.mxu1 %v16473_v57 }
 0x66d   : > { %10685 = vmatpush3.msra.mxu0 %v7672_v29  ;;  %10720 = vmatpush3.msra.mxu1 %v7688_v60  ;;  %v7730_v29 = vld [vmem:[%s16016_s4 + $0xe0] sm:$0xff]  ;;  %v7729_v60 = vld [vmem:[%s16016_s4 + $0xd8] sm:$0xff] }
 0x66e   : > { %10686 = vmatprep.subr.mxu0 %v16473_v57  ;;  %10721 = vmatprep.subr.mxu1 %v16473_v57 }
 0x66f   : > { %10687 = vmatpush3.msra.mxu0 %v7671_v38  ;;  %10722 = vmatpush3.msra.mxu1 %v7687_v21  ;;  %v7727_v38 = vld [vmem:[%s16016_s4 + $0xc8] sm:$0xff]  ;;  %v7726_v21 = vld [vmem:[%s16016_s4 + $0xc0] sm:$0xff] }
 0x670   : > { %10688 = vmatprep.subr.mxu0 %v16473_v57  ;;  %10723 = vmatprep.subr.mxu1 %v16473_v57 }
 0x671   : > { %10689 = vmatpush3.msra.mxu0 %v7670_v43  ;;  %10690 = vmatprep.mubr.msk.f32.mxu0 %vm10956_vm3, %v16473_v57  ;;  %v7725_v43 = vld [vmem:[%s16016_s4 + $0xb8] sm:$0xff] }
 0x672   : > { %10724 = vmatpush3.msra.mxu1 %v7686_v51  ;;  %10725 = vmatprep.mubr.msk.f32.mxu1 %vm10956_vm3, %v16473_v57  ;;  %v7724_v51 = vld [vmem:[%s16016_s4 + $0xb0] sm:$0xff] }
 0x673   : > { %10691 = vmatmul.mubr.f32.vlgmr.msra.gmra.mxu0 %v6628_v58  ;;  %10726 = vmatmul.mubr.f32.vlgmr.msra.gmra.mxu1 %v6717_v47  ;;  %v7723_v58 = vld [vmem:[%s16016_s4 + $0xa8] sm:$0xff] }
 0x674   : > { %10728 = vmatprep.subr.mxu0 %v16473_v57  ;;  %10760 = vmatprep.mubr.msk.f32.mxu0 %vm10956_vm3, %v16473_v57 }
 0x675   : > { %10729 = vmatpush3.msra.mxu0 %v7717_v14  ;;  %10763 = vmatprep.subr.mxu1 %v16473_v57 }
 0x676   : > { %10730 = vmatprep.subr.mxu0 %v16473_v57  ;;  %10795 = vmatprep.mubr.msk.f32.mxu1 %vm10956_vm3, %v16473_v57 }
 0x677   : > { %10731 = vmatpush3.msra.mxu0 %v7716_v22  ;;  %10764 = vmatpush3.msra.mxu1 %v6913_v9  ;;  %v7722_v22 = vld [vmem:[%s16016_s4 + $0xa0] sm:$0xff] }
 0x678   : > { %10732 = vmatprep.subr.mxu0 %v16473_v57  ;;  %10765 = vmatprep.subr.mxu1 %v16473_v57 }
 0x679   : > { %10733 = vmatpush3.msra.mxu0 %v7715_v45  ;;  %10766 = vmatpush3.msra.mxu1 %v6912_v50 }
 0x67a   : > { %10734 = vmatprep.subr.mxu0 %v16473_v57  ;;  %10767 = vmatprep.subr.mxu1 %v16473_v57 }
 0x67b   : > { %10735 = vmatpush3.msra.mxu0 %v7714_v0  ;;  %10768 = vmatpush3.msra.mxu1 %v6911_v55 }
 0x67c   : > { %10736 = vmatprep.subr.mxu0 %v16473_v57  ;;  %10769 = vmatprep.subr.mxu1 %v16473_v57 }
 0x67d   : > { %10737 = vmatpush3.msra.mxu0 %v7713_v24  ;;  %10770 = vmatpush3.msra.mxu1 %v6910_v34 }
 0x67e   : > { %10738 = vmatprep.subr.mxu0 %v16473_v57  ;;  %10771 = vmatprep.subr.mxu1 %v16473_v57 }
 0x67f   : > { %10739 = vmatpush3.msra.mxu0 %v7712_v59  ;;  %10772 = vmatpush3.msra.mxu1 %v6909_v54  ;;  %v7721_v59 = vld [vmem:[%s16016_s4 + $0x98] sm:$0xff]  ;;  %v7003_v54 = vld [vmem:[%s16017_s5 + $0x4] sm:$0x1] }
 0x680   : > { %10740 = vmatprep.subr.mxu0 %v16473_v57  ;;  %10773 = vmatprep.subr.mxu1 %v16473_v57 }
 0x681   : > { %10741 = vmatpush3.msra.mxu0 %v7711_v39  ;;  %10774 = vmatpush3.msra.mxu1 %v6908_v33 }
 0x682   : > { %10742 = vmatprep.subr.mxu0 %v16473_v57  ;;  %10775 = vmatprep.subr.mxu1 %v16473_v57 }
 0x683   : > { %10743 = vmatpush3.msra.mxu0 %v7710_v17  ;;  %10776 = vmatpush3.msra.mxu1 %v6907_v11 }
 0x684   : > { %10744 = vmatprep.subr.mxu0 %v16473_v57  ;;  %10777 = vmatprep.subr.mxu1 %v16473_v57 }
 0x685   : > { %10745 = vmatpush3.msra.mxu0 %v7709_v6  ;;  %10778 = vmatpush3.msra.mxu1 %v6906_v42 }
 0x686   : > { %10746 = vmatprep.subr.mxu0 %v16473_v57  ;;  %10779 = vmatprep.subr.mxu1 %v16473_v57 }
 0x687   : > { %10747 = vmatpush3.msra.mxu0 %v7708_v3  ;;  %10780 = vmatpush3.msra.mxu1 %v6905_v27 }
 0x688   : > { %10748 = vmatprep.subr.mxu0 %v16473_v57  ;;  %10781 = vmatprep.subr.mxu1 %v16473_v57 }
 0x689   : > { %10749 = vmatpush3.msra.mxu0 %v7707_v36  ;;  %v5822_v46 = vpop.f32.mrf.mxu0  ;;  %v5911_v12 = vpop.f32.mrf.mxu1  ;;  %10782 = vmatpush3.msra.mxu1 %v6904_v25 }
 0x68a   : > { %10750 = vmatprep.subr.mxu0 %v16473_v57  ;;  %v5826_v10 = vadd.f32 %v5822_v46, %v15772_v61  ;;  %10783 = vmatprep.subr.mxu1 %v16473_v57  ;;  %v7728_v61 = vld [vmem:[%s16016_s4 + $0xd0] sm:$0xff] }
 0x68b   : > { %10751 = vmatpush3.msra.mxu0 %v7706_v31  ;;  %v10342_v49 = vpop.f32.mrf.mxu0  ;;  %v10377_v41 = vpop.f32.mrf.mxu1  ;;  %10784 = vmatpush3.msra.mxu1 %v6903_v28 }
 0x68c   : > { %10752 = vmatprep.subr.mxu0 %v16473_v57  ;;  %v5915_v19 = vadd.f32 %v5911_v12, %v5826_v10  ;;  %10785 = vmatprep.subr.mxu1 %v16473_v57 }
 0x68d   : > { %10753 = vmatpush3.msra.mxu0 %v7705_v56  ;;  %10786 = vmatpush3.msra.mxu1 %v6902_v35 }
 0x68e   : > { %10754 = vmatprep.subr.mxu0 %v16473_v57  ;;  %10787 = vmatprep.subr.mxu1 %v16473_v57 }
 0x68f   : > { %10755 = vmatpush3.msra.mxu0 %v7704_v44  ;;  %10788 = vmatpush3.msra.mxu1 %v6901_v8 }
 0x690   : > { %10756 = vmatprep.subr.mxu0 %v16473_v57  ;;  %10789 = vmatprep.subr.mxu1 %v16473_v57 }
 0x691   : > { %10757 = vmatpush3.msra.mxu0 %v7703_v63  ;;  %10790 = vmatpush3.msra.mxu1 %v6900_v5  ;;  %v6895_v63 = vld [vmem:[%s16017_s5 + $0x2] sm:$0x1] }
 0x692   : > { %10758 = vmatprep.subr.mxu0 %v16473_v57  ;;  %10791 = vmatprep.subr.mxu1 %v16473_v57 }
 0x693   : > { %10759 = vmatpush3.msra.mxu0 %v7702_v1  ;;  %10792 = vmatpush3.msra.mxu1 %v6899_v37 }
 0x694   : > { %10761 = vmatmul.mubr.f32.vlgmr.msra.gmra.mxu0 %v6806_v18  ;;  %10798 = vmatprep.subr.mxu0 %v16473_v57 }
 0x695   : > { %10830 = vmatprep.mubr.msk.f32.mxu0 %vm10956_vm3, %v16473_v57  ;;  %10793 = vmatprep.subr.mxu1 %v16473_v57 }
 0x696   : > { %10794 = vmatpush3.msra.mxu1 %v6898_v30  ;;  %10799 = vmatpush3.msra.mxu0 %v7733_v23 }
 0x697   : > { %10800 = vmatprep.subr.mxu0 %v16473_v57 }
 0x698   : > { %10801 = vmatpush3.msra.mxu0 %v7732_v16 }
 0x699   : > { %10802 = vmatprep.subr.mxu0 %v16473_v57 }
 0x69a   : > { %10803 = vmatpush3.msra.mxu0 %v7731_v62 }
 0x69b   : > { %10804 = vmatprep.subr.mxu0 %v16473_v57 }
 0x69c   : > { %10805 = vmatpush3.msra.mxu0 %v7730_v29 }
 0x69d   : > { %10806 = vmatprep.subr.mxu0 %v16473_v57 }
 0x69e   : > { %10807 = vmatpush3.msra.mxu0 %v7729_v60 }
 0x69f   : > { %10808 = vmatprep.subr.mxu0 %v16473_v57 }
 0x6a0   : > { %10809 = vmatpush3.msra.mxu0 %v7728_v61 }
 0x6a1   : > { %10810 = vmatprep.subr.mxu0 %v16473_v57 }
 0x6a2   : > { %10811 = vmatpush3.msra.mxu0 %v7727_v38 }
 0x6a3   : > { %10812 = vmatprep.subr.mxu0 %v16473_v57 }
 0x6a4   : > { %10813 = vmatpush3.msra.mxu0 %v7726_v21 }
 0x6a5   : > { %10814 = vmatprep.subr.mxu0 %v16473_v57 }
 0x6a6   : > { %10815 = vmatpush3.msra.mxu0 %v7725_v43 }
 0x6a7   : > { %10816 = vmatprep.subr.mxu0 %v16473_v57 }
 0x6a8   : > { %10817 = vmatpush3.msra.mxu0 %v7724_v51 }
 0x6a9   : > { %10818 = vmatprep.subr.mxu0 %v16473_v57 }
 0x6aa   : > { %10819 = vmatpush3.msra.mxu0 %v7723_v58 }
 0x6ab   : > { %v6000_v15 = vpop.f32.mrf.mxu0  ;;  %v6089_v53 = vpop.f32.mrf.mxu1  ;;  %10820 = vmatprep.subr.mxu0 %v16473_v57 }
 0x6ac   : > { %v6004_v48 = vadd.f32 %v6000_v15, %v5915_v19  ;;  %10821 = vmatpush3.msra.mxu0 %v7722_v22 }
 0x6ad   : > { %v10412_v20 = vpop.f32.mrf.mxu0  ;;  %v10447_v13 = vpop.f32.mrf.mxu1  ;;  %10822 = vmatprep.subr.mxu0 %v16473_v57 }
 0x6ae   : > { %v6093_v32 = vadd.f32 %v6089_v53, %v6004_v48  ;;  %10823 = vmatpush3.msra.mxu0 %v7721_v59  ;;  %v7720_v48 = vld [vmem:[%s16016_s4 + $0x90] sm:$0xff]  ;;  %v7719_v20 = vld [vmem:[%s16016_s4 + $0x88] sm:$0xff]  ;;  %v7718_v13 = vld [vmem:[%s16016_s4 + $0x80] sm:$0xff] }
 0x6af   : > { %10824 = vmatprep.subr.mxu0 %v16473_v57 }
 0x6b0   : > { %10825 = vmatpush3.msra.mxu0 %v7720_v48 }
 0x6b1   : > { %10826 = vmatprep.subr.mxu0 %v16473_v57 }
 0x6b2   : > { %10827 = vmatpush3.msra.mxu0 %v7719_v20 }
 0x6b3   : > { %10828 = vmatprep.subr.mxu0 %v16473_v57  ;;  %v16531_v57 = vld [vmem:[#allocation51_spill] sm:$0xff] }
 0x6b4   : > { %10829 = vmatpush3.msra.mxu0 %v7718_v13  ;;  %v7076_v33 = vsub.s32 0, %v16531_v57 }
 0x6cd   : > { %v6178_v26 = vpop.f32.mrf.mxu0  ;;  %v6267_v52 = vpop.f32.mrf.mxu1 }
 0x6ce   : > { %v6182_v40 = vadd.f32 %v6178_v26, %v6093_v32  ;;  %v6914_v32 = vld [vmem:[%s16017_s5 + $0x3] sm:$0x1] }
 0x6cf   : > { %v10482_v7 = vpop.f32.mrf.mxu0  ;;  %v10517_v4 = vpop.f32.mrf.mxu1 }
 0x6d0   : > { %v6271_v2 = vadd.f32 %v6267_v52, %v6182_v40 }
 0x6ef   : > { %v6356_v47 = vpop.f32.mrf.mxu0  ;;  %v6445_v14 = vpop.f32.mrf.mxu1 }
 0x6f0   : > { %v6360_v45 = vadd.f32 %v6356_v47, %v6271_v2 }
 0x6f1   : > { %v10552_v0 = vpop.f32.mrf.mxu0  ;;  %v10587_v24 = vpop.f32.mrf.mxu1 }
 0x6f2   : > { %v6449_v39 = vadd.f32 %v6445_v14, %v6360_v45 }
 0x711   : > { %v6534_v17 = vpop.f32.mrf.mxu0  ;;  %v6623_v6 = vpop.f32.mrf.mxu1 }
 0x712   : > { %v6538_v10 = vadd.f32 %v6534_v17, %v6449_v39 }
 0x713   : > { %v10622_v3 = vpop.f32.mrf.mxu0  ;;  %v10657_v36 = vpop.f32.mrf.mxu1 }
 0x714   : > { %v6627_v49 = vadd.f32 %v6623_v6, %v6538_v10 }
 0x733   : > { %v6712_v31 = vpop.f32.mrf.mxu0  ;;  %v6801_v46 = vpop.f32.mrf.mxu1 }
 0x734   : > { %v6716_v41 = vadd.f32 %v6712_v31, %v6627_v49 }
 0x735   : > { %v10692_v12 = vpop.f32.mrf.mxu0  ;;  %v10727_v56 = vpop.f32.mrf.mxu1 }
 0x736   : > { %v6805_v44 = vadd.f32 %v6801_v46, %v6716_v41 }
 0x754   : > { %v6890_v19 = vpop.f32.mrf.mxu0 }
 0x755   : > { %v6894_v1 = vadd.f32 %v6890_v19, %v6805_v44 }
 0x756   : > { %v10762_v18 = vpop.f32.mrf.mxu0 }
 0x757   : > { %v6896_v15 = vadd.f32 %v6895_v63, %v6894_v1 }
 0x759   : > { %v6897_v53 = vmax.f32 %v6896_v15, 0.0 }
 0x75b   : > { %10796 = vmatmul.mubr.f32.vlgmr.msra.gmra.mxu1 %v6897_v53 }
 0x81b   : > { %v6981_v9 = vpop.f32.mrf.mxu1 }
 0x81c   : > { %v6982_v50 = vadd.f32 %v6981_v9, %v6914_v32 }
 0x81d   : > { %v10797_v55 = vpop.f32.mrf.mxu1 }
 0x81e   : > { %v6985_v34 = vmax.f32 %v6982_v50, 0.0 }
 0x820   : > { %10831 = vmatmul.mubr.f32.vlgmr.msra.gmra.mxu0 %v6985_v34 }
 0x8e0   : > { %v7070_v11 = vpop.f32.mrf.mxu0 }
 0x8e1   : > { %v7071_v42 = vadd.f32 %v7070_v11, %v7003_v54 }
 0x8e2   : > { %v10832_v27 = vpop.f32.mrf.mxu0 }
 0x8e3   : > { %v7077_v25 = vrot.slane %v7071_v42, %v7076_v33 }
 0x8e5   : > { %7078 = vst [vmem:[%s249_s12] sm:$0xff] %v7077_v25 }
 0x8e6 PF: > { %s16_s21 = sadd.s32 1, %s10949_s21  }
 0x8e7   : > { %p13_p4 = scmp.ge.s32.totalorder %s16_s21, 4  }
 0x8e9   :  { %15 = sbr.rel (!%p13_p4) target bundleno = 1 (0x1), region = 106 }

</bundles_post_ra>
